<compile_context>
chip_gen: v5e
topology: v5e:2x2
jax: 0.10.0
libtpu: 0.0.40
codegen_flags: <defaults>
</compile_context>

<pallas_src>
import functools
import numpy as np
import jax
import jax.numpy as jnp
from jax.experimental import pallas as pl
from jax.experimental.pallas import tpu as pltpu


# ----------------------------------------------------------------------------
# Fused Pallas kernel: stem matmul -> maxpool -> bottleneck -> adaptive pool
# ----------------------------------------------------------------------------
def encoder_kernel(patch_ref, ws_ref, ss_ref, bs_ref,
                   w1_ref, s1_ref, b1_ref,
                   w2_ref, s2_ref, b2_ref,
                   w3_ref, s3_ref, b3_ref,
                   wp_ref, sp_ref, bp_ref,
                   pool_ref, o_ref, tap_ref, feat_ref, *, SH, SW):
    # ---- stem: (SH*SW, K) @ (K, Cstem) + folded BN + ReLU (bf16 operands, f32 accumulate) ----
    stem = jnp.dot(patch_ref[...], ws_ref[...], preferred_element_type=jnp.float32)
    stem = jnp.maximum(stem * ss_ref[...] + bs_ref[...], 0.0)          # (SH*SW, Cstem) f32
    cstem = stem.shape[1]
    H, W = SH // 2, SW // 2
    n = H * W

    # ---- maxpool 3x3 / stride 2 / pad 1, fully in VMEM -------------------------------------
    # Values are post-ReLU (>= 0), so zero padding is equivalent to -inf padding.
    ximg = stem.reshape(SH, SW, cstem)
    xr = ximg.reshape(H, 2, SW, cstem)                                  # even/odd input rows
    even_r, odd_r = xr[:, 0], xr[:, 1]
    prev_r = jnp.concatenate([jnp.zeros((1, SW, cstem), jnp.float32), odd_r[:H - 1]], axis=0)
    rows = jnp.maximum(jnp.maximum(even_r, odd_r), prev_r)              # (H, SW, Cstem)
    rc = rows.reshape(H, W, 2, cstem)                                   # even/odd input cols
    even_c, odd_c = rc[:, :, 0], rc[:, :, 1]
    prev_c = jnp.concatenate([jnp.zeros((H, 1, cstem), jnp.float32), odd_c[:, :W - 1]], axis=1)
    x = jnp.maximum(jnp.maximum(even_c, odd_c), prev_c).reshape(n, cstem)   # (n, Cstem) f32
    x_bf = x.astype(jnp.bfloat16)

    # ---- bottleneck 1x1 + BN + ReLU ---------------------------------------------------------
    h1 = jnp.dot(x_bf, w1_ref[...], preferred_element_type=jnp.float32)
    h1 = jnp.maximum(h1 * s1_ref[...] + b1_ref[...], 0.0)               # (n, Cmid) f32
    cmid = h1.shape[1]

    # ---- 3x3 conv (pad 1): stage 9 shifted taps in VMEM -> one (n,9*Cmid)@(9*Cmid,Cmid) dot --
    def shift_rows(v, s):            # t[i] = v[i + s], zero-filled where i + s is out of range
        if s == 0:
            return v
        pad = jnp.zeros((abs(s), v.shape[1]), v.dtype)
        if s > 0:
            return jnp.concatenate([v[s:], pad], axis=0)
        return jnp.concatenate([pad, v[:n + s]], axis=0)

    wpos = jax.lax.broadcasted_iota(jnp.int32, (n, cmid), 0) % W        # W is a power of two
    m_left = wpos >= 1                                                  # valid when kw == 0
    m_right = wpos <= W - 2                                             # valid when kw == 2
    for k in range(9):
        kh, kw = k // 3, k % 3
        t = shift_rows(h1, (kh - 1) * W + (kw - 1))                     # row bounds zeroed here
        if kw == 0:
            t = jnp.where(m_left, t, 0.0)
        elif kw == 2:
            t = jnp.where(m_right, t, 0.0)
        tap_ref[:, k * cmid:(k + 1) * cmid] = t.astype(jnp.bfloat16)
    h2 = jnp.dot(tap_ref[...], w2_ref[...], preferred_element_type=jnp.float32)
    h2 = jnp.maximum(h2 * s2_ref[...] + b2_ref[...], 0.0).astype(jnp.bfloat16)

    # ---- 1x1 (main) + 1x1 projection shortcut, residual add + ReLU --------------------------
    h3 = jnp.dot(h2, w3_ref[...], preferred_element_type=jnp.float32) * s3_ref[...] + b3_ref[...]
    sk = jnp.dot(x_bf, wp_ref[...], preferred_element_type=jnp.float32) * sp_ref[...] + bp_ref[...]
    feat_ref[...] = jnp.maximum(h3 + sk, 0.0)                           # (n, Cout) f32 in VMEM

    # ---- AdaptiveAvgPool2d((enc, enc)) as one (Q, n) @ (n, Cout) matmul, lane-dense output ---
    o_ref[...] = jnp.dot(pool_ref[...], feat_ref[...],
                         preferred_element_type=jnp.float32).astype(o_ref.dtype)


# ----------------------------------------------------------------------------
# Pallas wrapper
# ----------------------------------------------------------------------------
def fused_image_encoder(patches, pool_mat, params, B, SH, SW, enc):
    H, W = SH // 2, SW // 2
    n = H * W
    Q = enc * enc
    Cmid = params["b_w1"].shape[0]
    Cout = params["b_w3"].shape[0]

    def mat(w):                      # (Cout, Cin, KH, KW) -> (KH*KW*Cin, Cout), bf16 operands
        return jnp.transpose(w, (2, 3, 1, 0)).reshape(-1, w.shape[0]).astype(jnp.bfloat16)

    def vec(v):                      # folded-BN scale/shift stay f32 (epilogue precision)
        return v.reshape(1, -1).astype(jnp.float32)

    args = (patches,
            mat(params["stem_w"]), vec(params["stem_scale"]), vec(params["stem_shift"]),
            mat(params["b_w1"]), vec(params["b_s1"]), vec(params["b_h1"]),
            mat(params["b_w2"]), vec(params["b_s2"]), vec(params["b_h2"]),
            mat(params["b_w3"]), vec(params["b_s3"]), vec(params["b_h3"]),
            mat(params["b_wp"]), vec(params["b_sp"]), vec(params["b_hp"]),
            pool_mat.astype(jnp.float32))

    def full_spec(a):
        return pl.BlockSpec(a.shape, lambda b: (0,) * a.ndim)

    in_specs = [pl.BlockSpec((None, SH * SW, patches.shape[-1]), lambda b: (b, 0, 0))]
    in_specs += [full_spec(a) for a in args[1:]]

    out = pl.pallas_call(
        functools.partial(encoder_kernel, SH=SH, SW=SW),
        out_shape=jax.ShapeDtypeStruct((B, Q, Cout), jnp.float32),
        grid=(B,),
        in_specs=in_specs,
        out_specs=pl.BlockSpec((None, Q, Cout), lambda b: (b, 0, 0)),
        scratch_shapes=[pltpu.VMEM((n, 9 * Cmid), jnp.bfloat16),   # 3x3 tap matrix
                        pltpu.VMEM((n, Cout), jnp.float32)],       # residual output (feat)
        compiler_params=pltpu.CompilerParams(
            dimension_semantics=("parallel",),
            vmem_limit_bytes=32 * 1024 * 1024),
    )(*args)
    return out.reshape(B, enc, enc, Cout)


# ----------------------------------------------------------------------------
# Plain-JAX glue (NHWC im2col for the stem, adaptive-pool matrix)
# ----------------------------------------------------------------------------
def im2col_nhwc(x, kh, kw, stride, pad):
    # x: (B, H, W, C).  Channel stays the minor dim, so the flatten is a pure reshape.
    B, H, W, C = x.shape
    OH = (H + 2 * pad - kh) // stride + 1
    OW = (W + 2 * pad - kw) // stride + 1
    xp = jnp.pad(x, ((0, 0), (pad, pad), (pad, pad), (0, 0)))
    cols = []
    for i in range(kh):
        for j in range(kw):
            cols.append(xp[:, i:i + stride * OH:stride, j:j + stride * OW:stride, :])
    patches = jnp.stack(cols, axis=3)                          # (B, OH, OW, kh*kw, C)
    return patches.reshape(B, OH * OW, kh * kw * C), OH, OW


def adaptive_pool_matrix(in_size, out_size):
    # Exact PyTorch AdaptiveAvgPool bins: start=floor(o*I/O), end=ceil((o+1)*I/O).
    P = np.zeros((in_size, out_size), np.float32)
    for o in range(out_size):
        s = (o * in_size) // out_size
        e = -(-((o + 1) * in_size) // out_size)
        P[s:e, o] = 1.0 / (e - s)
    return P


def adaptive_pool_matrix_2d(H, W, out_h, out_w):
    Ph = adaptive_pool_matrix(H, out_h)                        # (H, OH)
    Pw = adaptive_pool_matrix(W, out_w)                        # (W, OW)
    return jnp.asarray(np.kron(Ph.T, Pw.T))                    # (OH*OW, H*W)


# ----------------------------------------------------------------------------
# ImageEncoder forward
# ----------------------------------------------------------------------------
def image_encoder_forward(images, params, *, enc_image_size=14):
    B = images.shape[0]
    x_nhwc = jnp.transpose(images, (0, 2, 3, 1))               # one tiny NCHW->NHWC transpose
    patches, SH, SW = im2col_nhwc(x_nhwc, 7, 7, 2, 3)
    assert SH % 2 == 0 and SW % 2 == 0, (SH, SW)
    patches = patches.astype(jnp.bfloat16)                     # bf16 MXU operands
    H, W = SH // 2, SW // 2
    pool_mat = adaptive_pool_matrix_2d(H, W, enc_image_size, enc_image_size)
    return fused_image_encoder(patches, pool_mat, params, B, SH, SW, enc_image_size)


# ----------------------------------------------------------------------------
# Deterministic parameter init (synthetic; BN folded into scale/shift)
# ----------------------------------------------------------------------------
def init_params(key, c_stem=32, c_mid=32, c_out=128):
    ks = jax.random.split(key, 10)

    def conv_w(k, cout, cin, kh, kw):
        return jax.random.normal(k, (cout, cin, kh, kw), jnp.float32) / np.sqrt(cin * kh * kw)

    def bn(k, c):
        k1, k2, k3, k4 = jax.random.split(k, 4)
        gamma = 1.0 + 0.1 * jax.random.normal(k1, (c,), jnp.float32)
        beta = 0.1 * jax.random.normal(k2, (c,), jnp.float32)
        mean = 0.1 * jax.random.normal(k3, (c,), jnp.float32)
        var = 1.0 + 0.1 * jax.random.uniform(k4, (c,), jnp.float32)
        scale = gamma / jnp.sqrt(var + 1e-5)
        shift = beta - scale * mean
        return scale, shift

    p = {}
    p["stem_w"] = conv_w(ks[0], c_stem, 3, 7, 7)
    p["stem_scale"], p["stem_shift"] = bn(ks[1], c_stem)
    p["b_w1"] = conv_w(ks[2], c_mid, c_stem, 1, 1); p["b_s1"], p["b_h1"] = bn(ks[3], c_mid)
    p["b_w2"] = conv_w(ks[4], c_mid, c_mid, 3, 3);  p["b_s2"], p["b_h2"] = bn(ks[5], c_mid)
    p["b_w3"] = conv_w(ks[6], c_out, c_mid, 1, 1);  p["b_s3"], p["b_h3"] = bn(ks[7], c_out)
    p["b_wp"] = conv_w(ks[8], c_out, c_stem, 1, 1); p["b_sp"], p["b_hp"] = bn(ks[9], c_out)
    return p


# ----------------------------------------------------------------------------
# Pure-JAX f32 reference (for correctness check)
# ----------------------------------------------------------------------------
def reference_forward(images, params, enc):
    dn = ("NCHW", "OIHW", "NCHW")

    def conv(x, w, stride, pad):
        return jax.lax.conv_general_dilated(x, w, (stride, stride),
                                            [(pad, pad), (pad, pad)],
                                            dimension_numbers=dn)

    def bn(x, scale, shift):
        return x * scale[None, :, None, None] + shift[None, :, None, None]

    x = jax.nn.relu(bn(conv(images, params["stem_w"], 2, 3),
                       params["stem_scale"], params["stem_shift"]))
    x = jax.lax.reduce_window(x, -jnp.inf, jax.lax.max, (1, 1, 3, 3), (1, 1, 2, 2),
                              [(0, 0), (0, 0), (1, 1), (1, 1)])
    h = jax.nn.relu(bn(conv(x, params["b_w1"], 1, 0), params["b_s1"], params["b_h1"]))
    h = jax.nn.relu(bn(conv(h, params["b_w2"], 1, 1), params["b_s2"], params["b_h2"]))
    h = bn(conv(h, params["b_w3"], 1, 0), params["b_s3"], params["b_h3"])
    sk = bn(conv(x, params["b_wp"], 1, 0), params["b_sp"], params["b_hp"])
    y = jax.nn.relu(h + sk)
    B, C, H, W = y.shape
    Ph = jnp.asarray(adaptive_pool_matrix(H, enc))
    Pw = jnp.asarray(adaptive_pool_matrix(W, enc))
    pooled = jnp.einsum("bchw,hi,wj->bcij", y, Ph, Pw)
    return pooled.transpose(0, 2, 3, 1)


# ----------------------------------------------------------------------------
if __name__ == "__main__":
    enc_image_size = 14
    key = jax.random.PRNGKey(0)
    k_img, k_par = jax.random.split(key)

    images = jax.random.normal(k_img, (2, 3, 64, 64), jnp.float32)   # NCHW, like PyTorch
    params = init_params(k_par, c_stem=32, c_mid=32, c_out=128)

    fwd = jax.jit(functools.partial(image_encoder_forward, enc_image_size=enc_image_size))
    out = jax.block_until_ready(fwd(images, params))
    assert out.shape == (2, enc_image_size, enc_image_size, 128), out.shape

    ref = jax.block_until_ready(reference_forward(images, params, enc_image_size))
    # bf16 matmul operands (f32 accumulate/epilogue) vs. f32 reference: tolerance 2e-2.
    np.testing.assert_allclose(np.asarray(out), np.asarray(ref), rtol=2e-2, atol=2e-2)

    print("KERNEL_OK")
</pallas_src>

<mosaic_0001>
module attributes {stable_mosaic.version = 11 : i64} {
  func.func @encoder_kernel(%arg0: i32, %arg1: memref<1x1024x147xbf16, #tpu.memory_space<vmem>>, %arg2: memref<147x32xbf16, #tpu.memory_space<vmem>>, %arg3: memref<1x32xf32, #tpu.memory_space<vmem>>, %arg4: memref<1x32xf32, #tpu.memory_space<vmem>>, %arg5: memref<32x32xbf16, #tpu.memory_space<vmem>>, %arg6: memref<1x32xf32, #tpu.memory_space<vmem>>, %arg7: memref<1x32xf32, #tpu.memory_space<vmem>>, %arg8: memref<288x32xbf16, #tpu.memory_space<vmem>>, %arg9: memref<1x32xf32, #tpu.memory_space<vmem>>, %arg10: memref<1x32xf32, #tpu.memory_space<vmem>>, %arg11: memref<32x128xbf16, #tpu.memory_space<vmem>>, %arg12: memref<1x128xf32, #tpu.memory_space<vmem>>, %arg13: memref<1x128xf32, #tpu.memory_space<vmem>>, %arg14: memref<32x128xbf16, #tpu.memory_space<vmem>>, %arg15: memref<1x128xf32, #tpu.memory_space<vmem>>, %arg16: memref<1x128xf32, #tpu.memory_space<vmem>>, %arg17: memref<196x256xf32, #tpu.memory_space<vmem>>, %arg18: memref<1x196x128xf32, #tpu.memory_space<vmem>>, %arg19: memref<256x288xbf16, #tpu.memory_space<vmem>>, %arg20: memref<256x128xf32, #tpu.memory_space<vmem>>) attributes {dimension_semantics = [#tpu.dimension_semantics<parallel>], iteration_bounds = array<i64: 2>, scalar_prefetch = 0 : i64, scratch_operands = 2 : i64, tpu.core_type = #tpu.core_type<tc>, window_params = [{transform_indices = @transform_0, window_bounds = array<i64: 1, 1024, 147>}, {pipeline_mode = #tpu.pipeline_mode<synchronous>, transform_indices = @transform_1, window_bounds = array<i64: 147, 32>}, {pipeline_mode = #tpu.pipeline_mode<synchronous>, transform_indices = @transform_2, window_bounds = array<i64: 1, 32>}, {pipeline_mode = #tpu.pipeline_mode<synchronous>, transform_indices = @transform_3, window_bounds = array<i64: 1, 32>}, {pipeline_mode = #tpu.pipeline_mode<synchronous>, transform_indices = @transform_4, window_bounds = array<i64: 32, 32>}, {pipeline_mode = #tpu.pipeline_mode<synchronous>, transform_indices = @transform_5, window_bounds = array<i64: 1, 32>}, {pipeline_mode = #tpu.pipeline_mode<synchronous>, transform_indices = @transform_6, window_bounds = array<i64: 1, 32>}, {pipeline_mode = #tpu.pipeline_mode<synchronous>, transform_indices = @transform_7, window_bounds = array<i64: 288, 32>}, {pipeline_mode = #tpu.pipeline_mode<synchronous>, transform_indices = @transform_8, window_bounds = array<i64: 1, 32>}, {pipeline_mode = #tpu.pipeline_mode<synchronous>, transform_indices = @transform_9, window_bounds = array<i64: 1, 32>}, {pipeline_mode = #tpu.pipeline_mode<synchronous>, transform_indices = @transform_10, window_bounds = array<i64: 32, 128>}, {pipeline_mode = #tpu.pipeline_mode<synchronous>, transform_indices = @transform_11, window_bounds = array<i64: 1, 128>}, {pipeline_mode = #tpu.pipeline_mode<synchronous>, transform_indices = @transform_12, window_bounds = array<i64: 1, 128>}, {pipeline_mode = #tpu.pipeline_mode<synchronous>, transform_indices = @transform_13, window_bounds = array<i64: 32, 128>}, {pipeline_mode = #tpu.pipeline_mode<synchronous>, transform_indices = @transform_14, window_bounds = array<i64: 1, 128>}, {pipeline_mode = #tpu.pipeline_mode<synchronous>, transform_indices = @transform_15, window_bounds = array<i64: 1, 128>}, {pipeline_mode = #tpu.pipeline_mode<synchronous>, transform_indices = @transform_16, window_bounds = array<i64: 196, 256>}, {transform_indices = @transform_17, window_bounds = array<i64: 1, 196, 128>}]} {
    %c0 = arith.constant 0 : index
    %c0_0 = arith.constant 0 : index
    %c0_1 = arith.constant 0 : index
    %0 = vector.load %arg1[%c0, %c0_0, %c0_1] : memref<1x1024x147xbf16, #tpu.memory_space<vmem>>, vector<1x1024x147xbf16>
    %1 = vector.shape_cast %0 : vector<1x1024x147xbf16> to vector<1024x147xbf16>
    %c0_2 = arith.constant 0 : index
    %c0_3 = arith.constant 0 : index
    %2 = vector.load %arg2[%c0_2, %c0_3] : memref<147x32xbf16, #tpu.memory_space<vmem>>, vector<147x32xbf16>
    %cst = arith.constant dense<0.000000e+00> : vector<1024x32xf32>
    %3 = tpu.matmul %1, %2, %cst {dimension_numbers = #tpu.dot_dimension_numbers<[1], [0], [0], [1], [0, 0, 1, 1], [], []>} : vector<1024x147xbf16>, vector<147x32xbf16>, vector<1024x32xf32> -> vector<1024x32xf32>
    %c0_4 = arith.constant 0 : index
    %c0_5 = arith.constant 0 : index
    %4 = vector.load %arg3[%c0_4, %c0_5] : memref<1x32xf32, #tpu.memory_space<vmem>>, vector<1x32xf32>
    %5 = vector.broadcast %4 : vector<1x32xf32> to vector<1024x32xf32>
    %6 = arith.mulf %3, %5 : vector<1024x32xf32>
    %c0_6 = arith.constant 0 : index
    %c0_7 = arith.constant 0 : index
    %7 = vector.load %arg4[%c0_6, %c0_7] : memref<1x32xf32, #tpu.memory_space<vmem>>, vector<1x32xf32>
    %8 = vector.broadcast %7 : vector<1x32xf32> to vector<1024x32xf32>
    %9 = arith.addf %6, %8 : vector<1024x32xf32>
    %cst_8 = arith.constant 0.000000e+00 : f32
    %10 = vector.broadcast %cst_8 : f32 to vector<1024x32xf32>
    %11 = arith.maximumf %9, %10 : vector<1024x32xf32>
    %12 = vector.shape_cast %11 : vector<1024x32xf32> to vector<32x32x32xf32>
    %13 = vector.shape_cast %12 : vector<32x32x32xf32> to vector<16x2x32x32xf32>
    %14 = vector.extract_strided_slice %13 {offsets = [0, 0, 0, 0], sizes = [16, 1, 32, 32], strides = [1, 1, 1, 1]} : vector<16x2x32x32xf32> to vector<16x1x32x32xf32>
    %15 = vector.shape_cast %14 : vector<16x1x32x32xf32> to vector<16x32x32xf32>
    %16 = vector.extract_strided_slice %13 {offsets = [0, 1, 0, 0], sizes = [16, 1, 32, 32], strides = [1, 1, 1, 1]} : vector<16x2x32x32xf32> to vector<16x1x32x32xf32>
    %17 = vector.shape_cast %16 : vector<16x1x32x32xf32> to vector<16x32x32xf32>
    %cst_9 = arith.constant 0.000000e+00 : f32
    %18 = vector.broadcast %cst_9 : f32 to vector<1x32x32xf32>
    %19 = vector.extract_strided_slice %17 {offsets = [0, 0, 0], sizes = [15, 32, 32], strides = [1, 1, 1]} : vector<16x32x32xf32> to vector<15x32x32xf32>
    %20 = tpu.concatenate %18, %19 in 0 : vector<1x32x32xf32>, vector<15x32x32xf32> -> vector<16x32x32xf32>
    %21 = arith.maximumf %15, %17 : vector<16x32x32xf32>
    %22 = arith.maximumf %21, %20 : vector<16x32x32xf32>
    %23 = vector.shape_cast %22 : vector<16x32x32xf32> to vector<16x16x2x32xf32>
    %24 = vector.extract_strided_slice %23 {offsets = [0, 0, 0, 0], sizes = [16, 16, 1, 32], strides = [1, 1, 1, 1]} : vector<16x16x2x32xf32> to vector<16x16x1x32xf32>
    %25 = vector.shape_cast %24 : vector<16x16x1x32xf32> to vector<16x16x32xf32>
    %26 = vector.extract_strided_slice %23 {offsets = [0, 0, 1, 0], sizes = [16, 16, 1, 32], strides = [1, 1, 1, 1]} : vector<16x16x2x32xf32> to vector<16x16x1x32xf32>
    %27 = vector.shape_cast %26 : vector<16x16x1x32xf32> to vector<16x16x32xf32>
    %cst_10 = arith.constant 0.000000e+00 : f32
    %28 = vector.broadcast %cst_10 : f32 to vector<16x1x32xf32>
    %29 = vector.extract_strided_slice %27 {offsets = [0, 0, 0], sizes = [16, 15, 32], strides = [1, 1, 1]} : vector<16x16x32xf32> to vector<16x15x32xf32>
    %30 = tpu.concatenate %28, %29 in 1 : vector<16x1x32xf32>, vector<16x15x32xf32> -> vector<16x16x32xf32>
    %31 = arith.maximumf %25, %27 : vector<16x16x32xf32>
    %32 = arith.maximumf %31, %30 : vector<16x16x32xf32>
    %33 = vector.shape_cast %32 : vector<16x16x32xf32> to vector<256x32xf32>
    %34 = arith.truncf %33 : vector<256x32xf32> to vector<256x32xbf16>
    %c0_11 = arith.constant 0 : index
    %c0_12 = arith.constant 0 : index
    %35 = vector.load %arg5[%c0_11, %c0_12] : memref<32x32xbf16, #tpu.memory_space<vmem>>, vector<32x32xbf16>
    %cst_13 = arith.constant dense<0.000000e+00> : vector<256x32xf32>
    %36 = tpu.matmul %34, %35, %cst_13 {dimension_numbers = #tpu.dot_dimension_numbers<[1], [0], [0], [1], [0, 0, 1, 1], [], []>} : vector<256x32xbf16>, vector<32x32xbf16>, vector<256x32xf32> -> vector<256x32xf32>
    %c0_14 = arith.constant 0 : index
    %c0_15 = arith.constant 0 : index
    %37 = vector.load %arg6[%c0_14, %c0_15] : memref<1x32xf32, #tpu.memory_space<vmem>>, vector<1x32xf32>
    %38 = vector.broadcast %37 : vector<1x32xf32> to vector<256x32xf32>
    %39 = arith.mulf %36, %38 : vector<256x32xf32>
    %c0_16 = arith.constant 0 : index
    %c0_17 = arith.constant 0 : index
    %40 = vector.load %arg7[%c0_16, %c0_17] : memref<1x32xf32, #tpu.memory_space<vmem>>, vector<1x32xf32>
    %41 = vector.broadcast %40 : vector<1x32xf32> to vector<256x32xf32>
    %42 = arith.addf %39, %41 : vector<256x32xf32>
    %cst_18 = arith.constant 0.000000e+00 : f32
    %43 = vector.broadcast %cst_18 : f32 to vector<256x32xf32>
    %44 = arith.maximumf %42, %43 : vector<256x32xf32>
    %45 = tpu.iota {dimensions = array<i32: 0>} : vector<256x32xi32>
    %c16_i32 = arith.constant 16 : i32
    %c0_i32 = arith.constant 0 : i32
    %46 = arith.cmpi eq, %c16_i32, %c0_i32 : i32
    %c1_i32 = arith.constant 1 : i32
    %47 = arith.select %46, %c1_i32, %c16_i32 : i32
    %48 = vector.broadcast %47 : i32 to vector<256x32xi32>
    %49 = arith.remsi %45, %48 : vector<256x32xi32>
    %c0_i32_19 = arith.constant 0 : i32
    %50 = vector.broadcast %c0_i32_19 : i32 to vector<256x32xi32>
    %51 = arith.cmpi ne, %49, %50 : vector<256x32xi32>
    %c0_i32_20 = arith.constant 0 : i32
    %52 = vector.broadcast %c0_i32_20 : i32 to vector<256x32xi32>
    %53 = arith.cmpi slt, %49, %52 : vector<256x32xi32>
    %c0_i32_21 = arith.constant 0 : i32
    %54 = arith.cmpi slt, %47, %c0_i32_21 : i32
    %55 = vector.broadcast %54 : i1 to vector<256x32xi1>
    %56 = vector.broadcast %55 : vector<256x32xi1> to vector<256x32xi1>
    %57 = arith.xori %53, %56 : vector<256x32xi1>
    %58 = arith.andi %57, %51 : vector<256x32xi1>
    %59 = vector.broadcast %47 : i32 to vector<256x32xi32>
    %60 = arith.addi %49, %59 : vector<256x32xi32>
    %61 = arith.select %58, %60, %49 : vector<256x32xi1>, vector<256x32xi32>
    %c1_i32_22 = arith.constant 1 : i32
    %62 = vector.broadcast %c1_i32_22 : i32 to vector<256x32xi32>
    %63 = arith.cmpi sge, %61, %62 : vector<256x32xi32>
    %c14_i32 = arith.constant 14 : i32
    %64 = vector.broadcast %c14_i32 : i32 to vector<256x32xi32>
    %65 = arith.cmpi sle, %61, %64 : vector<256x32xi32>
    %cst_23 = arith.constant 0.000000e+00 : f32
    %66 = vector.broadcast %cst_23 : f32 to vector<17x32xf32>
    %67 = vector.extract_strided_slice %44 {offsets = [0, 0], sizes = [239, 32], strides = [1, 1]} : vector<256x32xf32> to vector<239x32xf32>
    %68 = tpu.concatenate %66, %67 in 0 : vector<17x32xf32>, vector<239x32xf32> -> vector<256x32xf32>
    %cst_24 = arith.constant 0.000000e+00 : f32
    %69 = vector.broadcast %cst_24 : f32 to vector<256x32xf32>
    %70 = arith.select %63, %68, %69 : vector<256x32xi1>, vector<256x32xf32>
    %71 = arith.truncf %70 : vector<256x32xf32> to vector<256x32xbf16>
    %c0_25 = arith.constant 0 : index
    %c0_26 = arith.constant 0 : index
    %72 = vector.load %arg19[%c0_25, %c0_26] : memref<256x288xbf16, #tpu.memory_space<vmem>>, vector<256x32xbf16>
    tpu.vector_store %arg19[%c0_25, %c0_26], %71 {strides = array<i32>} : memref<256x288xbf16, #tpu.memory_space<vmem>>, vector<256x32xbf16>,
    %cst_27 = arith.constant 0.000000e+00 : f32
    %73 = vector.broadcast %cst_27 : f32 to vector<16x32xf32>
    %74 = vector.extract_strided_slice %44 {offsets = [0, 0], sizes = [240, 32], strides = [1, 1]} : vector<256x32xf32> to vector<240x32xf32>
    %75 = tpu.concatenate %73, %74 in 0 : vector<16x32xf32>, vector<240x32xf32> -> vector<256x32xf32>
    %76 = arith.truncf %75 : vector<256x32xf32> to vector<256x32xbf16>
    %c0_28 = arith.constant 0 : index
    %c32 = arith.constant 32 : index
    %77 = vector.load %arg19[%c0_28, %c32] : memref<256x288xbf16, #tpu.memory_space<vmem>>, vector<256x32xbf16>
    tpu.vector_store %arg19[%c0_28, %c32], %76 {strides = array<i32>} : memref<256x288xbf16, #tpu.memory_space<vmem>>, vector<256x32xbf16>,
    %cst_29 = arith.constant 0.000000e+00 : f32
    %78 = vector.broadcast %cst_29 : f32 to vector<15x32xf32>
    %79 = vector.extract_strided_slice %44 {offsets = [0, 0], sizes = [241, 32], strides = [1, 1]} : vector<256x32xf32> to vector<241x32xf32>
    %80 = tpu.concatenate %78, %79 in 0 : vector<15x32xf32>, vector<241x32xf32> -> vector<256x32xf32>
    %cst_30 = arith.constant 0.000000e+00 : f32
    %81 = vector.broadcast %cst_30 : f32 to vector<256x32xf32>
    %82 = arith.select %65, %80, %81 : vector<256x32xi1>, vector<256x32xf32>
    %83 = arith.truncf %82 : vector<256x32xf32> to vector<256x32xbf16>
    %c0_31 = arith.constant 0 : index
    %c64 = arith.constant 64 : index
    %84 = vector.load %arg19[%c0_31, %c64] : memref<256x288xbf16, #tpu.memory_space<vmem>>, vector<256x32xbf16>
    tpu.vector_store %arg19[%c0_31, %c64], %83 {strides = array<i32>} : memref<256x288xbf16, #tpu.memory_space<vmem>>, vector<256x32xbf16>,
    %cst_32 = arith.constant 0.000000e+00 : f32
    %85 = vector.broadcast %cst_32 : f32 to vector<1x32xf32>
    %86 = vector.extract_strided_slice %44 {offsets = [0, 0], sizes = [255, 32], strides = [1, 1]} : vector<256x32xf32> to vector<255x32xf32>
    %87 = tpu.concatenate %85, %86 in 0 : vector<1x32xf32>, vector<255x32xf32> -> vector<256x32xf32>
    %cst_33 = arith.constant 0.000000e+00 : f32
    %88 = vector.broadcast %cst_33 : f32 to vector<256x32xf32>
    %89 = arith.select %63, %87, %88 : vector<256x32xi1>, vector<256x32xf32>
    %90 = arith.truncf %89 : vector<256x32xf32> to vector<256x32xbf16>
    %c0_34 = arith.constant 0 : index
    %c96 = arith.constant 96 : index
    %91 = vector.load %arg19[%c0_34, %c96] : memref<256x288xbf16, #tpu.memory_space<vmem>>, vector<256x32xbf16>
    tpu.vector_store %arg19[%c0_34, %c96], %90 {strides = array<i32>} : memref<256x288xbf16, #tpu.memory_space<vmem>>, vector<256x32xbf16>,
    %92 = arith.truncf %44 : vector<256x32xf32> to vector<256x32xbf16>
    %c0_35 = arith.constant 0 : index
    %c128 = arith.constant 128 : index
    %93 = vector.load %arg19[%c0_35, %c128] : memref<256x288xbf16, #tpu.memory_space<vmem>>, vector<256x32xbf16>
    tpu.vector_store %arg19[%c0_35, %c128], %92 {strides = array<i32>} : memref<256x288xbf16, #tpu.memory_space<vmem>>, vector<256x32xbf16>,
    %cst_36 = arith.constant 0.000000e+00 : f32
    %94 = vector.broadcast %cst_36 : f32 to vector<1x32xf32>
    %95 = vector.extract_strided_slice %44 {offsets = [1, 0], sizes = [255, 32], strides = [1, 1]} : vector<256x32xf32> to vector<255x32xf32>
    %96 = tpu.concatenate %95, %94 in 0 : vector<255x32xf32>, vector<1x32xf32> -> vector<256x32xf32>
    %cst_37 = arith.constant 0.000000e+00 : f32
    %97 = vector.broadcast %cst_37 : f32 to vector<256x32xf32>
    %98 = arith.select %65, %96, %97 : vector<256x32xi1>, vector<256x32xf32>
    %99 = arith.truncf %98 : vector<256x32xf32> to vector<256x32xbf16>
    %c0_38 = arith.constant 0 : index
    %c160 = arith.constant 160 : index
    %100 = vector.load %arg19[%c0_38, %c160] : memref<256x288xbf16, #tpu.memory_space<vmem>>, vector<256x32xbf16>
    tpu.vector_store %arg19[%c0_38, %c160], %99 {strides = array<i32>} : memref<256x288xbf16, #tpu.memory_space<vmem>>, vector<256x32xbf16>,
    %cst_39 = arith.constant 0.000000e+00 : f32
    %101 = vector.broadcast %cst_39 : f32 to vector<15x32xf32>
    %102 = vector.extract_strided_slice %44 {offsets = [15, 0], sizes = [241, 32], strides = [1, 1]} : vector<256x32xf32> to vector<241x32xf32>
    %103 = tpu.concatenate %102, %101 in 0 : vector<241x32xf32>, vector<15x32xf32> -> vector<256x32xf32>
    %cst_40 = arith.constant 0.000000e+00 : f32
    %104 = vector.broadcast %cst_40 : f32 to vector<256x32xf32>
    %105 = arith.select %63, %103, %104 : vector<256x32xi1>, vector<256x32xf32>
    %106 = arith.truncf %105 : vector<256x32xf32> to vector<256x32xbf16>
    %c0_41 = arith.constant 0 : index
    %c192 = arith.constant 192 : index
    %107 = vector.load %arg19[%c0_41, %c192] : memref<256x288xbf16, #tpu.memory_space<vmem>>, vector<256x32xbf16>
    tpu.vector_store %arg19[%c0_41, %c192], %106 {strides = array<i32>} : memref<256x288xbf16, #tpu.memory_space<vmem>>, vector<256x32xbf16>,
    %cst_42 = arith.constant 0.000000e+00 : f32
    %108 = vector.broadcast %cst_42 : f32 to vector<16x32xf32>
    %109 = vector.extract_strided_slice %44 {offsets = [16, 0], sizes = [240, 32], strides = [1, 1]} : vector<256x32xf32> to vector<240x32xf32>
    %110 = tpu.concatenate %109, %108 in 0 : vector<240x32xf32>, vector<16x32xf32> -> vector<256x32xf32>
    %111 = arith.truncf %110 : vector<256x32xf32> to vector<256x32xbf16>
    %c0_43 = arith.constant 0 : index
    %c224 = arith.constant 224 : index
    %112 = vector.load %arg19[%c0_43, %c224] : memref<256x288xbf16, #tpu.memory_space<vmem>>, vector<256x32xbf16>
    tpu.vector_store %arg19[%c0_43, %c224], %111 {strides = array<i32>} : memref<256x288xbf16, #tpu.memory_space<vmem>>, vector<256x32xbf16>,
    %cst_44 = arith.constant 0.000000e+00 : f32
    %113 = vector.broadcast %cst_44 : f32 to vector<17x32xf32>
    %114 = vector.extract_strided_slice %44 {offsets = [17, 0], sizes = [239, 32], strides = [1, 1]} : vector<256x32xf32> to vector<239x32xf32>
    %115 = tpu.concatenate %114, %113 in 0 : vector<239x32xf32>, vector<17x32xf32> -> vector<256x32xf32>
    %cst_45 = arith.constant 0.000000e+00 : f32
    %116 = vector.broadcast %cst_45 : f32 to vector<256x32xf32>
    %117 = arith.select %65, %115, %116 : vector<256x32xi1>, vector<256x32xf32>
    %118 = arith.truncf %117 : vector<256x32xf32> to vector<256x32xbf16>
    %c0_46 = arith.constant 0 : index
    %c256 = arith.constant 256 : index
    %119 = vector.load %arg19[%c0_46, %c256] : memref<256x288xbf16, #tpu.memory_space<vmem>>, vector<256x32xbf16>
    tpu.vector_store %arg19[%c0_46, %c256], %118 {strides = array<i32>} : memref<256x288xbf16, #tpu.memory_space<vmem>>, vector<256x32xbf16>,
    %c0_47 = arith.constant 0 : index
    %c0_48 = arith.constant 0 : index
    %120 = vector.load %arg19[%c0_47, %c0_48] : memref<256x288xbf16, #tpu.memory_space<vmem>>, vector<256x288xbf16>
    %c0_49 = arith.constant 0 : index
    %c0_50 = arith.constant 0 : index
    %121 = vector.load %arg8[%c0_49, %c0_50] : memref<288x32xbf16, #tpu.memory_space<vmem>>, vector<288x32xbf16>
    %cst_51 = arith.constant dense<0.000000e+00> : vector<256x32xf32>
    %122 = tpu.matmul %120, %121, %cst_51 {dimension_numbers = #tpu.dot_dimension_numbers<[1], [0], [0], [1], [0, 0, 1, 1], [], []>} : vector<256x288xbf16>, vector<288x32xbf16>, vector<256x32xf32> -> vector<256x32xf32>
    %c0_52 = arith.constant 0 : index
    %c0_53 = arith.constant 0 : index
    %123 = vector.load %arg9[%c0_52, %c0_53] : memref<1x32xf32, #tpu.memory_space<vmem>>, vector<1x32xf32>
    %124 = vector.broadcast %123 : vector<1x32xf32> to vector<256x32xf32>
    %125 = arith.mulf %122, %124 : vector<256x32xf32>
    %c0_54 = arith.constant 0 : index
    %c0_55 = arith.constant 0 : index
    %126 = vector.load %arg10[%c0_54, %c0_55] : memref<1x32xf32, #tpu.memory_space<vmem>>, vector<1x32xf32>
    %127 = vector.broadcast %126 : vector<1x32xf32> to vector<256x32xf32>
    %128 = arith.addf %125, %127 : vector<256x32xf32>
    %cst_56 = arith.constant 0.000000e+00 : f32
    %129 = vector.broadcast %cst_56 : f32 to vector<256x32xf32>
    %130 = arith.maximumf %128, %129 : vector<256x32xf32>
    %131 = arith.truncf %130 : vector<256x32xf32> to vector<256x32xbf16>
    %c0_57 = arith.constant 0 : index
    %c0_58 = arith.constant 0 : index
    %132 = vector.load %arg11[%c0_57, %c0_58] : memref<32x128xbf16, #tpu.memory_space<vmem>>, vector<32x128xbf16>
    %cst_59 = arith.constant dense<0.000000e+00> : vector<256x128xf32>
    %133 = tpu.matmul %131, %132, %cst_59 {dimension_numbers = #tpu.dot_dimension_numbers<[1], [0], [0], [1], [0, 0, 1, 1], [], []>} : vector<256x32xbf16>, vector<32x128xbf16>, vector<256x128xf32> -> vector<256x128xf32>
    %c0_60 = arith.constant 0 : index
    %c0_61 = arith.constant 0 : index
    %134 = vector.load %arg12[%c0_60, %c0_61] : memref<1x128xf32, #tpu.memory_space<vmem>>, vector<1x128xf32>
    %135 = vector.broadcast %134 : vector<1x128xf32> to vector<256x128xf32>
    %136 = arith.mulf %133, %135 : vector<256x128xf32>
    %c0_62 = arith.constant 0 : index
    %c0_63 = arith.constant 0 : index
    %137 = vector.load %arg13[%c0_62, %c0_63] : memref<1x128xf32, #tpu.memory_space<vmem>>, vector<1x128xf32>
    %138 = vector.broadcast %137 : vector<1x128xf32> to vector<256x128xf32>
    %139 = arith.addf %136, %138 : vector<256x128xf32>
    %c0_64 = arith.constant 0 : index
    %c0_65 = arith.constant 0 : index
    %140 = vector.load %arg14[%c0_64, %c0_65] : memref<32x128xbf16, #tpu.memory_space<vmem>>, vector<32x128xbf16>
    %cst_66 = arith.constant dense<0.000000e+00> : vector<256x128xf32>
    %141 = tpu.matmul %34, %140, %cst_66 {dimension_numbers = #tpu.dot_dimension_numbers<[1], [0], [0], [1], [0, 0, 1, 1], [], []>} : vector<256x32xbf16>, vector<32x128xbf16>, vector<256x128xf32> -> vector<256x128xf32>
    %c0_67 = arith.constant 0 : index
    %c0_68 = arith.constant 0 : index
    %142 = vector.load %arg15[%c0_67, %c0_68] : memref<1x128xf32, #tpu.memory_space<vmem>>, vector<1x128xf32>
    %143 = vector.broadcast %142 : vector<1x128xf32> to vector<256x128xf32>
    %144 = arith.mulf %141, %143 : vector<256x128xf32>
    %c0_69 = arith.constant 0 : index
    %c0_70 = arith.constant 0 : index
    %145 = vector.load %arg16[%c0_69, %c0_70] : memref<1x128xf32, #tpu.memory_space<vmem>>, vector<1x128xf32>
    %146 = vector.broadcast %145 : vector<1x128xf32> to vector<256x128xf32>
    %147 = arith.addf %144, %146 : vector<256x128xf32>
    %148 = arith.addf %139, %147 : vector<256x128xf32>
    %cst_71 = arith.constant 0.000000e+00 : f32
    %149 = vector.broadcast %cst_71 : f32 to vector<256x128xf32>
    %150 = arith.maximumf %148, %149 : vector<256x128xf32>
    %c0_72 = arith.constant 0 : index
    %c0_73 = arith.constant 0 : index
    %151 = vector.load %arg20[%c0_72, %c0_73] : memref<256x128xf32, #tpu.memory_space<vmem>>, vector<256x128xf32>
    tpu.vector_store %arg20[%c0_72, %c0_73], %150 {strides = array<i32>} : memref<256x128xf32, #tpu.memory_space<vmem>>, vector<256x128xf32>,
    %c0_74 = arith.constant 0 : index
    %c0_75 = arith.constant 0 : index
    %152 = vector.load %arg17[%c0_74, %c0_75] : memref<196x256xf32, #tpu.memory_space<vmem>>, vector<196x256xf32>
    %c0_76 = arith.constant 0 : index
    %c0_77 = arith.constant 0 : index
    %153 = vector.load %arg20[%c0_76, %c0_77] : memref<256x128xf32, #tpu.memory_space<vmem>>, vector<256x128xf32>
    %cst_78 = arith.constant dense<0.000000e+00> : vector<196x128xf32>
    %154 = tpu.matmul %152, %153, %cst_78 {dimension_numbers = #tpu.dot_dimension_numbers<[1], [0], [0], [1], [0, 0, 1, 1], [], []>} : vector<196x256xf32>, vector<256x128xf32>, vector<196x128xf32> -> vector<196x128xf32>
    %c0_79 = arith.constant 0 : index
    %c0_80 = arith.constant 0 : index
    %c0_81 = arith.constant 0 : index
    %155 = vector.load %arg18[%c0_79, %c0_80, %c0_81] : memref<1x196x128xf32, #tpu.memory_space<vmem>>, vector<1x196x128xf32>
    %156 = vector.shape_cast %155 : vector<1x196x128xf32> to vector<196x128xf32>
    %157 = vector.shape_cast %154 : vector<196x128xf32> to vector<1x196x128xf32>
    tpu.vector_store %arg18[%c0_79, %c0_80, %c0_81], %157 {strides = array<i32>} : memref<1x196x128xf32, #tpu.memory_space<vmem>>, vector<1x196x128xf32>,
    return
  }
  func.func @transform_0(%arg0: i32) -> (i32, i32, i32) {
    %c0_i32 = arith.constant 0 : i32
    %c0_i32_0 = arith.constant 0 : i32
    %c0_i32_1 = arith.constant 0 : i32
    return %arg0, %c0_i32, %c0_i32_0 : i32, i32, i32
  }
  func.func @transform_1(%arg0: i32) -> (i32, i32) {
    %c0_i32 = arith.constant 0 : i32
    %c0_i32_0 = arith.constant 0 : i32
    %c0_i32_1 = arith.constant 0 : i32
    return %c0_i32, %c0_i32_0 : i32, i32
  }
  func.func @transform_2(%arg0: i32) -> (i32, i32) {
    %c0_i32 = arith.constant 0 : i32
    %c0_i32_0 = arith.constant 0 : i32
    %c0_i32_1 = arith.constant 0 : i32
    return %c0_i32, %c0_i32_0 : i32, i32
  }
  func.func @transform_3(%arg0: i32) -> (i32, i32) {
    %c0_i32 = arith.constant 0 : i32
    %c0_i32_0 = arith.constant 0 : i32
    %c0_i32_1 = arith.constant 0 : i32
    return %c0_i32, %c0_i32_0 : i32, i32
  }
  func.func @transform_4(%arg0: i32) -> (i32, i32) {
    %c0_i32 = arith.constant 0 : i32
    %c0_i32_0 = arith.constant 0 : i32
    %c0_i32_1 = arith.constant 0 : i32
    return %c0_i32, %c0_i32_0 : i32, i32
  }
  func.func @transform_5(%arg0: i32) -> (i32, i32) {
    %c0_i32 = arith.constant 0 : i32
    %c0_i32_0 = arith.constant 0 : i32
    %c0_i32_1 = arith.constant 0 : i32
    return %c0_i32, %c0_i32_0 : i32, i32
  }
  func.func @transform_6(%arg0: i32) -> (i32, i32) {
    %c0_i32 = arith.constant 0 : i32
    %c0_i32_0 = arith.constant 0 : i32
    %c0_i32_1 = arith.constant 0 : i32
    return %c0_i32, %c0_i32_0 : i32, i32
  }
  func.func @transform_7(%arg0: i32) -> (i32, i32) {
    %c0_i32 = arith.constant 0 : i32
    %c0_i32_0 = arith.constant 0 : i32
    %c0_i32_1 = arith.constant 0 : i32
    return %c0_i32, %c0_i32_0 : i32, i32
  }
  func.func @transform_8(%arg0: i32) -> (i32, i32) {
    %c0_i32 = arith.constant 0 : i32
    %c0_i32_0 = arith.constant 0 : i32
    %c0_i32_1 = arith.constant 0 : i32
    return %c0_i32, %c0_i32_0 : i32, i32
  }
  func.func @transform_9(%arg0: i32) -> (i32, i32) {
    %c0_i32 = arith.constant 0 : i32
    %c0_i32_0 = arith.constant 0 : i32
    %c0_i32_1 = arith.constant 0 : i32
    return %c0_i32, %c0_i32_0 : i32, i32
  }
  func.func @transform_10(%arg0: i32) -> (i32, i32) {
    %c0_i32 = arith.constant 0 : i32
    %c0_i32_0 = arith.constant 0 : i32
    %c0_i32_1 = arith.constant 0 : i32
    return %c0_i32, %c0_i32_0 : i32, i32
  }
  func.func @transform_11(%arg0: i32) -> (i32, i32) {
    %c0_i32 = arith.constant 0 : i32
    %c0_i32_0 = arith.constant 0 : i32
    %c0_i32_1 = arith.constant 0 : i32
    return %c0_i32, %c0_i32_0 : i32, i32
  }
  func.func @transform_12(%arg0: i32) -> (i32, i32) {
    %c0_i32 = arith.constant 0 : i32
    %c0_i32_0 = arith.constant 0 : i32
    %c0_i32_1 = arith.constant 0 : i32
    return %c0_i32, %c0_i32_0 : i32, i32
  }
  func.func @transform_13(%arg0: i32) -> (i32, i32) {
    %c0_i32 = arith.constant 0 : i32
    %c0_i32_0 = arith.constant 0 : i32
    %c0_i32_1 = arith.constant 0 : i32
    return %c0_i32, %c0_i32_0 : i32, i32
  }
  func.func @transform_14(%arg0: i32) -> (i32, i32) {
    %c0_i32 = arith.constant 0 : i32
    %c0_i32_0 = arith.constant 0 : i32
    %c0_i32_1 = arith.constant 0 : i32
    return %c0_i32, %c0_i32_0 : i32, i32
  }
  func.func @transform_15(%arg0: i32) -> (i32, i32) {
    %c0_i32 = arith.constant 0 : i32
    %c0_i32_0 = arith.constant 0 : i32
    %c0_i32_1 = arith.constant 0 : i32
    return %c0_i32, %c0_i32_0 : i32, i32
  }
  func.func @transform_16(%arg0: i32) -> (i32, i32) {
    %c0_i32 = arith.constant 0 : i32
    %c0_i32_0 = arith.constant 0 : i32
    %c0_i32_1 = arith.constant 0 : i32
    return %c0_i32, %c0_i32_0 : i32, i32
  }
  func.func @transform_17(%arg0: i32) -> (i32, i32, i32) {
    %c0_i32 = arith.constant 0 : i32
    %c0_i32_0 = arith.constant 0 : i32
    %c0_i32_1 = arith.constant 0 : i32
    return %arg0, %c0_i32, %c0_i32_0 : i32, i32, i32
  }
}

</mosaic_0001>

<bundles_post_ra>
// kernel: image_encoder_forward.1
= control target key start
LH: loop header
LB: loop body
LE: loop exit
PB: predicated region body
PF: predicated region fallthrough
CT: control target
= control target key end

     0   :  { %s12370_s24 = smov 0   ;;  %s18551_s0 = inlined_call_operand.vmem [shape: bf16[2,1024,147], index: 0, kind: input, shape index: {}]   ;;  %s18552_s1 = inlined_call_operand.vmem [shape: bf16[147,32], index: 1, kind: input, shape index: {}]   ;;  %s18553_s2 = inlined_call_operand.vmem [shape: f32[1,32], index: 2, kind: input, shape index: {}]   ;;  %s18554_s3 = inlined_call_operand.vmem [shape: f32[1,32], index: 3, kind: input, shape index: {}]   ;;  %s18555_s4 = inlined_call_operand.vmem [shape: bf16[32,32], index: 4, kind: input, shape index: {}]   ;;  %s18556_s5 = inlined_call_operand.vmem [shape: f32[1,32], index: 5, kind: input, shape index: {}]   ;;  %s18557_s6 = inlined_call_operand.vmem [shape: f32[1,32], index: 6, kind: input, shape index: {}]   ;;  %s18558_s7 = inlined_call_operand.vmem [shape: bf16[288,32], index: 7, kind: input, shape index: {}]   ;;  %s18559_s8 = inlined_call_operand.vmem [shape: f32[1,32], index: 8, kind: input, shape index: {}]   ;;  %s18560_s9 = inlined_call_operand.vmem [shape: f32[1,32], index: 9, kind: input, shape index: {}]   ;;  %s18561_s10 = inlined_call_operand.vmem [shape: bf16[32,128], index: 10, kind: input, shape index: {}]   ;;  %s18562_s11 = inlined_call_operand.vmem [shape: f32[1,128], index: 11, kind: input, shape index: {}]   ;;  %s18563_s12 = inlined_call_operand.vmem [shape: f32[1,128], index: 12, kind: input, shape index: {}]   ;;  %s18564_s13 = inlined_call_operand.vmem [shape: bf16[32,128], index: 13, kind: input, shape index: {}]   ;;  %s18565_s14 = inlined_call_operand.vmem [shape: f32[1,128], index: 14, kind: input, shape index: {}]   ;;  %s18566_s15 = inlined_call_operand.vmem [shape: f32[1,128], index: 15, kind: input, shape index: {}]   ;;  %s18567_s16 = inlined_call_operand.vmem [shape: f32[196,256], index: 16, kind: input, shape index: {}]   ;;  %s18568_s17 = inlined_call_operand.vmem [shape: f32[2,196,128], index: 17, kind: output, shape index: {}]  }
   0x1   :  { %18854 = sst [smem:[#allocation116_spill]] %s18551_s0 }
   0x2   :  { %18855 = sst [smem:[#allocation117_spill]] %s18552_s1 }
   0x3 LB: > { %s10769_s25 = sadd.s32 4294967295, %s12273_s24   ;;  %p10773_p0 = scmp.ge.s32.totalorder %s12273_s24, 1  ;;  %s12273_s24 = sphi %s12370_s24, %s27_s24  }
   0x4   : > { %p487_p1 = scmp.lt.s32.totalorder %s12273_s24, 3 }
   0x6   : > { %p488_p2 = pnand %p10773_p0, %p487_p1 }
   0x8   : > { %491 = sbr.rel (%p488_p2) target bundleno = 2609 (0xa31), region = 88 }
   0xd   : > { %s18856_s28 = sld [smem:[#allocation117_spill]]  ;;  %vm18616_vm0 = vcmask 1040384   ;;  %vm1524_vm1 = vcmask 1041408   ;;  %p539_p3 = scmp.lt.s32.totalorder %s10769_s25, 1  ;;  %v12275_v4 = vmov 65535   ;;  %vm18626_vm2 = vcmask 154624  }
   0xe   : > { %v1525_v5 = vsel %vm18616_vm0, 4294967295, %v12275_v4  ;;  %s18857_s23 = sld [smem:[#allocation116_spill]]  ;;  %vm18693_vm3 = vcmask 1042434   ;;  %vm18692_vm4 = vcmask 1043459   ;;  %vm18673_vm5 = vcmask 1044484   ;;  %s12277_s0 = smov 32  }
   0xf   : > { %v1526_v7 = vsel %vm1524_vm1, %v1525_v5, 0  ;;  %s20005_s25 = smov (!%p539_p3, %s10769_s25), 1  ;;  %vm18649_vm6 = vcmask 1045509   ;;  %vm18647_vm7 = vcmask 1046534   ;;  %vm18624_vm8 = vcmask 1047559   ;;  %s12278_s19 = smov 64  }
  0x10   : > { %s11999_s20 = sshll.u32 %s20005_s25, 10  ;;  %vm18621_vm9 = vcmask 1041409   ;;  %vm18623_vm10 = vcmask 261120   ;;  %vm18603_vm11 = vcmask 257024   ;;  %vm18669_vm12 = vcmask 1046528   ;;  %s12279_s21 = smov 96  }
  0x13   : > { %v12135_v0 = vld [vmem:[%s18856_s28 + $0x38] sm:$0xff]  ;;  %v696_v1 = vld [vmem:[%s18856_s28 + $0x48] sm:$0x3]  ;;  %v12134_v3 = vld [vmem:[%s18856_s28 + $0x30] sm:$0xff] }
  0x14   : > { %v1310_v2 = vunpack.c.l.b16 %v696_v1  ;;  %1530 = vmatpush.bf16.msra.mxu0 %v12135_v0  ;;  %12209 = vmatpush.bf16.msra.mxu2 %v12135_v0  ;;  %v12133_v9 = vld [vmem:[%s18856_s28 + $0x28] sm:$0xff]  ;;  %s12397_s26 = scalar_lea.vmem %s18857_s23, %s11999_s20  ;;  %v12136_v10 = vld [vmem:[%s18856_s28 + $0x40] sm:$0xff]  ;;  %v12131_v15 = vld [vmem:[%s18856_s28 + $0x18] sm:$0xff] }
  0x15   : > { %v12000_v11 = vld [vmem:[%s12397_s26 + $0x4] sm:$0xf]  ;;  %v10781_v12 = vld [vmem:[%s12397_s26 + $0x8] sm:$0xf0]  ;;  %v12130_v16 = vld [vmem:[%s18856_s28 + $0x10] sm:$0xff] }
  0x16   : > { %v1320_v6 = vpack.c.b16 %v1310_v2, %v1310_v2  ;;  %v10784_v13 = vor.u32 %v12000_v11, %v10781_v12  ;;  %v12132_v14 = vld [vmem:[%s18856_s28 + $0x20] sm:$0xff]  ;;  %v12129_v17 = vld [vmem:[%s18856_s28 + $0x8] sm:$0xff]  ;;  %v12002_v18 = vld [vmem:[%s12397_s26 + $0x14] sm:$0xf] }
  0x17   : > { %v10789_v19 = vld [vmem:[%s12397_s26 + $0x18] sm:$0xf0]  ;;  %v12128_v21 = vld [vmem:[%s18856_s28] sm:$0xff]  ;;  %v12001_v23 = vld [vmem:[%s12397_s26 + $0x4] sm:$0xf0] }
  0x18   : > { %v1528_v8 = vand.u32 %v1526_v7, %v1320_v6  ;;  %1531 = vmatpush.bf16.msra.mxu0 %v12134_v3  ;;  %12210 = vmatpush.bf16.msra.mxu2 %v12134_v3  ;;  %v10792_v20 = vor.u32 %v12002_v18, %v10789_v19  ;;  %v10779_v22 = vld [vmem:[%s12397_s26] sm:$0xf]  ;;  %v12004_v25 = vld [vmem:[%s12397_s26 + $0x24] sm:$0xf]  ;;  %v10797_v26 = vld [vmem:[%s12397_s26 + $0x28] sm:$0xf0] }
  0x19   : > { %v10780_v24 = vor.u32 %v12001_v23, %v10779_v22  ;;  %v10800_v27 = vor.u32 %v12004_v25, %v10797_v26  ;;  %v10787_v28 = vld [vmem:[%s12397_s26 + $0x10] sm:$0xf]  ;;  %v12003_v29 = vld [vmem:[%s12397_s26 + $0x14] sm:$0xf0]  ;;  %v12006_v31 = vld [vmem:[%s12397_s26 + $0x34] sm:$0xf] }
  0x1a   : > { %1865 = vmatpush.bf16.msra.mxu1 %v1528_v8  ;;  %v10788_v30 = vor.u32 %v12003_v29, %v10787_v28  ;;  %v10805_v32 = vld [vmem:[%s12397_s26 + $0x38] sm:$0xf0]  ;;  %v10795_v34 = vld [vmem:[%s12397_s26 + $0x20] sm:$0xf]  ;;  %v12005_v35 = vld [vmem:[%s12397_s26 + $0x24] sm:$0xf0] }
  0x1b   : > { %v10808_v33 = vor.u32 %v12006_v31, %v10805_v32  ;;  %v10796_v36 = vor.u32 %v12005_v35, %v10795_v34  ;;  %v12008_v37 = vld [vmem:[%s12397_s26 + $0x44] sm:$0xf]  ;;  %v10813_v38 = vld [vmem:[%s12397_s26 + $0x48] sm:$0xf0]  ;;  %v10803_v40 = vld [vmem:[%s12397_s26 + $0x30] sm:$0xf] }
  0x1c   : > { %1532 = vmatpush.bf16.msra.mxu0 %v12133_v9  ;;  %12211 = vmatpush.bf16.msra.mxu2 %v12133_v9  ;;  %v10816_v39 = vor.u32 %v12008_v37, %v10813_v38  ;;  %v12007_v41 = vld [vmem:[%s12397_s26 + $0x34] sm:$0xf0]  ;;  %v12010_v43 = vld [vmem:[%s12397_s26 + $0x54] sm:$0xf]  ;;  %v10821_v44 = vld [vmem:[%s12397_s26 + $0x58] sm:$0xf0] }
  0x1d   : > { %v10804_v42 = vor.u32 %v12007_v41, %v10803_v40  ;;  %v10824_v45 = vor.u32 %v12010_v43, %v10821_v44  ;;  %v10811_v46 = vld [vmem:[%s12397_s26 + $0x40] sm:$0xf]  ;;  %v12009_v47 = vld [vmem:[%s12397_s26 + $0x44] sm:$0xf0]  ;;  %v12012_v49 = vld [vmem:[%s12397_s26 + $0x64] sm:$0xf] }
  0x1e   : > { %1866 = vmatpush.bf16.msra.mxu1 %v12136_v10  ;;  %v10812_v48 = vor.u32 %v12009_v47, %v10811_v46  ;;  %v10829_v50 = vld [vmem:[%s12397_s26 + $0x68] sm:$0xf0]  ;;  %v10819_v52 = vld [vmem:[%s12397_s26 + $0x50] sm:$0xf]  ;;  %v12011_v53 = vld [vmem:[%s12397_s26 + $0x54] sm:$0xf0] }
  0x1f   : > { %v10832_v51 = vor.u32 %v12012_v49, %v10829_v50  ;;  %v10820_v54 = vor.u32 %v12011_v53, %v10819_v52  ;;  %v12014_v55 = vld [vmem:[%s12397_s26 + $0x74] sm:$0xf]  ;;  %v10837_v56 = vld [vmem:[%s12397_s26 + $0x78] sm:$0xf0]  ;;  %v10827_v58 = vld [vmem:[%s12397_s26 + $0x60] sm:$0xf] }
  0x20   : > { %1533 = vmatpush.bf16.msra.mxu0 %v12132_v14  ;;  %12212 = vmatpush.bf16.msra.mxu2 %v12132_v14  ;;  %v10840_v57 = vor.u32 %v12014_v55, %v10837_v56  ;;  %v12013_v59 = vld [vmem:[%s12397_s26 + $0x64] sm:$0xf0]  ;;  %v12016_v61 = vld [vmem:[%s12397_s26 + $0x84] sm:$0xf]  ;;  %v10845_v62 = vld [vmem:[%s12397_s26 + $0x88] sm:$0xf0] }
  0x21   : > { %11325 = vmatmul.msk.bf16.vlgmr.msra.gmra.mxu1 %vm18626_vm2, %v10784_v13  ;;  %v10828_v60 = vor.u32 %v12013_v59, %v10827_v58  ;;  %v10848_v63 = vor.u32 %v12016_v61, %v10845_v62  ;;  %v10835_v0 = vld [vmem:[%s12397_s26 + $0x70] sm:$0xf]  ;;  %v12015_v1 = vld [vmem:[%s12397_s26 + $0x74] sm:$0xf0]  ;;  %v12018_v5 = vld [vmem:[%s12397_s26 + $0x94] sm:$0xf] }
  0x22   : > { %v10836_v3 = vor.u32 %v12015_v1, %v10835_v0  ;;  %v10853_v6 = vld [vmem:[%s12397_s26 + $0x98] sm:$0xf0]  ;;  %v10843_v8 = vld [vmem:[%s12397_s26 + $0x80] sm:$0xf]  ;;  %v12017_v9 = vld [vmem:[%s12397_s26 + $0x84] sm:$0xf0] }
  0x23   : > { %v10856_v7 = vor.u32 %v12018_v5, %v10853_v6  ;;  %v10844_v11 = vor.u32 %v12017_v9, %v10843_v8  ;;  %v10851_v18 = vld [vmem:[%s12397_s26 + $0x90] sm:$0xf]  ;;  %v12019_v19 = vld [vmem:[%s12397_s26 + $0x94] sm:$0xf0]  ;;  %v12022_v25 = vld [vmem:[%s12397_s26 + $0xb4] sm:$0xf] }
  0x24   : > { %1534 = vmatpush.bf16.msra.mxu0 %v12131_v15  ;;  %12213 = vmatpush.bf16.msra.mxu2 %v12131_v15  ;;  %v12020_v15 = vld [vmem:[%s12397_s26 + $0xa4] sm:$0xf]  ;;  %v10869_v26 = vld [vmem:[%s12397_s26 + $0xb8] sm:$0xf0]  ;;  %v12475_v28 = vld [vmem:[%s18553_s2] ss:$0 sm:$0xff] }
  0x25   : > { %v10859_v29 = vld [vmem:[%s12397_s26 + $0xa0] sm:$0xf]  ;;  %v12021_v31 = vld [vmem:[%s12397_s26 + $0xa4] sm:$0xf0]  ;;  %v12024_v52 = vld [vmem:[%s12397_s26 + $0xc4] sm:$0xf] }
  0x26   : > { %v11275_v32 = vld [vmem:[%s12397_s26 + $0x3e0] sm:$0xf]  ;;  %v10860_v38 = vor.u32 %v12021_v31, %v10859_v29  ;;  %v10877_v53 = vld [vmem:[%s12397_s26 + $0xc8] sm:$0xf0]  ;;  %v11283_v61 = vld [vmem:[%s12397_s26 + $0x3f0] sm:$0xf] }
  0x27   : > { %v12485_v37 = vld [vmem:[%s18554_s3] ss:$0 sm:$0xff]  ;;  %v10880_v59 = vor.u32 %v12024_v52, %v10877_v53  ;;  %v12127_v62 = vld [vmem:[%s12397_s26 + $0x3f4] sm:$0xf0] }
  0x28   : > { %1535 = vmatpush.bf16.msra.mxu0 %v12130_v16  ;;  %12214 = vmatpush.bf16.msra.mxu2 %v12130_v16  ;;  %v10861_v16 = vld [vmem:[%s12397_s26 + $0xa8] sm:$0xf0] }
  0x2c   : > { %1536 = vmatpush.bf16.msra.mxu0 %v12129_v17  ;;  %12215 = vmatpush.bf16.msra.mxu2 %v12129_v17  ;;  %v10864_v17 = vor.u32 %v12020_v15, %v10861_v16 }
  0x30   : > { %1537 = vmatpush.bf16.msra.mxu0 %v12128_v21  ;;  %12216 = vmatpush.bf16.msra.mxu2 %v12128_v21  ;;  %v10852_v21 = vor.u32 %v12019_v19, %v10851_v18 }
  0x31   : > { %11326 = vmatmul.msk.bf16.gmra.mxu1 %vm18626_vm2, %v10792_v20 }
  0x33   : > { %1538 = vmatmul.bf16.vlgmr.msra.gmra.mxu0 %v10780_v24 }
  0x41   : > { %11327 = vmatmul.msk.bf16.gmra.mxu1 %vm18626_vm2, %v10800_v27 }
  0x43   : > { %1543 = vmatmul.bf16.gmra.mxu0 %v10788_v30  ;;  %v10872_v30 = vor.u32 %v12022_v25, %v10869_v26 }
  0x51   : > { %11328 = vmatmul.msk.bf16.gmra.mxu1 %vm18626_vm2, %v10808_v33  ;;  %v12125_v33 = vld [vmem:[%s12397_s26 + $0x3e4] sm:$0xf0] }
  0x52   : > { %v11276_v35 = vor.u32 %v12125_v33, %v11275_v32 }
  0x53   : > { %1548 = vmatmul.bf16.gmra.mxu0 %v10796_v36 }
  0x54   : > { %1848 = vmatmul.bf16.vlgmr.msra.gmra.mxu2 %v11276_v35  ;;  %v10885_v35 = vld [vmem:[%s12397_s26 + $0xd8] sm:$0xf0] }
  0x61   : > { %11329 = vmatmul.msk.bf16.gmra.mxu1 %vm18626_vm2, %v10816_v39 }
  0x63   : > { %1553 = vmatmul.bf16.gmra.mxu0 %v10804_v42 }
  0x71   : > { %11330 = vmatmul.msk.bf16.gmra.mxu1 %vm18626_vm2, %v10824_v45 }
  0x73   : > { %1558 = vmatmul.bf16.gmra.mxu0 %v10812_v48 }
  0x81   : > { %11331 = vmatmul.msk.bf16.gmra.mxu1 %vm18626_vm2, %v10832_v51 }
  0x83   : > { %1563 = vmatmul.bf16.gmra.mxu0 %v10820_v54 }
  0x91   : > { %11332 = vmatmul.msk.bf16.gmra.mxu1 %vm18626_vm2, %v10840_v57  ;;  %v10867_v57 = vld [vmem:[%s12397_s26 + $0xb0] sm:$0xf] }
  0x93   : > { %1568 = vmatmul.bf16.gmra.mxu0 %v10828_v60  ;;  %v12023_v60 = vld [vmem:[%s12397_s26 + $0xb4] sm:$0xf0] }
  0x9e   : > { %v1868_v2 = vpop.f32.mrf.mxu1 }
  0xa1   : > { %11333 = vmatmul.msk.bf16.gmra.mxu1 %vm18626_vm2, %v10848_v63 }
  0xa3   : > { %1573 = vmatmul.bf16.gmra.mxu0 %v10836_v3 }
  0xa6   : > { %v1870_v4 = vpop.f32.mrf.mxu1 }
  0xae   : > { %v1873_v10 = vpop.f32.mrf.mxu1 }
  0xb0   : > { %v1539_v12 = vpop.f32.mrf.mxu0 }
  0xb1   : > { %11334 = vmatmul.msk.bf16.gmra.mxu1 %vm18626_vm2, %v10856_v7  ;;  %v1869_v27 = vadd.f32 %v1868_v2, %v1539_v12  ;;  %v10868_v7 = vor.u32 %v12023_v60, %v10867_v57  ;;  %v12577_v57 = vld [vmem:[%s12397_s26 + $0xe4] sm:$0xf] }
  0xb3   : > { %1578 = vmatmul.bf16.gmra.mxu0 %v10844_v11  ;;  %v2192_v36 = vmul.f32 %v12475_v28, %v1869_v27  ;;  %v12138_v27 = vld [vmem:[%s18555_s4 + $0x8] sm:$0xff] }
  0xb4   : > { %6722 = vmatpush.bf16.msrb.mxu2 %v12138_v27 }
  0xb5   : > { %v2324_v41 = vadd.f32 %v12485_v37, %v2192_v36 }
  0xb6   : > { %v1875_v13 = vpop.f32.mrf.mxu1 }
  0xb7   : > { %v2452_v46 = vmax.f32 %v2324_v41, 0.0 }
  0xb8   : > { %v1541_v14 = vpop.f32.mrf.mxu0 }
  0xb9   : > { %v1871_v43 = vadd.f32 %v1870_v4, %v1541_v14  ;;  %v11284_v4 = vor.u32 %v12127_v62, %v11283_v61 }
  0xbb   : > { %v2193_v48 = vmul.f32 %v12475_v28, %v1871_v43  ;;  %1853 = vmatmul.bf16.gmra.mxu2 %v11284_v4  ;;  %v12025_v43 = vld [vmem:[%s12397_s26 + $0xc4] sm:$0xf0]  ;;  %v12586_v4 = vld [vmem:[%s12397_s26 + $0xe8] sm:$0xf0] }
  0xbd   : > { %v2325_v58 = vadd.f32 %v12485_v37, %v2193_v48 }
  0xbe   : > { %v1878_v20 = vpop.f32.mrf.mxu1 }
  0xbf   : > { %v2453_v8 = vmax.f32 %v2325_v58, 0.0 }
  0xc0   : > { %v1544_v22 = vpop.f32.mrf.mxu0 }
  0xc1   : > { %11335 = vmatmul.msk.bf16.gmra.mxu1 %vm18626_vm2, %v10864_v17  ;;  %v1874_v54 = vadd.f32 %v1873_v10, %v1544_v22 }
  0xc3   : > { %1583 = vmatmul.bf16.gmra.mxu0 %v10852_v21  ;;  %v2194_v5 = vmul.f32 %v12475_v28, %v1874_v54 }
  0xc5   : > { %v2326_v18 = vadd.f32 %v12485_v37, %v2194_v5 }
  0xc6   : > { %v1880_v23 = vpop.f32.mrf.mxu1 }
  0xc8   : > { %v1546_v24 = vpop.f32.mrf.mxu0 }
  0xc9   : > { %v1876_v2 = vadd.f32 %v1875_v13, %v1546_v24 }
  0xcb   : > { %v2195_v14 = vmul.f32 %v12475_v28, %v1876_v2 }
  0xcd   : > { %v2327_v24 = vadd.f32 %v12485_v37, %v2195_v14 }
  0xce   : > { %v1883_v34 = vpop.f32.mrf.mxu1 }
  0xcf   : > { %v2455_v48 = vmax.f32 %v2327_v24, 0.0 }
  0xd0   : > { %v1549_v39 = vpop.f32.mrf.mxu0 }
  0xd1   : > { %11336 = vmatmul.msk.bf16.gmra.mxu1 %vm18626_vm2, %v10872_v30  ;;  %v1879_v40 = vadd.f32 %v1878_v20, %v1549_v39  ;;  %v2454_v30 = vmax.f32 %v2326_v18, 0.0 }
  0xd3   : > { %v2196_v42 = vmul.f32 %v12475_v28, %v1879_v40  ;;  %1588 = vmatmul.bf16.gmra.mxu0 %v10860_v38 }
  0xd5   : > { %v12491_v44 = vadd.f32 %v12485_v37, %v2196_v42  ;;  %v10875_v42 = vld [vmem:[%s12397_s26 + $0xc0] sm:$0xf] }
  0xd6   : > { %v12493_v45 = vpop.f32.mrf.mxu1 }
  0xd7   : > { %v18573_v47 = vmax.f32 %v12491_v44, 0.0 }
  0xd8   : > { %v1551_v49 = vpop.f32.mrf.mxu0 }
  0xd9   : > { %v2580_v50 = vmax.f32 %v2452_v46, %v18573_v47  ;;  %v1881_v51 = vadd.f32 %v1880_v23, %v1551_v49  ;;  %v12137_v49 = vld [vmem:[%s18555_s4] sm:$0xff] }
  0xda   : > { %6723 = vmatpush.bf16.msrb.mxu2 %v12137_v49 }
  0xdb   : > { %v12501_v55 = vmax.f32 %v2580_v50, 0.0  ;;  %v2197_v56 = vmul.f32 %v12475_v28, %v1881_v51 }
  0xdd   : > { %v12510_v63 = vrot.slane %v12501_v55, 2  ;;  %v12513_v0 = vrot.slane %v12501_v55, 4  ;;  %v12518_v3 = vadd.f32 %v12485_v37, %v2197_v56  ;;  %v3156_v9 = vperm.slane %v12501_v55, 1 }
  0xde   : > { %v12515_v1 = vpop.f32.mrf.mxu1  ;;  %v12528_v15 = vrot.slane %v12501_v55, 6  ;;  %v11389_v39 = vrot.slane %v12501_v55, 9  ;;  %v10876_v56 = vor.u32 %v12025_v43, %v10875_v42 }
  0xdf   : > { %v3157_v6 = vperm.slane %v12510_v63, 1  ;;  %v18572_v10 = vmax.f32 %v12518_v3, 0.0  ;;  %v3158_v12 = vperm.slane %v12513_v0, 1  ;;  %v11390_v54 = vrot.slane %v12510_v63, 9 }
  0xe0   : > { %v1554_v11 = vpop.f32.mrf.mxu0  ;;  %v3159_v25 = vperm.slane %v12528_v15, 1 }
  0xe1   : > { %11337 = vmatmul.msk.bf16.gmra.mxu1 %vm18626_vm2, %v10880_v59  ;;  %v1884_v13 = vadd.f32 %v1883_v34, %v1554_v11  ;;  %v3397_v16 = vsel %vm18693_vm3, %v3157_v6, %v3156_v9  ;;  %v2581_v17 = vmax.f32 %v2453_v8, %v18572_v10  ;;  %v12026_v34 = vld [vmem:[%s12397_s26 + $0xd4] sm:$0xf]  ;;  %v12581_v59 = vmax.f32 %v12501_v55, %v11389_v39  ;;  %v12592_v6 = vld [vmem:[%s12397_s26 + $0xd0] sm:$0xf]  ;;  %v12598_v11 = vld [vmem:[%s12397_s26 + $0xd4] sm:$0xf0] }
  0xe2   : > { %v3399_v21 = vsel %vm18692_vm4, %v3158_v12, %v3397_v16  ;;  %v10888_v53 = vor.u32 %v12026_v34, %v10885_v35  ;;  %v11391_v8 = vrot.slane %v12513_v0, 9  ;;  %v11392_v9 = vrot.slane %v12528_v15, 9 }
  0xe3   : > { %v2198_v19 = vmul.f32 %v12475_v28, %v1884_v13  ;;  %1593 = vmatmul.bf16.gmra.mxu0 %v10868_v7  ;;  %v12535_v20 = vmax.f32 %v2581_v17, 0.0  ;;  %v3401_v38 = vsel %vm18673_vm5, %v3159_v25, %v3399_v21  ;;  %v10896_v25 = vor.u32 %v12577_v57, %v12586_v4 }
  0xe4   : > { %v4412_v27 = vmax.f32 %v12510_v63, %v11390_v54  ;;  %v4413_v35 = vmax.f32 %v12513_v0, %v11391_v8  ;;  %v4414_v39 = vmax.f32 %v12528_v15, %v11392_v9 }
  0xe5   : > { %v12539_v22 = vadd.f32 %v12485_v37, %v2198_v19  ;;  %v3160_v26 = vperm.slane %v12535_v20, 1  ;;  %v12550_v29 = vrot.slane %v12535_v20, 2  ;;  %v12554_v32 = vrot.slane %v12535_v20, 4 }
  0xe6   : > { %v12541_v23 = vpop.f32.mrf.mxu1  ;;  %v12571_v50 = vrot.slane %v12535_v20, 6  ;;  %v11393_v13 = vrot.slane %v12535_v20, 9 }
  0xe7   : > { %v18571_v31 = vmax.f32 %v12539_v22, 0.0  ;;  %v3161_v36 = vperm.slane %v12550_v29, 1  ;;  %v3403_v46 = vsel %vm18649_vm6, %v3160_v26, %v3401_v38  ;;  %v11394_v14 = vrot.slane %v12550_v29, 9 }
  0xe8   : > { %v1556_v33 = vpop.f32.mrf.mxu0  ;;  %v3163_v7 = vperm.slane %v12571_v50, 1  ;;  %v11395_v21 = vrot.slane %v12554_v32, 9  ;;  %v11396_v38 = vrot.slane %v12571_v50, 9 }
  0xe9   : > { %v2582_v40 = vmax.f32 %v2454_v30, %v18571_v31  ;;  %v1886_v41 = vadd.f32 %v12493_v45, %v1556_v33  ;;  %v3162_v45 = vperm.slane %v12554_v32, 1  ;;  %v3405_v58 = vsel %vm18647_vm7, %v3161_v36, %v3403_v46 }
  0xea   : > { %v10884_v33 = vor.u32 %v12598_v11, %v12592_v6  ;;  %v4416_v42 = vmax.f32 %v12550_v29, %v11394_v14  ;;  %v4417_v43 = vmax.f32 %v12554_v32, %v11395_v21 }
  0xeb   : > { %v2646_v51 = vmax.f32 %v2582_v40, 0.0  ;;  %v2199_v52 = vmul.f32 %v12475_v28, %v1886_v41  ;;  %v3407_v12 = vsel %vm18624_vm8, %v3162_v45, %v3405_v58  ;;  %v4415_v40 = vmax.f32 %v12535_v20, %v11393_v13 }
  0xec   : > { %v12616_v34 = vsel %vm18616_vm0, 0.0, %v3407_v12  ;;  %v4418_v58 = vmax.f32 %v12571_v50, %v11396_v38 }
  0xed   : > { %v2778_v60 = vrot.slane %v2646_v51, 2  ;;  %v2779_v61 = vrot.slane %v2646_v51, 4  ;;  %v3164_v62 = vperm.slane %v2646_v51, 1  ;;  %v12589_v5 = vadd.f32 %v12485_v37, %v2199_v52 }
  0xee   : > { %v12583_v2 = vpop.f32.mrf.mxu1  ;;  %v2780_v24 = vrot.slane %v2646_v51, 6  ;;  %v11397_v36 = vrot.slane %v2646_v51, 9  ;;  %v4683_v52 = vrot.slane %v12616_v34, 2  ;;  %v4684_v29 = vrot.slane %v12616_v34, 4 }
  0xef   : > { %v3165_v55 = vperm.slane %v2778_v60, 1  ;;  %v3166_v16 = vperm.slane %v2779_v61, 1  ;;  %v18570_v17 = vmax.f32 %v12589_v5, 0.0  ;;  %v3409_v19 = vsel %vm18621_vm9, %v3164_v62, %v3163_v7 }
  0xf0   : > { %v1559_v18 = vpop.f32.mrf.mxu0  ;;  %v3167_v46 = vperm.slane %v2780_v24, 1  ;;  %v11399_v0 = vrot.slane %v2779_v61, 9  ;;  %v11400_v15 = vrot.slane %v2780_v24, 9  ;;  %v4685_v9 = vrot.slane %v12616_v34, 6 }
  0xf1   : > { %11338 = vmatmul.msk.bf16.gmra.mxu1 %vm18626_vm2, %v10888_v53  ;;  %v3410_v26 = vsel %vm18693_vm3, %v3165_v55, %v3409_v19  ;;  %v2583_v30 = vmax.f32 %v2455_v48, %v18570_v17  ;;  %v11398_v48 = vrot.slane %v2778_v60, 9  ;;  %v12636_v55 = vadd.f32 %v12515_v1, %v1559_v18 }
  0xf2   : > { %v3411_v41 = vsel %vm18692_vm4, %v3166_v16, %v3410_v26  ;;  %v4421_v13 = vmax.f32 %v2779_v61, %v11399_v0  ;;  %v4422_v16 = vmax.f32 %v2780_v24, %v11400_v15  ;;  %v4780_v19 = vrot.slane %v4683_v52, 1 }
  0xf3   : > { %1598 = vmatmul.bf16.gmra.mxu0 %v10876_v56  ;;  %v2647_v63 = vmax.f32 %v2583_v30, 0.0  ;;  %v4419_v56 = vmax.f32 %v2646_v51, %v11397_v36  ;;  %v3412_v20 = vsel %vm18673_vm5, %v3167_v46, %v3411_v41  ;;  %v4420_v12 = vmax.f32 %v2778_v60, %v11398_v48 }
  0xf4   : > { %v4779_v51 = vrot.slane %v12616_v34, 1  ;;  %v4781_v36 = vrot.slane %v4684_v29, 1  ;;  %v4782_v46 = vrot.slane %v4685_v9, 1  ;;  %v5163_v18 = vmax.f32 %v12581_v59, %v12616_v34 }
  0xf5   : > { %v3168_v53 = vperm.slane %v2647_v63, 1  ;;  %v2781_v45 = vrot.slane %v2647_v63, 2  ;;  %v2782_v54 = vrot.slane %v2647_v63, 4  ;;  %v2783_v14 = vrot.slane %v2647_v63, 6 }
  0xf6   : > { %v12625_v49 = vpop.f32.mrf.mxu1  ;;  %v11401_v26 = vrot.slane %v2647_v63, 9  ;;  %v5164_v48 = vmax.f32 %v4412_v27, %v4779_v51  ;;  %v5165_v15 = vmax.f32 %v4413_v35, %v4683_v52  ;;  %v5168_v31 = vmax.f32 %v4416_v42, %v4781_v36 }
  0xf7   : > { %v3169_v32 = vperm.slane %v2781_v45, 1  ;;  %v3170_v7 = vperm.slane %v2782_v54, 1  ;;  %v3413_v8 = vsel %vm18649_vm6, %v3168_v53, %v3412_v20  ;;  %v11402_v30 = vrot.slane %v2781_v45, 9 }
  0xf8   : > { %v12631_v62 = vpop.f32.mrf.mxu0  ;;  %v11403_v60 = vrot.slane %v2782_v54, 9  ;;  %v11404_v0 = vrot.slane %v2783_v14, 9  ;;  %v5166_v20 = vmax.f32 %v4414_v39, %v4780_v19  ;;  %v5169_v51 = vmax.f32 %v4417_v43, %v4685_v9 }
  0xf9   : > { %v3414_v50 = vsel %vm18647_vm7, %v3169_v32, %v3413_v8  ;;  %v4423_v32 = vmax.f32 %v2647_v63, %v11401_v26  ;;  %v5420_v35 = vpack.c.bf16 %v5164_v48, %v5164_v48  ;;  %v5421_v52 = vpack.c.bf16 %v5165_v15, %v5165_v15 }
  0xfa   : > { %v3415_v21 = vsel %vm18624_vm8, %v3170_v7, %v3414_v50  ;;  %v4424_v7 = vmax.f32 %v2781_v45, %v11402_v30  ;;  %v5167_v50 = vmax.f32 %v4415_v40, %v4684_v29  ;;  %v4425_v27 = vmax.f32 %v2782_v54, %v11403_v60 }
  0xfb   : > { %v4686_v38 = vrot.slane %v3415_v21, 2  ;;  %v4687_v41 = vrot.slane %v3415_v21, 4  ;;  %v4783_v53 = vrot.slane %v3415_v21, 1  ;;  %v4688_v61 = vrot.slane %v3415_v21, 6 }
  0xfc   : > { %v4426_v39 = vmax.f32 %v2783_v14, %v11404_v0  ;;  %v5171_v63 = vmax.f32 %v4419_v56, %v3415_v21  ;;  %v5422_v45 = vpack.c.bf16 %v5166_v20, %v5166_v20  ;;  %v5170_v57 = vmax.f32 %v4418_v58, %v4782_v46 }
  0xfd   : > { %v4784_v24 = vrot.slane %v4686_v38, 1  ;;  %v4785_v8 = vrot.slane %v4687_v41, 1  ;;  %v5172_v10 = vmax.f32 %v4420_v12, %v4783_v53  ;;  %v5173_v47 = vmax.f32 %v4421_v13, %v4686_v38 }
  0xfe   : > { %v12641_v1 = vpop.f32.mrf.mxu1  ;;  %v4786_v34 = vrot.slane %v4688_v61, 1  ;;  %v5175_v4 = vmax.f32 %v4423_v32, %v4687_v41  ;;  %v5423_v40 = vpack.c.bf16 %v5167_v50, %v5167_v50  ;;  %v5177_v42 = vmax.f32 %v4425_v27, %v4688_v61  ;;  %v12030_v32 = vld [vmem:[%s12397_s26 + $0xf4] sm:$0xf]  ;;  %v10901_v27 = vld [vmem:[%s12397_s26 + $0xf8] sm:$0xf0] }
  0xff   : > { %v5174_v59 = vmax.f32 %v4422_v16, %v4784_v24  ;;  %v5428_v29 = vpack.c.bf16 %v5172_v10, %v5172_v10  ;;  %v5429_v12 = vpack.c.bf16 %v5173_v47, %v5173_v47  ;;  %v5419_v9 = vpack.c.bf16 %v5163_v18, %v5163_v18 }
 0x100   : > { %v12649_v17 = vpop.f32.mrf.mxu0  ;;  %v5178_v43 = vmax.f32 %v4426_v39, %v4786_v34  ;;  %v5424_v14 = vpack.c.bf16 %v5168_v31, %v5168_v31  ;;  %v5936_v56 = vunpack.c.l.b16 %v5420_v35  ;;  %v5425_v16 = vpack.c.bf16 %v5169_v51, %v5169_v51 }
 0x101   : > { %11339 = vmatmul.msk.bf16.gmra.mxu1 %vm18626_vm2, %v10896_v25  ;;  %v5176_v25 = vmax.f32 %v4424_v7, %v4785_v8  ;;  %v5430_v13 = vpack.c.bf16 %v5174_v59, %v5174_v59  ;;  %v5427_v19 = vpack.c.bf16 %v5171_v63, %v5171_v63  ;;  %v5937_v21 = vunpack.c.l.b16 %v5421_v52  ;;  %v10891_v52 = vld [vmem:[%s12397_s26 + $0xe0] sm:$0xf] }
 0x102   : > { %v5938_v26 = vunpack.c.l.b16 %v5422_v45  ;;  %v5426_v6 = vpack.c.bf16 %v5170_v57, %v5170_v57  ;;  %v5431_v11 = vpack.c.bf16 %v5175_v4, %v5175_v4  ;;  %v5939_v58 = vunpack.c.l.b16 %v5423_v40  ;;  %v12029_v45 = vld [vmem:[%s12397_s26 + $0xe4] sm:$0xf0] }
 0x103   : > { %1603 = vmatmul.bf16.gmra.mxu0 %v10884_v33  ;;  %v5432_v33 = vpack.c.bf16 %v5176_v25, %v5176_v25  ;;  %v5433_v36 = vpack.c.bf16 %v5177_v42, %v5177_v42  ;;  %v5944_v47 = vunpack.c.l.b16 %v5428_v29  ;;  %v5945_v10 = vunpack.c.l.b16 %v5429_v12 }
 0x104   : > { %v5946_v38 = vunpack.c.l.b16 %v5430_v13  ;;  %v5434_v41 = vpack.c.bf16 %v5178_v43, %v5178_v43  ;;  %v5935_v46 = vunpack.c.l.b16 %v5419_v9  ;;  %v5940_v31 = vunpack.c.l.b16 %v5424_v14 }
 0x105   : > { %v6191_v53 = vrot.slane %v5936_v56, 7  ;;  %v5941_v60 = vunpack.c.l.b16 %v5425_v16  ;;  %v5943_v61 = vunpack.c.l.b16 %v5427_v19  ;;  %v6193_v18 = vrot.slane %v5937_v21, 6 }
 0x106   : > { %v12654_v54 = vpop.f32.mrf.mxu1  ;;  %v6195_v48 = vrot.slane %v5938_v26, 5  ;;  %v5947_v0 = vunpack.c.l.b16 %v5431_v11  ;;  %v5948_v24 = vunpack.c.l.b16 %v5432_v33  ;;  %v6197_v20 = vrot.slane %v5939_v58, 4 }
 0x107   : > { %v6192_v15 = vsel %vm18621_vm9, %v6191_v53, %v5935_v46  ;;  %v6205_v8 = vrot.slane %v5944_v47, 7  ;;  %v6207_v50 = vrot.slane %v5945_v10, 6  ;;  %v6209_v59 = vrot.slane %v5946_v38, 5 }
 0x108   : > { %v12656_v30 = vpop.f32.mrf.mxu0  ;;  %v6194_v7 = vsel %vm18693_vm3, %v6193_v18, %v6192_v15  ;;  %v2200_v34 = vmul.f32 %v12475_v28, %v12636_v55  ;;  %v5949_v35 = vunpack.c.l.b16 %v5433_v36  ;;  %v6199_v63 = vrot.slane %v5940_v31, 3 }
 0x109   : > { %v6196_v39 = vsel %vm18692_vm4, %v6195_v48, %v6194_v7  ;;  %v5942_v57 = vunpack.c.l.b16 %v5426_v6  ;;  %v5950_v4 = vunpack.c.l.b16 %v5434_v41  ;;  %v6206_v40 = vsel %vm18621_vm9, %v6205_v8, %v5943_v61  ;;  %v10899_v8 = vld [vmem:[%s12397_s26 + $0xf0] sm:$0xf] }
 0x10a   : > { %v6198_v25 = vsel %vm18673_vm5, %v6197_v20, %v6196_v39  ;;  %v6201_v29 = vrot.slane %v5941_v60, 2  ;;  %v6208_v12 = vsel %vm18693_vm3, %v6207_v50, %v6206_v40  ;;  %v6211_v55 = vrot.slane %v5947_v0, 4  ;;  %v12032_v20 = vld [vmem:[%s12397_s26 + $0x104] sm:$0xf]  ;;  %v12031_v50 = vld [vmem:[%s12397_s26 + $0xf4] sm:$0xf0] }
 0x10b   : > { %v6200_v42 = vsel %vm18649_vm6, %v6199_v63, %v6198_v25  ;;  %v6210_v13 = vsel %vm18692_vm4, %v6209_v59, %v6208_v12  ;;  %v6213_v43 = vrot.slane %v5948_v24, 3  ;;  %v10904_v9 = vor.u32 %v12030_v32, %v10901_v27  ;;  %v10909_v32 = vld [vmem:[%s12397_s26 + $0x108] sm:$0xf0] }
 0x10c   : > { %v10892_v56 = vor.u32 %v12029_v45, %v10891_v52  ;;  %v6202_v16 = vsel %vm18647_vm7, %v6201_v29, %v6200_v42  ;;  %v6212_v19 = vsel %vm18673_vm5, %v6211_v55, %v6210_v13  ;;  %v6215_v21 = vrot.slane %v5949_v35, 2 }
 0x10d   : > { %v6203_v6 = vrot.slane %v5942_v57, 1  ;;  %v6214_v11 = vsel %vm18649_vm6, %v6213_v43, %v6212_v19  ;;  %v6217_v33 = vrot.slane %v5950_v4, 1  ;;  %v2332_v58 = vadd.f32 %v12485_v37, %v2200_v34 }
 0x10e   : > { %v12664_v51 = vpop.f32.mrf.mxu1  ;;  %v6216_v36 = vsel %vm18647_vm7, %v6215_v21, %v6214_v11  ;;  %v1891_v10 = vadd.f32 %v12541_v23, %v12631_v62  ;;  %v1894_v48 = vadd.f32 %v12583_v2, %v12649_v17  ;;  %v18859_v0 = vmax.f32 %v12491_v44, 0.0  ;;  %v12034_v11 = vld [vmem:[%s12397_s26 + $0x114] sm:$0xf] }
 0x10f   : > { %v6204_v38 = vsel %vm18624_vm8, %v6203_v6, %v6202_v16  ;;  %v2460_v53 = vmax.f32 %v2332_v58, 0.0  ;;  %v1896_v44 = vadd.f32 %v12625_v49, %v12656_v30  ;;  %v10912_v17 = vor.u32 %v12032_v20, %v10909_v32 }
 0x110   : > { %v1569_v14 = vpop.f32.mrf.mxu0  ;;  %v2201_v62 = vmul.f32 %v12475_v28, %v1891_v10  ;;  %v2202_v34 = vmul.f32 %v12475_v28, %v1894_v48  ;;  %v10900_v39 = vor.u32 %v12031_v50, %v10899_v8 }
 0x111   : > { %v1899_v26 = vadd.f32 %v12641_v1, %v1569_v14  ;;  %11340 = vmatmul.msk.bf16.gmra.mxu1 %vm18626_vm2, %v10904_v9  ;;  %v6218_v1 = vsel %vm18624_vm8, %v6217_v33, %v6216_v36  ;;  %v2203_v49 = vmul.f32 %v12475_v28, %v1896_v44  ;;  %v10917_v33 = vld [vmem:[%s12397_s26 + $0x118] sm:$0xf0] }
 0x112   : > { %v12686_v41 = vpack.c.b16 %v6218_v1, %v6204_v38  ;;  %v2333_v7 = vadd.f32 %v12485_v37, %v2201_v62  ;;  %v2334_v29 = vadd.f32 %v12485_v37, %v2202_v34  ;;  %v10907_v38 = vld [vmem:[%s12397_s26 + $0x100] sm:$0xf]  ;;  %v12033_v1 = vld [vmem:[%s12397_s26 + $0x104] sm:$0xf0] }
 0x113   : > { %v2204_v47 = vmul.f32 %v12475_v28, %v1899_v26  ;;  %1608 = vmatmul.bf16.gmra.mxu0 %v10892_v56  ;;  %v2335_v14 = vadd.f32 %v12485_v37, %v2203_v49  ;;  %v10908_v32 = vor.u32 %v12033_v1, %v10907_v38  ;;  %v12791_v49 = vld [vmem:[%s12397_s26 + $0x110] sm:$0xf]  ;;  %v18862_v38 = vmax.f32 %v12589_v5, 0.0 }
 0x114   : > { %18858 = vst [vmem:[#allocation4_spill] sm:$0xff] %v12686_v41  ;;  %11653 = vmatmul.msk.bf16.vlgmr.msrb.gmra.mxu2 %vm18623_vm10, %v12686_v41  ;;  %v2461_v63 = vmax.f32 %v2333_v7, 0.0 }
 0x115   : > { %v12689_v46 = vadd.f32 %v12485_v37, %v2204_v47 }
 0x116   : > { %v1905_v31 = vpop.f32.mrf.mxu1 }
 0x117   : > { %v18577_v23 = vmax.f32 %v12689_v46, 0.0 }
 0x118   : > { %v1571_v60 = vpop.f32.mrf.mxu0 }
 0x119   : > { %v2584_v61 = vmax.f32 %v2460_v53, %v18577_v23  ;;  %v1901_v18 = vadd.f32 %v12654_v54, %v1571_v60  ;;  %v2463_v60 = vmax.f32 %v2335_v14, 0.0 }
 0x11b   : > { %v12702_v24 = vmax.f32 %v2584_v61, %v18859_v0  ;;  %v2205_v15 = vmul.f32 %v12475_v28, %v1901_v18  ;;  %v18861_v18 = vmax.f32 %v12539_v22, 0.0 }
 0x11d   : > { %v12711_v59 = vrot.slane %v12702_v24, 2  ;;  %v12714_v54 = vrot.slane %v12702_v24, 4  ;;  %v12721_v2 = vadd.f32 %v12485_v37, %v2205_v15  ;;  %v3171_v52 = vperm.slane %v12702_v24, 1 }
 0x11e   : > { %v12716_v27 = vpop.f32.mrf.mxu1  ;;  %v12735_v42 = vrot.slane %v12702_v24, 6  ;;  %v11405_v61 = vrot.slane %v12702_v24, 9  ;;  %v10920_v15 = vor.u32 %v12034_v11, %v10917_v33 }
 0x11f   : > { %v3172_v35 = vperm.slane %v12711_v59, 1  ;;  %v18576_v45 = vmax.f32 %v12721_v2, 0.0  ;;  %v3173_v4 = vperm.slane %v12714_v54, 1  ;;  %v11406_v8 = vrot.slane %v12711_v59, 9 }
 0x120   : > { %v1574_v57 = vpop.f32.mrf.mxu0  ;;  %v3174_v19 = vperm.slane %v12735_v42, 1  ;;  %v11407_v50 = vrot.slane %v12714_v54, 9 }
 0x121   : > { %v1904_v25 = vadd.f32 %v12664_v51, %v1574_v57  ;;  %v3416_v30 = vsel %vm18693_vm3, %v3172_v35, %v3171_v52  ;;  %v2585_v40 = vmax.f32 %v2461_v63, %v18576_v45  ;;  %11341 = vmatmul.msk.bf16.gmra.mxu1 %vm18626_vm2, %v10912_v17  ;;  %v18860_v51 = vmax.f32 %v12518_v3, 0.0  ;;  %v12779_v35 = vld [vmem:[%s12397_s26 + $0x128] sm:$0xf0] }
 0x122   : > { %v3417_v9 = vsel %vm18692_vm4, %v3173_v4, %v3416_v30  ;;  %v2462_v3 = vmax.f32 %v2334_v29, 0.0  ;;  %v11408_v52 = vrot.slane %v12735_v42, 9  ;;  %v12788_v4 = vmax.f32 %v12702_v24, %v11405_v61  ;;  %v12794_v30 = vld [vmem:[%s12397_s26 + $0x114] sm:$0xf0] }
 0x123   : > { %v2206_v12 = vmul.f32 %v12475_v28, %v1904_v25  ;;  %1613 = vmatmul.bf16.gmra.mxu0 %v10900_v39  ;;  %v12741_v55 = vmax.f32 %v2585_v40, %v18860_v51  ;;  %v3418_v36 = vsel %vm18673_vm5, %v3174_v19, %v3417_v9 }
 0x125   : > { %v12744_v13 = vadd.f32 %v12485_v37, %v2206_v12  ;;  %v3175_v56 = vperm.slane %v12741_v55, 1  ;;  %v2787_v16 = vrot.slane %v12741_v55, 2  ;;  %v2788_v26 = vrot.slane %v12741_v55, 4 }
 0x126   : > { %v12746_v43 = vpop.f32.mrf.mxu1  ;;  %v12763_v53 = vrot.slane %v12741_v55, 6  ;;  %v11409_v57 = vrot.slane %v12741_v55, 9 }
 0x127   : > { %v18575_v21 = vmax.f32 %v12744_v13, 0.0  ;;  %v3176_v58 = vperm.slane %v2787_v16, 1  ;;  %v3419_v62 = vsel %vm18649_vm6, %v3175_v56, %v3418_v36  ;;  %v3177_v20 = vperm.slane %v2788_v26, 1 }
 0x128   : > { %v1576_v6 = vpop.f32.mrf.mxu0  ;;  %v3178_v39 = vperm.slane %v12763_v53, 1  ;;  %v11410_v12 = vrot.slane %v2787_v16, 9  ;;  %v11411_v56 = vrot.slane %v2788_v26, 9  ;;  %v4430_v36 = vmax.f32 %v12735_v42, %v11408_v52 }
 0x129   : > { %v2586_v47 = vmax.f32 %v2462_v3, %v18575_v21  ;;  %v1906_v10 = vadd.f32 %v1905_v31, %v1576_v6  ;;  %v12771_v31 = vld [vmem:[%s12397_s26 + $0x124] sm:$0xf]  ;;  %v3420_v7 = vsel %vm18647_vm7, %v3176_v58, %v3419_v62  ;;  %v4428_v3 = vmax.f32 %v12711_v59, %v11406_v8 }
 0x12a   : > { %v3421_v40 = vsel %vm18624_vm8, %v3177_v20, %v3420_v7  ;;  %v4429_v6 = vmax.f32 %v12714_v54, %v11407_v50  ;;  %v4431_v59 = vmax.f32 %v12741_v55, %v11409_v57  ;;  %v4432_v54 = vmax.f32 %v2787_v16, %v11410_v12 }
 0x12b   : > { %v2650_v48 = vmax.f32 %v2586_v47, %v18861_v18  ;;  %v2207_v0 = vmul.f32 %v12475_v28, %v1906_v10  ;;  %v12810_v58 = vsel %vm18616_vm0, 0.0, %v3421_v40  ;;  %v11412_v10 = vrot.slane %v12763_v53, 9 }
 0x12c   : > { %v4433_v61 = vmax.f32 %v2788_v26, %v11411_v56  ;;  %v4689_v42 = vrot.slane %v12810_v58, 2  ;;  %v4787_v12 = vrot.slane %v12810_v58, 1 }
 0x12d   : > { %v2790_v44 = vrot.slane %v2650_v48, 2  ;;  %v2791_v17 = vrot.slane %v2650_v48, 4  ;;  %v3179_v34 = vperm.slane %v2650_v48, 1  ;;  %v12783_v63 = vadd.f32 %v12485_v37, %v2207_v0 }
 0x12e   : > { %v12776_v22 = vpop.f32.mrf.mxu1  ;;  %v2792_v24 = vrot.slane %v2650_v48, 6  ;;  %v11413_v47 = vrot.slane %v2650_v48, 9  ;;  %v4434_v5 = vmax.f32 %v12763_v53, %v11412_v10 }
 0x12f   : > { %v3180_v25 = vperm.slane %v2790_v44, 1  ;;  %v3422_v29 = vsel %vm18621_vm9, %v3179_v34, %v3178_v39  ;;  %v3181_v51 = vperm.slane %v2791_v17, 1  ;;  %v18574_v37 = vmax.f32 %v12783_v63, 0.0 }
 0x130   : > { %v1579_v9 = vpop.f32.mrf.mxu0  ;;  %v3182_v0 = vperm.slane %v2792_v24, 1  ;;  %v11416_v20 = vrot.slane %v2792_v24, 9  ;;  %v4435_v50 = vmax.f32 %v2650_v48, %v11413_v47  ;;  %v4690_v34 = vrot.slane %v12810_v58, 4 }
 0x131   : > { %v3423_v19 = vsel %vm18693_vm3, %v3180_v25, %v3422_v29  ;;  %v2587_v11 = vmax.f32 %v2463_v60, %v18574_v37  ;;  %11342 = vmatmul.msk.bf16.gmra.mxu1 %vm18626_vm2, %v10920_v15  ;;  %v11414_v60 = vrot.slane %v2790_v44, 9  ;;  %v11415_v15 = vrot.slane %v2791_v17, 9 }
 0x132   : > { %v3424_v62 = vsel %vm18692_vm4, %v3181_v51, %v3423_v19  ;;  %v1909_v7 = vadd.f32 %v12716_v27, %v1579_v9  ;;  %v4438_v29 = vmax.f32 %v2792_v24, %v11416_v20  ;;  %v4691_v27 = vrot.slane %v12810_v58, 6 }
 0x133   : > { %1618 = vmatmul.bf16.gmra.mxu0 %v10908_v32  ;;  %v2651_v1 = vmax.f32 %v2587_v11, %v18862_v38  ;;  %v3425_v16 = vsel %vm18673_vm5, %v3182_v0, %v3424_v62  ;;  %v4436_v25 = vmax.f32 %v2790_v44, %v11414_v60  ;;  %v4437_v40 = vmax.f32 %v2791_v17, %v11415_v15 }
 0x134   : > { %v12831_v51 = vmul.f32 %v12475_v28, %v1909_v7  ;;  %v4788_v9 = vrot.slane %v4689_v42, 1  ;;  %v4789_v47 = vrot.slane %v4690_v34, 1  ;;  %v5179_v24 = vmax.f32 %v12788_v4, %v12810_v58 }
 0x135   : > { %v3183_v32 = vperm.slane %v2651_v1, 1  ;;  %v2793_v8 = vrot.slane %v2651_v1, 2  ;;  %v2794_v55 = vrot.slane %v2651_v1, 4  ;;  %v2795_v53 = vrot.slane %v2651_v1, 6 }
 0x136   : > { %v12818_v18 = vpop.f32.mrf.mxu1  ;;  %v11417_v19 = vrot.slane %v2651_v1, 9  ;;  %v4790_v60 = vrot.slane %v4691_v27, 1  ;;  %v5180_v0 = vmax.f32 %v4428_v3, %v4787_v12  ;;  %v5182_v7 = vmax.f32 %v4430_v36, %v4788_v9 }
 0x137   : > { %v3184_v39 = vperm.slane %v2793_v8, 1  ;;  %v3185_v52 = vperm.slane %v2794_v55, 1  ;;  %v3426_v57 = vsel %vm18649_vm6, %v3183_v32, %v3425_v16  ;;  %v11418_v11 = vrot.slane %v2793_v8, 9 }
 0x138   : > { %v12825_v26 = vpop.f32.mrf.mxu0  ;;  %v11419_v62 = vrot.slane %v2794_v55, 9  ;;  %v11420_v15 = vrot.slane %v2795_v53, 9  ;;  %v5181_v32 = vmax.f32 %v4429_v6, %v4689_v42  ;;  %v4439_v16 = vmax.f32 %v2651_v1, %v11417_v19 }
 0x139   : > { %v3427_v48 = vsel %vm18647_vm7, %v3184_v39, %v3426_v57  ;;  %v4440_v39 = vmax.f32 %v2793_v8, %v11418_v11  ;;  %v5183_v57 = vmax.f32 %v4431_v59, %v4690_v34  ;;  %v5184_v37 = vmax.f32 %v4432_v54, %v4789_v47 }
 0x13a   : > { %v3428_v56 = vsel %vm18624_vm8, %v3185_v52, %v3427_v48  ;;  %v4441_v58 = vmax.f32 %v2794_v55, %v11419_v62  ;;  %v5185_v33 = vmax.f32 %v4433_v61, %v4691_v27  ;;  %v5436_v14 = vpack.c.bf16 %v5180_v0, %v5180_v0 }
 0x13b   : > { %v4692_v10 = vrot.slane %v3428_v56, 2  ;;  %v4693_v44 = vrot.slane %v3428_v56, 4  ;;  %v4791_v17 = vrot.slane %v3428_v56, 1  ;;  %v4694_v28 = vrot.slane %v3428_v56, 6 }
 0x13c   : > { %v18863_v3 = vor.u32 %v12771_v31, %v12779_v35  ;;  %v4442_v6 = vmax.f32 %v2795_v53, %v11420_v15  ;;  %v5187_v36 = vmax.f32 %v4435_v50, %v3428_v56  ;;  %v5437_v1 = vpack.c.bf16 %v5181_v32, %v5181_v32  ;;  %v12038_v32 = vld [vmem:[%s12397_s26 + $0x134] sm:$0xf] }
 0x13d   : > { %v4792_v20 = vrot.slane %v4692_v10, 1  ;;  %v4793_v52 = vrot.slane %v4693_v44, 1  ;;  %v5188_v21 = vmax.f32 %v4436_v25, %v4791_v17  ;;  %v5189_v45 = vmax.f32 %v4437_v40, %v4692_v10 }
 0x13e   : > { %v12837_v38 = vpop.f32.mrf.mxu1  ;;  %v4794_v23 = vrot.slane %v4694_v28, 1  ;;  %v5438_v42 = vpack.c.bf16 %v5182_v7, %v5182_v7  ;;  %v18864_v59 = vor.u32 %v12794_v30, %v12791_v49  ;;  %v5186_v54 = vmax.f32 %v4434_v5, %v4790_v60 }
 0x13f   : > { %v5190_v4 = vmax.f32 %v4438_v29, %v4792_v20  ;;  %v5191_v8 = vmax.f32 %v4439_v16, %v4693_v44  ;;  %v5192_v34 = vmax.f32 %v4440_v39, %v4793_v52  ;;  %v5439_v55 = vpack.c.bf16 %v5183_v57, %v5183_v57  ;;  %v10933_v57 = vld [vmem:[%s12397_s26 + $0x138] sm:$0xf0] }
 0x140   : > { %v12839_v48 = vpop.f32.mrf.mxu0  ;;  %v5193_v25 = vmax.f32 %v4441_v58, %v4694_v28  ;;  %v5444_v61 = vpack.c.bf16 %v5188_v21, %v5188_v21  ;;  %v5445_v40 = vpack.c.bf16 %v5189_v45, %v5189_v45  ;;  %v5194_v31 = vmax.f32 %v4442_v6, %v4794_v23 }
 0x141   : > { %11343 = vmatmul.msk.bf16.gmra.mxu1 %vm18626_vm2, %v18863_v3  ;;  %v5446_v29 = vpack.c.bf16 %v5190_v4, %v5190_v4  ;;  %v5435_v35 = vpack.c.bf16 %v5179_v24, %v5179_v24  ;;  %v5440_v12 = vpack.c.bf16 %v5184_v37, %v5184_v37  ;;  %v5952_v50 = vunpack.c.l.b16 %v5436_v14 }
 0x142   : > { %v5441_v53 = vpack.c.bf16 %v5185_v33, %v5185_v33  ;;  %v5443_v9 = vpack.c.bf16 %v5187_v36, %v5187_v36  ;;  %v5953_v56 = vunpack.c.l.b16 %v5437_v1  ;;  %v5954_v19 = vunpack.c.l.b16 %v5438_v42  ;;  %v10923_v1 = vld [vmem:[%s12397_s26 + $0x120] sm:$0xf]  ;;  %v12037_v42 = vld [vmem:[%s12397_s26 + $0x124] sm:$0xf0] }
 0x143   : > { %1623 = vmatmul.bf16.gmra.mxu0 %v18864_v59  ;;  %v5442_v49 = vpack.c.bf16 %v5186_v54, %v5186_v54  ;;  %v5447_v30 = vpack.c.bf16 %v5191_v8, %v5191_v8  ;;  %v5448_v5 = vpack.c.bf16 %v5192_v34, %v5192_v34  ;;  %v5955_v11 = vunpack.c.l.b16 %v5439_v55 }
 0x144   : > { %v5449_v10 = vpack.c.bf16 %v5193_v25, %v5193_v25  ;;  %v5960_v45 = vunpack.c.l.b16 %v5444_v61  ;;  %v5961_v21 = vunpack.c.l.b16 %v5445_v40  ;;  %v5962_v44 = vunpack.c.l.b16 %v5446_v29 }
 0x145   : > { %v5450_v17 = vpack.c.bf16 %v5194_v31, %v5194_v31  ;;  %v5951_v23 = vunpack.c.l.b16 %v5435_v35  ;;  %v5956_v37 = vunpack.c.l.b16 %v5440_v12  ;;  %v6219_v14 = vrot.slane %v5952_v50, 7 }
 0x146   : > { %v12848_v27 = vpop.f32.mrf.mxu1  ;;  %v5957_v33 = vunpack.c.l.b16 %v5441_v53  ;;  %v5959_v24 = vunpack.c.l.b16 %v5443_v9  ;;  %v6221_v62 = vrot.slane %v5953_v56, 6  ;;  %v6223_v28 = vrot.slane %v5954_v19, 5 }
 0x147   : > { %v5963_v60 = vunpack.c.l.b16 %v5447_v30  ;;  %v5964_v0 = vunpack.c.l.b16 %v5448_v5  ;;  %v6220_v15 = vsel %vm18621_vm9, %v6219_v14, %v5951_v23  ;;  %v6225_v20 = vrot.slane %v5955_v11, 4  ;;  %v12874_v5 = vld [vmem:[%s18554_s3] ss:$0 sm:$0xff] }
 0x148   : > { %v12850_v47 = vpop.f32.mrf.mxu0  ;;  %v6222_v7 = vsel %vm18693_vm3, %v6221_v62, %v6220_v15  ;;  %v6233_v16 = vrot.slane %v5960_v45, 7  ;;  %v6235_v39 = vrot.slane %v5961_v21, 6  ;;  %v6237_v52 = vrot.slane %v5962_v44, 5 }
 0x149   : > { %v5958_v58 = vunpack.c.l.b16 %v5442_v49  ;;  %v5965_v3 = vunpack.c.l.b16 %v5449_v10  ;;  %v6224_v6 = vsel %vm18692_vm4, %v6223_v28, %v6222_v7  ;;  %v6227_v36 = vrot.slane %v5956_v37, 3 }
 0x14a   : > { %v5966_v59 = vunpack.c.l.b16 %v5450_v17  ;;  %v6226_v54 = vsel %vm18673_vm5, %v6225_v20, %v6224_v6  ;;  %v6229_v8 = vrot.slane %v5957_v33, 2  ;;  %v6234_v34 = vsel %vm18621_vm9, %v6233_v16, %v5959_v24  ;;  %v12040_v20 = vld [vmem:[%s12397_s26 + $0x144] sm:$0xf]  ;;  %v10931_v16 = vld [vmem:[%s12397_s26 + $0x130] sm:$0xf] }
 0x14b   : > { %v6228_v55 = vsel %vm18649_vm6, %v6227_v36, %v6226_v54  ;;  %v6236_v25 = vsel %vm18693_vm3, %v6235_v39, %v6234_v34  ;;  %v6239_v61 = vrot.slane %v5963_v60, 4  ;;  %v10936_v40 = vor.u32 %v12038_v32, %v10933_v57  ;;  %v10941_v32 = vld [vmem:[%s12397_s26 + $0x148] sm:$0xf0]  ;;  %v12039_v39 = vld [vmem:[%s12397_s26 + $0x134] sm:$0xf0] }
 0x14c   : > { %v6238_v29 = vsel %vm18692_vm4, %v6237_v52, %v6236_v25  ;;  %v6241_v31 = vrot.slane %v5964_v0, 3  ;;  %v10924_v12 = vor.u32 %v12037_v42, %v10923_v1  ;;  %v6230_v50 = vsel %vm18647_vm7, %v6229_v8, %v6228_v55 }
 0x14d   : > { %v6240_v53 = vsel %vm18673_vm5, %v6239_v61, %v6238_v29  ;;  %v6243_v9 = vrot.slane %v5965_v3, 2  ;;  %v6231_v19 = vrot.slane %v5958_v58, 1  ;;  %v6245_v30 = vrot.slane %v5966_v59, 1 }
 0x14e   : > { %v12856_v4 = vpop.f32.mrf.mxu1  ;;  %v6242_v49 = vsel %vm18649_vm6, %v6241_v31, %v6240_v53  ;;  %v2340_v11 = vadd.f32 %v12874_v5, %v12831_v51  ;;  %v1911_v21 = vadd.f32 %v12746_v43, %v12825_v26  ;;  %v1914_v28 = vadd.f32 %v12776_v22, %v12839_v48 }
 0x14f   : > { %v6244_v10 = vsel %vm18647_vm7, %v6243_v9, %v6242_v49  ;;  %v6232_v44 = vsel %vm18624_vm8, %v6231_v19, %v6230_v50  ;;  %v18866_v60 = vmax.f32 %v12689_v46, 0.0  ;;  %v1916_v22 = vadd.f32 %v12818_v18, %v12850_v47 }
 0x150   : > { %v1589_v35 = vpop.f32.mrf.mxu0  ;;  %v6246_v17 = vsel %vm18624_vm8, %v6245_v30, %v6244_v10  ;;  %v2468_v14 = vmax.f32 %v2340_v11, 0.0  ;;  %v10944_v48 = vor.u32 %v12040_v20, %v10941_v32  ;;  %v10932_v6 = vor.u32 %v12039_v39, %v10931_v16  ;;  %v12041_v10 = vld [vmem:[%s12397_s26 + $0x144] sm:$0xf0]  ;;  %v12968_v16 = vld [vmem:[%s12397_s26 + $0x168] sm:$0xf0] }
 0x151   : > { %v1919_v56 = vadd.f32 %v12837_v38, %v1589_v35  ;;  %11344 = vmatmul.msk.bf16.gmra.mxu1 %vm18626_vm2, %v10936_v40  ;;  %v12882_v38 = vld [vmem:[%s18553_s2] ss:$0 sm:$0xff]  ;;  %v12889_v51 = vpack.c.b16 %v6246_v17, %v6232_v44  ;;  %v12042_v35 = vld [vmem:[%s12397_s26 + $0x154] sm:$0xf] }
 0x152   : > { %v2209_v26 = vmul.f32 %v12882_v38, %v1911_v21  ;;  %v2211_v47 = vmul.f32 %v12882_v38, %v1916_v22 }
 0x153   : > { %v2212_v45 = vmul.f32 %v12882_v38, %v1919_v56  ;;  %1628 = vmatmul.bf16.gmra.mxu0 %v10924_v12  ;;  %18865 = vst [vmem:[#allocation5_spill] sm:$0xff] %v12889_v51  ;;  %11654 = vmatmul.msk.bf16.gmra.mxu2 %vm18623_vm10, %v12889_v51  ;;  %v10949_v12 = vld [vmem:[%s12397_s26 + $0x158] sm:$0xf0]  ;;  %v10939_v56 = vld [vmem:[%s12397_s26 + $0x140] sm:$0xf] }
 0x154   : > { %v2341_v7 = vadd.f32 %v12874_v5, %v2209_v26  ;;  %v2343_v53 = vadd.f32 %v12874_v5, %v2211_v47 }
 0x155   : > { %v12892_v23 = vadd.f32 %v12874_v5, %v2212_v45 }
 0x156   : > { %v1925_v37 = vpop.f32.mrf.mxu1  ;;  %v2469_v36 = vmax.f32 %v2341_v7, 0.0  ;;  %v12965_v7 = vld [vmem:[%s12397_s26 + $0x164] sm:$0xf] }
 0x157   : > { %v18581_v43 = vmax.f32 %v12892_v23, 0.0 }
 0x158   : > { %v1591_v33 = vpop.f32.mrf.mxu0 }
 0x159   : > { %v2588_v24 = vmax.f32 %v2468_v14, %v18581_v43  ;;  %v1921_v62 = vadd.f32 %v12848_v27, %v1591_v33  ;;  %v2210_v27 = vmul.f32 %v12882_v38, %v1914_v28  ;;  %v10952_v28 = vor.u32 %v12042_v35, %v10949_v12 }
 0x15b   : > { %v2652_v0 = vmax.f32 %v2588_v24, %v18866_v60  ;;  %v2213_v15 = vmul.f32 %v12882_v38, %v1921_v62  ;;  %v2342_v25 = vadd.f32 %v12874_v5, %v2210_v27  ;;  %v2471_v62 = vmax.f32 %v2343_v53, 0.0 }
 0x15c   : > { %v10940_v60 = vor.u32 %v12041_v10, %v10939_v56 }
 0x15d   : > { %v12911_v52 = vrot.slane %v2652_v0, 2  ;;  %v12913_v57 = vrot.slane %v2652_v0, 4  ;;  %v12920_v46 = vadd.f32 %v12874_v5, %v2213_v15  ;;  %v3186_v1 = vperm.slane %v2652_v0, 1 }
 0x15e   : > { %v12915_v58 = vpop.f32.mrf.mxu1  ;;  %v12932_v55 = vrot.slane %v2652_v0, 6  ;;  %v2470_v49 = vmax.f32 %v2342_v25, 0.0  ;;  %v11421_v30 = vrot.slane %v2652_v0, 9  ;;  %v18868_v15 = vmax.f32 %v12744_v13, 0.0  ;;  %v12988_v25 = vld [vmem:[%s12397_s26 + $0x154] sm:$0xf0] }
 0x15f   : > { %v3187_v3 = vperm.slane %v12911_v52, 1  ;;  %v18580_v42 = vmax.f32 %v12920_v46, 0.0  ;;  %v3188_v54 = vperm.slane %v12913_v57, 1  ;;  %v11423_v27 = vrot.slane %v12913_v57, 9 }
 0x160   : > { %v1594_v59 = vpop.f32.mrf.mxu0  ;;  %v12970_v22 = vmax.f32 %v2652_v0, %v11421_v30  ;;  %v11424_v13 = vrot.slane %v12932_v55, 9 }
 0x161   : > { %v1924_v18 = vadd.f32 %v12856_v4, %v1594_v59  ;;  %v3429_v8 = vsel %vm18693_vm3, %v3187_v3, %v3186_v1  ;;  %v2589_v34 = vmax.f32 %v2469_v36, %v18580_v42  ;;  %11345 = vmatmul.msk.bf16.gmra.mxu1 %vm18626_vm2, %v10944_v48  ;;  %v18867_v4 = vmax.f32 %v12721_v2, 0.0 }
 0x162   : > { %v3430_v50 = vsel %vm18692_vm4, %v3188_v54, %v3429_v8  ;;  %v3189_v2 = vperm.slane %v12932_v55, 1  ;;  %v11422_v48 = vrot.slane %v12911_v52, 9  ;;  %v4445_v30 = vmax.f32 %v12913_v57, %v11423_v27 }
 0x163   : > { %v2214_v61 = vmul.f32 %v12882_v38, %v1924_v18  ;;  %1633 = vmatmul.bf16.gmra.mxu0 %v10932_v6  ;;  %v12938_v40 = vmax.f32 %v2589_v34, %v18867_v4  ;;  %v12985_v34 = vld [vmem:[%s12397_s26 + $0x150] sm:$0xf]  ;;  %v4446_v10 = vmax.f32 %v12932_v55, %v11424_v13 }
 0x164   : > { %v3431_v17 = vsel %vm18673_vm5, %v3189_v2, %v3430_v50  ;;  %v4444_v56 = vmax.f32 %v12911_v52, %v11422_v48 }
 0x165   : > { %v12941_v29 = vadd.f32 %v12874_v5, %v2214_v61  ;;  %v3190_v9 = vperm.slane %v12938_v40, 1  ;;  %v2799_v19 = vrot.slane %v12938_v40, 2  ;;  %v2800_v45 = vrot.slane %v12938_v40, 4 }
 0x166   : > { %v12943_v31 = vpop.f32.mrf.mxu1  ;;  %v2801_v33 = vrot.slane %v12938_v40, 6  ;;  %v11425_v18 = vrot.slane %v12938_v40, 9 }
 0x167   : > { %v18579_v11 = vmax.f32 %v12941_v29, 0.0  ;;  %v3191_v44 = vperm.slane %v2799_v19, 1  ;;  %v3432_v24 = vsel %vm18649_vm6, %v3190_v9, %v3431_v17  ;;  %v3192_v39 = vperm.slane %v2800_v45, 1 }
 0x168   : > { %v1596_v21 = vpop.f32.mrf.mxu0  ;;  %v3193_v59 = vperm.slane %v2801_v33, 1  ;;  %v11426_v47 = vrot.slane %v2799_v19, 9  ;;  %v11427_v35 = vrot.slane %v2800_v45, 9  ;;  %v11428_v9 = vrot.slane %v2801_v33, 9 }
 0x169   : > { %v2590_v14 = vmax.f32 %v2470_v49, %v18579_v11  ;;  %v1926_v26 = vadd.f32 %v1925_v37, %v1596_v21  ;;  %v3433_v37 = vsel %vm18647_vm7, %v3191_v44, %v3432_v24  ;;  %v13000_v44 = vpop.f32.mrf.mxu2  ;;  %v4447_v52 = vmax.f32 %v12938_v40, %v11425_v18 }
 0x16a   : > { %v3434_v61 = vsel %vm18624_vm8, %v3192_v39, %v3433_v37  ;;  %18870 = vst [vmem:[#allocation7_spill] sm:$0xff] %v13000_v44  ;;  %v4448_v24 = vmax.f32 %v2799_v19, %v11426_v47  ;;  %v4449_v55 = vmax.f32 %v2800_v45, %v11427_v35  ;;  %v13011_v39 = vmax.f32 %v2801_v33, %v11428_v9 }
 0x16b   : > { %v2654_v20 = vmax.f32 %v2590_v14, %v18868_v15  ;;  %v2215_v32 = vmul.f32 %v12882_v38, %v1926_v26  ;;  %v13005_v14 = vsel %vm18616_vm0, 0.0, %v3434_v61  ;;  %v18871_v15 = vmax.f32 %v12783_v63, 0.0 }
 0x16c   : > { %v4695_v40 = vrot.slane %v13005_v14, 2  ;;  %v4696_v45 = vrot.slane %v13005_v14, 4  ;;  %v4697_v33 = vrot.slane %v13005_v14, 6  ;;  %v4795_v9 = vrot.slane %v13005_v14, 1 }
 0x16d   : > { %v2802_v3 = vrot.slane %v2654_v20, 2  ;;  %v2803_v6 = vrot.slane %v2654_v20, 4  ;;  %v3194_v36 = vperm.slane %v2654_v20, 1  ;;  %v12979_v54 = vadd.f32 %v12874_v5, %v2215_v32 }
 0x16e   : > { %v12976_v1 = vpop.f32.mrf.mxu1  ;;  %v2804_v2 = vrot.slane %v2654_v20, 6  ;;  %v11429_v26 = vrot.slane %v2654_v20, 9 }
 0x16f   : > { %18869 = vst [vmem:[#allocation6_spill] sm:$0xff] %v12979_v54  ;;  %v3195_v8 = vperm.slane %v2802_v3, 1  ;;  %v3435_v4 = vsel %vm18621_vm9, %v3194_v36, %v3193_v59  ;;  %v3196_v12 = vperm.slane %v2803_v6, 1  ;;  %v18578_v50 = vmax.f32 %v12979_v54, 0.0 }
 0x170   : > { %v1599_v53 = vpop.f32.mrf.mxu0  ;;  %v11430_v57 = vrot.slane %v2802_v3, 9  ;;  %v11431_v32 = vrot.slane %v2803_v6, 9  ;;  %v3197_v27 = vperm.slane %v2804_v2, 1  ;;  %v11432_v13 = vrot.slane %v2804_v2, 9 }
 0x171   : > { %v3436_v49 = vsel %vm18693_vm3, %v3195_v8, %v3435_v4  ;;  %v2591_v21 = vmax.f32 %v2471_v62, %v18578_v50  ;;  %11346 = vmatmul.msk.bf16.gmra.mxu1 %vm18626_vm2, %v10952_v28  ;;  %v1929_v37 = vadd.f32 %v12915_v58, %v1599_v53  ;;  %v4451_v59 = vmax.f32 %v2654_v20, %v11429_v26 }
 0x172   : > { %v3437_v28 = vsel %vm18692_vm4, %v3196_v12, %v3436_v49  ;;  %v4452_v18 = vmax.f32 %v2802_v3, %v11430_v57  ;;  %v4453_v4 = vmax.f32 %v2803_v6, %v11431_v32  ;;  %v4454_v53 = vmax.f32 %v2804_v2, %v11432_v13 }
 0x173   : > { %1638 = vmatmul.bf16.gmra.mxu0 %v10940_v60  ;;  %v2655_v62 = vmax.f32 %v2591_v21, %v18871_v15  ;;  %v3438_v63 = vsel %vm18673_vm5, %v3197_v27, %v3437_v28  ;;  %v13022_v35 = vmul.f32 %v12882_v38, %v1929_v37  ;;  %v4796_v21 = vrot.slane %v4695_v40, 1  ;;  %v13031_v28 = vpop.f32.mrf.mxu2 }
 0x174   : > { %v4797_v20 = vrot.slane %v4696_v45, 1  ;;  %v13028_v3 = vmax.f32 %v12970_v22, %v13005_v14  ;;  %v4798_v6 = vrot.slane %v4697_v33, 1  ;;  %18872 = vst [vmem:[#allocation8_spill] sm:$0xff] %v13031_v28 }
 0x175   : > { %v3198_v60 = vperm.slane %v2655_v62, 1  ;;  %v2805_v36 = vrot.slane %v2655_v62, 2  ;;  %v2806_v19 = vrot.slane %v2655_v62, 4  ;;  %v2807_v12 = vrot.slane %v2655_v62, 6 }
 0x176   : > { %v13014_v48 = vpop.f32.mrf.mxu1  ;;  %v11433_v57 = vrot.slane %v2655_v62, 9  ;;  %v5200_v43 = vmax.f32 %v4448_v24, %v4797_v20  ;;  %v18874_v24 = vor.u32 %v12988_v25, %v12985_v34 }
 0x177   : > { %v3199_v8 = vperm.slane %v2805_v36, 1  ;;  %v3200_v58 = vperm.slane %v2806_v19, 1  ;;  %v3439_v61 = vsel %vm18649_vm6, %v3198_v60, %v3438_v63  ;;  %v11434_v15 = vrot.slane %v2805_v36, 9 }
 0x178   : > { %v1601_v47 = vpop.f32.mrf.mxu0  ;;  %v11435_v60 = vrot.slane %v2806_v19, 9  ;;  %v11436_v63 = vrot.slane %v2807_v12, 9  ;;  %v4455_v50 = vmax.f32 %v2655_v62, %v11433_v57 }
 0x179   : > { %v3440_v49 = vsel %vm18647_vm7, %v3199_v8, %v3439_v61  ;;  %v5196_v8 = vmax.f32 %v4444_v56, %v4795_v9  ;;  %v5197_v61 = vmax.f32 %v4445_v30, %v4695_v40  ;;  %v13036_v22 = vadd.f32 %v12943_v31, %v1601_v47 }
 0x17a   : > { %v3441_v26 = vsel %vm18624_vm8, %v3200_v58, %v3440_v49  ;;  %v5198_v58 = vmax.f32 %v4446_v10, %v4796_v21  ;;  %v5199_v49 = vmax.f32 %v4447_v52, %v4696_v45  ;;  %v4456_v11 = vmax.f32 %v2805_v36, %v11434_v15 }
 0x17b   : > { %v4698_v32 = vrot.slane %v3441_v26, 2  ;;  %v4699_v37 = vrot.slane %v3441_v26, 4  ;;  %v4700_v2 = vrot.slane %v3441_v26, 6  ;;  %v4799_v27 = vrot.slane %v3441_v26, 1 }
 0x17c   : > { %v4457_v44 = vmax.f32 %v2806_v19, %v11435_v60  ;;  %v4458_v54 = vmax.f32 %v2807_v12, %v11436_v63  ;;  %v5201_v56 = vmax.f32 %v4449_v55, %v4697_v33  ;;  %v5452_v30 = vpack.c.bf16 %v5196_v8, %v5196_v8  ;;  %v12046_v63 = vld [vmem:[%s12397_s26 + $0x174] sm:$0xf] }
 0x17d   : > { %v4800_v14 = vrot.slane %v4698_v32, 1  ;;  %v4801_v42 = vrot.slane %v4699_v37, 1  ;;  %v4802_v0 = vrot.slane %v4700_v2, 1  ;;  %v5204_v51 = vmax.f32 %v4452_v18, %v4799_v27 }
 0x17e   : > { %v13033_v13 = vpop.f32.mrf.mxu1  ;;  %v5205_v41 = vmax.f32 %v4453_v4, %v4698_v32  ;;  %v18873_v31 = vor.u32 %v12965_v7, %v12968_v16  ;;  %v5203_v10 = vmax.f32 %v4451_v59, %v3441_v26  ;;  %v5207_v52 = vmax.f32 %v4455_v50, %v4699_v37 }
 0x17f   : > { %v5206_v28 = vmax.f32 %v4454_v53, %v4800_v14  ;;  %v5453_v62 = vpack.c.bf16 %v5197_v61, %v5197_v61  ;;  %v5454_v40 = vpack.c.bf16 %v5198_v58, %v5198_v58  ;;  %v5202_v36 = vmax.f32 %v13011_v39, %v4798_v6  ;;  %v13052_v53 = vpop.f32.mrf.mxu2 }
 0x180   : > { %v13038_v17 = vpop.f32.mrf.mxu0  ;;  %v5208_v45 = vmax.f32 %v4456_v11, %v4801_v42  ;;  %v5209_v19 = vmax.f32 %v4457_v44, %v4700_v2  ;;  %v5455_v18 = vpack.c.bf16 %v5199_v49, %v5199_v49  ;;  %v5210_v55 = vmax.f32 %v4458_v54, %v4802_v0  ;;  %18875 = vst [vmem:[#allocation9_spill] sm:$0xff] %v13052_v53  ;;  %v10965_v49 = vld [vmem:[%s12397_s26 + $0x178] sm:$0xf0] }
 0x181   : > { %11347 = vmatmul.msk.bf16.gmra.mxu1 %vm18626_vm2, %v18873_v31  ;;  %v5460_v33 = vpack.c.bf16 %v5204_v51, %v5204_v51  ;;  %v5461_v47 = vpack.c.bf16 %v5205_v41, %v5205_v41  ;;  %v5462_v4 = vpack.c.bf16 %v5206_v28, %v5206_v28  ;;  %v5451_v16 = vpack.c.bf16 %v13028_v3, %v13028_v3 }
 0x182   : > { %v5456_v50 = vpack.c.bf16 %v5200_v43, %v5200_v43  ;;  %v5457_v59 = vpack.c.bf16 %v5201_v56, %v5201_v56  ;;  %v5968_v12 = vunpack.c.l.b16 %v5452_v30  ;;  %v5459_v34 = vpack.c.bf16 %v5203_v10, %v5203_v10 }
 0x183   : > { %1643 = vmatmul.bf16.gmra.mxu0 %v18874_v24  ;;  %v5463_v25 = vpack.c.bf16 %v5207_v52, %v5207_v52  ;;  %v5969_v39 = vunpack.c.l.b16 %v5453_v62  ;;  %v5970_v42 = vunpack.c.l.b16 %v5454_v40  ;;  %v5458_v11 = vpack.c.bf16 %v5202_v36, %v5202_v36 }
 0x184   : > { %v5464_v44 = vpack.c.bf16 %v5208_v45, %v5208_v45  ;;  %v5465_v54 = vpack.c.bf16 %v5209_v19, %v5209_v19  ;;  %v5971_v51 = vunpack.c.l.b16 %v5455_v18  ;;  %v5466_v0 = vpack.c.bf16 %v5210_v55, %v5210_v55 }
 0x185   : > { %v5976_v9 = vunpack.c.l.b16 %v5460_v33  ;;  %v5977_v21 = vunpack.c.l.b16 %v5461_v47  ;;  %v5978_v20 = vunpack.c.l.b16 %v5462_v4  ;;  %v5967_v43 = vunpack.c.l.b16 %v5451_v16  ;;  %v10955_v33 = vld [vmem:[%s12397_s26 + $0x160] sm:$0xf]  ;;  %v12045_v47 = vld [vmem:[%s12397_s26 + $0x164] sm:$0xf0] }
 0x186   : > { %v13048_v7 = vpop.f32.mrf.mxu1  ;;  %v5972_v3 = vunpack.c.l.b16 %v5456_v50  ;;  %v5973_v26 = vunpack.c.l.b16 %v5457_v59  ;;  %v6247_v57 = vrot.slane %v5968_v12, 7  ;;  %v5975_v15 = vunpack.c.l.b16 %v5459_v34 }
 0x187   : > { %v5979_v6 = vunpack.c.l.b16 %v5463_v25  ;;  %v6249_v28 = vrot.slane %v5969_v39, 6  ;;  %v6251_v32 = vrot.slane %v5970_v42, 5  ;;  %v5980_v37 = vunpack.c.l.b16 %v5464_v44  ;;  %v13069_v4 = vpop.f32.mrf.mxu2 }
 0x188   : > { %v13054_v41 = vpop.f32.mrf.mxu0  ;;  %v5981_v2 = vunpack.c.l.b16 %v5465_v54  ;;  %v6248_v27 = vsel %vm18621_vm9, %v6247_v57, %v5967_v43  ;;  %v6253_v60 = vrot.slane %v5971_v51, 4  ;;  %v6261_v61 = vrot.slane %v5976_v9, 7  ;;  %18876 = vst [vmem:[#allocation10_spill] sm:$0xff] %v13069_v4 }
 0x189   : > { %v6250_v8 = vsel %vm18693_vm3, %v6249_v28, %v6248_v27  ;;  %v6263_v14 = vrot.slane %v5977_v21, 6  ;;  %v6265_v58 = vrot.slane %v5978_v20, 5  ;;  %v5974_v56 = vunpack.c.l.b16 %v5458_v11 }
 0x18a   : > { %v5982_v30 = vunpack.c.l.b16 %v5466_v0  ;;  %v6252_v31 = vsel %vm18692_vm4, %v6251_v32, %v6250_v8  ;;  %v6255_v10 = vrot.slane %v5972_v3, 3  ;;  %v6257_v62 = vrot.slane %v5973_v26, 2  ;;  %v13112_v32 = vld [vmem:[%s18556_s5] ss:$0 sm:$0xff] }
 0x18b   : > { %v6254_v52 = vsel %vm18673_vm5, %v6253_v60, %v6252_v31  ;;  %v6262_v40 = vsel %vm18621_vm9, %v6261_v61, %v5975_v15  ;;  %v6267_v24 = vrot.slane %v5979_v6, 4  ;;  %v6269_v18 = vrot.slane %v5980_v37, 3  ;;  %v13127_v60 = vld [vmem:[%s18557_s6] ss:$0 sm:$0xff]  ;;  %v10963_v31 = vld [vmem:[%s12397_s26 + $0x170] sm:$0xf] }
 0x18c   : > { %v6256_v45 = vsel %vm18649_vm6, %v6255_v10, %v6254_v52  ;;  %v6264_v19 = vsel %vm18693_vm3, %v6263_v14, %v6262_v40  ;;  %v10968_v55 = vor.u32 %v12046_v63, %v10965_v49  ;;  %v6271_v50 = vrot.slane %v5981_v2, 2  ;;  %v10973_v49 = vld [vmem:[%s12397_s26 + $0x188] sm:$0xf0]  ;;  %v12047_v10 = vld [vmem:[%s12397_s26 + $0x174] sm:$0xf0] }
 0x18d   : > { %v6266_v16 = vsel %vm18692_vm4, %v6265_v58, %v6264_v19  ;;  %v6258_v12 = vsel %vm18647_vm7, %v6257_v62, %v6256_v45  ;;  %v18585_v39 = vmov 0.0|0.0   ;;  %v6909_v42 = vlaneseq  ;;  %v12048_v58 = vld [vmem:[%s12397_s26 + $0x184] sm:$0xf] }
 0x18e   : > { %v13063_v36 = vpop.f32.mrf.mxu1  ;;  %v6268_v34 = vsel %vm18673_vm5, %v6267_v24, %v6266_v16  ;;  %7665 = vrot.lane.b32.xlu0 %v18585_v39, %s12277_s0  ;;  %9040 = vst.msk [vmem:[#allocation2 + $0x170] sm:$0xf] %vm18603_vm11, %v18585_v39  ;;  %v6259_v11 = vrot.slane %v5974_v56, 1  ;;  %v6273_v54 = vrot.slane %v5982_v30, 1  ;;  %v10956_v51 = vor.u32 %v12045_v47, %v10955_v33 }
 0x18f   : > { %v6270_v44 = vsel %vm18649_vm6, %v6269_v18, %v6268_v34  ;;  %9041 = vst.msk [vmem:[#allocation2 + $0x17c] sm:$0xf] %vm18603_vm11, %v18585_v39  ;;  %v2217_v26 = vmul.f32 %v12882_v38, %v13036_v22  ;;  %v1934_v57 = vadd.f32 %v12976_v1, %v13038_v17  ;;  %v1936_v6 = vadd.f32 %v13014_v48, %v13054_v41 }
 0x190   : > { %v1609_v59 = vpop.f32.mrf.mxu0  ;;  %v6272_v0 = vsel %vm18647_vm7, %v6271_v50, %v6270_v44  ;;  %7572 = vst.msk [vmem:[#allocation2] sm:$0xf] %vm18603_vm11, %v18585_v39  ;;  %v6260_v21 = vsel %vm18624_vm8, %v6259_v11, %v6258_v12  ;;  %v18878_v63 = vmax.f32 %v12892_v23, 0.0  ;;  %v10976_v40 = vor.u32 %v12048_v58, %v10973_v49 }
 0x191   : > { %v1939_v25 = vadd.f32 %v13033_v13, %v1609_v59  ;;  %11348 = vmatmul.msk.bf16.gmra.mxu1 %vm18626_vm2, %v10968_v55  ;;  %v2348_v13 = vadd.f32 %v12874_v5, %v13022_v35  ;;  %v6274_v20 = vsel %vm18624_vm8, %v6273_v54, %v6272_v0  ;;  %7573 = vst.msk [vmem:[#allocation2 + $0xc] sm:$0xf] %vm18603_vm11, %v18585_v39  ;;  %v13098_v35 = vshrl.u32 %v6909_v42, 7 }
 0x192   : > { %v13093_v43 = vpack.c.b16 %v6274_v20, %v6260_v21  ;;  %v2349_v41 = vadd.f32 %v12874_v5, %v2217_v26  ;;  %v2218_v2 = vmul.f32 %v12882_v38, %v1934_v57  ;;  %v10964_v50 = vor.u32 %v12047_v10, %v10963_v31 }
 0x193   : > { %v2220_v9 = vmul.f32 %v12882_v38, %v1939_v25  ;;  %1648 = vmatmul.bf16.gmra.mxu0 %v10956_v51  ;;  %v2476_v15 = vmax.f32 %v2348_v13, 0.0  ;;  %v6911_v48 = vadd.s32 8, %v13098_v35  ;;  %v18880_v12 = vmov 0 }
 0x194   : > { %18877 = vst [vmem:[#allocation11_spill] sm:$0xff] %v13093_v43  ;;  %11655 = vmatmul.msk.bf16.gmra.mxu2 %vm18623_vm10, %v13093_v43  ;;  %v2477_v24 = vmax.f32 %v2349_v41, 0.0  ;;  %v2350_v45 = vadd.f32 %v12874_v5, %v2218_v2  ;;  %v6946_v25 = vand.u32 15, %v13098_v35  ;;  %v18883_v21 = vmax.f32 %v12920_v46, 0.0  ;;  %v13204_v41 = vld [vmem:[%s12397_s26 + $0x194] sm:$0xf] }
 0x195   : > { %v13096_v3 = vadd.f32 %v12874_v5, %v2220_v9  ;;  %v6953_v30 = vand.u32 15, %v6911_v48  ;;  %v18885_v48 = vmov 0 }
 0x196   : > { %v13114_v37 = vpop.f32.mrf.mxu1  ;;  %7979 = vrot.lane.b32.xlu0 %v18585_v39, %s12278_s19  ;;  %vm13199_vm14 = vcmp.ge.s32.totalorder %v6946_v25, 1  ;;  %v18889_v25 = vmax.f32 %v12941_v29, 0.0 }
 0x197   : > { %v18591_v28 = vmax.f32 %v13096_v3, 0.0  ;;  %v6725_v27 = vpop.f32.mrf.mxu2  ;;  %vm13161_vm13 = vcmp.le.s32.totalorder %v6953_v30, 14  ;;  %v18886_v48 = vsel %vm13199_vm14, 4294967295, %v18885_v48 }
 0x198   : > { %v1611_v22 = vpop.f32.mrf.mxu0  ;;  %v6809_v61 = vmul.f32 %v13112_v32, %v6725_v27  ;;  %v18881_v12 = vsel %vm13161_vm13, 4294967295, %v18880_v12  ;;  %18887 = vst [vmem:[#allocation15_spill] sm:$0xff] %v18886_v48 }
 0x199   : > { %v2592_v1 = vmax.f32 %v2476_v15, %v18591_v28  ;;  %v1941_v17 = vadd.f32 %v13048_v7, %v1611_v22  ;;  %v2219_v7 = vmul.f32 %v12882_v38, %v1936_v6  ;;  %18882 = vst [vmem:[#allocation13_spill] sm:$0xff] %v18881_v12  ;;  %v2478_v15 = vmax.f32 %v2350_v45, 0.0 }
 0x19a   : > { %v6845_v62 = vadd.f32 %v13127_v60, %v6809_v61 }
 0x19b   : > { %v13132_v8 = vmax.f32 %v2592_v1, %v18878_v63  ;;  %v2221_v14 = vmul.f32 %v12882_v38, %v1941_v17  ;;  %v13152_v19 = vadd.f32 %v12874_v5, %v2219_v7 }
 0x19c   : > { %v13157_v33 = vmax.f32 %v6845_v62, 0.0  ;;  %v13226_v62 = vadd.s32 16, %v13098_v35 }
 0x19d   : > { %v13139_v56 = vrot.slane %v13132_v8, 2  ;;  %v13144_v52 = vrot.slane %v13132_v8, 4  ;;  %v13148_v23 = vadd.f32 %v12874_v5, %v2221_v14  ;;  %v3201_v59 = vperm.slane %v13132_v8, 1  ;;  %v10981_v14 = vld [vmem:[%s12397_s26 + $0x198] sm:$0xf0] }
 0x19e   : > { %v13155_v55 = vpop.f32.mrf.mxu1  ;;  %v7793_v54 = vrot.slane %v13157_v33, 1  ;;  %v13174_v51 = vpack.c.bf16 %v13157_v33, %v13157_v33  ;;  %v7420_v9 = vrot.slane %v13157_v33, 7  ;;  %v13190_v57 = vrot.slane %v13132_v8, 6 }
 0x19f   : > { %18879 = vst [vmem:[#allocation12_spill] sm:$0xff] %v13148_v23  ;;  %v3202_v18 = vperm.slane %v13139_v56, 1  ;;  %v18587_v47 = vmax.f32 %v13148_v23, 0.0  ;;  %v3203_v42 = vperm.slane %v13144_v52, 1  ;;  %v6727_v44 = vpop.f32.mrf.mxu2  ;;  %v2479_v1 = vmax.f32 %v13152_v19, 0.0 }
 0x1a0   : > { %v1614_v16 = vpop.f32.mrf.mxu0  ;;  %v7885_v26 = vsel %vm18669_vm12, 0.0, %v7793_v54  ;;  %8342 = vst.msk [vmem:[#allocation2 + $0x4] sm:$0xf] %vm18603_vm11, %v13174_v51  ;;  %v13213_v61 = vsel %vm18616_vm0, 0.0, %v7420_v9  ;;  %v3204_v10 = vperm.slane %v13190_v57, 1 }
 0x1a1   : > { %v1944_v34 = vadd.f32 %v13063_v36, %v1614_v16  ;;  %v2593_v11 = vmax.f32 %v2477_v24, %v18587_v47  ;;  %11349 = vmatmul.msk.bf16.gmra.mxu1 %vm18626_vm2, %v10976_v40  ;;  %v3442_v13 = vsel %vm18693_vm3, %v3202_v18, %v3201_v59  ;;  %v6810_v36 = vmul.f32 %v13112_v32, %v6727_v44 }
 0x1a2   : > { %v7886_v46 = vsel %vm13161_vm13, %v7885_v26, 0.0  ;;  %v3443_v2 = vsel %vm18692_vm4, %v3203_v42, %v3442_v13  ;;  %v8115_v16 = vsel %vm13199_vm14, %v13213_v61, 0.0  ;;  %v11437_v13 = vrot.slane %v13132_v8, 9 }
 0x1a3   : > { %v2222_v0 = vmul.f32 %v12882_v38, %v1944_v34  ;;  %v13182_v20 = vmax.f32 %v2593_v11, %v18883_v21  ;;  %1653 = vmatmul.bf16.gmra.mxu0 %v10964_v50  ;;  %v6846_v6 = vadd.f32 %v13127_v60, %v6810_v36  ;;  %v7917_v17 = vpack.c.bf16 %v7886_v46, %v7886_v46 }
 0x1a4   : > { %v10984_v50 = vor.u32 %v13204_v41, %v10981_v14  ;;  %v3444_v34 = vsel %vm18673_vm5, %v3204_v10, %v3443_v2  ;;  %v11438_v21 = vrot.slane %v13139_v56, 9  ;;  %v8147_v46 = vpack.c.bf16 %v8115_v16, %v8115_v16  ;;  %v13280_v10 = vld [vmem:[%s12397_s26 + $0x1a8] sm:$0xf0] }
 0x1a5   : > { %v13196_v22 = vadd.f32 %v12874_v5, %v2222_v0  ;;  %v13207_v27 = vmax.f32 %v6846_v6, 0.0  ;;  %v13217_v58 = vrot.slane %v13182_v20, 2  ;;  %v3205_v49 = vperm.slane %v13182_v20, 1  ;;  %7981 = vrot.lane.b32.xlu1 %v7917_v17, %s12278_s19  ;;  %v10971_v0 = vld [vmem:[%s12397_s26 + $0x180] sm:$0xf] }
 0x1a6   : > { %v13210_v63 = vpop.f32.mrf.mxu1  ;;  %v13222_v31 = vrot.slane %v13182_v20, 6  ;;  %v13239_v59 = vrot.slane %v13182_v20, 4  ;;  %v4460_v19 = vmax.f32 %v13139_v56, %v11438_v21 }
 0x1a7   : > { %18884 = vst [vmem:[#allocation14_spill] sm:$0xff] %v13196_v22  ;;  %v18588_v7 = vmax.f32 %v13196_v22, 0.0  ;;  %v7605_v24 = vpack.c.bf16 %v13207_v27, %v13207_v27  ;;  %v18589_v45 = vrot.slane %v13207_v27, 7  ;;  %v3206_v44 = vperm.slane %v13217_v58, 1 }
 0x1a8   : > { %18888 = vst [vmem:[#allocation16_spill] sm:$0xff] %v13207_v27  ;;  %v1616_v30 = vpop.f32.mrf.mxu0  ;;  %v3445_v29 = vsel %vm18649_vm6, %v3205_v49, %v3444_v34  ;;  %v3208_v6 = vperm.slane %v13222_v31, 1  ;;  %v18590_v41 = vrot.slane %v13207_v27, 1  ;;  %v3207_v2 = vperm.slane %v13239_v59, 1 }
 0x1a9   : > { %v2594_v40 = vmax.f32 %v2478_v15, %v18588_v7  ;;  %v1946_v18 = vadd.f32 %v13114_v37, %v1616_v30  ;;  %7669 = vrot.lane.b32.xlu0 %v7605_v24, %s12277_s0  ;;  %8343 = vst.msk [vmem:[#allocation2 + $0x10] sm:$0xf] %vm18603_vm11, %v7605_v24  ;;  %v7422_v37 = vsel %vm18616_vm0, %v7420_v9, %v18589_v45  ;;  %v12049_v9 = vld [vmem:[%s12397_s26 + $0x184] sm:$0xf0]  ;;  %v13277_v30 = vld [vmem:[%s12397_s26 + $0x1a4] sm:$0xf] }
 0x1aa   : > { %v7542_v36 = vpack.c.bf16 %v7422_v37, %v7422_v37  ;;  %v13289_v37 = vld [vmem:[%s12397_s26 + $0x190] sm:$0xf]  ;;  %v18894_v22 = vor.u32 %v13277_v30, %v13280_v10 }
 0x1ab   : > { %v13244_v42 = vmax.f32 %v2594_v40, %v18889_v25  ;;  %v2223_v11 = vmul.f32 %v12882_v38, %v1946_v18  ;;  %v3446_v40 = vsel %vm18647_vm7, %v3206_v44, %v3445_v29  ;;  %v10972_v25 = vor.u32 %v12049_v9, %v10971_v0 }
 0x1ac   : > { %8213 = vrot.lane.b32.xlu2 %v7542_v36, %s12279_s21  ;;  %7575 = vst.msk [vmem:[#allocation2 + $0x24] sm:$0xf] %vm18603_vm11, %v7542_v36  ;;  %v13299_v29 = vmax.f32 %v13132_v8, %v11437_v13  ;;  %v7795_v0 = vsel %vm18669_vm12, %v7793_v54, %v18590_v41  ;;  %v3447_v8 = vsel %vm18624_vm8, %v3207_v2, %v3446_v40  ;;  %v11442_v2 = vrot.slane %v13217_v58, 9 }
 0x1ad   : > { %v13258_v26 = vrot.slane %v13244_v42, 2  ;;  %v13261_v15 = vrot.slane %v13244_v42, 4  ;;  %v3209_v38 = vperm.slane %v13244_v42, 1  ;;  %v13269_v17 = vadd.f32 %v12874_v5, %v2223_v11  ;;  %8211 = vrot.lane.b32.xlu1 %v8147_v46, %s12279_s21  ;;  %v13292_v11 = vld [vmem:[%s12397_s26 + $0x194] sm:$0xf0] }
 0x1ae   : > { %v13274_v49 = vpop.f32.mrf.mxu1  ;;  %v11439_v5 = vrot.slane %v13144_v52, 9  ;;  %v13295_v36 = vrot.slane %v13244_v42, 6  ;;  %v11440_v46 = vrot.slane %v13190_v57, 9  ;;  %v11445_v40 = vrot.slane %v13244_v42, 9 }
 0x1af   : > { %18890 = vst [vmem:[#allocation17_spill] sm:$0xff] %v13269_v17  ;;  %v3210_v14 = vperm.slane %v13258_v26, 1  ;;  %v3448_v24 = vsel %vm18621_vm9, %v3209_v38, %v3208_v6  ;;  %v3211_v18 = vperm.slane %v13261_v15, 1  ;;  %v18586_v16 = vmax.f32 %v13269_v17, 0.0 }
 0x1b0   : > { %v1619_v34 = vpop.f32.mrf.mxu0  ;;  %v13328_v39 = vpack.c.bf16 %v7795_v0, %v7795_v0  ;;  %v13332_v56 = vsel %vm18616_vm0, 0.0, %v3447_v8  ;;  %v11444_v0 = vrot.slane %v13222_v31, 9  ;;  %v11446_v8 = vrot.slane %v13258_v26, 9 }
 0x1b1   : > { %v3449_v44 = vsel %vm18693_vm3, %v3210_v14, %v3448_v24  ;;  %v2595_v6 = vmax.f32 %v2479_v1, %v18586_v16  ;;  %11350 = vmatmul.msk.bf16.gmra.mxu1 %vm18626_vm2, %v10984_v50  ;;  %v4461_v1 = vmax.f32 %v13144_v52, %v11439_v5  ;;  %v18891_v14 = vld [vmem:[#allocation6_spill] sm:$0xff]  ;;  %v11441_v50 = vrot.slane %v13182_v20, 9 }
 0x1b2   : > { %v18892_v33 = vmax.f32 %v18891_v14, 0.0  ;;  %v3450_v54 = vsel %vm18692_vm4, %v3211_v18, %v3449_v44  ;;  %18893 = vst [vmem:[#allocation6_spill] sm:$0xff] %v13328_v39  ;;  %v3212_v16 = vperm.slane %v13295_v36, 1  ;;  %v11443_v18 = vrot.slane %v13239_v59, 9 }
 0x1b3   : > { %1658 = vmatmul.bf16.gmra.mxu0 %v10972_v25  ;;  %v13341_v25 = vadd.f32 %v13155_v55, %v1619_v34  ;;  %v11447_v55 = vrot.slane %v13261_v15, 9  ;;  %v11448_v34 = vrot.slane %v13295_v36, 9  ;;  %v4462_v7 = vmax.f32 %v13190_v57, %v11440_v46 }
 0x1b4   : > { %v13322_v24 = vmax.f32 %v2595_v6, %v18892_v33  ;;  %7667 = vrot.lane.b32.xlu2 %v13174_v51, %s12277_s0  ;;  %v3451_v6 = vsel %vm18673_vm5, %v3212_v16, %v3450_v54  ;;  %v4463_v16 = vmax.f32 %v13182_v20, %v11441_v50  ;;  %v4701_v54 = vrot.slane %v13332_v56, 2 }
 0x1b5   : > { %7983 = vrot.lane.b32.xlu1 %v13328_v39, %s12278_s19  ;;  %v4464_v28 = vmax.f32 %v13217_v58, %v11442_v2  ;;  %v4465_v38 = vmax.f32 %v13239_v59, %v11443_v18  ;;  %v4467_v13 = vmax.f32 %v13244_v42, %v11445_v40  ;;  %v4702_v57 = vrot.slane %v13332_v56, 4 }
 0x1b6   : > { %v3213_v52 = vperm.slane %v13322_v24, 1  ;;  %v2817_v21 = vrot.slane %v13322_v24, 2  ;;  %v2818_v5 = vrot.slane %v13322_v24, 4  ;;  %v13343_v44 = vpop.f32.mrf.mxu1  ;;  %v2819_v45 = vrot.slane %v13322_v24, 6 }
 0x1b7   : > { %v11449_v20 = vrot.slane %v13322_v24, 9  ;;  %v4703_v46 = vrot.slane %v13332_v56, 6  ;;  %v4803_v9 = vrot.slane %v13332_v56, 1  ;;  %v4804_v2 = vrot.slane %v4701_v54, 1 }
 0x1b8   : > { %v13350_v51 = vpop.f32.mrf.mxu0  ;;  %v3214_v14 = vperm.slane %v2817_v21, 1  ;;  %v3215_v33 = vperm.slane %v2818_v5, 1  ;;  %v3452_v47 = vsel %vm18649_vm6, %v3213_v52, %v3451_v6  ;;  %v4466_v6 = vmax.f32 %v13222_v31, %v11444_v0 }
 0x1b9   : > { %v11452_v59 = vrot.slane %v2819_v45, 9  ;;  %v4469_v42 = vmax.f32 %v13261_v15, %v11447_v55  ;;  %v4470_v40 = vmax.f32 %v13295_v36, %v11448_v34  ;;  %v4471_v39 = vmax.f32 %v13322_v24, %v11449_v20 }
 0x1ba   : > { %v3453_v41 = vsel %vm18647_vm7, %v3214_v14, %v3452_v47  ;;  %v11450_v47 = vrot.slane %v2817_v21, 9  ;;  %v11451_v14 = vrot.slane %v2818_v5, 9  ;;  %v4806_v4 = vrot.slane %v4703_v46, 1 }
 0x1bb   : > { %v3454_v52 = vsel %vm18624_vm8, %v3215_v33, %v3453_v41  ;;  %v4468_v41 = vmax.f32 %v13258_v26, %v11446_v8  ;;  %v4805_v33 = vrot.slane %v4702_v57, 1  ;;  %v5212_v53 = vmax.f32 %v4460_v19, %v4803_v9 }
 0x1bc   : > { %v4704_v50 = vrot.slane %v3454_v52, 2  ;;  %v4705_v58 = vrot.slane %v3454_v52, 4  ;;  %v4706_v18 = vrot.slane %v3454_v52, 6  ;;  %v4807_v31 = vrot.slane %v3454_v52, 1 }
 0x1bd   : > { %v5213_v12 = vmax.f32 %v4461_v1, %v4701_v54  ;;  %v4472_v17 = vmax.f32 %v2817_v21, %v11450_v47  ;;  %v4473_v23 = vmax.f32 %v2818_v5, %v11451_v14  ;;  %v5214_v8 = vmax.f32 %v4462_v7, %v4804_v2 }
 0x1be   : > { %v13370_v0 = vpop.f32.mrf.mxu1  ;;  %v4808_v43 = vrot.slane %v4704_v50, 1  ;;  %v4809_v26 = vrot.slane %v4705_v58, 1  ;;  %v4474_v15 = vmax.f32 %v2819_v45, %v11452_v59  ;;  %v4810_v36 = vrot.slane %v4706_v18, 1 }
 0x1bf   : > { %v5211_v55 = vmax.f32 %v13299_v29, %v13332_v56  ;;  %v5220_v34 = vmax.f32 %v4468_v41, %v4807_v31  ;;  %v5215_v27 = vmax.f32 %v4463_v16, %v4702_v57  ;;  %v5216_v24 = vmax.f32 %v4464_v28, %v4805_v33 }
 0x1c0   : > { %v13374_v48 = vpop.f32.mrf.mxu0  ;;  %v5221_v20 = vmax.f32 %v4469_v42, %v4704_v50  ;;  %v5222_v9 = vmax.f32 %v4470_v40, %v4808_v43  ;;  %v18895_v19 = vor.u32 %v13292_v11, %v13289_v37  ;;  %v5217_v7 = vmax.f32 %v4465_v38, %v4703_v46 }
 0x1c1   : > { %11351 = vmatmul.msk.bf16.gmra.mxu1 %vm18626_vm2, %v18894_v22  ;;  %v5218_v1 = vmax.f32 %v4466_v6, %v4806_v4  ;;  %v5468_v21 = vpack.c.bf16 %v5212_v53, %v5212_v53  ;;  %v5469_v30 = vpack.c.bf16 %v5213_v12, %v5213_v12  ;;  %v5219_v10 = vmax.f32 %v4467_v13, %v3454_v52 }
 0x1c2   : > { %v5223_v22 = vmax.f32 %v4471_v39, %v4705_v58  ;;  %v5224_v45 = vmax.f32 %v4472_v17, %v4809_v26  ;;  %v5470_v5 = vpack.c.bf16 %v5214_v8, %v5214_v8  ;;  %v5225_v54 = vmax.f32 %v4473_v23, %v4706_v18 }
 0x1c3   : > { %1663 = vmatmul.bf16.gmra.mxu0 %v18895_v19  ;;  %v5226_v47 = vmax.f32 %v4474_v15, %v4810_v36  ;;  %v5467_v29 = vpack.c.bf16 %v5211_v55, %v5211_v55  ;;  %v5476_v56 = vpack.c.bf16 %v5220_v34, %v5220_v34  ;;  %v5471_v28 = vpack.c.bf16 %v5215_v27, %v5215_v27 }
 0x1c4   : > { %v5472_v43 = vpack.c.bf16 %v5216_v24, %v5216_v24  ;;  %v5477_v57 = vpack.c.bf16 %v5221_v20, %v5221_v20  ;;  %v5478_v50 = vpack.c.bf16 %v5222_v9, %v5222_v9  ;;  %v5473_v11 = vpack.c.bf16 %v5217_v7, %v5217_v7  ;;  %v12054_v24 = vld [vmem:[%s12397_s26 + $0x1b4] sm:$0xf] }
 0x1c5   : > { %v5474_v4 = vpack.c.bf16 %v5218_v1, %v5218_v1  ;;  %v5984_v53 = vunpack.c.l.b16 %v5468_v21  ;;  %v5985_v12 = vunpack.c.l.b16 %v5469_v30  ;;  %v5475_v38 = vpack.c.bf16 %v5219_v10, %v5219_v10  ;;  %v10997_v21 = vld [vmem:[%s12397_s26 + $0x1b8] sm:$0xf0] }
 0x1c6   : > { %v13386_v16 = vpop.f32.mrf.mxu1  ;;  %v5479_v39 = vpack.c.bf16 %v5223_v22, %v5223_v22  ;;  %v5480_v17 = vpack.c.bf16 %v5224_v45, %v5224_v45  ;;  %v5986_v13 = vunpack.c.l.b16 %v5470_v5  ;;  %v5481_v23 = vpack.c.bf16 %v5225_v54, %v5225_v54  ;;  %v10987_v54 = vld [vmem:[%s12397_s26 + $0x1a0] sm:$0xf] }
 0x1c7   : > { %v5482_v52 = vpack.c.bf16 %v5226_v47, %v5226_v47  ;;  %v5983_v6 = vunpack.c.l.b16 %v5467_v29  ;;  %v5992_v46 = vunpack.c.l.b16 %v5476_v56  ;;  %v18896_v14 = vand.u32 15, %v13226_v62  ;;  %v12053_v47 = vld [vmem:[%s12397_s26 + $0x1a4] sm:$0xf0] }
 0x1c8   : > { %v13388_v37 = vpop.f32.mrf.mxu0  ;;  %v18897_v27 = vmov 0  ;;  %v5987_v58 = vunpack.c.l.b16 %v5471_v28  ;;  %v5988_v2 = vunpack.c.l.b16 %v5472_v43  ;;  %v5993_v59 = vunpack.c.l.b16 %v5477_v57 }
 0x1c9   : > { %vm13392_vm15 = vcmp.ge.s32.totalorder %v18896_v14, 1  ;;  %v5994_v41 = vunpack.c.l.b16 %v5478_v50  ;;  %v5989_v18 = vunpack.c.l.b16 %v5473_v11  ;;  %v5990_v31 = vunpack.c.l.b16 %v5474_v4 }
 0x1ca   : > { %v18898_v27 = vsel %vm13392_vm15, 4294967295, %v18897_v27  ;;  %v6275_v42 = vrot.slane %v5984_v53, 7  ;;  %v6277_v40 = vrot.slane %v5985_v12, 6  ;;  %v5991_v33 = vunpack.c.l.b16 %v5475_v38 }
 0x1cb   : > { %18899 = vst [vmem:[#allocation18_spill] sm:$0xff] %v18898_v27  ;;  %v5995_v26 = vunpack.c.l.b16 %v5479_v39  ;;  %v5996_v8 = vunpack.c.l.b16 %v5480_v17  ;;  %v6279_v15 = vrot.slane %v5986_v13, 5  ;;  %v5997_v36 = vunpack.c.l.b16 %v5481_v23 }
 0x1cc   : > { %v5998_v62 = vunpack.c.l.b16 %v5482_v52  ;;  %v6276_v55 = vsel %vm18621_vm9, %v6275_v42, %v5983_v6  ;;  %v6289_v34 = vrot.slane %v5992_v46, 7  ;;  %v6281_v19 = vrot.slane %v5987_v58, 4  ;;  %v13418_v52 = vld [vmem:[%s18553_s2] ss:$0 sm:$0xff] }
 0x1cd   : > { %v6278_v9 = vsel %vm18693_vm3, %v6277_v40, %v6276_v55  ;;  %v6291_v7 = vrot.slane %v5993_v59, 6  ;;  %v6293_v1 = vrot.slane %v5994_v41, 5  ;;  %v6283_v10 = vrot.slane %v5988_v2, 3 }
 0x1ce   : > { %v13398_v20 = vpop.f32.mrf.mxu1  ;;  %v6280_v30 = vsel %vm18692_vm4, %v6279_v15, %v6278_v9  ;;  %v6285_v22 = vrot.slane %v5989_v18, 2  ;;  %v6290_v45 = vsel %vm18621_vm9, %v6289_v34, %v5991_v33  ;;  %v6295_v28 = vrot.slane %v5995_v26, 4  ;;  %v13434_v18 = vld [vmem:[%s18554_s3] ss:$0 sm:$0xff]  ;;  %v12056_v34 = vld [vmem:[%s12397_s26 + $0x1c4] sm:$0xf] }
 0x1cf   : > { %v6282_v29 = vsel %vm18673_vm5, %v6281_v19, %v6280_v30  ;;  %v6292_v56 = vsel %vm18693_vm3, %v6291_v7, %v6290_v45  ;;  %v6297_v43 = vrot.slane %v5996_v8, 3  ;;  %v11000_v11 = vor.u32 %v12054_v24, %v10997_v21  ;;  %v11005_v24 = vld [vmem:[%s12397_s26 + $0x1c8] sm:$0xf0]  ;;  %v10995_v7 = vld [vmem:[%s12397_s26 + $0x1b0] sm:$0xf] }
 0x1d0   : > { %v1629_v5 = vpop.f32.mrf.mxu0  ;;  %v6284_v57 = vsel %vm18649_vm6, %v6283_v10, %v6282_v29  ;;  %v6294_v50 = vsel %vm18692_vm4, %v6293_v1, %v6292_v56  ;;  %v6299_v38 = vrot.slane %v5997_v36, 2  ;;  %v10988_v39 = vor.u32 %v12053_v47, %v10987_v54  ;;  %v12055_v1 = vld [vmem:[%s12397_s26 + $0x1b4] sm:$0xf0] }
 0x1d1   : > { %v1959_v4 = vadd.f32 %v13370_v0, %v1629_v5  ;;  %v6286_v53 = vsel %vm18647_vm7, %v6285_v22, %v6284_v57  ;;  %v6296_v12 = vsel %vm18673_vm5, %v6295_v28, %v6294_v50  ;;  %v6287_v17 = vrot.slane %v5990_v31, 1  ;;  %11352 = vmatmul.msk.bf16.gmra.mxu1 %vm18626_vm2, %v11000_v11 }
 0x1d2   : > { %v6298_v13 = vsel %vm18649_vm6, %v6297_v43, %v6296_v12  ;;  %v6301_v23 = vrot.slane %v5998_v62, 1  ;;  %v2224_v0 = vmul.f32 %v13418_v52, %v13341_v25  ;;  %v7510_v14 = vsel %vm13392_vm15, %v13213_v61, 0.0  ;;  %v18906_v12 = vld [vmem:[#allocation16_spill] sm:$0xff] }
 0x1d3   : > { %v2228_v6 = vmul.f32 %v13418_v52, %v1959_v4  ;;  %v6300_v46 = vsel %vm18647_vm7, %v6299_v38, %v6298_v13  ;;  %1668 = vmatmul.bf16.gmra.mxu0 %v10988_v39  ;;  %v6288_v58 = vsel %vm18624_vm8, %v6287_v17, %v6286_v53  ;;  %v7541_v59 = vpack.c.bf16 %v7510_v14, %v7510_v14 }
 0x1d4   : > { %v6302_v2 = vsel %vm18624_vm8, %v6301_v23, %v6300_v46  ;;  %v2356_v42 = vadd.f32 %v13434_v18, %v2224_v0  ;;  %v6913_v33 = vadd.s32 24, %v13098_v35  ;;  %v1951_v26 = vadd.f32 %v13210_v63, %v13350_v51 }
 0x1d5   : > { %v13429_v41 = vpack.c.b16 %v6302_v2, %v6288_v58  ;;  %v13437_v25 = vadd.f32 %v13434_v18, %v2228_v6  ;;  %7574 = vst.msk [vmem:[#allocation2 + $0x18] sm:$0xf] %vm18603_vm11, %v7541_v59  ;;  %v1954_v8 = vadd.f32 %v13274_v49, %v13374_v48  ;;  %v11008_v10 = vor.u32 %v12056_v34, %v11005_v24 }
 0x1d6   : > { %v13439_v31 = vpop.f32.mrf.mxu1  ;;  %v6730_v15 = vpop.f32.mrf.mxu2  ;;  %v2484_v9 = vmax.f32 %v2356_v42, 0.0  ;;  %v6967_v19 = vand.u32 15, %v6913_v33  ;;  %v2225_v63 = vmul.f32 %v13418_v52, %v1951_v26  ;;  %v10996_v45 = vor.u32 %v12055_v1, %v10995_v7  ;;  %v12194_v33 = vld [vmem:[%s18558_s7 + $0x38] sm:$0xff]  ;;  %v18913_v7 = vld [vmem:[#allocation14_spill] sm:$0xff] }
 0x1d7   : > { %18900 = vst [vmem:[#allocation19_spill] sm:$0xff] %v13429_v41  ;;  %11656 = vmatmul.msk.bf16.gmra.mxu2 %vm18623_vm10, %v13429_v41  ;;  %v18606_v36 = vmax.f32 %v13437_v25, 0.0  ;;  %v6811_v62 = vmul.f32 %v13112_v32, %v6730_v15  ;;  %v2226_v51 = vmul.f32 %v13418_v52, %v1954_v8  ;;  %v18901_v47 = vmov 0  ;;  %9538 = vmatpush.bf16.msra.mxu3 %v12194_v33 }
 0x1d8   : > { %v1631_v61 = vpop.f32.mrf.mxu0  ;;  %vm13468_vm1 = vcmp.le.s32.totalorder %v6967_v19, 14  ;;  %v2357_v56 = vadd.f32 %v13434_v18, %v2225_v63  ;;  %v1956_v43 = vadd.f32 %v13343_v44, %v13388_v37  ;;  %v18905_v11 = vmax.f32 %v13096_v3, 0.0 }
 0x1d9   : > { %v1961_v40 = vadd.f32 %v13386_v16, %v1631_v61  ;;  %v6847_v16 = vadd.f32 %v13127_v60, %v6811_v62  ;;  %v2596_v48 = vmax.f32 %v2484_v9, %v18606_v36  ;;  %v18902_v47 = vsel %vm13468_vm1, 4294967295, %v18901_v47 }
 0x1da   : > { %18903 = vst [vmem:[#allocation20_spill] sm:$0xff] %v18902_v47  ;;  %v2358_v28 = vadd.f32 %v13434_v18, %v2226_v51  ;;  %v18907_v38 = vrot.slane %v18906_v12, 1  ;;  %v18909_v39 = vrot.slane %v18906_v12, 7  ;;  %v2485_v0 = vmax.f32 %v2357_v56, 0.0  ;;  %v12057_v56 = vld [vmem:[%s12397_s26 + $0x1c4] sm:$0xf0] }
 0x1db   : > { %v2229_v55 = vmul.f32 %v13418_v52, %v1961_v40  ;;  %v6879_v49 = vmax.f32 %v6847_v16, 0.0  ;;  %v13481_v4 = vmax.f32 %v2596_v48, %v18905_v11  ;;  %v2227_v46 = vmul.f32 %v13418_v52, %v1956_v43  ;;  %v12191_v47 = vld [vmem:[%s18558_s7 + $0x20] sm:$0xff] }
 0x1dc   : > { %v2486_v59 = vmax.f32 %v2358_v28, 0.0  ;;  %v18914_v1 = vmax.f32 %v18913_v7, 0.0 }
 0x1dd   : > { %v13466_v30 = vadd.f32 %v13434_v18, %v2229_v55  ;;  %v7423_v5 = vrot.slane %v6879_v49, 7  ;;  %v7796_v54 = vrot.slane %v6879_v49, 1  ;;  %v13477_v50 = vpack.c.bf16 %v6879_v49, %v6879_v49  ;;  %v12058_v49 = vld [vmem:[%s12397_s26 + $0x1d4] sm:$0xf] }
 0x1de   : > { %v13463_v21 = vpop.f32.mrf.mxu1  ;;  %v6732_v57 = vpop.f32.mrf.mxu2  ;;  %v2359_v55 = vadd.f32 %v13434_v18, %v2227_v46  ;;  %v13536_v24 = vrot.slane %v13481_v4, 4  ;;  %v3216_v28 = vperm.slane %v13481_v4, 1 }
 0x1df   : > { %18904 = vst [vmem:[#allocation21_spill] sm:$0xff] %v13477_v50  ;;  %v6812_v53 = vmul.f32 %v13112_v32, %v6732_v57  ;;  %v13492_v17 = vsel %vm18616_vm0, %v18909_v39, %v7423_v5  ;;  %v18605_v44 = vmax.f32 %v13466_v30, 0.0 }
 0x1e0   : > { %v1634_v22 = vpop.f32.mrf.mxu0  ;;  %18910 = vst [vmem:[#allocation22_spill] sm:$0xff] %v13492_v17  ;;  %v8117_v32 = vsel %vm13392_vm15, %v13492_v17, 0.0  ;;  %v2487_v43 = vmax.f32 %v2359_v55, 0.0  ;;  %v3218_v57 = vperm.slane %v13536_v24, 1 }
 0x1e1   : > { %v1964_v29 = vadd.f32 %v13398_v20, %v1634_v22  ;;  %v13487_v20 = vsel %vm18669_vm12, %v18907_v38, %v7796_v54  ;;  %11353 = vmatmul.msk.bf16.gmra.mxu1 %vm18626_vm2, %v11008_v10  ;;  %8344 = vst.msk [vmem:[#allocation2 + $0x1c] sm:$0xf] %vm18603_vm11, %v13477_v50  ;;  %v6848_v13 = vadd.f32 %v13127_v60, %v6812_v53  ;;  %v13517_v60 = vrot.slane %v13481_v4, 2  ;;  %v18917_v10 = vld [vmem:[#allocation12_spill] sm:$0xff] }
 0x1e2   : > { %18908 = vst [vmem:[#allocation16_spill] sm:$0xff] %v13487_v20  ;;  %v7888_v3 = vsel %vm13468_vm1, %v13487_v20, 0.0  ;;  %v8149_v6 = vpack.c.bf16 %v8117_v32, %v8117_v32  ;;  %v2597_v61 = vmax.f32 %v2485_v0, %v18605_v44  ;;  %v18918_v22 = vmax.f32 %v18917_v10, 0.0  ;;  %v13627_v10 = vld [vmem:[%s12397_s26 + $0x1e4] sm:$0xf] }
 0x1e3   : > { %v2230_v37 = vmul.f32 %v13418_v52, %v1964_v29  ;;  %v7919_v23 = vpack.c.bf16 %v7888_v3, %v7888_v3  ;;  %1673 = vmatmul.bf16.gmra.mxu0 %v10996_v45  ;;  %v13510_v58 = vmax.f32 %v6848_v13, 0.0  ;;  %v3217_v19 = vperm.slane %v13517_v60, 1  ;;  %v11013_v29 = vld [vmem:[%s12397_s26 + $0x1d8] sm:$0xf0] }
 0x1e4   : > { %8215 = vrot.lane.b32.xlu0 %v8149_v6, %s12279_s21  ;;  %v13559_v45 = vmax.f32 %v2597_v61, %v18918_v22  ;;  %v11016_v39 = vor.u32 %v12058_v49, %v11013_v29  ;;  %v12193_v6 = vld [vmem:[%s18558_s7 + $0x30] sm:$0xff]  ;;  %v13596_v0 = vrot.slane %v13481_v4, 6  ;;  %v13630_v22 = vld [vmem:[%s12397_s26 + $0x1e8] sm:$0xf0] }
 0x1e5   : > { %v13508_v14 = vadd.f32 %v13434_v18, %v2230_v37  ;;  %7985 = vrot.lane.b32.xlu2 %v7919_v23, %s12278_s19  ;;  %v18607_v26 = vrot.slane %v13510_v58, 7  ;;  %v13528_v8 = vpack.c.bf16 %v13510_v58, %v13510_v58  ;;  %v18608_v62 = vrot.slane %v13510_v58, 1  ;;  %9539 = vmatpush.bf16.msra.mxu3 %v12193_v6 }
 0x1e6   : > { %v13514_v2 = vpop.f32.mrf.mxu1  ;;  %v3455_v38 = vsel %vm18693_vm3, %v3217_v19, %v3216_v28  ;;  %v3220_v37 = vperm.slane %v13559_v45, 1  ;;  %v13603_v61 = vrot.slane %v13559_v45, 4  ;;  %v3219_v7 = vperm.slane %v13596_v0, 1 }
 0x1e7   : > { %18911 = vst [vmem:[#allocation23_spill] sm:$0xff] %v13508_v14  ;;  %v18604_v42 = vmax.f32 %v13508_v14, 0.0  ;;  %v7426_v9 = vsel %vm18616_vm0, %v7423_v5, %v18607_v26  ;;  %v7799_v16 = vsel %vm18669_vm12, %v7796_v54, %v18608_v62  ;;  %v11003_v54 = vld [vmem:[%s12397_s26 + $0x1c0] sm:$0xf] }
 0x1e8   : > { %v1636_v40 = vpop.f32.mrf.mxu0  ;;  %18912 = vst [vmem:[#allocation24_spill] sm:$0xff] %v13528_v8  ;;  %v13552_v51 = vpack.c.bf16 %v7426_v9, %v7426_v9  ;;  %v13554_v48 = vpack.c.bf16 %v7799_v16, %v7799_v16  ;;  %v11004_v32 = vor.u32 %v12057_v56, %v11003_v54  ;;  %v3456_v16 = vsel %vm18692_vm4, %v3218_v57, %v3455_v38  ;;  %v13638_v54 = vld [vmem:[%s12397_s26 + $0x1d0] sm:$0xf]  ;;  %v13641_v56 = vld [vmem:[%s12397_s26 + $0x1d4] sm:$0xf0] }
 0x1e9   : > { %v1966_v15 = vadd.f32 %v13439_v31, %v1636_v40  ;;  %v2598_v34 = vmax.f32 %v2486_v59, %v18604_v42  ;;  %8345 = vst.msk [vmem:[#allocation2 + $0x28] sm:$0xf] %vm18603_vm11, %v13528_v8  ;;  %v13600_v59 = vrot.slane %v13559_v45, 2  ;;  %v13606_v40 = vrot.slane %v13559_v45, 6 }
 0x1ea   : > { %18915 = vst [vmem:[#allocation14_spill] sm:$0xff] %v13552_v51  ;;  %8217 = vrot.lane.b32.xlu1 %v13552_v51, %s12279_s21  ;;  %v3222_v28 = vperm.slane %v13603_v61, 1 }
 0x1eb   : > { %v2231_v31 = vmul.f32 %v13418_v52, %v1966_v15  ;;  %v13550_v63 = vmax.f32 %v2598_v34, %v18914_v1  ;;  %18916 = vst [vmem:[#allocation25_spill] sm:$0xff] %v13554_v48  ;;  %v18920_v15 = vld [vmem:[#allocation17_spill] sm:$0xff]  ;;  %v3221_v1 = vperm.slane %v13600_v59, 1  ;;  %v3223_v49 = vperm.slane %v13606_v40, 1 }
 0x1ec   : > { %7577 = vst.msk [vmem:[#allocation2 + $0x3c] sm:$0xf] %vm18603_vm11, %v13552_v51  ;;  %7673 = vrot.lane.b32.xlu0 %v13528_v8, %s12277_s0  ;;  %v18921_v55 = vmax.f32 %v18920_v15, 0.0 }
 0x1ed   : > { %v13562_v5 = vadd.f32 %v13434_v18, %v2231_v31  ;;  %v13574_v11 = vrot.slane %v13550_v63, 2  ;;  %7671 = vrot.lane.b32.xlu2 %v13477_v50, %s12277_s0  ;;  %9010 = vst.msk [vmem:[#allocation2 + $0x8] sm:$0xf] %vm18603_vm11, %v13554_v48  ;;  %v13588_v13 = vrot.slane %v13550_v63, 4  ;;  %v3224_v46 = vperm.slane %v13550_v63, 1  ;;  %v12192_v31 = vld [vmem:[%s18558_s7 + $0x28] sm:$0xff] }
 0x1ee   : > { %v13581_v12 = vpop.f32.mrf.mxu1  ;;  %v13620_v19 = vrot.slane %v13550_v63, 6  ;;  %9540 = vmatpush.bf16.msra.mxu3 %v12192_v31  ;;  %v11012_v31 = vor.u32 %v13641_v56, %v13638_v54  ;;  %vm18622_vm11 = vcmask 519424   ;;  %v11454_v56 = vrot.slane %v13517_v60, 9 }
 0x1ef   : > { %18919 = vst [vmem:[#allocation12_spill] sm:$0xff] %v13562_v5  ;;  %v18602_v53 = vmax.f32 %v13562_v5, 0.0  ;;  %v3225_v33 = vperm.slane %v13574_v11, 1  ;;  %v3461_v57 = vsel %vm18621_vm9, %v3224_v46, %v3223_v49 }
 0x1f0   : > { %v1639_v3 = vpop.f32.mrf.mxu0  ;;  %v3227_v15 = vperm.slane %v13620_v19, 1  ;;  %v4476_v62 = vmax.f32 %v13517_v60, %v11454_v56 }
 0x1f1   : > { %v2599_v23 = vmax.f32 %v2487_v43, %v18602_v53  ;;  %v1969_v9 = vadd.f32 %v13463_v21, %v1639_v3  ;;  %11354 = vmatmul.msk.bf16.gmra.mxu1 %vm18626_vm2, %v11016_v39  ;;  %v3226_v21 = vperm.slane %v13588_v13, 1  ;;  %v3457_v43 = vsel %vm18673_vm5, %v3219_v7, %v3456_v16 }
 0x1f2   : > { %7987 = vrot.lane.b32.xlu1 %v13554_v48, %s12278_s19  ;;  %v3462_v46 = vsel %vm18693_vm3, %v3225_v33, %v3461_v57  ;;  %v11453_v7 = vrot.slane %v13481_v4, 9  ;;  %v11456_v57 = vrot.slane %v13596_v0, 9  ;;  %9541 = vmatpush.bf16.msra.mxu3 %v12191_v47 }
 0x1f3   : > { %v13611_v34 = vmax.f32 %v2599_v23, %v18921_v55  ;;  %1678 = vmatmul.bf16.gmra.mxu0 %v11004_v32  ;;  %v2232_v39 = vmul.f32 %v13418_v52, %v1969_v9  ;;  %v3458_v23 = vsel %vm18649_vm6, %v3220_v37, %v3457_v43  ;;  %v11024_v9 = vor.u32 %v13627_v10, %v13630_v22 }
 0x1f4   : > { %v3459_v16 = vsel %vm18647_vm7, %v3221_v1, %v3458_v23  ;;  %v3463_v49 = vsel %vm18692_vm4, %v3226_v21, %v3462_v46  ;;  %v11461_v37 = vrot.slane %v13550_v63, 9  ;;  %v13668_v1 = vadd.s32 32, %v13098_v35 }
 0x1f5   : > { %v13633_v29 = vrot.slane %v13611_v34, 2  ;;  %v3228_v38 = vperm.slane %v13611_v34, 1  ;;  %v13651_v32 = vrot.slane %v13611_v34, 4  ;;  %v3460_v43 = vsel %vm18624_vm8, %v3222_v28, %v3459_v16 }
 0x1f6   : > { %v13648_v3 = vpop.f32.mrf.mxu1  ;;  %v3464_v53 = vsel %vm18673_vm5, %v3227_v15, %v3463_v49  ;;  %v13671_v33 = vadd.f32 %v13434_v18, %v2232_v39  ;;  %v2831_v10 = vrot.slane %v13611_v34, 6  ;;  %v11455_v28 = vrot.slane %v13536_v24, 9 }
 0x1f7   : > { %v3229_v55 = vperm.slane %v13633_v29, 1  ;;  %v3230_v22 = vperm.slane %v13651_v32, 1  ;;  %v3465_v54 = vsel %vm18649_vm6, %v3228_v38, %v3464_v53  ;;  %v3631_v39 = vsel %vm18616_vm0, 0.0, %v3460_v43 }
 0x1f8   : > { %v1641_v6 = vpop.f32.mrf.mxu0  ;;  %v11457_v15 = vrot.slane %v13559_v45, 9  ;;  %v11458_v16 = vrot.slane %v13600_v59, 9  ;;  %v11459_v46 = vrot.slane %v13603_v61, 9  ;;  %v11460_v53 = vrot.slane %v13606_v40, 9 }
 0x1f9   : > { %v3466_v21 = vsel %vm18647_vm7, %v3229_v55, %v3465_v54  ;;  %v13681_v23 = vadd.f32 %v13514_v2, %v1641_v6  ;;  %v11462_v38 = vrot.slane %v13574_v11, 9  ;;  %v11463_v55 = vrot.slane %v13588_v13, 9 }
 0x1fa   : > { %v13693_v54 = vsel %vm18624_vm8, %v3230_v22, %v3466_v21  ;;  %v11464_v2 = vrot.slane %v13620_v19, 9  ;;  %v11465_v6 = vrot.slane %v13611_v34, 9  ;;  %v11466_v43 = vrot.slane %v13633_v29, 9 }
 0x1fb   : > { %v11467_v44 = vrot.slane %v13651_v32, 9  ;;  %v11468_v36 = vrot.slane %v2831_v10, 9  ;;  %v4475_v26 = vmax.f32 %v13481_v4, %v11453_v7  ;;  %v4477_v41 = vmax.f32 %v13536_v24, %v11455_v28 }
 0x1fc   : > { %v4478_v22 = vmax.f32 %v13596_v0, %v11456_v57  ;;  %v4479_v21 = vmax.f32 %v13559_v45, %v11457_v15  ;;  %v4480_v27 = vmax.f32 %v13600_v59, %v11458_v16  ;;  %v4481_v48 = vmax.f32 %v13603_v61, %v11459_v46 }
 0x1fd   : > { %v4482_v8 = vmax.f32 %v13606_v40, %v11460_v53  ;;  %v4483_v51 = vmax.f32 %v13550_v63, %v11461_v37  ;;  %v4707_v50 = vrot.slane %v3631_v39, 2  ;;  %vm18648_vm0 = vcmask 781824  }
 0x1fe   : > { %v13690_v49 = vpop.f32.mrf.mxu1  ;;  %v4484_v4 = vmax.f32 %v13574_v11, %v11462_v38  ;;  %v4708_v60 = vrot.slane %v3631_v39, 4  ;;  %v4709_v7 = vrot.slane %v3631_v39, 6  ;;  %v4710_v24 = vrot.slane %v13693_v54, 2 }
 0x1ff   : > { %v4711_v45 = vrot.slane %v13693_v54, 4  ;;  %v4712_v0 = vrot.slane %v13693_v54, 6  ;;  %v4811_v59 = vrot.slane %v3631_v39, 1  ;;  %v4812_v61 = vrot.slane %v4707_v50, 1 }
 0x200   : > { %v13698_v42 = vpop.f32.mrf.mxu0  ;;  %v7666_v20 = vpop.permute.xlu0 %7665  ;;  %v4485_v63 = vmax.f32 %v13588_v13, %v11463_v55  ;;  %v4486_v11 = vmax.f32 %v13620_v19, %v11464_v2  ;;  %v4813_v40 = vrot.slane %v4708_v60, 1  ;;  %v4814_v37 = vrot.slane %v4709_v7, 1 }
 0x201   : > { %11355 = vmatmul.msk.bf16.gmra.mxu1 %vm18626_vm2, %v11024_v9  ;;  %7759 = vst.msk [vmem:[#allocation2] sm:$0xf] %vm18622_vm11, %v7666_v20  ;;  %v4487_v56 = vmax.f32 %v13611_v34, %v11465_v6  ;;  %v4488_v9 = vmax.f32 %v13633_v29, %v11466_v43  ;;  %v4815_v28 = vrot.slane %v13693_v54, 1  ;;  %v4816_v57 = vrot.slane %v4710_v24, 1 }
 0x202   : > { %7760 = vst.msk [vmem:[#allocation2 + $0xc] sm:$0xf] %vm18622_vm11, %v7666_v20  ;;  %v4489_v16 = vmax.f32 %v13651_v32, %v11467_v44  ;;  %v4817_v46 = vrot.slane %v4711_v45, 1  ;;  %v4818_v20 = vrot.slane %v4712_v0, 1  ;;  %v5227_v19 = vmax.f32 %v4475_v26, %v3631_v39 }
 0x203   : > { %1683 = vmatmul.bf16.gmra.mxu0 %v11012_v31  ;;  %v4490_v31 = vmax.f32 %v2831_v10, %v11468_v36  ;;  %v5228_v38 = vmax.f32 %v4476_v62, %v4811_v59  ;;  %v5229_v55 = vmax.f32 %v4477_v41, %v4707_v50  ;;  %v5230_v34 = vmax.f32 %v4478_v22, %v4812_v61 }
 0x204   : > { %v5231_v2 = vmax.f32 %v4479_v21, %v4708_v60  ;;  %v5232_v29 = vmax.f32 %v4480_v27, %v4813_v40  ;;  %v5233_v6 = vmax.f32 %v4481_v48, %v4709_v7  ;;  %v5234_v43 = vmax.f32 %v4482_v8, %v4814_v37  ;;  %v12190_v27 = vld [vmem:[%s18558_s7 + $0x18] sm:$0xff] }
 0x205   : > { %v5235_v36 = vmax.f32 %v4483_v51, %v13693_v54  ;;  %v5236_v44 = vmax.f32 %v4484_v4, %v4815_v28  ;;  %v5237_v32 = vmax.f32 %v4485_v63, %v4710_v24  ;;  %v5238_v10 = vmax.f32 %v4486_v11, %v4816_v57  ;;  %9542 = vmatpush.bf16.msra.mxu3 %v12190_v27  ;;  %v12189_v63 = vld [vmem:[%s18558_s7 + $0x10] sm:$0xff] }
 0x206   : > { %v13722_v15 = vpop.f32.mrf.mxu1  ;;  %v13725_v53 = vpop.permute.xlu2 %8213  ;;  %v5239_v14 = vmax.f32 %v4487_v56, %v4711_v45  ;;  %v5240_v26 = vmax.f32 %v4488_v9, %v4817_v46  ;;  %v5241_v62 = vmax.f32 %v4489_v16, %v4712_v0  ;;  %v5242_v41 = vmax.f32 %v4490_v31, %v4818_v20 }
 0x207   : > { %v5483_v50 = vpack.c.bf16 %v5227_v19, %v5227_v19  ;;  %v5484_v8 = vpack.c.bf16 %v5228_v38, %v5228_v38  ;;  %v5485_v51 = vpack.c.bf16 %v5229_v55, %v5229_v55  ;;  %v5486_v48 = vpack.c.bf16 %v5230_v34, %v5230_v34 }
 0x208   : > { %v13727_v13 = vpop.f32.mrf.mxu0  ;;  %v13733_v5 = vpop.permute.xlu0 %7979  ;;  %v5487_v39 = vpack.c.bf16 %v5231_v2, %v5231_v2  ;;  %v5488_v54 = vpack.c.bf16 %v5232_v29, %v5232_v29  ;;  %v5489_v22 = vpack.c.bf16 %v5233_v6, %v5233_v6  ;;  %v5490_v21 = vpack.c.bf16 %v5234_v43, %v5234_v43  ;;  %v12188_v6 = vld [vmem:[%s18558_s7 + $0x8] sm:$0xff] }
 0x209   : > { %18922 = vst [vmem:[#allocation17_spill] sm:$0xff] %v13733_v5  ;;  %v5491_v4 = vpack.c.bf16 %v5235_v36, %v5235_v36  ;;  %v5492_v60 = vpack.c.bf16 %v5236_v44, %v5236_v44  ;;  %v5493_v7 = vpack.c.bf16 %v5237_v32, %v5237_v32  ;;  %v5494_v24 = vpack.c.bf16 %v5238_v10, %v5238_v10  ;;  %v12062_v10 = vld [vmem:[%s12397_s26 + $0x1f4] sm:$0xf] }
 0x20a   : > { %8076 = vst.msk [vmem:[#allocation2] sm:$0xf] %vm18648_vm0, %v13733_v5  ;;  %v5495_v45 = vpack.c.bf16 %v5239_v14, %v5239_v14  ;;  %v5496_v0 = vpack.c.bf16 %v5240_v26, %v5240_v26  ;;  %v5497_v59 = vpack.c.bf16 %v5241_v62, %v5241_v62  ;;  %v5498_v61 = vpack.c.bf16 %v5242_v41, %v5242_v41 }
 0x20b   : > { %v5999_v40 = vunpack.c.l.b16 %v5483_v50  ;;  %v6000_v37 = vunpack.c.l.b16 %v5484_v8  ;;  %v6001_v56 = vunpack.c.l.b16 %v5485_v51  ;;  %v6002_v9 = vunpack.c.l.b16 %v5486_v48  ;;  %9543 = vmatpush.bf16.msra.mxu3 %v12189_v63  ;;  %v11029_v50 = vld [vmem:[%s12397_s26 + $0x1f8] sm:$0xf0] }
 0x20c   : > { %v6003_v28 = vunpack.c.l.b16 %v5487_v39  ;;  %v6004_v57 = vunpack.c.l.b16 %v5488_v54  ;;  %v6005_v16 = vunpack.c.l.b16 %v5489_v22  ;;  %v13746_v31 = vunpack.c.l.b16 %v5490_v21 }
 0x20d   : > { %v6007_v46 = vunpack.c.l.b16 %v5491_v4  ;;  %v6008_v20 = vunpack.c.l.b16 %v5492_v60  ;;  %v6009_v19 = vunpack.c.l.b16 %v5493_v7  ;;  %v6010_v38 = vunpack.c.l.b16 %v5494_v24  ;;  %v11019_v60 = vld [vmem:[%s12397_s26 + $0x1e0] sm:$0xf]  ;;  %v12061_v7 = vld [vmem:[%s12397_s26 + $0x1e4] sm:$0xf0] }
 0x20e   : > { %v13740_v47 = vpop.f32.mrf.mxu1  ;;  %v7668_v11 = vpop.permute.xlu2 %7667  ;;  %v6011_v55 = vunpack.c.l.b16 %v5495_v45  ;;  %v6012_v34 = vunpack.c.l.b16 %v5496_v0  ;;  %v6013_v2 = vunpack.c.l.b16 %v5497_v59  ;;  %v6014_v29 = vunpack.c.l.b16 %v5498_v61 }
 0x20f   : > { %7761 = vst.msk [vmem:[#allocation2 + $0x18] sm:$0xf] %vm18622_vm11, %v7668_v11  ;;  %v6303_v43 = vrot.slane %v6000_v37, 7  ;;  %v6305_v36 = vrot.slane %v6001_v56, 6  ;;  %v6307_v44 = vrot.slane %v6002_v9, 5  ;;  %v6309_v32 = vrot.slane %v6003_v28, 4  ;;  %9544 = vmatpush.bf16.msra.mxu3 %v12188_v6 }
 0x210   : > { %v1649_v14 = vpop.f32.mrf.mxu0  ;;  %v6311_v26 = vrot.slane %v6004_v57, 3  ;;  %v6313_v62 = vrot.slane %v6005_v16, 2  ;;  %v6315_v41 = vrot.slane %v13746_v31, 1  ;;  %v6317_v27 = vrot.slane %v6008_v20, 7  ;;  %v12187_v56 = vld [vmem:[%s18558_s7] sm:$0xff] }
 0x211   : > { %v6304_v8 = vsel %vm18621_vm9, %v6303_v43, %v5999_v40  ;;  %v6319_v51 = vrot.slane %v6009_v19, 6  ;;  %v6321_v48 = vrot.slane %v6010_v38, 5  ;;  %v6323_v39 = vrot.slane %v6011_v55, 4  ;;  %v13780_v19 = vld [vmem:[%s18556_s5] ss:$0 sm:$0xff] }
 0x212   : > { %v6306_v54 = vsel %vm18693_vm3, %v6305_v36, %v6304_v8  ;;  %v6318_v22 = vsel %vm18621_vm9, %v6317_v27, %v6007_v46  ;;  %v6325_v21 = vrot.slane %v6012_v34, 3  ;;  %v6327_v4 = vrot.slane %v6013_v2, 2 }
 0x213   : > { %v6308_v45 = vsel %vm18692_vm4, %v6307_v44, %v6306_v54  ;;  %v6320_v0 = vsel %vm18693_vm3, %v6319_v51, %v6318_v22  ;;  %v6329_v59 = vrot.slane %v6014_v29, 1  ;;  %v11032_v61 = vor.u32 %v12062_v10, %v11029_v50  ;;  %9545 = vmatpush.bf16.msra.mxu3 %v12187_v56 }
 0x214   : > { %v6310_v63 = vsel %vm18673_vm5, %v6309_v32, %v6308_v45  ;;  %v6322_v11 = vsel %vm18692_vm4, %v6321_v48, %v6320_v0  ;;  %v1979_v40 = vadd.f32 %v13690_v49, %v1649_v14  ;;  %vm18625_vm9 = vcmask 1044224  }
 0x215   : > { %v6312_v9 = vsel %vm18649_vm6, %v6311_v26, %v6310_v63  ;;  %v6324_v28 = vsel %vm18673_vm5, %v6323_v39, %v6322_v11  ;;  %11356 = vmatmul.msk.bf16.gmra.mxu1 %vm18626_vm2, %v11032_v61  ;;  %v11020_v31 = vor.u32 %v12061_v7, %v11019_v60  ;;  %v2233_v55 = vmul.f32 %v13418_v52, %v13681_v23  ;;  %v13798_v23 = vld [vmem:[%s18557_s6] ss:$0 sm:$0xff]  ;;  %v11037_v61 = vld [vmem:[%s12397_s26 + $0x208] sm:$0xf0] }
 0x216   : > { %v13759_v24 = vpop.f32.mrf.mxu1  ;;  %v6314_v20 = vsel %vm18647_vm7, %v6313_v62, %v6312_v9  ;;  %v6326_v49 = vsel %vm18649_vm6, %v6325_v21, %v6324_v28  ;;  %v2236_v14 = vmul.f32 %v13418_v52, %v1979_v40  ;;  %v6915_v2 = vadd.s32 40, %v13098_v35 }
 0x217   : > { %v7982_v57 = vpop.permute.xlu1 %7981  ;;  %v6735_v16 = vpop.f32.mrf.mxu2  ;;  %1688 = vmatmul.bf16.gmra.mxu0 %v11020_v31  ;;  %v6316_v29 = vsel %vm18624_vm8, %v6315_v41, %v6314_v20  ;;  %v1974_v44 = vadd.f32 %v13581_v12, %v13698_v42  ;;  %v6974_v26 = vand.u32 15, %v13668_v1  ;;  %v2492_v62 = vmax.f32 %v13671_v33, 0.0 }
 0x218   : > { %v1651_v37 = vpop.f32.mrf.mxu0  ;;  %8077 = vst.msk [vmem:[#allocation2 + $0xc] sm:$0xf] %vm18648_vm0, %v7982_v57  ;;  %v6813_v38 = vmul.f32 %v13780_v19, %v6735_v16  ;;  %v13793_v43 = vadd.f32 %v13434_v18, %v2236_v14  ;;  %v6981_v10 = vand.u32 15, %v6915_v2  ;;  %v2365_v8 = vadd.f32 %v13434_v18, %v2233_v55  ;;  %v11027_v57 = vld [vmem:[%s12397_s26 + $0x1f0] sm:$0xf] }
 0x219   : > { %v1981_v46 = vadd.f32 %v13722_v15, %v1651_v37  ;;  %v6328_v15 = vsel %vm18647_vm7, %v6327_v4, %v6326_v49  ;;  %8309 = vst.msk [vmem:[#allocation2 + $0xc] sm:$0xf] %vm18625_vm9, %v13725_v53  ;;  %v18925_v12 = vmov 0  ;;  %v2234_v54 = vmul.f32 %v13418_v52, %v1974_v44  ;;  %v12063_v16 = vld [vmem:[%s12397_s26 + $0x1f4] sm:$0xf0] }
 0x21a   : > { %v6330_v6 = vsel %vm18624_vm8, %v6329_v59, %v6328_v15  ;;  %v6849_v36 = vadd.f32 %v13798_v23, %v6813_v38  ;;  %v18630_v41 = vmax.f32 %v13793_v43, 0.0  ;;  %v1976_v22 = vadd.f32 %v13648_v3, %v13727_v13  ;;  %v12064_v59 = vld [vmem:[%s12397_s26 + $0x204] sm:$0xf] }
 0x21b   : > { %v2237_v34 = vmul.f32 %v13418_v52, %v1981_v46  ;;  %v7670_v53 = vpop.permute.xlu0 %7669  ;;  %v13803_v32 = vpack.c.b16 %v6330_v6, %v6316_v29  ;;  %v18929_v60 = vmov 0  ;;  %v18932_v45 = vrot.slane %v13510_v58, 1 }
 0x21c   : > { %7762 = vst.msk [vmem:[#allocation2 + $0x24] sm:$0xf] %vm18622_vm11, %v7670_v53  ;;  %v13809_v27 = vmax.f32 %v6849_v36, 0.0  ;;  %vm13819_vm11 = vcmp.le.s32.totalorder %v6981_v10, 14  ;;  %v2600_v1 = vmax.f32 %v2492_v62, %v18630_v41  ;;  %v18934_v3 = vrot.slane %v13510_v58, 7 }
 0x21d   : > { %18923 = vst [vmem:[#allocation26_spill] sm:$0xff] %v13803_v32  ;;  %11657 = vmatmul.msk.bf16.gmra.mxu2 %vm18623_vm10, %v13803_v32  ;;  %v13817_v42 = vadd.f32 %v13434_v18, %v2237_v34  ;;  %v18926_v12 = vsel %vm13819_vm11, 4294967295, %v18925_v12  ;;  %vm13834_vm10 = vcmp.ge.s32.totalorder %v6974_v26, 1  ;;  %vm18935_vm8 = vcmask 1040384  }
 0x21e   : > { %v13811_v50 = vpop.f32.mrf.mxu1  ;;  %18927 = vst [vmem:[#allocation28_spill] sm:$0xff] %v18926_v12  ;;  %v7427_v33 = vrot.slane %v13809_v27, 7  ;;  %v7800_v51 = vrot.slane %v13809_v27, 1  ;;  %v13829_v39 = vpack.c.bf16 %v13809_v27, %v13809_v27  ;;  %v18930_v60 = vsel %vm13834_vm10, 4294967295, %v18929_v60 }
 0x21f   : > { %18924 = vst [vmem:[#allocation27_spill] sm:$0xff] %v13817_v42  ;;  %v8212_v21 = vpop.permute.xlu1 %8211  ;;  %v6737_v4 = vpop.f32.mrf.mxu2  ;;  %v2493_v11 = vmax.f32 %v2365_v8, 0.0  ;;  %v18939_v9 = vmax.f32 %v13437_v25, 0.0  ;;  %v7512_v31 = vsel %vm13834_vm10, %v13492_v17, 0.0  ;;  %v11040_v14 = vor.u32 %v12064_v59, %v11037_v61 }
 0x220   : > { %v1654_v48 = vpop.f32.mrf.mxu0  ;;  %18928 = vst [vmem:[#allocation29_spill] sm:$0xff] %v13829_v39  ;;  %v6814_v7 = vmul.f32 %v13780_v19, %v6737_v4  ;;  %v13845_v0 = vsel %vm18669_vm12, %v18932_v45, %v7800_v51  ;;  %v13850_v13 = vsel %vm18935_vm8, %v18934_v3, %v7427_v33  ;;  %vm18938_vm8 = vcmask 257024   ;;  %v12140_v10 = vld [vmem:[#allocation2 + $0x8] sm:$0xf0] }
 0x221   : > { %18931 = vst [vmem:[#allocation30_spill] sm:$0xff] %v18930_v60  ;;  %v1984_v63 = vadd.f32 %v13740_v47, %v1654_v48  ;;  %v7890_v40 = vsel %vm13819_vm11, %v13845_v0, 0.0  ;;  %v8951_v56 = vsel %vm13161_vm13, %v13845_v0, 0.0  ;;  %v8119_v58 = vsel %vm13834_vm10, %v13850_v13, 0.0 }
 0x222   : > { %8308 = vst.msk [vmem:[#allocation2] sm:$0xf] %vm18625_vm9, %v8212_v21  ;;  %v13868_v28 = vmax.f32 %v2600_v1, %v18939_v9  ;;  %v18628_v47 = vmax.f32 %v13817_v42, 0.0  ;;  %v6850_v46 = vadd.f32 %v13798_v23, %v6814_v7  ;;  %v7921_v20 = vpack.c.bf16 %v7890_v40, %v7890_v40 }
 0x223   : > { %18933 = vst [vmem:[#allocation31_spill] sm:$0xff] %v13845_v0  ;;  %v8981_v49 = vpack.c.bf16 %v8951_v56, %v8951_v56  ;;  %v2366_v38 = vadd.f32 %v13434_v18, %v2234_v54  ;;  %v2235_v55 = vmul.f32 %v13418_v52, %v1976_v22  ;;  %v8151_v25 = vpack.c.bf16 %v8119_v58, %v8119_v58 }
 0x224   : > { %18936 = vst [vmem:[#allocation32_spill] sm:$0xff] %v13850_v13  ;;  %v2238_v15 = vmul.f32 %v13418_v52, %v1984_v63  ;;  %v13882_v2 = vmax.f32 %v6850_v46, 0.0  ;;  %7989 = vrot.lane.b32.xlu2 %v7921_v20, %s12278_s19  ;;  %v11028_v29 = vor.u32 %v12063_v16, %v11027_v57  ;;  %v7543_v6 = vpack.c.bf16 %v7512_v31, %v7512_v31 }
 0x225   : > { %8346 = vst.msk [vmem:[#allocation2 + $0x34] sm:$0xf] %vm18938_vm8, %v13829_v39  ;;  %v13887_v36 = vrot.slane %v13868_v28, 2  ;;  %v2601_v53 = vmax.f32 %v2493_v11, %v18628_v47  ;;  %8219 = vrot.lane.b32.xlu0 %v8151_v25, %s12279_s21  ;;  %11357 = vmatmul.msk.bf16.gmra.mxu1 %vm18626_vm2, %v11040_v14  ;;  %v2494_v21 = vmax.f32 %v2366_v38, 0.0  ;;  %v2367_v4 = vadd.f32 %v13434_v18, %v2235_v55  ;;  %vm18943_vm2 = vmmov %vm18938_vm8  ;;  %v12066_v14 = vld [vmem:[%s12397_s26 + $0x214] sm:$0xf] }
 0x226   : > { %v13880_v34 = vpop.f32.mrf.mxu1  ;;  %9011 = vst.msk [vmem:[#allocation2 + $0x14] sm:$0xf] %vm18938_vm8, %v8981_v49  ;;  %v13893_v44 = vadd.f32 %v13434_v18, %v2238_v15  ;;  %v18631_v1 = vrot.slane %v13882_v2, 7  ;;  %v13899_v48 = vpack.c.bf16 %v13882_v2, %v13882_v2  ;;  %v18632_v22 = vrot.slane %v13882_v2, 1  ;;  %v11045_v15 = vld [vmem:[%s12397_s26 + $0x218] sm:$0xf0] }
 0x227   : > { %v7984_v62 = vpop.permute.xlu1 %7983  ;;  %7576 = vst.msk [vmem:[#allocation2 + $0x30] sm:$0xf] %vm18938_vm8, %v7543_v6  ;;  %v13908_v3 = vrot.slane %v13868_v28, 4  ;;  %1693 = vmatmul.bf16.gmra.mxu0 %v11028_v29  ;;  %vm18942_vm9 = vcmask 1040384   ;;  %v3232_v63 = vperm.slane %v13887_v36, 1  ;;  %v18946_v56 = vmax.f32 %v13466_v30, 0.0 }
 0x228   : > { %18940 = vst [vmem:[#allocation33_spill] sm:$0xff] %v13893_v44  ;;  %v1656_v26 = vpop.f32.mrf.mxu0  ;;  %v18629_v7 = vmax.f32 %v13893_v44, 0.0  ;;  %v7803_v61 = vsel %vm18669_vm12, %v7800_v51, %v18632_v22  ;;  %v3231_v27 = vperm.slane %v13868_v28, 1  ;;  %v18948_v51 = vld [vmem:[#allocation23_spill] sm:$0xff]  ;;  %v2495_v31 = vmax.f32 %v2367_v4, 0.0 }
 0x229   : > { %v11671_v8 = vld [vmem:[#allocation2] sm:$0xf]  ;;  %18941 = vst [vmem:[#allocation34_spill] sm:$0xff] %v13899_v48  ;;  %v1986_v54 = vadd.f32 %v13759_v24, %v1656_v26  ;;  %v7430_v24 = vsel %vm18942_vm9, %v7427_v33, %v18631_v1  ;;  %v13926_v33 = vpack.c.bf16 %v7803_v61, %v7803_v61  ;;  %v13930_v58 = vmax.f32 %v2601_v53, %v18946_v56  ;;  %vm18950_vm9 = vmmov %vm18943_vm2 }
 0x22a   : > { %8078 = vst.msk [vmem:[#allocation2 + $0x18] sm:$0xf] %vm18648_vm0, %v7984_v62  ;;  %v11672_v45 = vor.u32 %v12140_v10, %v11671_v8  ;;  %v2602_v11 = vmax.f32 %v2494_v21, %v18629_v7  ;;  %v13924_v40 = vpack.c.bf16 %v7430_v24, %v7430_v24  ;;  %v18949_v57 = vmax.f32 %v18948_v51, 0.0  ;;  %v11035_v26 = vld [vmem:[%s12397_s26 + $0x200] sm:$0xf] }
 0x22b   : > { %8347 = vst.msk [vmem:[#allocation2 + $0x40] sm:$0xf] %vm18943_vm2, %v13899_v48  ;;  %v2239_v59 = vmul.f32 %v13418_v52, %v1986_v54  ;;  %v3233_v46 = vperm.slane %v13908_v3, 1  ;;  %v3468_v20 = vsel %vm18693_vm3, %v3232_v63, %v3231_v27  ;;  %v13966_v29 = vrot.slane %v13868_v28, 6  ;;  %v18951_v54 = vld [vmem:[#allocation12_spill] sm:$0xff] }
 0x22c   : > { %9546 = vmatmul.bf16.vlgmr.msra.gmra.mxu3 %v11672_v45  ;;  %18944 = vst [vmem:[#allocation35_spill] sm:$0xff] %v13924_v40  ;;  %v13938_v16 = vmax.f32 %v2602_v11, %v18949_v57  ;;  %8221 = vrot.lane.b32.xlu1 %v13924_v40, %s12279_s21  ;;  %v13969_v6 = vrot.slane %v13930_v58, 2  ;;  %v3235_v53 = vperm.slane %v13930_v58, 1  ;;  %v13975_v62 = vrot.slane %v13930_v58, 6  ;;  %v12065_v45 = vld [vmem:[%s12397_s26 + $0x204] sm:$0xf0] }
 0x22d   : > { %18945 = vst [vmem:[#allocation36_spill] sm:$0xff] %v13926_v33  ;;  %v13933_v9 = vadd.f32 %v13434_v18, %v2239_v59  ;;  %7675 = vrot.lane.b32.xlu2 %v13829_v39, %s12277_s0  ;;  %7677 = vrot.lane.b32.xlu0 %v13899_v48, %s12277_s0  ;;  %v18952_v21 = vmax.f32 %v18951_v54, 0.0  ;;  %v13984_v24 = vrot.slane %v13930_v58, 4  ;;  %v3234_v61 = vperm.slane %v13966_v29, 1 }
 0x22e   : > { %7579 = vst.msk [vmem:[#allocation2 + $0x54] sm:$0xf] %vm18943_vm2, %v13924_v40  ;;  %v13944_v30 = vpop.f32.mrf.mxu1  ;;  %v13954_v49 = vrot.slane %v13938_v16, 2  ;;  %v13960_v55 = vrot.slane %v13938_v16, 4  ;;  %v3239_v10 = vperm.slane %v13938_v16, 1  ;;  %v13987_v59 = vrot.slane %v13938_v16, 6 }
 0x22f   : > { %18947 = vst [vmem:[#allocation37_spill] sm:$0xff] %v13933_v9  ;;  %v18627_v18 = vmax.f32 %v13933_v9, 0.0  ;;  %v3236_v63 = vperm.slane %v13969_v6, 1  ;;  %v3238_v11 = vperm.slane %v13975_v62, 1  ;;  %v3469_v56 = vsel %vm18692_vm4, %v3233_v46, %v3468_v20 }
 0x230   : > { %9012 = vst.msk [vmem:[#allocation2 + $0x20] sm:$0xf] %vm18950_vm9, %v13926_v33  ;;  %v1659_v38 = vpop.f32.mrf.mxu0  ;;  %v3240_v8 = vperm.slane %v13954_v49, 1  ;;  %v3241_v27 = vperm.slane %v13960_v55, 1  ;;  %v11048_v51 = vor.u32 %v12066_v14, %v11045_v15  ;;  %v3470_v54 = vsel %vm18673_vm5, %v3234_v61, %v3469_v56  ;;  %v14009_v14 = vld [vmem:[%s12397_s26 + $0x228] sm:$0xf0] }
 0x231   : > { %v2603_v25 = vmax.f32 %v2495_v31, %v18627_v18  ;;  %v11036_v31 = vor.u32 %v12065_v45, %v11035_v26  ;;  %vm18953_vm8 = vcmask 1041409   ;;  %v1989_v20 = vadd.f32 %v13811_v50, %v1659_v38  ;;  %v14006_v18 = vld [vmem:[%s12397_s26 + $0x224] sm:$0xf]  ;;  %v14014_v26 = vld [vmem:[%s12397_s26 + $0x210] sm:$0xf] }
 0x232   : > { %v3237_v15 = vperm.slane %v13984_v24, 1  ;;  %v3471_v47 = vsel %vm18649_vm6, %v3235_v53, %v3470_v54  ;;  %v14017_v45 = vld [vmem:[%s12397_s26 + $0x214] sm:$0xf0]  ;;  %vm18954_vm2 = vcmask 154624   ;;  %v11469_v56 = vrot.slane %v13868_v28, 9 }
 0x233   : > { %v13980_v4 = vmax.f32 %v2603_v25, %v18952_v21  ;;  %v3474_v21 = vsel %vm18953_vm8, %v3239_v10, %v3238_v11  ;;  %v3242_v10 = vperm.slane %v13987_v59, 1  ;;  %v3472_v50 = vsel %vm18647_vm7, %v3236_v63, %v3471_v47 }
 0x234   : > { %7991 = vrot.lane.b32.xlu1 %v13926_v33, %s12278_s19  ;;  %v3475_v38 = vsel %vm18693_vm3, %v3240_v8, %v3474_v21  ;;  %vm18955_vm9 = vcmask 1047559   ;;  %v11477_v63 = vrot.slane %v13938_v16, 9  ;;  %vm18956_vm8 = vcmask 1040384  }
 0x235   : > { %v13995_v57 = vrot.slane %v13980_v4, 2  ;;  %v3243_v46 = vperm.slane %v13980_v4, 1  ;;  %v14020_v61 = vrot.slane %v13980_v4, 4  ;;  %11358 = vmatmul.msk.bf16.gmra.mxu1 %vm18954_vm2, %v11048_v51  ;;  %v3476_v53 = vsel %vm18692_vm4, %v3241_v27, %v3475_v38  ;;  %vm18957_vm2 = vmmov %vm18955_vm9 }
 0x236   : > { %v13999_v25 = vpop.f32.mrf.mxu1  ;;  %v3477_v54 = vsel %vm18673_vm5, %v3242_v10, %v3476_v53  ;;  %v3473_v47 = vsel %vm18955_vm9, %v3237_v15, %v3472_v50  ;;  %v14038_v51 = vmul.f32 %v13418_v52, %v1989_v20  ;;  %v2843_v27 = vrot.slane %v13980_v4, 6 }
 0x237   : > { %v3244_v11 = vperm.slane %v13995_v57, 1  ;;  %1698 = vmatmul.bf16.gmra.mxu0 %v11036_v31  ;;  %v3478_v8 = vsel %vm18649_vm6, %v3243_v46, %v3477_v54  ;;  %v3245_v21 = vperm.slane %v14020_v61, 1  ;;  %v11470_v38 = vrot.slane %v13887_v36, 9 }
 0x238   : > { %v1661_v7 = vpop.f32.mrf.mxu0  ;;  %v11471_v15 = vrot.slane %v13908_v3, 9  ;;  %v3632_v46 = vsel %vm18956_vm8, 0.0, %v3473_v47  ;;  %v11472_v52 = vrot.slane %v13966_v29, 9  ;;  %v11473_v20 = vrot.slane %v13930_v58, 9 }
 0x239   : > { %v14043_v31 = vadd.f32 %v13880_v34, %v1661_v7  ;;  %v3479_v10 = vsel %vm18647_vm7, %v3244_v11, %v3478_v8  ;;  %v11474_v53 = vrot.slane %v13969_v6, 9  ;;  %v11475_v54 = vrot.slane %v13984_v24, 9 }
 0x23a   : > { %v11476_v34 = vrot.slane %v13975_v62, 9  ;;  %v11478_v7 = vrot.slane %v13954_v49, 9  ;;  %v11479_v11 = vrot.slane %v13960_v55, 9  ;;  %v3480_v1 = vsel %vm18957_vm2, %v3245_v21, %v3479_v10 }
 0x23b   : > { %v11480_v47 = vrot.slane %v13987_v59, 9  ;;  %v11481_v41 = vrot.slane %v13980_v4, 9  ;;  %v11482_v32 = vrot.slane %v13995_v57, 9  ;;  %v11483_v5 = vrot.slane %v14020_v61, 9 }
 0x23c   : > { %v11484_v60 = vrot.slane %v2843_v27, 9  ;;  %v4491_v33 = vmax.f32 %v13868_v28, %v11469_v56  ;;  %v4492_v48 = vmax.f32 %v13887_v36, %v11470_v38  ;;  %v4493_v40 = vmax.f32 %v13908_v3, %v11471_v15 }
 0x23d   : > { %v4494_v39 = vmax.f32 %v13966_v29, %v11472_v52  ;;  %v4495_v21 = vmax.f32 %v13930_v58, %v11473_v20  ;;  %v4496_v10 = vmax.f32 %v13969_v6, %v11474_v53  ;;  %v4497_v0 = vmax.f32 %v13984_v24, %v11475_v54 }
 0x23e   : > { %v14048_v50 = vpop.f32.mrf.mxu1  ;;  %v4713_v17 = vrot.slane %v3632_v46, 2  ;;  %v4714_v37 = vrot.slane %v3632_v46, 4  ;;  %v4498_v12 = vmax.f32 %v13975_v62, %v11476_v34  ;;  %v4716_v9 = vrot.slane %v3480_v1, 2 }
 0x23f   : > { %v7986_v8 = vpop.permute.xlu2 %7985  ;;  %v4717_v42 = vrot.slane %v3480_v1, 4  ;;  %v4819_v28 = vrot.slane %v3632_v46, 1  ;;  %v4499_v3 = vmax.f32 %v13938_v16, %v11477_v63  ;;  %v4718_v29 = vrot.slane %v3480_v1, 6 }
 0x240   : > { %v1664_v22 = vpop.f32.mrf.mxu0  ;;  %8079 = vst.msk [vmem:[#allocation2 + $0x24] sm:$0xf] %vm18648_vm0, %v7986_v8  ;;  %v4715_v8 = vrot.slane %v3632_v46, 6  ;;  %v4820_v56 = vrot.slane %v4713_v17, 1  ;;  %v4500_v6 = vmax.f32 %v13954_v49, %v11478_v7  ;;  %v4501_v24 = vmax.f32 %v13960_v55, %v11479_v11 }
 0x241   : > { %v14073_v36 = vadd.f32 %v13944_v30, %v1664_v22  ;;  %v4821_v38 = vrot.slane %v4714_v37, 1  ;;  %v4823_v15 = vrot.slane %v3480_v1, 1  ;;  %v4502_v62 = vmax.f32 %v13987_v59, %v11480_v47 }
 0x242   : > { %v4503_v52 = vmax.f32 %v13980_v4, %v11481_v41  ;;  %v4822_v20 = vrot.slane %v4715_v8, 1  ;;  %v4824_v53 = vrot.slane %v4716_v9, 1  ;;  %v4504_v16 = vmax.f32 %v13995_v57, %v11482_v32 }
 0x243   : > { %v4505_v63 = vmax.f32 %v14020_v61, %v11483_v5  ;;  %v4825_v54 = vrot.slane %v4717_v42, 1  ;;  %v5244_v34 = vmax.f32 %v4492_v48, %v4819_v28  ;;  %v18958_v49 = vor.u32 %v14006_v18, %v14009_v14 }
 0x244   : > { %vm18959_vm9 = vcmask 154624   ;;  %vm18960_vm8 = vcmask 519424   ;;  %v4506_v55 = vmax.f32 %v2843_v27, %v11484_v60  ;;  %v4826_v41 = vrot.slane %v4718_v29, 1 }
 0x245   : > { %11359 = vmatmul.msk.bf16.gmra.mxu1 %vm18959_vm9, %v18958_v49  ;;  %v5245_v4 = vmax.f32 %v4493_v40, %v4713_v17  ;;  %v5246_v59 = vmax.f32 %v4494_v39, %v4820_v56  ;;  %v5243_v7 = vmax.f32 %v4491_v33, %v3632_v46  ;;  %v5247_v11 = vmax.f32 %v4495_v21, %v4714_v37 }
 0x246   : > { %v14076_v58 = vpop.f32.mrf.mxu1  ;;  %v5248_v47 = vmax.f32 %v4496_v10, %v4821_v38  ;;  %v5252_v44 = vmax.f32 %v4500_v6, %v4823_v15  ;;  %v18961_v5 = vor.u32 %v14017_v45, %v14014_v26  ;;  %v5249_v32 = vmax.f32 %v4497_v0, %v4715_v8 }
 0x247   : > { %v7672_v22 = vpop.permute.xlu2 %7671  ;;  %v5250_v48 = vmax.f32 %v4498_v12, %v4822_v20  ;;  %v5253_v57 = vmax.f32 %v4501_v24, %v4716_v9  ;;  %v5254_v18 = vmax.f32 %v4502_v62, %v4824_v53  ;;  %v5251_v14 = vmax.f32 %v4499_v3, %v3480_v1 }
 0x248   : > { %v14082_v30 = vpop.f32.mrf.mxu0  ;;  %7763 = vst.msk [vmem:[#allocation2 + $0x30] sm:$0xf] %vm18960_vm8, %v7672_v22  ;;  %1703 = vmatmul.bf16.gmra.mxu0 %v18961_v5  ;;  %v5255_v61 = vmax.f32 %v4503_v52, %v4717_v42  ;;  %v5256_v28 = vmax.f32 %v4504_v16, %v4825_v54  ;;  %v5500_v22 = vpack.c.bf16 %v5244_v34, %v5244_v34  ;;  %vm18962_vm2 = vcmask 1041409  }
 0x249   : > { %v5257_v60 = vmax.f32 %v4505_v63, %v4718_v29  ;;  %v5258_v27 = vmax.f32 %v4506_v55, %v4826_v41  ;;  %v5501_v17 = vpack.c.bf16 %v5245_v4, %v5245_v4  ;;  %v5502_v39 = vpack.c.bf16 %v5246_v59, %v5246_v59  ;;  %v12070_v59 = vld [vmem:[%s12397_s26 + $0x234] sm:$0xf]  ;;  %vm18963_vm9 = vmmov %vm18962_vm2 }
 0x24a   : > { %v5499_v40 = vpack.c.bf16 %v5243_v7, %v5243_v7  ;;  %v5503_v37 = vpack.c.bf16 %v5247_v11, %v5247_v11  ;;  %v5504_v33 = vpack.c.bf16 %v5248_v47, %v5248_v47  ;;  %v5508_v46 = vpack.c.bf16 %v5252_v44, %v5252_v44  ;;  %v11061_v7 = vld [vmem:[%s12397_s26 + $0x238] sm:$0xf0] }
 0x24b   : > { %v5505_v21 = vpack.c.bf16 %v5249_v32, %v5249_v32  ;;  %v5506_v10 = vpack.c.bf16 %v5250_v48, %v5250_v48  ;;  %v5509_v26 = vpack.c.bf16 %v5253_v57, %v5253_v57  ;;  %v5510_v45 = vpack.c.bf16 %v5254_v18, %v5254_v18  ;;  %v11051_v48 = vld [vmem:[%s12397_s26 + $0x220] sm:$0xf] }
 0x24c   : > { %v5507_v12 = vpack.c.bf16 %v5251_v14, %v5251_v14  ;;  %v5511_v9 = vpack.c.bf16 %v5255_v61, %v5255_v61  ;;  %v5512_v1 = vpack.c.bf16 %v5256_v28, %v5256_v28  ;;  %v6016_v42 = vunpack.c.l.b16 %v5500_v22  ;;  %v12069_v28 = vld [vmem:[%s12397_s26 + $0x224] sm:$0xf0] }
 0x24d   : > { %v5513_v8 = vpack.c.bf16 %v5257_v60, %v5257_v60  ;;  %v5514_v3 = vpack.c.bf16 %v5258_v27, %v5258_v27  ;;  %v6017_v29 = vunpack.c.l.b16 %v5501_v17  ;;  %v6018_v56 = vunpack.c.l.b16 %v5502_v39 }
 0x24e   : > { %v14094_v0 = vpop.f32.mrf.mxu1  ;;  %v6015_v24 = vunpack.c.l.b16 %v5499_v40  ;;  %v6019_v38 = vunpack.c.l.b16 %v5503_v37  ;;  %v6020_v44 = vunpack.c.l.b16 %v5504_v33  ;;  %v6024_v15 = vunpack.c.l.b16 %v5508_v46 }
 0x24f   : > { %v6021_v62 = vunpack.c.l.b16 %v5505_v21  ;;  %v6022_v52 = vunpack.c.l.b16 %v5506_v10  ;;  %v6025_v20 = vunpack.c.l.b16 %v5509_v26  ;;  %v6026_v53 = vunpack.c.l.b16 %v5510_v45 }
 0x250   : > { %v1669_v6 = vpop.f32.mrf.mxu0  ;;  %v6027_v16 = vunpack.c.l.b16 %v5511_v9  ;;  %v6028_v63 = vunpack.c.l.b16 %v5512_v1  ;;  %v6331_v54 = vrot.slane %v6016_v42, 7  ;;  %v6333_v34 = vrot.slane %v6017_v29, 6 }
 0x251   : > { %v6023_v49 = vunpack.c.l.b16 %v5507_v12  ;;  %v6029_v55 = vunpack.c.l.b16 %v5513_v8  ;;  %v6030_v41 = vunpack.c.l.b16 %v5514_v3  ;;  %v6335_v4 = vrot.slane %v6018_v56, 5  ;;  %v14118_v8 = vld [vmem:[%s18553_s2] ss:$0 sm:$0xff] }
 0x252   : > { %v6332_v11 = vsel %vm18962_vm2, %v6331_v54, %v6015_v24  ;;  %v6337_v47 = vrot.slane %v6019_v38, 4  ;;  %v6345_v5 = vrot.slane %v6024_v15, 7  ;;  %v6347_v32 = vrot.slane %v6025_v20, 6 }
 0x253   : > { %v6334_v57 = vsel %vm18693_vm3, %v6333_v34, %v6332_v11  ;;  %v6339_v18 = vrot.slane %v6020_v44, 3  ;;  %v6341_v14 = vrot.slane %v6021_v62, 2  ;;  %v6349_v61 = vrot.slane %v6026_v53, 5  ;;  %v14127_v44 = vld [vmem:[%s18554_s3] ss:$0 sm:$0xff] }
 0x254   : > { %v6336_v22 = vsel %vm18692_vm4, %v6335_v4, %v6334_v57  ;;  %v6346_v60 = vsel %vm18963_vm9, %v6345_v5, %v6023_v49  ;;  %v6351_v27 = vrot.slane %v6027_v16, 4  ;;  %v6353_v17 = vrot.slane %v6028_v63, 3  ;;  %v11069_v57 = vld [vmem:[%s12397_s26 + $0x248] sm:$0xf0] }
 0x255   : > { %v6338_v37 = vsel %vm18673_vm5, %v6337_v47, %v6336_v22  ;;  %v6348_v33 = vsel %vm18693_vm3, %v6347_v32, %v6346_v60  ;;  %v11064_v46 = vor.u32 %v12070_v59, %v11061_v7  ;;  %v1999_v21 = vadd.f32 %v14048_v50, %v1669_v6 }
 0x256   : > { %v8216_v39 = vpop.permute.xlu0 %8215  ;;  %v14104_v40 = vpop.f32.mrf.mxu1  ;;  %vm18964_vm8 = vcmask 1044224   ;;  %v6340_v26 = vsel %vm18649_vm6, %v6339_v18, %v6338_v37  ;;  %v6350_v45 = vsel %vm18692_vm4, %v6349_v61, %v6348_v33  ;;  %v6355_v12 = vrot.slane %v6029_v55, 2  ;;  %v11059_v33 = vld [vmem:[%s12397_s26 + $0x230] sm:$0xf] }
 0x257   : > { %8310 = vst.msk [vmem:[#allocation2 + $0x18] sm:$0xf] %vm18964_vm8, %v8216_v39  ;;  %v11052_v9 = vor.u32 %v12069_v28, %v11051_v48  ;;  %v6342_v1 = vsel %vm18647_vm7, %v6341_v14, %v6340_v26  ;;  %v6352_v42 = vsel %vm18673_vm5, %v6351_v27, %v6350_v45  ;;  %vm18965_vm2 = vcmask 154624   ;;  %v12072_v48 = vld [vmem:[%s12397_s26 + $0x244] sm:$0xf] }
 0x258   : > { %v1671_v10 = vpop.f32.mrf.mxu0  ;;  %11360 = vmatmul.msk.bf16.gmra.mxu1 %vm18965_vm2, %v11064_v46  ;;  %v2244_v50 = vmul.f32 %v14118_v8, %v1999_v21  ;;  %v6917_v29 = vadd.s32 56, %v13098_v35  ;;  %v6343_v56 = vrot.slane %v6022_v52, 1  ;;  %v6354_v6 = vsel %vm18649_vm6, %v6353_v17, %v6352_v42  ;;  %v12071_v46 = vld [vmem:[%s12397_s26 + $0x234] sm:$0xf0] }
 0x259   : > { %v6357_v24 = vrot.slane %v6030_v41, 1  ;;  %1708 = vmatmul.bf16.gmra.mxu0 %v11052_v9  ;;  %v2372_v15 = vadd.f32 %v14127_v44, %v14038_v51  ;;  %v6356_v62 = vsel %vm18647_vm7, %v6355_v12, %v6354_v6  ;;  %v2001_v20 = vadd.f32 %v14076_v58, %v1671_v10 }
 0x25a   : > { %v6740_v3 = vpop.f32.mrf.mxu2  ;;  %v6916_v52 = vadd.s32 48, %v13098_v35  ;;  %v2241_v53 = vmul.f32 %v14118_v8, %v14043_v31  ;;  %vm18966_vm9 = vcmask 1047559   ;;  %v14142_v49 = vadd.f32 %v14127_v44, %v2244_v50 }
 0x25b   : > { %v6815_v38 = vmul.f32 %v13780_v19, %v6740_v3  ;;  %v6344_v16 = vsel %vm18966_vm9, %v6343_v56, %v6342_v1  ;;  %vm18967_vm8 = vmmov %vm18966_vm9  ;;  %v6995_v55 = vand.u32 15, %v6917_v29  ;;  %v2242_v41 = vmul.f32 %v14118_v8, %v14073_v36 }
 0x25c   : > { %v6358_v63 = vsel %vm18967_vm8, %v6357_v24, %v6356_v62  ;;  %v8218_v51 = vpop.permute.xlu1 %8217  ;;  %v6988_v58 = vand.u32 15, %v6916_v52  ;;  %vm18969_vm2 = vcmask 1044224   ;;  %v2500_v7 = vmax.f32 %v2372_v15, 0.0 }
 0x25d   : > { %v6851_v54 = vadd.f32 %v13798_v23, %v6815_v38  ;;  %v14139_v34 = vpack.c.b16 %v6358_v63, %v6344_v16  ;;  %8311 = vst.msk [vmem:[#allocation2 + $0x24] sm:$0xf] %vm18969_vm2, %v8218_v51  ;;  %vm18970_vm9 = vcmask 261120   ;;  %v2245_v11 = vmul.f32 %v14118_v8, %v2001_v20 }
 0x25e   : > { %v7674_v4 = vpop.permute.xlu0 %7673  ;;  %v14149_v59 = vpop.f32.mrf.mxu1  ;;  %vm18971_vm8 = vcmask 519424   ;;  %v14156_v36 = vadd.f32 %v14127_v44, %v2241_v53  ;;  %v18655_v18 = vmax.f32 %v14142_v49, 0.0  ;;  %vm14163_vm2 = vcmp.le.s32.totalorder %v6995_v55, 14  ;;  %v11683_v3 = vld [vmem:[#allocation2 + $0x18] sm:$0xf] }
 0x25f   : > { %18968 = vst [vmem:[#allocation23_spill] sm:$0xff] %v14139_v34  ;;  %v14146_v31 = vmax.f32 %v6851_v54, 0.0  ;;  %11658 = vmatmul.msk.bf16.gmra.mxu2 %vm18970_vm9, %v14139_v34  ;;  %v18972_v61 = vmov 0  ;;  %vm14167_vm9 = vcmp.ge.s32.totalorder %v6988_v58, 1  ;;  %v18975_v28 = vmov 0 }
 0x260   : > { %7764 = vst.msk [vmem:[#allocation2 + $0x3c] sm:$0xf] %vm18971_vm8, %v7674_v4  ;;  %v1674_v47 = vpop.f32.mrf.mxu0  ;;  %v18973_v61 = vsel %vm14163_vm2, 4294967295, %v18972_v61  ;;  %v18976_v28 = vsel %vm14167_vm9, 4294967295, %v18975_v28  ;;  %v2374_v60 = vadd.f32 %v14127_v44, %v2242_v41  ;;  %v18979_v17 = vrot.slane %v13882_v2, 1 }
 0x261   : > { %v7431_v5 = vrot.slane %v14146_v31, 7  ;;  %v7804_v32 = vrot.slane %v14146_v31, 1  ;;  %18974 = vst [vmem:[#allocation12_spill] sm:$0xff] %v18973_v61  ;;  %v14173_v22 = vpack.c.bf16 %v14146_v31, %v14146_v31  ;;  %v2004_v37 = vadd.f32 %v14094_v0, %v1674_v47  ;;  %v18997_v31 = vld [vmem:[#allocation33_spill] sm:$0xff] }
 0x262   : > { %v6742_v14 = vpop.f32.mrf.mxu2  ;;  %18977 = vst [vmem:[#allocation38_spill] sm:$0xff] %v18976_v28  ;;  %v1996_v21 = vadd.f32 %v13999_v25, %v14082_v30  ;;  %v14190_v10 = vadd.f32 %v14127_v44, %v2245_v11  ;;  %v18982_v26 = vrot.slane %v13882_v2, 7  ;;  %vm18983_vm8 = vcmask 1040384  }
 0x263   : > { %18978 = vst [vmem:[#allocation39_spill] sm:$0xff] %v14173_v22  ;;  %v6816_v27 = vmul.f32 %v13780_v19, %v6742_v14  ;;  %v14182_v39 = vsel %vm18669_vm12, %v18979_v17, %v7804_v32  ;;  %v11072_v45 = vor.u32 %v12072_v48, %v11069_v57  ;;  %vm18985_vm7 = vcmask 257024  }
 0x264   : > { %18980 = vst [vmem:[#allocation40_spill] sm:$0xff] %v14182_v39  ;;  %v14195_v19 = vsel %vm18983_vm8, %v18982_v26, %v7431_v5  ;;  %v7892_v0 = vsel %vm14163_vm2, %v14182_v39, 0.0  ;;  %v8953_v30 = vsel %vm13468_vm1, %v14182_v39, 0.0  ;;  %v7514_v2 = vsel %vm14167_vm9, %v13850_v13, 0.0  ;;  %v7988_v50 = vpop.permute.xlu1 %7987  ;;  %vm18992_vm6 = vmmov %vm18985_vm7 }
 0x265   : > { %18981 = vst [vmem:[#allocation41_spill] sm:$0xff] %v14190_v10  ;;  %v6852_v12 = vadd.f32 %v13798_v23, %v6816_v27  ;;  %v2604_v9 = vmax.f32 %v2500_v7, %v18655_v18  ;;  %v7923_v1 = vpack.c.bf16 %v7892_v0, %v7892_v0  ;;  %v8983_v42 = vpack.c.bf16 %v8953_v30, %v8953_v30  ;;  %v12143_v23 = vld [vmem:[#allocation2 + $0x20] sm:$0xf0]  ;;  %v19000_v30 = vld [vmem:[#allocation27_spill] sm:$0xff] }
 0x266   : > { %18984 = vst [vmem:[#allocation42_spill] sm:$0xff] %v14195_v19  ;;  %v11060_v29 = vor.u32 %v12071_v46, %v11059_v33  ;;  %v8121_v6 = vsel %vm14167_vm9, %v14195_v19, 0.0  ;;  %v2246_v24 = vmul.f32 %v14118_v8, %v2004_v37  ;;  %v11684_v38 = vor.u32 %v12143_v23, %v11683_v3  ;;  %v14218_v15 = vpop.f32.mrf.mxu1  ;;  %v11067_v23 = vld [vmem:[%s12397_s26 + $0x240] sm:$0xf] }
 0x267   : > { %8348 = vst.msk [vmem:[#allocation2 + $0x4c] sm:$0xf] %vm18985_vm7, %v14173_v22  ;;  %v14211_v56 = vmax.f32 %v6852_v12, 0.0  ;;  %v2243_v62 = vmul.f32 %v14118_v8, %v1996_v21  ;;  %v18652_v20 = vmax.f32 %v14190_v10, 0.0  ;;  %7993 = vrot.lane.b32.xlu2 %v7923_v1, %s12278_s19  ;;  %v8153_v52 = vpack.c.bf16 %v8121_v6, %v8121_v6  ;;  %v11077_v12 = vld [vmem:[%s12397_s26 + $0x258] sm:$0xf0] }
 0x268   : > { %8080 = vst.msk [vmem:[#allocation2 + $0x30] sm:$0xf] %vm18648_vm0, %v7988_v50  ;;  %v1676_v53 = vpop.f32.mrf.mxu0  ;;  %v7545_v16 = vpack.c.bf16 %v7514_v2, %v7514_v2  ;;  %v14225_v63 = vadd.f32 %v14127_v44, %v2246_v24  ;;  %9551 = vmatmul.bf16.gmra.mxu3 %v11684_v38  ;;  %v2501_v58 = vmax.f32 %v14156_v36, 0.0  ;;  %v18989_v41 = vmax.f32 %v13793_v43, 0.0 }
 0x269   : > { %9013 = vst.msk [vmem:[#allocation2 + $0x2c] sm:$0xf] %vm18985_vm7, %v8983_v42  ;;  %v18653_v54 = vrot.slane %v14211_v56, 7  ;;  %v14230_v51 = vpack.c.bf16 %v14211_v56, %v14211_v56  ;;  %v2006_v55 = vadd.f32 %v14104_v40, %v1676_v53  ;;  %8223 = vrot.lane.b32.xlu0 %v8153_v52, %s12279_s21  ;;  %vm18990_vm8 = vcmask 154624   ;;  %1713 = vmatmul.bf16.gmra.mxu0 %v11060_v29  ;;  %v12073_v29 = vld [vmem:[%s12397_s26 + $0x244] sm:$0xf0] }
 0x26a   : > { %18987 = vst [vmem:[#allocation43_spill] sm:$0xff] %v14225_v63  ;;  %v14236_v4 = vmax.f32 %v2604_v9, %v18989_v41  ;;  %11361 = vmatmul.msk.bf16.gmra.mxu1 %vm18990_vm8, %v11072_v45  ;;  %v18654_v7 = vrot.slane %v14211_v56, 1  ;;  %v2502_v11 = vmax.f32 %v2374_v60, 0.0  ;;  %v18651_v47 = vmax.f32 %v14225_v63, 0.0  ;;  %v12074_v45 = vld [vmem:[%s12397_s26 + $0x254] sm:$0xf] }
 0x26b   : > { %18988 = vst [vmem:[#allocation44_spill] sm:$0xff] %v14230_v51  ;;  %vm18991_vm0 = vcmask 1040384   ;;  %v2247_v43 = vmul.f32 %v14118_v8, %v2006_v55  ;;  %v2375_v36 = vadd.f32 %v14127_v44, %v2243_v62  ;;  %v19001_v2 = vmax.f32 %v19000_v30, 0.0  ;;  %v19002_v62 = vld [vmem:[#allocation37_spill] sm:$0xff] }
 0x26c   : > { %7578 = vst.msk [vmem:[#allocation2 + $0x48] sm:$0xf] %vm18985_vm7, %v7545_v16  ;;  %v7434_v40 = vsel %vm18991_vm0, %v7431_v5, %v18653_v54  ;;  %v7807_v57 = vsel %vm18669_vm12, %v7804_v32, %v18654_v7  ;;  %v2605_v5 = vmax.f32 %v2501_v58, %v18652_v20  ;;  %v2606_v14 = vmax.f32 %v2502_v11, %v18651_v47  ;;  %vm18996_vm0 = vmmov %vm18992_vm6 }
 0x26d   : > { %8349 = vst.msk [vmem:[#allocation2 + $0x58] sm:$0xf] %vm18992_vm6, %v14230_v51  ;;  %v14250_v48 = vpack.c.bf16 %v7434_v40, %v7434_v40  ;;  %v14262_v60 = vadd.f32 %v14127_v44, %v2247_v43  ;;  %v14264_v27 = vpack.c.bf16 %v7807_v57, %v7807_v57  ;;  %v14267_v17 = vrot.slane %v14236_v4, 2  ;;  %vm18999_vm6 = vmmov %vm18996_vm0 }
 0x26e   : > { %v18998_v32 = vmax.f32 %v18997_v31, 0.0  ;;  %v14278_v46 = vpop.f32.mrf.mxu1  ;;  %v2503_v21 = vmax.f32 %v2375_v36, 0.0  ;;  %v14283_v26 = vrot.slane %v14236_v4, 4  ;;  %v14291_v9 = vmax.f32 %v2605_v5, %v19001_v2 }
 0x26f   : > { %18993 = vst [vmem:[#allocation45_spill] sm:$0xff] %v14250_v48  ;;  %8225 = vrot.lane.b32.xlu1 %v14250_v48, %s12279_s21  ;;  %v18650_v33 = vmax.f32 %v14262_v60, 0.0  ;;  %7679 = vrot.lane.b32.xlu2 %v14173_v22, %s12277_s0  ;;  %v3247_v1 = vperm.slane %v14267_v17, 1  ;;  %v11080_v3 = vor.u32 %v12074_v45, %v11077_v12  ;;  %v3246_v6 = vperm.slane %v14236_v4, 1 }
 0x270   : > { %18994 = vst [vmem:[#allocation46_spill] sm:$0xff] %v14262_v60  ;;  %v14275_v37 = vmax.f32 %v2606_v14, %v18998_v32  ;;  %v1679_v0 = vpop.f32.mrf.mxu0  ;;  %v3248_v24 = vperm.slane %v14283_v26, 1  ;;  %v19003_v52 = vmax.f32 %v19002_v62, 0.0  ;;  %v14314_v55 = vrot.slane %v14236_v4, 6 }
 0x271   : > { %18995 = vst [vmem:[#allocation47_spill] sm:$0xff] %v14264_v27  ;;  %7681 = vrot.lane.b32.xlu0 %v14230_v51, %s12277_s0  ;;  %v2607_v42 = vmax.f32 %v2503_v21, %v18650_v33  ;;  %v2009_v16 = vadd.f32 %v14149_v59, %v1679_v0  ;;  %v14317_v58 = vrot.slane %v14291_v9, 2  ;;  %v14320_v41 = vrot.slane %v14291_v9, 6 }
 0x272   : > { %7581 = vst.msk [vmem:[#allocation2 + $0x6c] sm:$0xf] %vm18996_vm0, %v14250_v48  ;;  %v14299_v50 = vrot.slane %v14275_v37, 2  ;;  %v14306_v38 = vrot.slane %v14275_v37, 4  ;;  %v3481_v11 = vsel %vm18693_vm3, %v3247_v1, %v3246_v6  ;;  %v3254_v40 = vperm.slane %v14275_v37, 1 }
 0x273   : > { %9014 = vst.msk [vmem:[#allocation2 + $0x38] sm:$0xf] %vm18999_vm6, %v14264_v27  ;;  %v14310_v53 = vmax.f32 %v2607_v42, %v19003_v52  ;;  %v11068_v43 = vor.u32 %v12073_v29, %v11067_v23  ;;  %v14327_v59 = vrot.slane %v14291_v9, 4  ;;  %v3250_v36 = vperm.slane %v14291_v9, 1  ;;  %v14346_v1 = vld [vmem:[%s12397_s26 + $0x264] sm:$0xf] }
 0x274   : > { %v3255_v57 = vperm.slane %v14299_v50, 1  ;;  %v14334_v14 = vrot.slane %v14275_v37, 6  ;;  %v3256_v32 = vperm.slane %v14306_v38, 1  ;;  %v3249_v21 = vperm.slane %v14314_v55, 1  ;;  %v14349_v42 = vld [vmem:[%s12397_s26 + $0x268] sm:$0xf0] }
 0x275   : > { %v14337_v31 = vrot.slane %v14310_v53, 2  ;;  %v3251_v45 = vperm.slane %v14317_v58, 1  ;;  %v3253_v12 = vperm.slane %v14320_v41, 1  ;;  %v3258_v0 = vperm.slane %v14310_v53, 1  ;;  %v14354_v29 = vld [vmem:[%s12397_s26 + $0x250] sm:$0xf] }
 0x276   : > { %v14331_v5 = vpop.f32.mrf.mxu1  ;;  %v2248_v30 = vmul.f32 %v14118_v8, %v2009_v16  ;;  %v3482_v23 = vsel %vm18692_vm4, %v3248_v24, %v3481_v11  ;;  %v14357_v6 = vld [vmem:[%s12397_s26 + $0x254] sm:$0xf0]  ;;  %v14360_v62 = vrot.slane %v14310_v53, 4  ;;  %v3252_v52 = vperm.slane %v14327_v59, 1 }
 0x277   : > { %7995 = vrot.lane.b32.xlu1 %v14264_v27, %s12278_s19  ;;  %v3483_v16 = vsel %vm18673_vm5, %v3249_v21, %v3482_v23  ;;  %vm19004_vm7 = vcmask 1041409   ;;  %v3257_v47 = vperm.slane %v14334_v14, 1  ;;  %v3259_v24 = vperm.slane %v14337_v31, 1 }
 0x278   : > { %v1681_v2 = vpop.f32.mrf.mxu0  ;;  %v3487_v33 = vsel %vm19004_vm7, %v3254_v40, %v3253_v12  ;;  %vm19005_vm0 = vcmask 1045509   ;;  %vm19006_vm6 = vcmask 1046534   ;;  %v11485_v7 = vrot.slane %v14236_v4, 9 }
 0x279   : > { %1718 = vmatmul.bf16.gmra.mxu0 %v11068_v43  ;;  %v3488_v11 = vsel %vm18693_vm3, %v3255_v57, %v3487_v33  ;;  %v11088_v21 = vor.u32 %v14346_v1, %v14349_v42  ;;  %v11076_v40 = vor.u32 %v14357_v6, %v14354_v29  ;;  %v11493_v12 = vrot.slane %v14275_v37, 9  ;;  %vm19008_vm7 = vmmov %vm19005_vm0 }
 0x27a   : > { %11362 = vmatmul.msk.bf16.gmra.mxu1 %vm18990_vm8, %v11080_v3  ;;  %v3484_v3 = vsel %vm19005_vm0, %v3250_v36, %v3483_v16  ;;  %v3489_v54 = vsel %vm18692_vm4, %v3256_v32, %v3488_v11  ;;  %v3260_v36 = vperm.slane %v14360_v62, 1  ;;  %vm19007_vm8 = vcmask 1047559   ;;  %vm19009_vm0 = vmmov %vm19006_vm6 }
 0x27b   : > { %v3485_v20 = vsel %vm19006_vm6, %v3251_v45, %v3484_v3  ;;  %v3490_v43 = vsel %vm18673_vm5, %v3257_v47, %v3489_v54  ;;  %v14382_v32 = vadd.f32 %v14127_v44, %v2248_v30  ;;  %v14385_v45 = vadd.f32 %v14218_v15, %v1681_v2 }
 0x27c   : > { %v3486_v33 = vsel %vm19007_vm8, %v3252_v52, %v3485_v20  ;;  %v3491_v57 = vsel %vm19008_vm7, %v3258_v0, %v3490_v43  ;;  %v2855_v1 = vrot.slane %v14310_v53, 6  ;;  %v11486_v54 = vrot.slane %v14267_v17, 9 }
 0x27d   : > { %v3492_v42 = vsel %vm19009_vm0, %v3259_v24, %v3491_v57  ;;  %v11487_v47 = vrot.slane %v14283_v26, 9  ;;  %v11488_v29 = vrot.slane %v14314_v55, 9  ;;  %v11489_v20 = vrot.slane %v14291_v9, 9 }
 0x27e   : > { %v7990_v23 = vpop.permute.xlu2 %7989  ;;  %vm19010_vm6 = vcmask 781824   ;;  %v14394_v0 = vpop.f32.mrf.mxu1  ;;  %vm19011_vm8 = vcmask 1040384   ;;  %v11490_v30 = vrot.slane %v14317_v58, 9  ;;  %v11491_v2 = vrot.slane %v14327_v59, 9 }
 0x27f   : > { %8081 = vst.msk [vmem:[#allocation2 + $0x3c] sm:$0xf] %vm19010_vm6, %v7990_v23  ;;  %v3633_v15 = vsel %vm19011_vm8, 0.0, %v3486_v33  ;;  %v11492_v6 = vrot.slane %v14320_v41, 9  ;;  %vm19012_vm7 = vcmask 1047559   ;;  %v11494_v16 = vrot.slane %v14299_v50, 9 }
 0x280   : > { %v3493_v52 = vsel %vm19012_vm7, %v3260_v36, %v3492_v42  ;;  %v11495_v24 = vrot.slane %v14306_v38, 9  ;;  %v11496_v3 = vrot.slane %v14334_v14, 9  ;;  %v14404_v11 = vpop.f32.mrf.mxu0  ;;  %v11497_v43 = vrot.slane %v14310_v53, 9 }
 0x281   : > { %v11498_v33 = vrot.slane %v14337_v31, 9  ;;  %v11499_v57 = vrot.slane %v14360_v62, 9  ;;  %v11500_v23 = vrot.slane %v2855_v1, 9  ;;  %v4507_v18 = vmax.f32 %v14236_v4, %v11485_v7 }
 0x282   : > { %v4508_v34 = vmax.f32 %v14267_v17, %v11486_v54  ;;  %v4509_v36 = vmax.f32 %v14283_v26, %v11487_v47  ;;  %v4510_v42 = vmax.f32 %v14314_v55, %v11488_v29  ;;  %v4511_v28 = vmax.f32 %v14291_v9, %v11489_v20 }
 0x283   : > { %v4512_v27 = vmax.f32 %v14317_v58, %v11490_v30  ;;  %v4513_v51 = vmax.f32 %v14327_v59, %v11491_v2  ;;  %v4514_v48 = vmax.f32 %v14320_v41, %v11492_v6  ;;  %v4719_v22 = vrot.slane %v3633_v15, 2 }
 0x284   : > { %v4720_v39 = vrot.slane %v3633_v15, 4  ;;  %v4721_v13 = vrot.slane %v3633_v15, 6  ;;  %v4722_v25 = vrot.slane %v3493_v52, 2  ;;  %v4515_v4 = vmax.f32 %v14275_v37, %v11493_v12 }
 0x285   : > { %v4516_v7 = vmax.f32 %v14299_v50, %v11494_v16  ;;  %v4723_v17 = vrot.slane %v3493_v52, 4  ;;  %v4827_v26 = vrot.slane %v3633_v15, 1  ;;  %v4517_v55 = vmax.f32 %v14306_v38, %v11495_v24 }
 0x286   : > { %v4724_v9 = vrot.slane %v3493_v52, 6  ;;  %v4828_v47 = vrot.slane %v4719_v22, 1  ;;  %v4829_v58 = vrot.slane %v4720_v39, 1  ;;  %vm19013_vm0 = vcmask 519424   ;;  %v14426_v38 = vpop.f32.mrf.mxu1 }
 0x287   : > { %v7676_v54 = vpop.permute.xlu2 %7675  ;;  %v4518_v41 = vmax.f32 %v14334_v14, %v11496_v3  ;;  %v4519_v59 = vmax.f32 %v14310_v53, %v11497_v43  ;;  %v4831_v29 = vrot.slane %v3493_v52, 1  ;;  %v4832_v20 = vrot.slane %v4722_v25, 1 }
 0x288   : > { %7765 = vst.msk [vmem:[#allocation2 + $0x48] sm:$0xf] %vm19013_vm0, %v7676_v54  ;;  %vm19014_vm6 = vcmask 154624   ;;  %v4520_v37 = vmax.f32 %v14337_v31, %v11498_v33  ;;  %v4521_v50 = vmax.f32 %v14360_v62, %v11499_v57  ;;  %v4830_v12 = vrot.slane %v4721_v13, 1  ;;  %v14428_v54 = vpop.f32.mrf.mxu0 }
 0x289   : > { %v4833_v30 = vrot.slane %v4723_v17, 1  ;;  %1723 = vmatmul.bf16.gmra.mxu0 %v11076_v40  ;;  %v4522_v2 = vmax.f32 %v2855_v1, %v11500_v23  ;;  %v5260_v6 = vmax.f32 %v4508_v34, %v4827_v26  ;;  %v5261_v16 = vmax.f32 %v4509_v36, %v4719_v22 }
 0x28a   : > { %11363 = vmatmul.msk.bf16.gmra.mxu1 %vm19014_vm6, %v11088_v21  ;;  %v5262_v24 = vmax.f32 %v4510_v42, %v4828_v47  ;;  %v4834_v14 = vrot.slane %v4724_v9, 1  ;;  %v5259_v3 = vmax.f32 %v4507_v18, %v3633_v15  ;;  %v5263_v53 = vmax.f32 %v4511_v28, %v4720_v39 }
 0x28b   : > { %v5264_v43 = vmax.f32 %v4512_v27, %v4829_v58  ;;  %v5265_v21 = vmax.f32 %v4513_v51, %v4721_v13  ;;  %v5268_v61 = vmax.f32 %v4516_v7, %v4831_v29  ;;  %v5269_v31 = vmax.f32 %v4517_v55, %v4722_v25 }
 0x28c   : > { %v5270_v33 = vmax.f32 %v4518_v41, %v4832_v20  ;;  %v5266_v62 = vmax.f32 %v4514_v48, %v4830_v12  ;;  %v5267_v57 = vmax.f32 %v4515_v4, %v3493_v52  ;;  %v5271_v60 = vmax.f32 %v4519_v59, %v4723_v17 }
 0x28d   : > { %v5272_v40 = vmax.f32 %v4520_v37, %v4833_v30  ;;  %v5273_v63 = vmax.f32 %v4521_v50, %v4724_v9  ;;  %v5516_v10 = vpack.c.bf16 %v5260_v6, %v5260_v6  ;;  %v5517_v1 = vpack.c.bf16 %v5261_v16, %v5261_v16  ;;  %v12078_v30 = vld [vmem:[%s12397_s26 + $0x274] sm:$0xf] }
 0x28e   : > { %v5518_v34 = vpack.c.bf16 %v5262_v24, %v5262_v24  ;;  %v5274_v22 = vmax.f32 %v4522_v2, %v4834_v14  ;;  %v5515_v23 = vpack.c.bf16 %v5259_v3, %v5259_v3  ;;  %v5519_v36 = vpack.c.bf16 %v5263_v53, %v5263_v53  ;;  %v11093_v3 = vld [vmem:[%s12397_s26 + $0x278] sm:$0xf0]  ;;  %v11083_v53 = vld [vmem:[%s12397_s26 + $0x260] sm:$0xf] }
 0x28f   : > { %v5520_v18 = vpack.c.bf16 %v5264_v43, %v5264_v43  ;;  %v5521_v28 = vpack.c.bf16 %v5265_v21, %v5265_v21  ;;  %v5524_v39 = vpack.c.bf16 %v5268_v61, %v5268_v61  ;;  %v5525_v27 = vpack.c.bf16 %v5269_v31, %v5269_v31 }
 0x290   : > { %v5526_v15 = vpack.c.bf16 %v5270_v33, %v5270_v33  ;;  %v5522_v13 = vpack.c.bf16 %v5266_v62, %v5266_v62  ;;  %v5523_v51 = vpack.c.bf16 %v5267_v57, %v5267_v57  ;;  %v5527_v25 = vpack.c.bf16 %v5271_v60, %v5271_v60  ;;  %v12077_v57 = vld [vmem:[%s12397_s26 + $0x264] sm:$0xf0] }
 0x291   : > { %v5528_v42 = vpack.c.bf16 %v5272_v40, %v5272_v40  ;;  %v5529_v48 = vpack.c.bf16 %v5273_v63, %v5273_v63  ;;  %v6032_v52 = vunpack.c.l.b16 %v5516_v10  ;;  %v6033_v4 = vunpack.c.l.b16 %v5517_v1 }
 0x292   : > { %v6034_v7 = vunpack.c.l.b16 %v5518_v34  ;;  %v5530_v17 = vpack.c.bf16 %v5274_v22, %v5274_v22  ;;  %v6031_v26 = vunpack.c.l.b16 %v5515_v23  ;;  %v6035_v55 = vunpack.c.l.b16 %v5519_v36  ;;  %v14430_v47 = vpop.f32.mrf.mxu1 }
 0x293   : > { %v6036_v9 = vunpack.c.l.b16 %v5520_v18  ;;  %v6037_v58 = vunpack.c.l.b16 %v5521_v28  ;;  %v6040_v41 = vunpack.c.l.b16 %v5524_v39  ;;  %v6041_v61 = vunpack.c.l.b16 %v5525_v27 }
 0x294   : > { %v6042_v59 = vunpack.c.l.b16 %v5526_v15  ;;  %v6038_v29 = vunpack.c.l.b16 %v5522_v13  ;;  %v6039_v60 = vunpack.c.l.b16 %v5523_v51  ;;  %v6043_v20 = vunpack.c.l.b16 %v5527_v25  ;;  %v1689_v2 = vpop.f32.mrf.mxu0 }
 0x295   : > { %v6359_v63 = vrot.slane %v6032_v52, 7  ;;  %v6044_v10 = vunpack.c.l.b16 %v5528_v42  ;;  %v6045_v37 = vunpack.c.l.b16 %v5529_v48  ;;  %v6361_v50 = vrot.slane %v6033_v4, 6 }
 0x296   : > { %v6363_v12 = vrot.slane %v6034_v7, 5  ;;  %v6046_v6 = vunpack.c.l.b16 %v5530_v17  ;;  %vm19015_vm8 = vcmask 1041409   ;;  %v6365_v24 = vrot.slane %v6035_v55, 4 }
 0x297   : > { %v6360_v16 = vsel %vm19015_vm8, %v6359_v63, %v6031_v26  ;;  %v6373_v14 = vrot.slane %v6040_v41, 7  ;;  %v6367_v21 = vrot.slane %v6036_v9, 3  ;;  %v6375_v31 = vrot.slane %v6041_v61, 6  ;;  %v8220_v62 = vpop.permute.xlu0 %8219  ;;  %vm19016_vm7 = vmmov %vm19015_vm8 }
 0x298   : > { %v6362_v43 = vsel %vm18693_vm3, %v6361_v50, %v6360_v16  ;;  %v6377_v33 = vrot.slane %v6042_v59, 5  ;;  %v6369_v1 = vrot.slane %v6037_v58, 2  ;;  %v6379_v22 = vrot.slane %v6043_v20, 4 }
 0x299   : > { %v6364_v40 = vsel %vm18692_vm4, %v6363_v12, %v6362_v43  ;;  %v6374_v34 = vsel %vm19016_vm7, %v6373_v14, %v6039_v60  ;;  %vm19017_vm0 = vcmask 1044224   ;;  %v6381_v18 = vrot.slane %v6044_v10, 3  ;;  %v12080_v43 = vld [vmem:[%s12397_s26 + $0x284] sm:$0xf] }
 0x29a   : > { %8312 = vst.msk [vmem:[#allocation2 + $0x30] sm:$0xf] %vm19017_vm0, %v8220_v62  ;;  %v6366_v23 = vsel %vm18673_vm5, %v6365_v24, %v6364_v40  ;;  %v6376_v36 = vsel %vm18693_vm3, %v6375_v31, %v6374_v34  ;;  %v11096_v28 = vor.u32 %v12078_v30, %v11093_v3  ;;  %vm19018_vm6 = vcmask 1045509   ;;  %v14449_v48 = vpop.f32.mrf.mxu1  ;;  %v14477_v30 = vld [vmem:[%s18556_s5] ss:$0 sm:$0xff] }
 0x29b   : > { %v6368_v39 = vsel %vm19018_vm6, %v6367_v21, %v6366_v23  ;;  %v6378_v27 = vsel %vm18692_vm4, %v6377_v33, %v6376_v36  ;;  %v2019_v15 = vadd.f32 %v14394_v0, %v1689_v2  ;;  %v11084_v13 = vor.u32 %v12077_v57, %v11083_v53  ;;  %vm19021_vm0 = vmmov %vm19018_vm6  ;;  %v14492_v24 = vld [vmem:[%s18557_s6] ss:$0 sm:$0xff]  ;;  %v11101_v21 = vld [vmem:[%s12397_s26 + $0x288] sm:$0xf0] }
 0x29c   : > { %vm19019_vm8 = vcmask 1046534   ;;  %v6380_v25 = vsel %vm18673_vm5, %v6379_v22, %v6378_v27  ;;  %v6383_v42 = vrot.slane %v6045_v37, 2  ;;  %vm19020_vm7 = vcmask 154624   ;;  %v1691_v58 = vpop.f32.mrf.mxu0  ;;  %v11091_v34 = vld [vmem:[%s12397_s26 + $0x270] sm:$0xf] }
 0x29d   : > { %v6370_v51 = vsel %vm19019_vm8, %v6369_v1, %v6368_v39  ;;  %11364 = vmatmul.msk.bf16.gmra.mxu1 %vm19020_vm7, %v11096_v28  ;;  %v6918_v52 = vadd.s32 64, %v13098_v35  ;;  %v6371_v4 = vrot.slane %v6038_v29, 1  ;;  %v6382_v7 = vsel %vm19021_vm0, %v6381_v18, %v6380_v25  ;;  %1728 = vmatmul.bf16.gmra.mxu0 %v11084_v13  ;;  %vm19022_vm6 = vmmov %vm19019_vm8  ;;  %v12079_v22 = vld [vmem:[%s12397_s26 + $0x274] sm:$0xf0] }
 0x29e   : > { %v6385_v17 = vrot.slane %v6046_v6, 1  ;;  %v2252_v26 = vmul.f32 %v14118_v8, %v2019_v15  ;;  %v2249_v0 = vmul.f32 %v14118_v8, %v14385_v45  ;;  %v6384_v55 = vsel %vm19022_vm6, %v6383_v42, %v6382_v7  ;;  %v8222_v9 = vpop.permute.xlu1 %8221 }
 0x29f   : > { %v6919_v41 = vadd.s32 72, %v13098_v35  ;;  %v7002_v61 = vand.u32 15, %v6918_v52  ;;  %vm19023_vm8 = vcmask 1047559   ;;  %vm19025_vm0 = vcmask 1044224   ;;  %v7678_v10 = vpop.permute.xlu0 %7677 }
 0x2a0   : > { %v6372_v59 = vsel %vm19023_vm8, %v6371_v4, %v6370_v51  ;;  %vm19024_vm7 = vmmov %vm19023_vm8  ;;  %v14461_v60 = vadd.f32 %v14127_v44, %v2252_v26  ;;  %8313 = vst.msk [vmem:[#allocation2 + $0x3c] sm:$0xf] %vm19025_vm0, %v8222_v9  ;;  %v2021_v20 = vadd.f32 %v14426_v38, %v1691_v58  ;;  %v6745_v45 = vpop.f32.mrf.mxu2  ;;  %v19027_v37 = vmov 0 }
 0x2a1   : > { %v6386_v29 = vsel %vm19024_vm7, %v6385_v17, %v6384_v55  ;;  %vm14467_vm6 = vcmp.ge.s32.totalorder %v7002_v61, 1  ;;  %v2014_v50 = vadd.f32 %v14278_v46, %v14404_v11  ;;  %v6817_v38 = vmul.f32 %v14477_v30, %v6745_v45  ;;  %v11695_v42 = vld [vmem:[#allocation2 + $0x30] sm:$0xf] }
 0x2a2   : > { %v14465_v63 = vpack.c.b16 %v6386_v29, %v6372_v59  ;;  %v19028_v37 = vsel %vm14467_vm6, 4294967295, %v19027_v37  ;;  %v18676_v12 = vmax.f32 %v14461_v60, 0.0  ;;  %vm19030_vm8 = vcmask 519424   ;;  %v14497_v53 = vpop.f32.mrf.mxu1 }
 0x2a3   : > { %19029 = vst [vmem:[#allocation27_spill] sm:$0xff] %v19028_v37  ;;  %v7516_v2 = vsel %vm14467_vm6, %v14195_v19, 0.0  ;;  %v2508_v6 = vmax.f32 %v14382_v32, 0.0  ;;  %vm19031_vm7 = vcmask 261120   ;;  %v2253_v46 = vmul.f32 %v14118_v8, %v2021_v20 }
 0x2a4   : > { %19026 = vst [vmem:[#allocation33_spill] sm:$0xff] %v14465_v63  ;;  %11659 = vmatmul.msk.bf16.gmra.mxu2 %vm19031_vm7, %v14465_v63  ;;  %v7547_v11 = vpack.c.bf16 %v7516_v2, %v7516_v2  ;;  %v2381_v16 = vadd.f32 %v14127_v44, %v2249_v0  ;;  %v6853_v14 = vadd.f32 %v14492_v24, %v6817_v38  ;;  %v7009_v3 = vand.u32 15, %v6919_v41  ;;  %v1694_v40 = vpop.f32.mrf.mxu0 }
 0x2a5   : > { %7766 = vst.msk [vmem:[#allocation2 + $0x54] sm:$0xf] %vm19030_vm8, %v7678_v10  ;;  %v2608_v32 = vmax.f32 %v2508_v6, %v18676_v12  ;;  %vm19032_vm0 = vcmask 257024   ;;  %v2250_v31 = vmul.f32 %v14118_v8, %v2014_v50  ;;  %v14506_v62 = vadd.f32 %v14127_v44, %v2253_v46 }
 0x2a6   : > { %7580 = vst.msk [vmem:[#allocation2 + $0x60] sm:$0xf] %vm19032_vm0, %v7547_v11  ;;  %v14503_v33 = vmax.f32 %v6853_v14, 0.0  ;;  %v7992_v57 = vpop.permute.xlu1 %7991  ;;  %v2509_v23 = vmax.f32 %v2381_v16, 0.0  ;;  %v2016_v36 = vadd.f32 %v14331_v5, %v14428_v54  ;;  %vm14512_vm8 = vcmp.le.s32.totalorder %v7009_v3, 14 }
 0x2a7   : > { %19033 = vst [vmem:[#allocation37_spill] sm:$0xff] %v14506_v62  ;;  %v12146_v1 = vld [vmem:[#allocation2 + $0x38] sm:$0xf0]  ;;  %v19034_v18 = vmov 0  ;;  %v11104_v28 = vor.u32 %v12080_v43, %v11101_v21  ;;  %vm19037_vm7 = vcmask 781824   ;;  %v19038_v39 = vmax.f32 %v14142_v49, 0.0 }
 0x2a8   : > { %v19035_v18 = vsel %vm14512_vm8, 4294967295, %v19034_v18  ;;  %8082 = vst.msk [vmem:[#allocation2 + $0x48] sm:$0xf] %vm19037_vm7, %v7992_v57  ;;  %v7435_v15 = vrot.slane %v14503_v33, 7  ;;  %v7808_v13 = vrot.slane %v14503_v33, 1  ;;  %v6747_v51 = vpop.f32.mrf.mxu2  ;;  %v2024_v25 = vadd.f32 %v14430_v47, %v1694_v40 }
 0x2a9   : > { %19036 = vst [vmem:[#allocation48_spill] sm:$0xff] %v19035_v18  ;;  %v14519_v27 = vmax.f32 %v2608_v32, %v19038_v39  ;;  %v2382_v5 = vadd.f32 %v14127_v44, %v2250_v31  ;;  %v6818_v54 = vmul.f32 %v14477_v30, %v6747_v51  ;;  %v11696_v52 = vor.u32 %v12146_v1, %v11695_v42  ;;  %v11099_v51 = vld [vmem:[%s12397_s26 + $0x280] sm:$0xf]  ;;  %v19056_v42 = vld [vmem:[#allocation43_spill] sm:$0xff] }
 0x2aa   : > { %v11092_v4 = vor.u32 %v12079_v22, %v11091_v34  ;;  %v18672_v7 = vmax.f32 %v14506_v62, 0.0  ;;  %v19039_v49 = vrot.slane %v14211_v56, 1  ;;  %v19041_v26 = vrot.slane %v14211_v56, 7  ;;  %v14553_v45 = vpop.f32.mrf.mxu1  ;;  %v11109_v34 = vld [vmem:[%s12397_s26 + $0x298] sm:$0xf0]  ;;  %v19053_v22 = vld [vmem:[#allocation41_spill] sm:$0xff] }
 0x2ab   : > { %vm19042_vm0 = vcmask 1040384   ;;  %v2254_v47 = vmul.f32 %v14118_v8, %v2024_v25  ;;  %v2251_v55 = vmul.f32 %v14118_v8, %v2016_v36  ;;  %v6854_v9 = vadd.f32 %v14492_v24, %v6818_v54  ;;  %9556 = vmatmul.bf16.gmra.mxu3 %v11696_v52  ;;  %v12081_v25 = vld [vmem:[%s12397_s26 + $0x284] sm:$0xf0] }
 0x2ac   : > { %v14530_v17 = vsel %vm18669_vm12, %v19039_v49, %v7808_v13  ;;  %v14535_v0 = vsel %vm19042_vm0, %v19041_v26, %v7435_v15  ;;  %v14547_v56 = vrot.slane %v14519_v27, 2  ;;  %vm19045_vm7 = vcmask 154624   ;;  %v1696_v11 = vpop.f32.mrf.mxu0 }
 0x2ad   : > { %19040 = vst [vmem:[#allocation49_spill] sm:$0xff] %v14530_v17  ;;  %v7894_v58 = vsel %vm14512_vm8, %v14530_v17, 0.0  ;;  %v8955_v61 = vsel %vm13819_vm11, %v14530_v17, 0.0  ;;  %v8123_v20 = vsel %vm14467_vm6, %v14535_v0, 0.0  ;;  %11365 = vmatmul.msk.bf16.gmra.mxu1 %vm19045_vm7, %v11104_v28  ;;  %v14555_v10 = vmax.f32 %v6854_v9, 0.0  ;;  %1733 = vmatmul.bf16.gmra.mxu0 %v11092_v4 }
 0x2ae   : > { %19043 = vst [vmem:[#allocation50_spill] sm:$0xff] %v14535_v0  ;;  %v7925_v59 = vpack.c.bf16 %v7894_v58, %v7894_v58  ;;  %v8985_v29 = vpack.c.bf16 %v8955_v61, %v8955_v61  ;;  %v8155_v50 = vpack.c.bf16 %v8123_v20, %v8123_v20  ;;  %v14558_v38 = vadd.f32 %v14127_v44, %v2254_v47 }
 0x2af   : > { %19046 = vst [vmem:[#allocation51_spill] sm:$0xff] %v14555_v10  ;;  %v14562_v2 = vpack.c.bf16 %v14503_v33, %v14503_v33  ;;  %v2510_v6 = vmax.f32 %v2382_v5, 0.0  ;;  %v2609_v46 = vmax.f32 %v2509_v23, %v18672_v7  ;;  %vm19049_vm0 = vcmask 257024   ;;  %v12082_v33 = vld [vmem:[%s12397_s26 + $0x294] sm:$0xf] }
 0x2b0   : > { %19047 = vst [vmem:[#allocation52_spill] sm:$0xff] %v14558_v38  ;;  %7997 = vrot.lane.b32.xlu2 %v7925_v59, %s12278_s19  ;;  %8227 = vrot.lane.b32.xlu0 %v8155_v50, %s12279_s21  ;;  %v18671_v16 = vmax.f32 %v14558_v38, 0.0  ;;  %v18674_v14 = vrot.slane %v14555_v10, 7  ;;  %vm19050_vm7 = vmmov %vm19049_vm0  ;;  %v14575_v3 = vpack.c.bf16 %v14555_v10, %v14555_v10  ;;  %v2026_v32 = vadd.f32 %v14449_v48, %v1696_v11 }
 0x2b1   : > { %19048 = vst [vmem:[#allocation53_spill] sm:$0xff] %v14562_v2  ;;  %v2383_v43 = vadd.f32 %v14127_v44, %v2251_v55  ;;  %v14580_v21 = vrot.slane %v14519_v27, 4  ;;  %v18675_v31 = vrot.slane %v14555_v10, 1  ;;  %v3262_v57 = vperm.slane %v14547_v56, 1 }
 0x2b2   : > { %9015 = vst.msk [vmem:[#allocation2 + $0x44] sm:$0xf] %vm19049_vm0, %v8985_v29  ;;  %v2610_v40 = vmax.f32 %v2510_v6, %v18671_v16  ;;  %vm19052_vm0 = vcmask 1040384   ;;  %v2255_v48 = vmul.f32 %v14118_v8, %v2026_v32  ;;  %v19054_v23 = vmax.f32 %v19053_v22, 0.0 }
 0x2b3   : > { %8350 = vst.msk [vmem:[#allocation2 + $0x64] sm:$0xf] %vm19050_vm7, %v14562_v2  ;;  %v7438_v1 = vsel %vm19052_vm0, %v7435_v15, %v18674_v14  ;;  %v7811_v39 = vsel %vm18669_vm12, %v7808_v13, %v18675_v31  ;;  %v3261_v15 = vperm.slane %v14519_v27, 1  ;;  %v19057_v5 = vmax.f32 %v19056_v42, 0.0  ;;  %vm19060_vm0 = vmmov %vm19050_vm7  ;;  %v14619_v13 = vpop.f32.mrf.mxu1 }
 0x2b4   : > { %19051 = vst [vmem:[#allocation54_spill] sm:$0xff] %v14575_v3  ;;  %v14596_v36 = vmax.f32 %v2609_v46, %v19054_v23  ;;  %v14598_v28 = vpack.c.bf16 %v7438_v1, %v7438_v1  ;;  %v14611_v52 = vadd.f32 %v14127_v44, %v2255_v48  ;;  %v14613_v4 = vpack.c.bf16 %v7811_v39, %v7811_v39  ;;  %v1699_v29 = vpop.f32.mrf.mxu0  ;;  %v19062_v39 = vld [vmem:[#allocation46_spill] sm:$0xff] }
 0x2b5   : > { %8351 = vst.msk [vmem:[#allocation2 + $0x70] sm:$0xf] %vm19050_vm7, %v14575_v3  ;;  %v14608_v54 = vmax.f32 %v2610_v40, %v19057_v5  ;;  %v2511_v49 = vmax.f32 %v2383_v43, 0.0  ;;  %v11112_v26 = vor.u32 %v12082_v33, %v11109_v34  ;;  %v3263_v47 = vperm.slane %v14580_v21, 1  ;;  %vm19061_vm7 = vmmov %vm19060_vm0 }
 0x2b6   : > { %19055 = vst [vmem:[#allocation41_spill] sm:$0xff] %v14598_v28  ;;  %8229 = vrot.lane.b32.xlu1 %v14598_v28, %s12279_s21  ;;  %v3494_v55 = vsel %vm18693_vm3, %v3262_v57, %v3261_v15  ;;  %v11100_v58 = vor.u32 %v12081_v25, %v11099_v51  ;;  %v18670_v59 = vmax.f32 %v14611_v52, 0.0  ;;  %v14635_v20 = vrot.slane %v14519_v27, 6  ;;  %v14668_v15 = vld [vmem:[%s12397_s26 + $0x2a4] sm:$0xf] }
 0x2b7   : > { %19058 = vst [vmem:[#allocation43_spill] sm:$0xff] %v14611_v52  ;;  %v14624_v9 = vrot.slane %v14608_v54, 2  ;;  %v14629_v61 = vrot.slane %v14608_v54, 4  ;;  %v14638_v50 = vrot.slane %v14596_v36, 2  ;;  %v3265_v6 = vperm.slane %v14596_v36, 1 }
 0x2b8   : > { %19059 = vst [vmem:[#allocation55_spill] sm:$0xff] %v14613_v4  ;;  %7683 = vrot.lane.b32.xlu2 %v14562_v2, %s12277_s0  ;;  %v3269_v46 = vperm.slane %v14608_v54, 1  ;;  %7685 = vrot.lane.b32.xlu0 %v14575_v3, %s12277_s0  ;;  %v14645_v11 = vrot.slane %v14596_v36, 4  ;;  %v14648_v32 = vrot.slane %v14596_v36, 6  ;;  %v2611_v33 = vmax.f32 %v2511_v49, %v18670_v59 }
 0x2b9   : > { %7583 = vst.msk [vmem:[#allocation2 + $0x84] sm:$0xf] %vm19060_vm0, %v14598_v28  ;;  %v3270_v43 = vperm.slane %v14624_v9, 1  ;;  %v2029_v57 = vadd.f32 %v14497_v53, %v1699_v29  ;;  %v3264_v40 = vperm.slane %v14635_v20, 1  ;;  %v14656_v1 = vrot.slane %v14608_v54, 6 }
 0x2ba   : > { %9016 = vst.msk [vmem:[#allocation2 + $0x50] sm:$0xf] %vm19061_vm7, %v14613_v4  ;;  %v3266_v48 = vperm.slane %v14638_v50, 1  ;;  %v3268_v34 = vperm.slane %v14648_v32, 1  ;;  %v3495_v22 = vsel %vm18692_vm4, %v3263_v47, %v3494_v55  ;;  %v3271_v23 = vperm.slane %v14629_v61, 1 }
 0x2bb   : > { %v19063_v51 = vmax.f32 %v19062_v39, 0.0  ;;  %v3496_v53 = vsel %vm18673_vm5, %v3264_v40, %v3495_v22  ;;  %vm19064_vm0 = vcmask 1045509   ;;  %vm19065_vm7 = vcmask 1041409   ;;  %v14677_v55 = vpop.f32.mrf.mxu1  ;;  %v14680_v29 = vld [vmem:[%s12397_s26 + $0x2a8] sm:$0xf0] }
 0x2bc   : > { %v3497_v42 = vsel %vm19064_vm0, %v3265_v6, %v3496_v53  ;;  %v3500_v5 = vsel %vm19065_vm7, %v3269_v46, %v3268_v34  ;;  %vm19066_vm12 = vcmask 154624   ;;  %v2256_v47 = vmul.f32 %v14118_v8, %v2029_v57  ;;  %v14687_v46 = vld [vmem:[%s12397_s26 + $0x290] sm:$0xf]  ;;  %v14690_v40 = vld [vmem:[%s12397_s26 + $0x294] sm:$0xf0]  ;;  %v1701_v22 = vpop.f32.mrf.mxu0 }
 0x2bd   : > { %v14664_v25 = vmax.f32 %v2611_v33, %v19063_v51  ;;  %11366 = vmatmul.msk.bf16.gmra.mxu1 %vm19066_vm12, %v11112_v26  ;;  %v3267_v6 = vperm.slane %v14645_v11, 1  ;;  %1738 = vmatmul.bf16.gmra.mxu0 %v11100_v58  ;;  %v3272_v26 = vperm.slane %v14656_v1, 1  ;;  %vm19067_vm12 = vcmask 1046534  }
 0x2be   : > { %7999 = vrot.lane.b32.xlu1 %v14613_v4, %s12278_s19  ;;  %v3498_v8 = vsel %vm19067_vm12, %v3266_v48, %v3497_v42  ;;  %v3501_v57 = vsel %vm18693_vm3, %v3270_v43, %v3500_v5  ;;  %v11120_v58 = vor.u32 %v14668_v15, %v14680_v29  ;;  %v11501_v59 = vrot.slane %v14519_v27, 9 }
 0x2bf   : > { %v3273_v49 = vperm.slane %v14664_v25, 1  ;;  %v14683_v33 = vrot.slane %v14664_v25, 2  ;;  %v14693_v34 = vrot.slane %v14664_v25, 4  ;;  %v3502_v51 = vsel %vm18692_vm4, %v3271_v23, %v3501_v57 }
 0x2c0   : > { %v3503_v53 = vsel %vm18673_vm5, %v3272_v26, %v3502_v51  ;;  %v11108_v16 = vor.u32 %v14690_v40, %v14687_v46  ;;  %vm19068_vm0 = vcmask 1047559   ;;  %vm19069_vm7 = vcmask 1045509  }
 0x2c1   : > { %v3274_v39 = vperm.slane %v14683_v33, 1  ;;  %v3499_v7 = vsel %vm19068_vm0, %v3267_v6, %v3498_v8  ;;  %v3504_v48 = vsel %vm19069_vm7, %v3273_v49, %v3503_v53  ;;  %v11509_v43 = vrot.slane %v14608_v54, 9  ;;  %v7994_v23 = vpop.permute.xlu2 %7993 }
 0x2c2   : > { %v14710_v42 = vadd.f32 %v14127_v44, %v2256_v47  ;;  %v3275_v5 = vperm.slane %v14693_v34, 1  ;;  %v11502_v15 = vrot.slane %v14547_v56, 9  ;;  %vm19070_vm12 = vcmask 781824  }
 0x2c3   : > { %8083 = vst.msk [vmem:[#allocation2 + $0x54] sm:$0xf] %vm19070_vm12, %v7994_v23  ;;  %v2867_v29 = vrot.slane %v14664_v25, 6  ;;  %vm19071_vm5 = vcmask 1046534   ;;  %v11503_v6 = vrot.slane %v14580_v21, 9  ;;  %v11504_v49 = vrot.slane %v14635_v20, 9  ;;  %v14725_v8 = vpop.f32.mrf.mxu1 }
 0x2c4   : > { %v3505_v46 = vsel %vm19071_vm5, %v3274_v39, %v3504_v48  ;;  %v14720_v40 = vadd.f32 %v14553_v45, %v1701_v22  ;;  %vm19072_vm0 = vcmask 1040384   ;;  %v11505_v47 = vrot.slane %v14596_v36, 9 }
 0x2c5   : > { %v3634_v44 = vsel %vm19072_vm0, 0.0, %v3499_v7  ;;  %v11506_v26 = vrot.slane %v14638_v50, 9  ;;  %v11507_v57 = vrot.slane %v14645_v11, 9  ;;  %v11508_v51 = vrot.slane %v14648_v32, 9  ;;  %v14735_v23 = vpop.f32.mrf.mxu0 }
 0x2c6   : > { %v11510_v39 = vrot.slane %v14624_v9, 9  ;;  %v11511_v53 = vrot.slane %v14629_v61, 9  ;;  %vm19073_vm5 = vcmask 1047559   ;;  %v11512_v45 = vrot.slane %v14656_v1, 9 }
 0x2c7   : > { %v3506_v48 = vsel %vm19073_vm5, %v3275_v5, %v3505_v46  ;;  %v11513_v7 = vrot.slane %v14664_v25, 9  ;;  %v11514_v22 = vrot.slane %v14683_v33, 9  ;;  %v11515_v14 = vrot.slane %v14693_v34, 9 }
 0x2c8   : > { %v11516_v31 = vrot.slane %v2867_v29, 9  ;;  %v4523_v12 = vmax.f32 %v14519_v27, %v11501_v59  ;;  %v4524_v63 = vmax.f32 %v14547_v56, %v11502_v15  ;;  %v4525_v37 = vmax.f32 %v14580_v21, %v11503_v6 }
 0x2c9   : > { %v4526_v4 = vmax.f32 %v14635_v20, %v11504_v49  ;;  %v4527_v5 = vmax.f32 %v14596_v36, %v11505_v47  ;;  %v4528_v46 = vmax.f32 %v14638_v50, %v11506_v26  ;;  %v4529_v3 = vmax.f32 %v14645_v11, %v11507_v57  ;;  %v7680_v19 = vpop.permute.xlu2 %7679 }
 0x2ca   : > { %v4725_v28 = vrot.slane %v3634_v44, 2  ;;  %v4726_v2 = vrot.slane %v3634_v44, 4  ;;  %v4727_v17 = vrot.slane %v3634_v44, 6  ;;  %v4530_v41 = vmax.f32 %v14648_v32, %v11508_v51 }
 0x2cb   : > { %v4531_v27 = vmax.f32 %v14608_v54, %v11509_v43  ;;  %v4728_v59 = vrot.slane %v3506_v48, 2  ;;  %v4729_v56 = vrot.slane %v3506_v48, 4  ;;  %vm19074_vm7 = vcmask 519424   ;;  %v14752_v32 = vpop.f32.mrf.mxu1 }
 0x2cc   : > { %7767 = vst.msk [vmem:[#allocation2 + $0x60] sm:$0xf] %vm19074_vm7, %v7680_v19  ;;  %v4532_v21 = vmax.f32 %v14624_v9, %v11510_v39  ;;  %v4730_v20 = vrot.slane %v3506_v48, 6  ;;  %v4835_v36 = vrot.slane %v3634_v44, 1  ;;  %v4836_v15 = vrot.slane %v4725_v28, 1 }
 0x2cd   : > { %v4533_v50 = vmax.f32 %v14629_v61, %v11511_v53  ;;  %v4534_v11 = vmax.f32 %v14656_v1, %v11512_v45  ;;  %v4837_v6 = vrot.slane %v4726_v2, 1  ;;  %v4839_v49 = vrot.slane %v3506_v48, 1  ;;  %1743 = vmatmul.bf16.gmra.mxu0 %v11108_v16  ;;  %v14757_v51 = vpop.f32.mrf.mxu0 }
 0x2ce   : > { %vm19075_vm12 = vcmask 154624   ;;  %v4535_v54 = vmax.f32 %v14664_v25, %v11513_v7  ;;  %v4536_v43 = vmax.f32 %v14683_v33, %v11514_v22  ;;  %v4838_v19 = vrot.slane %v4727_v17, 1 }
 0x2cf   : > { %11367 = vmatmul.msk.bf16.gmra.mxu1 %vm19075_vm12, %v11120_v58  ;;  %v4840_v47 = vrot.slane %v4728_v59, 1  ;;  %v4537_v9 = vmax.f32 %v14693_v34, %v11515_v14  ;;  %v4538_v26 = vmax.f32 %v2867_v29, %v11516_v31  ;;  %v4841_v57 = vrot.slane %v4729_v56, 1 }
 0x2d0   : > { %v5276_v61 = vmax.f32 %v4524_v63, %v4835_v36  ;;  %v4842_v1 = vrot.slane %v4730_v20, 1  ;;  %v5277_v39 = vmax.f32 %v4525_v37, %v4725_v28  ;;  %v5278_v53 = vmax.f32 %v4526_v4, %v4836_v15 }
 0x2d1   : > { %v5279_v58 = vmax.f32 %v4527_v5, %v4726_v2  ;;  %v5275_v45 = vmax.f32 %v4523_v12, %v3634_v44  ;;  %v5280_v18 = vmax.f32 %v4528_v46, %v4837_v6  ;;  %v5281_v52 = vmax.f32 %v4529_v3, %v4727_v17 }
 0x2d2   : > { %v5284_v25 = vmax.f32 %v4532_v21, %v4839_v49  ;;  %v5282_v7 = vmax.f32 %v4530_v41, %v4838_v19  ;;  %v5285_v33 = vmax.f32 %v4533_v50, %v4728_v59  ;;  %v5286_v22 = vmax.f32 %v4534_v11, %v4840_v47  ;;  %v12086_v47 = vld [vmem:[%s12397_s26 + $0x2b4] sm:$0xf] }
 0x2d3   : > { %v5287_v38 = vmax.f32 %v4535_v54, %v4729_v56  ;;  %v5283_v16 = vmax.f32 %v4531_v27, %v3506_v48  ;;  %v5288_v62 = vmax.f32 %v4536_v43, %v4841_v57  ;;  %v5289_v14 = vmax.f32 %v4537_v9, %v4730_v20 }
 0x2d4   : > { %v5532_v31 = vpack.c.bf16 %v5276_v61, %v5276_v61  ;;  %v5290_v34 = vmax.f32 %v4538_v26, %v4842_v1  ;;  %v5533_v63 = vpack.c.bf16 %v5277_v39, %v5277_v39  ;;  %v5534_v29 = vpack.c.bf16 %v5278_v53, %v5278_v53  ;;  %v11125_v61 = vld [vmem:[%s12397_s26 + $0x2b8] sm:$0xf0]  ;;  %v11115_v1 = vld [vmem:[%s12397_s26 + $0x2a0] sm:$0xf] }
 0x2d5   : > { %v5535_v36 = vpack.c.bf16 %v5279_v58, %v5279_v58  ;;  %v5531_v10 = vpack.c.bf16 %v5275_v45, %v5275_v45  ;;  %v5536_v37 = vpack.c.bf16 %v5280_v18, %v5280_v18  ;;  %v5537_v28 = vpack.c.bf16 %v5281_v52, %v5281_v52  ;;  %v14759_v48 = vpop.f32.mrf.mxu1 }
 0x2d6   : > { %v5540_v2 = vpack.c.bf16 %v5284_v25, %v5284_v25  ;;  %v5538_v12 = vpack.c.bf16 %v5282_v7, %v5282_v7  ;;  %v5541_v4 = vpack.c.bf16 %v5285_v33, %v5285_v33  ;;  %v5542_v17 = vpack.c.bf16 %v5286_v22, %v5286_v22  ;;  %v1709_v50 = vpop.f32.mrf.mxu0  ;;  %v12085_v7 = vld [vmem:[%s12397_s26 + $0x2a4] sm:$0xf0] }
 0x2d7   : > { %v5543_v3 = vpack.c.bf16 %v5287_v38, %v5287_v38  ;;  %v5539_v41 = vpack.c.bf16 %v5283_v16, %v5283_v16  ;;  %v5544_v44 = vpack.c.bf16 %v5288_v62, %v5288_v62  ;;  %v5545_v5 = vpack.c.bf16 %v5289_v14, %v5289_v14 }
 0x2d8   : > { %v6048_v46 = vunpack.c.l.b16 %v5532_v31  ;;  %v5546_v27 = vpack.c.bf16 %v5290_v34, %v5290_v34  ;;  %v6049_v59 = vunpack.c.l.b16 %v5533_v63  ;;  %v6050_v56 = vunpack.c.l.b16 %v5534_v29 }
 0x2d9   : > { %v6051_v21 = vunpack.c.l.b16 %v5535_v36  ;;  %v6047_v20 = vunpack.c.l.b16 %v5531_v10  ;;  %v6052_v15 = vunpack.c.l.b16 %v5536_v37  ;;  %v6053_v18 = vunpack.c.l.b16 %v5537_v28 }
 0x2da   : > { %v6056_v52 = vunpack.c.l.b16 %v5540_v2  ;;  %v6054_v11 = vunpack.c.l.b16 %v5538_v12  ;;  %v6057_v38 = vunpack.c.l.b16 %v5541_v4  ;;  %v6058_v6 = vunpack.c.l.b16 %v5542_v17 }
 0x2db   : > { %v6059_v62 = vunpack.c.l.b16 %v5543_v3  ;;  %v6060_v49 = vunpack.c.l.b16 %v5544_v44  ;;  %v6061_v54 = vunpack.c.l.b16 %v5545_v5  ;;  %v6387_v43 = vrot.slane %v6048_v46, 7  ;;  %v8224_v25 = vpop.permute.xlu0 %8223 }
 0x2dc   : > { %v6389_v19 = vrot.slane %v6049_v59, 6  ;;  %v6055_v9 = vunpack.c.l.b16 %v5539_v41  ;;  %v6062_v26 = vunpack.c.l.b16 %v5546_v27  ;;  %v6391_v57 = vrot.slane %v6050_v56, 5 }
 0x2dd   : > { %v6393_v10 = vrot.slane %v6051_v21, 4  ;;  %vm19076_vm0 = vcmask 1041409   ;;  %v6395_v53 = vrot.slane %v6052_v15, 3  ;;  %v6401_v58 = vrot.slane %v6056_v52, 7  ;;  %v14773_v12 = vpop.f32.mrf.mxu1 }
 0x2de   : > { %v6388_v39 = vsel %vm19076_vm0, %v6387_v43, %v6047_v20  ;;  %v6403_v45 = vrot.slane %v6057_v38, 6  ;;  %v6397_v22 = vrot.slane %v6053_v18, 2  ;;  %v6405_v16 = vrot.slane %v6058_v6, 5  ;;  %vm19078_vm7 = vmmov %vm19076_vm0  ;;  %v1711_v44 = vpop.f32.mrf.mxu0 }
 0x2df   : > { %v6390_v33 = vsel %vm18693_vm3, %v6389_v19, %v6388_v39  ;;  %v6407_v14 = vrot.slane %v6059_v62, 4  ;;  %vm19077_vm5 = vcmask 1044224   ;;  %v6402_v34 = vsel %vm19078_vm7, %v6401_v58, %v6055_v9  ;;  %v12088_v58 = vld [vmem:[%s12397_s26 + $0x2c4] sm:$0xf] }
 0x2e0   : > { %8314 = vst.msk [vmem:[#allocation2 + $0x48] sm:$0xf] %vm19077_vm5, %v8224_v25  ;;  %v6392_v31 = vsel %vm18692_vm4, %v6391_v57, %v6390_v33  ;;  %v6409_v63 = vrot.slane %v6060_v49, 3  ;;  %v6411_v29 = vrot.slane %v6061_v54, 2  ;;  %vm19079_vm12 = vcmask 1044484  }
 0x2e1   : > { %v6394_v36 = vsel %vm19079_vm12, %v6393_v10, %v6392_v31  ;;  %v6404_v37 = vsel %vm18693_vm3, %v6403_v45, %v6402_v34  ;;  %v11128_v28 = vor.u32 %v12086_v47, %v11125_v61  ;;  %v2039_v2 = vadd.f32 %v14725_v8, %v1709_v50  ;;  %v8226_v41 = vpop.permute.xlu1 %8225  ;;  %vm19082_vm7 = vmmov %vm19079_vm12  ;;  %v14784_v8 = vld [vmem:[%s18553_s2] ss:$0 sm:$0xff] }
 0x2e2   : > { %vm19080_vm0 = vcmask 1045509   ;;  %v6406_v17 = vsel %vm18692_vm4, %v6405_v16, %v6404_v37  ;;  %v11116_v3 = vor.u32 %v12085_v7, %v11115_v1  ;;  %v6921_v5 = vadd.s32 88, %v13098_v35  ;;  %v14795_v50 = vld [vmem:[%s18554_s3] ss:$0 sm:$0xff]  ;;  %v6750_v6 = vpop.f32.mrf.mxu2  ;;  %v11133_v16 = vld [vmem:[%s12397_s26 + $0x2c8] sm:$0xf0] }
 0x2e3   : > { %v6396_v4 = vsel %vm19080_vm0, %v6395_v53, %v6394_v36  ;;  %vm19081_vm5 = vcmask 1046534   ;;  %v6408_v27 = vsel %vm19082_vm7, %v6407_v14, %v6406_v17  ;;  %vm19083_vm12 = vcmask 154624   ;;  %v7682_v43 = vpop.permute.xlu0 %7681  ;;  %v12087_v36 = vld [vmem:[%s12397_s26 + $0x2b4] sm:$0xf0] }
 0x2e4   : > { %v6398_v46 = vsel %vm19081_vm5, %v6397_v22, %v6396_v4  ;;  %11368 = vmatmul.msk.bf16.gmra.mxu1 %vm19083_vm12, %v11128_v28  ;;  %v2260_v59 = vmul.f32 %v14784_v8, %v2039_v2  ;;  %vm19084_vm0 = vcmask 1044224   ;;  %v6920_v56 = vadd.s32 80, %v13098_v35  ;;  %1748 = vmatmul.bf16.gmra.mxu0 %v11116_v3 }
 0x2e5   : > { %8315 = vst.msk [vmem:[#allocation2 + $0x54] sm:$0xf] %vm19084_vm0, %v8226_v41  ;;  %v6399_v21 = vrot.slane %v6054_v11, 1  ;;  %vm19085_vm4 = vcmask 1045509   ;;  %v6413_v15 = vrot.slane %v6062_v26, 1  ;;  %v2041_v18 = vadd.f32 %v14752_v32, %v1711_v44 }
 0x2e6   : > { %v6410_v20 = vsel %vm19085_vm4, %v6409_v63, %v6408_v27  ;;  %v14798_v38 = vadd.f32 %v14795_v50, %v2260_v59  ;;  %v7016_v62 = vand.u32 15, %v6920_v56  ;;  %v2257_v11 = vmul.f32 %v14784_v8, %v14720_v40  ;;  %v1714_v25 = vpop.f32.mrf.mxu0 }
 0x2e7   : > { %v6412_v52 = vsel %vm19081_vm5, %v6411_v29, %v6410_v20  ;;  %vm19087_vm4 = vcmask 1047559   ;;  %v6819_v32 = vmul.f32 %v14477_v30, %v6750_v6  ;;  %vm19090_vm12 = vcmask 519424   ;;  %v14820_v1 = vpop.f32.mrf.mxu1  ;;  %v11123_v29 = vld [vmem:[%s12397_s26 + $0x2b0] sm:$0xf] }
 0x2e8   : > { %19086 = vst [vmem:[#allocation46_spill] sm:$0xff] %v14798_v38  ;;  %v6400_v49 = vsel %vm19087_vm4, %v6399_v21, %v6398_v46  ;;  %vm19088_vm7 = vmmov %vm19087_vm4  ;;  %v18698_v47 = vmax.f32 %v14798_v38, 0.0  ;;  %v7023_v9 = vand.u32 15, %v6921_v5  ;;  %vm14809_vm0 = vcmp.ge.s32.totalorder %v7016_v62, 1  ;;  %v19103_v5 = vld [vmem:[#allocation51_spill] sm:$0xff] }
 0x2e9   : > { %v6414_v54 = vsel %vm19088_vm7, %v6413_v15, %v6412_v52  ;;  %7768 = vst.msk [vmem:[#allocation2 + $0x6c] sm:$0xf] %vm19090_vm12, %v7682_v43  ;;  %v19091_v26 = vmov 0  ;;  %v2516_v40 = vmax.f32 %v14710_v42, 0.0  ;;  %v6855_v57 = vadd.f32 %v14492_v24, %v6819_v32  ;;  %v7996_v45 = vpop.permute.xlu1 %7995 }
 0x2ea   : > { %v14805_v19 = vpack.c.b16 %v6414_v54, %v6400_v49  ;;  %v19092_v26 = vsel %vm14809_vm0, 4294967295, %v19091_v26  ;;  %v2261_v10 = vmul.f32 %v14784_v8, %v2041_v18  ;;  %v2034_v61 = vadd.f32 %v14619_v13, %v14735_v23  ;;  %v11707_v13 = vld [vmem:[#allocation2 + $0x48] sm:$0xf]  ;;  %v6752_v4 = vpop.f32.mrf.mxu2 }
 0x2eb   : > { %19093 = vst [vmem:[#allocation57_spill] sm:$0xff] %v19092_v26  ;;  %vm19094_vm5 = vcmask 261120   ;;  %v7518_v39 = vsel %vm14809_vm0, %v14535_v0, 0.0  ;;  %v2612_v42 = vmax.f32 %v2516_v40, %v18698_v47  ;;  %v14827_v53 = vmax.f32 %v6855_v57, 0.0 }
 0x2ec   : > { %19089 = vst [vmem:[#allocation56_spill] sm:$0xff] %v14805_v19  ;;  %11660 = vmatmul.msk.bf16.gmra.mxu2 %vm19094_vm5, %v14805_v19  ;;  %v12149_v23 = vld [vmem:[#allocation2 + $0x50] sm:$0xf0]  ;;  %v7549_v7 = vpack.c.bf16 %v7518_v39, %v7518_v39  ;;  %v2389_v33 = vadd.f32 %v14795_v50, %v2257_v11  ;;  %vm14831_vm4 = vcmp.le.s32.totalorder %v7023_v9, 14  ;;  %v19095_v22 = vmov 0 }
 0x2ed   : > { %v19096_v22 = vsel %vm14831_vm4, 4294967295, %v19095_v22  ;;  %vm19098_vm7 = vcmask 781824   ;;  %v11708_v14 = vor.u32 %v12149_v23, %v11707_v13  ;;  %v7439_v31 = vrot.slane %v14827_v53, 7 }
 0x2ee   : > { %19097 = vst [vmem:[#allocation58_spill] sm:$0xff] %v19096_v22  ;;  %v7812_v34 = vrot.slane %v14827_v53, 1  ;;  %v14840_v63 = vadd.f32 %v14795_v50, %v2261_v10  ;;  %v14846_v37 = vpack.c.bf16 %v14827_v53, %v14827_v53  ;;  %v2258_v28 = vmul.f32 %v14784_v8, %v2034_v61  ;;  %v1716_v9 = vpop.f32.mrf.mxu0 }
 0x2ef   : > { %8084 = vst.msk [vmem:[#allocation2 + $0x60] sm:$0xf] %vm19098_vm7, %v7996_v45  ;;  %v2036_v2 = vadd.f32 %v14677_v55, %v14757_v51  ;;  %v2044_v17 = vadd.f32 %v14759_v48, %v1714_v25  ;;  %9561 = vmatmul.bf16.gmra.mxu3 %v11708_v14  ;;  %vm19101_vm12 = vcmask 257024   ;;  %v19102_v3 = vmax.f32 %v14461_v60, 0.0  ;;  %v14884_v49 = vpop.f32.mrf.mxu1 }
 0x2f0   : > { %19099 = vst [vmem:[#allocation59_spill] sm:$0xff] %v14840_v63  ;;  %v6820_v44 = vmul.f32 %v14477_v30, %v6752_v4  ;;  %v19104_v46 = vrot.slane %v19103_v5, 1  ;;  %vm19105_vm5 = vcmask 1046528   ;;  %v19107_v59 = vrot.slane %v19103_v5, 7  ;;  %vm19110_vm3 = vmmov %vm19101_vm12  ;;  %v11141_v4 = vld [vmem:[%s12397_s26 + $0x2d8] sm:$0xf0] }
 0x2f1   : > { %19100 = vst [vmem:[#allocation60_spill] sm:$0xff] %v14846_v37  ;;  %v14855_v41 = vmax.f32 %v2612_v42, %v19102_v3  ;;  %vm19108_vm7 = vcmask 1040384   ;;  %v11136_v48 = vor.u32 %v12088_v58, %v11133_v16  ;;  %v11124_v56 = vor.u32 %v12087_v36, %v11123_v29  ;;  %v19121_v36 = vld [vmem:[#allocation37_spill] sm:$0xff]  ;;  %v19123_v3 = vld [vmem:[#allocation52_spill] sm:$0xff] }
 0x2f2   : > { %7582 = vst.msk [vmem:[#allocation2 + $0x78] sm:$0xf] %vm19101_vm12, %v7549_v7  ;;  %v14861_v27 = vsel %vm19105_vm5, %v19104_v46, %v7812_v34  ;;  %v14866_v55 = vsel %vm19108_vm7, %v19107_v59, %v7439_v31  ;;  %v18697_v21 = vmax.f32 %v14840_v63, 0.0  ;;  %v6856_v20 = vadd.f32 %v14492_v24, %v6820_v44  ;;  %vm19115_vm5 = vmmov %vm19108_vm7 }
 0x2f3   : > { %19106 = vst [vmem:[#allocation51_spill] sm:$0xff] %v14861_v27  ;;  %v7896_v60 = vsel %vm14831_vm4, %v14861_v27, 0.0  ;;  %v8957_v30 = vsel %vm14163_vm2, %v14861_v27, 0.0  ;;  %v2390_v52 = vadd.f32 %v14795_v50, %v2258_v28  ;;  %v2259_v6 = vmul.f32 %v14784_v8, %v2036_v2  ;;  %vm19116_vm7 = vmmov %vm19110_vm3  ;;  %v12090_v2 = vld [vmem:[%s12397_s26 + $0x2d4] sm:$0xf] }
 0x2f4   : > { %19109 = vst [vmem:[#allocation61_spill] sm:$0xff] %v14866_v55  ;;  %v7927_v15 = vpack.c.bf16 %v7896_v60, %v7896_v60  ;;  %v8987_v18 = vpack.c.bf16 %v8957_v30, %v8957_v30  ;;  %v8125_v62 = vsel %vm14809_vm0, %v14866_v55, 0.0  ;;  %v2262_v11 = vmul.f32 %v14784_v8, %v2044_v17  ;;  %1753 = vmatmul.bf16.gmra.mxu0 %v11124_v56 }
 0x2f5   : > { %8352 = vst.msk [vmem:[#allocation2 + $0x7c] sm:$0xf] %vm19110_vm3, %v14846_v37  ;;  %v2517_v54 = vmax.f32 %v2389_v33, 0.0  ;;  %v14887_v32 = vrot.slane %v14855_v41, 2  ;;  %v14889_v43 = vmax.f32 %v6856_v20, 0.0  ;;  %v8157_v24 = vpack.c.bf16 %v8125_v62, %v8125_v62 }
 0x2f6   : > { %9017 = vst.msk [vmem:[#allocation2 + $0x5c] sm:$0xf] %vm19110_vm3, %v8987_v18  ;;  %8001 = vrot.lane.b32.xlu2 %v7927_v15, %s12278_s19  ;;  %vm19112_vm12 = vcmask 154624   ;;  %v14895_v40 = vadd.f32 %v14795_v50, %v2262_v11  ;;  %v2046_v57 = vadd.f32 %v14773_v12, %v1716_v9  ;;  %v2518_v53 = vmax.f32 %v2390_v52, 0.0  ;;  %v1719_v60 = vpop.f32.mrf.mxu0  ;;  %v11131_v52 = vld [vmem:[%s12397_s26 + $0x2c0] sm:$0xf] }
 0x2f7   : > { %11369 = vmatmul.msk.bf16.gmra.mxu1 %vm19112_vm12, %v11136_v48  ;;  %v2613_v10 = vmax.f32 %v2517_v54, %v18697_v21  ;;  %8231 = vrot.lane.b32.xlu0 %v8157_v24, %s12279_s21  ;;  %v18699_v61 = vrot.slane %v14889_v43, 7  ;;  %v14904_v39 = vpack.c.bf16 %v14889_v43, %v14889_v43  ;;  %v18700_v42 = vrot.slane %v14889_v43, 1  ;;  %vm19125_vm12 = vmmov %vm19116_vm7  ;;  %v14947_v46 = vpop.f32.mrf.mxu1  ;;  %v12089_v9 = vld [vmem:[%s12397_s26 + $0x2c4] sm:$0xf0] }
 0x2f8   : > { %19113 = vst [vmem:[#allocation62_spill] sm:$0xff] %v14895_v40  ;;  %v2391_v58 = vadd.f32 %v14795_v50, %v2259_v6  ;;  %v18696_v12 = vmax.f32 %v14895_v40, 0.0  ;;  %v2263_v45 = vmul.f32 %v14784_v8, %v2046_v57  ;;  %v14911_v25 = vrot.slane %v14855_v41, 4 }
 0x2f9   : > { %19114 = vst [vmem:[#allocation63_spill] sm:$0xff] %v14904_v39  ;;  %v3277_v13 = vperm.slane %v14887_v32, 1  ;;  %v7442_v23 = vsel %vm19115_vm5, %v7439_v31, %v18699_v61  ;;  %vm19117_vm3 = vcmask 1046528   ;;  %v19122_v28 = vmax.f32 %v19121_v36, 0.0  ;;  %vm19126_vm5 = vmmov %vm19116_vm7 }
 0x2fa   : > { %8353 = vst.msk [vmem:[#allocation2 + $0x88] sm:$0xf] %vm19116_vm7, %v14904_v39  ;;  %v7815_v7 = vsel %vm19117_vm3, %v7812_v34, %v18700_v42  ;;  %v2614_v33 = vmax.f32 %v2518_v53, %v18696_v12  ;;  %v14924_v16 = vpack.c.bf16 %v7442_v23, %v7442_v23  ;;  %v14927_v14 = vadd.f32 %v14795_v50, %v2263_v45  ;;  %v19128_v53 = vld [vmem:[#allocation43_spill] sm:$0xff] }
 0x2fb   : > { %v14929_v29 = vpack.c.bf16 %v7815_v7, %v7815_v7  ;;  %v14933_v31 = vmax.f32 %v2613_v10, %v19122_v28  ;;  %v3276_v17 = vperm.slane %v14855_v41, 1  ;;  %v19124_v34 = vmax.f32 %v19123_v3, 0.0 }
 0x2fc   : > { %19118 = vst [vmem:[#allocation64_spill] sm:$0xff] %v14924_v16  ;;  %8233 = vrot.lane.b32.xlu1 %v14924_v16, %s12279_s21  ;;  %v18694_v5 = vmax.f32 %v14927_v14, 0.0  ;;  %v2519_v59 = vmax.f32 %v2391_v58, 0.0  ;;  %v3278_v30 = vperm.slane %v14911_v25, 1  ;;  %vm19127_vm7 = vcmask 1042434  }
 0x2fd   : > { %19119 = vst [vmem:[#allocation65_spill] sm:$0xff] %v14927_v14  ;;  %v14940_v44 = vmax.f32 %v2614_v33, %v19124_v34  ;;  %v3507_v48 = vsel %vm19127_vm7, %v3277_v13, %v3276_v17  ;;  %v11144_v20 = vor.u32 %v12090_v2, %v11141_v4  ;;  %v14967_v6 = vrot.slane %v14855_v41, 6 }
 0x2fe   : > { %19120 = vst [vmem:[#allocation66_spill] sm:$0xff] %v14929_v29  ;;  %7687 = vrot.lane.b32.xlu2 %v14846_v37, %s12277_s0  ;;  %v2615_v18 = vmax.f32 %v2519_v59, %v18694_v5  ;;  %v14970_v62 = vrot.slane %v14933_v31, 2  ;;  %v3280_v11 = vperm.slane %v14933_v31, 1  ;;  %v2049_v24 = vadd.f32 %v14820_v1, %v1719_v60 }
 0x2ff   : > { %7585 = vst.msk [vmem:[#allocation2 + $0x9c] sm:$0xf] %vm19125_vm12, %v14924_v16  ;;  %v14956_v56 = vrot.slane %v14940_v44, 2  ;;  %v14959_v15 = vrot.slane %v14940_v44, 4  ;;  %7689 = vrot.lane.b32.xlu0 %v14904_v39, %s12277_s0  ;;  %v3284_v54 = vperm.slane %v14940_v44, 1  ;;  %v14977_v57 = vrot.slane %v14933_v31, 6  ;;  %v15000_v17 = vpop.f32.mrf.mxu1 }
 0x300   : > { %9018 = vst.msk [vmem:[#allocation2 + $0x68] sm:$0xf] %vm19126_vm5, %v14929_v29  ;;  %v19129_v58 = vmax.f32 %v19128_v53, 0.0  ;;  %v14985_v13 = vrot.slane %v14933_v31, 4  ;;  %v14988_v23 = vrot.slane %v14940_v44, 6  ;;  %v3279_v7 = vperm.slane %v14967_v6, 1 }
 0x301   : > { %v3285_v10 = vperm.slane %v14956_v56, 1  ;;  %v3281_v1 = vperm.slane %v14970_v62, 1  ;;  %v3283_v33 = vperm.slane %v14977_v57, 1  ;;  %vm19130_vm3 = vcmask 1043459  }
 0x302   : > { %v14982_v45 = vmax.f32 %v2615_v18, %v19129_v58  ;;  %v3508_v36 = vsel %vm19130_vm3, %v3278_v30, %v3507_v48  ;;  %v3286_v28 = vperm.slane %v14959_v15, 1  ;;  %v11132_v2 = vor.u32 %v12089_v9, %v11131_v52  ;;  %v1721_v30 = vpop.f32.mrf.mxu0  ;;  %v15010_v52 = vld [vmem:[%s12397_s26 + $0x2e4] sm:$0xf]  ;;  %v15013_v9 = vld [vmem:[%s12397_s26 + $0x2e8] sm:$0xf0] }
 0x303   : > { %vm19131_vm12 = vcmask 1044484   ;;  %vm19132_vm5 = vcmask 1041409   ;;  %v2264_v60 = vmul.f32 %v14784_v8, %v2049_v24  ;;  %v3282_v48 = vperm.slane %v14985_v13, 1 }
 0x304   : > { %v14996_v4 = vrot.slane %v14982_v45, 2  ;;  %8003 = vrot.lane.b32.xlu1 %v14929_v29, %s12278_s19  ;;  %v3509_v3 = vsel %vm19131_vm12, %v3279_v7, %v3508_v36  ;;  %v3513_v34 = vsel %vm19132_vm5, %v3284_v54, %v3283_v33  ;;  %v3288_v59 = vperm.slane %v14982_v45, 1  ;;  %1758 = vmatmul.bf16.gmra.mxu0 %v11132_v2  ;;  %v15022_v7 = vld [vmem:[%s12397_s26 + $0x2d0] sm:$0xf]  ;;  %v15025_v33 = vld [vmem:[%s12397_s26 + $0x2d4] sm:$0xf0] }
 0x305   : > { %vm19133_vm7 = vcmask 1045509   ;;  %vm19134_vm3 = vcmask 154624   ;;  %v15016_v53 = vrot.slane %v14982_v45, 4  ;;  %v3287_v54 = vperm.slane %v14988_v23, 1 }
 0x306   : > { %v3510_v18 = vsel %vm19133_vm7, %v3280_v11, %v3509_v3  ;;  %vm19135_vm12 = vcmask 1046534   ;;  %vm19136_vm5 = vcmask 1042434   ;;  %vm19137_vm7 = vcmask 1043459  }
 0x307   : > { %11370 = vmatmul.msk.bf16.gmra.mxu1 %vm19134_vm3, %v11144_v20  ;;  %v3511_v58 = vsel %vm19135_vm12, %v3281_v1, %v3510_v18  ;;  %v3514_v24 = vsel %vm19136_vm5, %v3285_v10, %v3513_v34  ;;  %v3289_v20 = vperm.slane %v14996_v4, 1  ;;  %vm19138_vm3 = vcmask 1044484  }
 0x308   : > { %v3515_v11 = vsel %vm19137_vm7, %v3286_v28, %v3514_v24  ;;  %v11517_v3 = vrot.slane %v14855_v41, 9  ;;  %v11152_v5 = vor.u32 %v15010_v52, %v15013_v9  ;;  %vm19139_vm0 = vcmask 1047559  }
 0x309   : > { %v3516_v36 = vsel %vm19138_vm3, %v3287_v54, %v3515_v11  ;;  %v3512_v1 = vsel %vm19139_vm0, %v3282_v48, %v3511_v58  ;;  %vm19140_vm12 = vcmask 1045509   ;;  %v11525_v2 = vrot.slane %v14940_v44, 9 }
 0x30a   : > { %v3517_v10 = vsel %vm19140_vm12, %v3288_v59, %v3516_v36  ;;  %v15037_v34 = vadd.f32 %v14795_v50, %v2264_v60  ;;  %v11140_v18 = vor.u32 %v15025_v33, %v15022_v7  ;;  %v3290_v28 = vperm.slane %v15016_v53, 1  ;;  %v15048_v59 = vpop.f32.mrf.mxu1  ;;  %v15054_v33 = vpop.f32.mrf.mxu0 }
 0x30b   : > { %v15043_v54 = vadd.f32 %v14884_v49, %v1721_v30  ;;  %v2879_v24 = vrot.slane %v14982_v45, 6  ;;  %vm19141_vm5 = vcmask 1046534   ;;  %v11518_v48 = vrot.slane %v14887_v32, 9  ;;  %v7998_v36 = vpop.permute.xlu2 %7997 }
 0x30c   : > { %v3518_v52 = vsel %vm19141_vm5, %v3289_v20, %v3517_v10  ;;  %vm19142_vm0 = vcmask 1040384   ;;  %v11519_v60 = vrot.slane %v14911_v25, 9  ;;  %v11520_v58 = vrot.slane %v14967_v6, 9 }
 0x30d   : > { %v3635_v9 = vsel %vm19142_vm0, 0.0, %v3512_v1  ;;  %v11521_v7 = vrot.slane %v14933_v31, 9  ;;  %v11522_v49 = vrot.slane %v14970_v62, 9  ;;  %v11523_v30 = vrot.slane %v14985_v13, 9 }
 0x30e   : > { %v11524_v20 = vrot.slane %v14977_v57, 9  ;;  %v11526_v11 = vrot.slane %v14956_v56, 9  ;;  %vm19143_vm7 = vcmask 1047559   ;;  %v11527_v1 = vrot.slane %v14959_v15, 9 }
 0x30f   : > { %v3519_v10 = vsel %vm19143_vm7, %v3290_v28, %v3518_v52  ;;  %v11528_v12 = vrot.slane %v14988_v23, 9  ;;  %v11529_v21 = vrot.slane %v14982_v45, 9  ;;  %vm19144_vm3 = vcmask 781824  }
 0x310   : > { %8085 = vst.msk [vmem:[#allocation2 + $0x6c] sm:$0xf] %vm19144_vm3, %v7998_v36  ;;  %v11530_v47 = vrot.slane %v14996_v4, 9  ;;  %v11531_v61 = vrot.slane %v15016_v53, 9  ;;  %v11532_v42 = vrot.slane %v2879_v24, 9  ;;  %v4539_v19 = vmax.f32 %v14855_v41, %v11517_v3 }
 0x311   : > { %v4540_v26 = vmax.f32 %v14887_v32, %v11518_v48  ;;  %v4541_v29 = vmax.f32 %v14911_v25, %v11519_v60  ;;  %v4542_v28 = vmax.f32 %v14967_v6, %v11520_v58  ;;  %v4543_v52 = vmax.f32 %v14933_v31, %v11521_v7 }
 0x312   : > { %v4544_v39 = vmax.f32 %v14970_v62, %v11522_v49  ;;  %v4731_v16 = vrot.slane %v3635_v9, 2  ;;  %v4732_v37 = vrot.slane %v3635_v9, 4  ;;  %v4733_v36 = vrot.slane %v3635_v9, 6  ;;  %v15078_v60 = vpop.f32.mrf.mxu1 }
 0x313   : > { %v4545_v27 = vmax.f32 %v14985_v13, %v11523_v30  ;;  %v4546_v0 = vmax.f32 %v14977_v57, %v11524_v20  ;;  %v4734_v51 = vrot.slane %v3519_v10, 2  ;;  %v4735_v22 = vrot.slane %v3519_v10, 4 }
 0x314   : > { %v4547_v41 = vmax.f32 %v14940_v44, %v11525_v2  ;;  %v4736_v32 = vrot.slane %v3519_v10, 6  ;;  %v4843_v3 = vrot.slane %v3635_v9, 1  ;;  %v4844_v25 = vrot.slane %v4731_v16, 1  ;;  %v7684_v44 = vpop.permute.xlu2 %7683  ;;  %v15083_v2 = vpop.f32.mrf.mxu0  ;;  %1763 = vmatmul.bf16.gmra.mxu0 %v11140_v18 }
 0x315   : > { %v4548_v6 = vmax.f32 %v14956_v56, %v11526_v11  ;;  %v4549_v31 = vmax.f32 %v14959_v15, %v11527_v1  ;;  %v4845_v48 = vrot.slane %v4732_v37, 1  ;;  %v4847_v62 = vrot.slane %v3519_v10, 1 }
 0x316   : > { %v4550_v58 = vmax.f32 %v14988_v23, %v11528_v12  ;;  %v4551_v13 = vmax.f32 %v14982_v45, %v11529_v21  ;;  %v4846_v57 = vrot.slane %v4733_v36, 1  ;;  %v4848_v7 = vrot.slane %v4734_v51, 1 }
 0x317   : > { %vm19145_vm12 = vcmask 154624   ;;  %v4552_v49 = vmax.f32 %v14996_v4, %v11530_v47  ;;  %v4553_v56 = vmax.f32 %v15016_v53, %v11531_v61  ;;  %v4849_v15 = vrot.slane %v4735_v22, 1 }
 0x318   : > { %11371 = vmatmul.msk.bf16.gmra.mxu1 %vm19145_vm12, %v11152_v5  ;;  %v5292_v30 = vmax.f32 %v4540_v26, %v4843_v3  ;;  %vm19146_vm5 = vcmask 519424   ;;  %v4554_v20 = vmax.f32 %v2879_v24, %v11532_v42  ;;  %v4850_v12 = vrot.slane %v4736_v32, 1 }
 0x319   : > { %7769 = vst.msk [vmem:[#allocation2 + $0x78] sm:$0xf] %vm19146_vm5, %v7684_v44  ;;  %v5293_v23 = vmax.f32 %v4541_v29, %v4731_v16  ;;  %v5294_v21 = vmax.f32 %v4542_v28, %v4844_v25  ;;  %v5291_v45 = vmax.f32 %v4539_v19, %v3635_v9  ;;  %v5295_v11 = vmax.f32 %v4543_v52, %v4732_v37 }
 0x31a   : > { %v5296_v1 = vmax.f32 %v4544_v39, %v4845_v48  ;;  %v5300_v5 = vmax.f32 %v4548_v6, %v4847_v62  ;;  %v5297_v14 = vmax.f32 %v4545_v27, %v4733_v36  ;;  %v5298_v40 = vmax.f32 %v4546_v0, %v4846_v57 }
 0x31b   : > { %v5301_v63 = vmax.f32 %v4549_v31, %v4734_v51  ;;  %v5302_v38 = vmax.f32 %v4550_v58, %v4848_v7  ;;  %v5299_v47 = vmax.f32 %v4547_v41, %v3519_v10  ;;  %v5303_v4 = vmax.f32 %v4551_v13, %v4735_v22  ;;  %v15088_v10 = vpop.f32.mrf.mxu1 }
 0x31c   : > { %v5304_v61 = vmax.f32 %v4552_v49, %v4849_v15  ;;  %v5548_v53 = vpack.c.bf16 %v5292_v30, %v5292_v30  ;;  %v5305_v26 = vmax.f32 %v4553_v56, %v4736_v32  ;;  %v5306_v3 = vmax.f32 %v4554_v20, %v4850_v12  ;;  %v12094_v30 = vld [vmem:[%s12397_s26 + $0x2f4] sm:$0xf]  ;;  %v11157_v20 = vld [vmem:[%s12397_s26 + $0x2f8] sm:$0xf0] }
 0x31d   : > { %v5549_v44 = vpack.c.bf16 %v5293_v23, %v5293_v23  ;;  %v5550_v18 = vpack.c.bf16 %v5294_v21, %v5294_v21  ;;  %v5547_v42 = vpack.c.bf16 %v5291_v45, %v5291_v45  ;;  %v5551_v24 = vpack.c.bf16 %v5295_v11, %v5295_v11  ;;  %v11147_v11 = vld [vmem:[%s12397_s26 + $0x2e0] sm:$0xf] }
 0x31e   : > { %v5552_v16 = vpack.c.bf16 %v5296_v1, %v5296_v1  ;;  %v5556_v29 = vpack.c.bf16 %v5300_v5, %v5300_v5  ;;  %v5553_v19 = vpack.c.bf16 %v5297_v14, %v5297_v14  ;;  %v5554_v37 = vpack.c.bf16 %v5298_v40, %v5298_v40  ;;  %v1729_v14 = vpop.f32.mrf.mxu0 }
 0x31f   : > { %v5557_v39 = vpack.c.bf16 %v5301_v63, %v5301_v63  ;;  %v5558_v9 = vpack.c.bf16 %v5302_v38, %v5302_v38  ;;  %v5555_v27 = vpack.c.bf16 %v5299_v47, %v5299_v47  ;;  %v5559_v0 = vpack.c.bf16 %v5303_v4, %v5303_v4 }
 0x320   : > { %v5560_v51 = vpack.c.bf16 %v5304_v61, %v5304_v61  ;;  %v6064_v28 = vunpack.c.l.b16 %v5548_v53  ;;  %v5561_v22 = vpack.c.bf16 %v5305_v26, %v5305_v26  ;;  %v5562_v52 = vpack.c.bf16 %v5306_v3, %v5306_v3  ;;  %v12093_v61 = vld [vmem:[%s12397_s26 + $0x2e4] sm:$0xf0] }
 0x321   : > { %v6065_v36 = vunpack.c.l.b16 %v5549_v44  ;;  %v6066_v41 = vunpack.c.l.b16 %v5550_v18  ;;  %v6063_v32 = vunpack.c.l.b16 %v5547_v42  ;;  %v6067_v25 = vunpack.c.l.b16 %v5551_v24 }
 0x322   : > { %v6068_v6 = vunpack.c.l.b16 %v5552_v16  ;;  %v6072_v31 = vunpack.c.l.b16 %v5556_v29  ;;  %v6069_v40 = vunpack.c.l.b16 %v5553_v19  ;;  %v6070_v63 = vunpack.c.l.b16 %v5554_v37  ;;  %v8228_v29 = vpop.permute.xlu0 %8227 }
 0x323   : > { %v6073_v38 = vunpack.c.l.b16 %v5557_v39  ;;  %v6074_v48 = vunpack.c.l.b16 %v5558_v9  ;;  %v6075_v62 = vunpack.c.l.b16 %v5559_v0  ;;  %v6076_v58 = vunpack.c.l.b16 %v5560_v51  ;;  %v15101_v19 = vpop.f32.mrf.mxu1 }
 0x324   : > { %v6415_v13 = vrot.slane %v6064_v28, 7  ;;  %v6417_v57 = vrot.slane %v6065_v36, 6  ;;  %v6071_v7 = vunpack.c.l.b16 %v5555_v27  ;;  %v6077_v49 = vunpack.c.l.b16 %v5561_v22 }
 0x325   : > { %v6078_v56 = vunpack.c.l.b16 %v5562_v52  ;;  %v6419_v15 = vrot.slane %v6066_v41, 5  ;;  %vm19147_vm0 = vcmask 1041409   ;;  %v6421_v23 = vrot.slane %v6067_v25, 4 }
 0x326   : > { %v6416_v12 = vsel %vm19147_vm0, %v6415_v13, %v6063_v32  ;;  %v6429_v21 = vrot.slane %v6072_v31, 7  ;;  %v6431_v45 = vrot.slane %v6073_v38, 6  ;;  %vm19148_vm7 = vcmask 1042434   ;;  %vm19150_vm12 = vmmov %vm19147_vm0  ;;  %v1731_v0 = vpop.f32.mrf.mxu0 }
 0x327   : > { %v6418_v1 = vsel %vm19148_vm7, %v6417_v57, %v6416_v12  ;;  %v6423_v5 = vrot.slane %v6068_v6, 3  ;;  %v6425_v47 = vrot.slane %v6069_v40, 2  ;;  %v6433_v4 = vrot.slane %v6074_v48, 5  ;;  %vm19152_vm6 = vmmov %vm19148_vm7  ;;  %v15125_v48 = vld [vmem:[%s18556_s5] ss:$0 sm:$0xff] }
 0x328   : > { %vm19149_vm3 = vcmask 1043459   ;;  %v6430_v26 = vsel %vm19150_vm12, %v6429_v21, %v6071_v7  ;;  %v6435_v3 = vrot.slane %v6075_v62, 4  ;;  %v6437_v44 = vrot.slane %v6076_v58, 3  ;;  %v15135_v57 = vld [vmem:[%s18557_s6] ss:$0 sm:$0xff] }
 0x329   : > { %v6420_v53 = vsel %vm19149_vm3, %v6419_v15, %v6418_v1  ;;  %vm19151_vm5 = vcmask 1044484   ;;  %v6432_v42 = vsel %vm19152_vm6, %v6431_v45, %v6430_v26  ;;  %v11160_v24 = vor.u32 %v12094_v30, %v11157_v20  ;;  %vm19154_vm7 = vmmov %vm19149_vm3  ;;  %v12095_v26 = vld [vmem:[%s12397_s26 + $0x2f4] sm:$0xf0] }
 0x32a   : > { %v6422_v18 = vsel %vm19151_vm5, %v6421_v23, %v6420_v53  ;;  %v2059_v16 = vadd.f32 %v15048_v59, %v1729_v14  ;;  %vm19153_vm0 = vcmask 1045509   ;;  %v6434_v39 = vsel %vm19154_vm7, %v6433_v4, %v6432_v42  ;;  %v6755_v14 = vpop.f32.mrf.mxu2  ;;  %v7686_v20 = vpop.permute.xlu0 %7685  ;;  %v11155_v4 = vld [vmem:[%s12397_s26 + $0x2f0] sm:$0xf] }
 0x32b   : > { %v6424_v37 = vsel %vm19153_vm0, %v6423_v5, %v6422_v18  ;;  %v6439_v9 = vrot.slane %v6077_v49, 2  ;;  %vm19155_vm3 = vcmask 1044224   ;;  %v11148_v27 = vor.u32 %v12093_v61, %v11147_v11  ;;  %vm19158_vm9 = vmmov %vm19153_vm0  ;;  %v15148_v12 = vpop.f32.mrf.mxu1 }
 0x32c   : > { %8316 = vst.msk [vmem:[#allocation2 + $0x60] sm:$0xf] %vm19155_vm3, %v8228_v29  ;;  %vm19156_vm12 = vcmask 1046534   ;;  %v6436_v28 = vsel %vm19151_vm5, %v6435_v3, %v6434_v39  ;;  %vm19157_vm6 = vcmask 154624   ;;  %v2268_v59 = vmul.f32 %v14784_v8, %v2059_v16 }
 0x32d   : > { %v6426_v51 = vsel %vm19156_vm12, %v6425_v47, %v6424_v37  ;;  %11372 = vmatmul.msk.bf16.gmra.mxu1 %vm19157_vm6, %v11160_v24  ;;  %v6923_v22 = vadd.s32 104, %v13098_v35  ;;  %v6427_v52 = vrot.slane %v6070_v63, 1  ;;  %v6438_v36 = vsel %vm19158_vm9, %v6437_v44, %v6436_v28  ;;  %1768 = vmatmul.bf16.gmra.mxu0 %v11148_v27  ;;  %vm19159_vm0 = vmmov %vm19156_vm12  ;;  %v11165_v47 = vld [vmem:[%s12397_s26 + $0x308] sm:$0xf0] }
 0x32e   : > { %v6441_v41 = vrot.slane %v6078_v56, 1  ;;  %v6922_v32 = vadd.s32 96, %v13098_v35  ;;  %v2054_v25 = vadd.f32 %v14947_v46, %v15054_v33  ;;  %v6440_v6 = vsel %vm19159_vm0, %v6439_v9, %v6438_v36  ;;  %v8230_v46 = vpop.permute.xlu1 %8229  ;;  %v1734_v11 = vpop.f32.mrf.mxu0 }
 0x32f   : > { %v15117_v31 = vadd.f32 %v14795_v50, %v2268_v59  ;;  %v2061_v40 = vadd.f32 %v15078_v60, %v1731_v0  ;;  %vm19161_vm7 = vcmask 1047559   ;;  %v6821_v62 = vmul.f32 %v15125_v48, %v6755_v14 }
 0x330   : > { %v6428_v38 = vsel %vm19161_vm7, %v6427_v52, %v6426_v51  ;;  %vm19162_vm3 = vmmov %vm19161_vm7  ;;  %v7030_v33 = vand.u32 15, %v6922_v32  ;;  %vm19164_vm9 = vcmask 1044224   ;;  %v7037_v13 = vand.u32 15, %v6923_v22  ;;  %v19185_v22 = vld [vmem:[#allocation46_spill] sm:$0xff] }
 0x331   : > { %19160 = vst [vmem:[#allocation37_spill] sm:$0xff] %v15117_v31  ;;  %v6442_v63 = vsel %vm19162_vm3, %v6441_v41, %v6440_v6  ;;  %v18721_v60 = vmax.f32 %v15117_v31, 0.0  ;;  %v6857_v7 = vadd.f32 %v15135_v57, %v6821_v62  ;;  %v19165_v49 = vmov 0 }
 0x332   : > { %v15128_v58 = vpack.c.b16 %v6442_v63, %v6428_v38  ;;  %8317 = vst.msk [vmem:[#allocation2 + $0x6c] sm:$0xf] %vm19164_vm9, %v8230_v46  ;;  %vm15138_vm12 = vcmp.ge.s32.totalorder %v7030_v33, 1  ;;  %v2265_v56 = vmul.f32 %v14784_v8, %v15043_v54  ;;  %v2266_v15 = vmul.f32 %v14784_v8, %v2054_v25  ;;  %v12096_v54 = vld [vmem:[%s12397_s26 + $0x304] sm:$0xf]  ;;  %v6757_v24 = vpop.f32.mrf.mxu2 }
 0x333   : > { %v19166_v49 = vsel %vm15138_vm12, 4294967295, %v19165_v49  ;;  %vm19168_vm5 = vcmask 261120   ;;  %v2269_v30 = vmul.f32 %v14784_v8, %v2061_v40  ;;  %v7520_v23 = vsel %vm15138_vm12, %v14866_v55, 0.0  ;;  %v11719_v6 = vld [vmem:[#allocation2 + $0x60] sm:$0xf]  ;;  %v15212_v62 = vpop.f32.mrf.mxu1 }
 0x334   : > { %19163 = vst [vmem:[#allocation52_spill] sm:$0xff] %v15128_v58  ;;  %11661 = vmatmul.msk.bf16.gmra.mxu2 %vm19168_vm5, %v15128_v58  ;;  %v2524_v21 = vmax.f32 %v15037_v34, 0.0  ;;  %v15154_v45 = vmax.f32 %v6857_v7, 0.0  ;;  %vm19169_vm6 = vcmask 519424   ;;  %v7551_v1 = vpack.c.bf16 %v7520_v23, %v7520_v23 }
 0x335   : > { %19167 = vst [vmem:[#allocation43_spill] sm:$0xff] %v19166_v49  ;;  %vm15158_vm0 = vcmp.le.s32.totalorder %v7037_v13, 14  ;;  %v19170_v5 = vmov 0  ;;  %vm19174_vm7 = vcmask 257024   ;;  %v2397_v44 = vadd.f32 %v14795_v50, %v2265_v56 }
 0x336   : > { %7770 = vst.msk [vmem:[#allocation2 + $0x84] sm:$0xf] %vm19169_vm6, %v7686_v20  ;;  %v19171_v5 = vsel %vm15158_vm0, 4294967295, %v19170_v5  ;;  %v2616_v61 = vmax.f32 %v2524_v21, %v18721_v60  ;;  %v7443_v53 = vrot.slane %v15154_v45, 7  ;;  %v7816_v34 = vrot.slane %v15154_v45, 1  ;;  %v8000_v51 = vpop.permute.xlu1 %7999  ;;  %vm19182_vm5 = vmmov %vm19174_vm7  ;;  %v1736_v7 = vpop.f32.mrf.mxu0 }
 0x337   : > { %19172 = vst [vmem:[#allocation67_spill] sm:$0xff] %v19171_v5  ;;  %v15171_v3 = vpack.c.bf16 %v15154_v45, %v15154_v45  ;;  %v2398_v18 = vadd.f32 %v14795_v50, %v2266_v15  ;;  %v15177_v42 = vadd.f32 %v14795_v50, %v2269_v30  ;;  %v2064_v16 = vadd.f32 %v15088_v10, %v1734_v11 }
 0x338   : > { %7584 = vst.msk [vmem:[#allocation2 + $0x90] sm:$0xf] %vm19174_vm7, %v7551_v1  ;;  %v2056_v29 = vadd.f32 %v15000_v17, %v15083_v2  ;;  %v6822_v37 = vmul.f32 %v15125_v48, %v6757_v24  ;;  %v19176_v39 = vrot.slane %v14889_v43, 1  ;;  %vm19177_vm3 = vcmask 1046528   ;;  %vm19188_vm7 = vmmov %vm19182_vm5 }
 0x339   : > { %19173 = vst [vmem:[#allocation68_spill] sm:$0xff] %v15171_v3  ;;  %v19179_v27 = vrot.slane %v14889_v43, 7  ;;  %vm19180_vm9 = vcmask 1040384   ;;  %v12152_v28 = vld [vmem:[#allocation2 + $0x68] sm:$0xf0]  ;;  %v11168_v59 = vor.u32 %v12096_v54, %v11165_v47  ;;  %vm19184_vm6 = vcmask 781824  }
 0x33a   : > { %19175 = vst [vmem:[#allocation69_spill] sm:$0xff] %v15177_v42  ;;  %v15186_v9 = vsel %vm19177_vm3, %v19176_v39, %v7816_v34  ;;  %v11156_v43 = vor.u32 %v12095_v26, %v11155_v4  ;;  %v19186_v52 = vmax.f32 %v19185_v22, 0.0  ;;  %v6858_v41 = vadd.f32 %v15135_v57, %v6822_v37 }
 0x33b   : > { %19178 = vst [vmem:[#allocation70_spill] sm:$0xff] %v15186_v9  ;;  %v15191_v0 = vsel %vm19180_vm9, %v19179_v27, %v7443_v53  ;;  %v7898_v17 = vsel %vm15158_vm0, %v15186_v9, 0.0  ;;  %v8959_v10 = vsel %vm14512_vm8, %v15186_v9, 0.0  ;;  %v18719_v14 = vmax.f32 %v15177_v42, 0.0  ;;  %v19198_v27 = vld [vmem:[#allocation62_spill] sm:$0xff] }
 0x33c   : > { %19181 = vst [vmem:[#allocation71_spill] sm:$0xff] %v15191_v0  ;;  %v15204_v36 = vmax.f32 %v2616_v61, %v19186_v52  ;;  %v7929_v32 = vpack.c.bf16 %v7898_v17, %v7898_v17  ;;  %v8989_v25 = vpack.c.bf16 %v8959_v10, %v8959_v10  ;;  %v8127_v40 = vsel %vm15138_vm12, %v15191_v0, 0.0  ;;  %v12098_v17 = vld [vmem:[%s12397_s26 + $0x314] sm:$0xf] }
 0x33d   : > { %8354 = vst.msk [vmem:[#allocation2 + $0x94] sm:$0xf] %vm19182_vm5, %v15171_v3  ;;  %v2270_v38 = vmul.f32 %v14784_v8, %v2064_v16  ;;  %v11720_v63 = vor.u32 %v12152_v28, %v11719_v6  ;;  %v2267_v46 = vmul.f32 %v14784_v8, %v2056_v29  ;;  %v15215_v33 = vmax.f32 %v6858_v41, 0.0  ;;  %1773 = vmatmul.bf16.gmra.mxu0 %v11156_v43  ;;  %v19196_v29 = vld [vmem:[#allocation59_spill] sm:$0xff]  ;;  %v15273_v28 = vpop.f32.mrf.mxu1 }
 0x33e   : > { %8086 = vst.msk [vmem:[#allocation2 + $0x78] sm:$0xf] %vm19184_vm6, %v8000_v51  ;;  %8005 = vrot.lane.b32.xlu2 %v7929_v32, %s12278_s19  ;;  %v8159_v13 = vpack.c.bf16 %v8127_v40, %v8127_v40  ;;  %v2525_v56 = vmax.f32 %v2397_v44, 0.0  ;;  %vm19189_vm3 = vcmask 154624   ;;  %v2066_v30 = vadd.f32 %v15101_v19, %v1736_v7  ;;  %v11173_v43 = vld [vmem:[%s12397_s26 + $0x318] sm:$0xf0]  ;;  %v1739_v22 = vpop.f32.mrf.mxu0 }
 0x33f   : > { %19187 = vst [vmem:[#allocation46_spill] sm:$0xff] %v15215_v33  ;;  %11373 = vmatmul.msk.bf16.gmra.mxu1 %vm19189_vm3, %v11168_v59  ;;  %v15221_v15 = vadd.f32 %v14795_v50, %v2270_v38  ;;  %9566 = vmatmul.bf16.gmra.mxu3 %v11720_v63  ;;  %v15225_v20 = vrot.slane %v15204_v36, 2  ;;  %v18720_v23 = vrot.slane %v15215_v33, 7  ;;  %v15231_v21 = vpack.c.bf16 %v15215_v33, %v15215_v33  ;;  %vm19201_vm3 = vmmov %vm19182_vm5  ;;  %v11163_v32 = vld [vmem:[%s12397_s26 + $0x300] sm:$0xf]  ;;  %v19203_v7 = vld [vmem:[#allocation65_spill] sm:$0xff] }
 0x340   : > { %9019 = vst.msk [vmem:[#allocation2 + $0x74] sm:$0xf] %vm19188_vm7, %v8989_v25  ;;  %8235 = vrot.lane.b32.xlu0 %v8159_v13, %s12279_s21  ;;  %v18722_v45 = vrot.slane %v15215_v33, 1  ;;  %v2526_v54 = vmax.f32 %v2398_v18, 0.0  ;;  %v2617_v11 = vmax.f32 %v2525_v56, %v18719_v14  ;;  %v2271_v1 = vmul.f32 %v14784_v8, %v2066_v30  ;;  %vm19200_vm7 = vmmov %vm19182_vm5  ;;  %v12097_v25 = vld [vmem:[%s12397_s26 + $0x304] sm:$0xf0] }
 0x341   : > { %19190 = vst [vmem:[#allocation72_spill] sm:$0xff] %v15221_v15  ;;  %v18718_v19 = vmax.f32 %v15221_v15, 0.0  ;;  %v2399_v47 = vadd.f32 %v14795_v50, %v2267_v46  ;;  %v15240_v4 = vrot.slane %v15204_v36, 4  ;;  %v7446_v61 = vsel %vm19180_vm9, %v7443_v53, %v18720_v23 }
 0x342   : > { %19191 = vst [vmem:[#allocation73_spill] sm:$0xff] %v15231_v21  ;;  %vm19192_vm6 = vcmask 1046528   ;;  %v15252_v18 = vpack.c.bf16 %v7446_v61, %v7446_v61  ;;  %v15255_v24 = vadd.f32 %v14795_v50, %v2271_v1  ;;  %v3292_v53 = vperm.slane %v15225_v20, 1 }
 0x343   : > { %8355 = vst.msk [vmem:[#allocation2 + $0xa0] sm:$0xf] %vm19182_vm5, %v15231_v21  ;;  %v7819_v26 = vsel %vm19192_vm6, %v7816_v34, %v18722_v45  ;;  %v2618_v44 = vmax.f32 %v2526_v54, %v18718_v19  ;;  %v19197_v37 = vmax.f32 %v19196_v29, 0.0  ;;  %v19199_v34 = vmax.f32 %v19198_v27, 0.0 }
 0x344   : > { %19193 = vst [vmem:[#allocation74_spill] sm:$0xff] %v15252_v18  ;;  %v15257_v16 = vpack.c.bf16 %v7819_v26, %v7819_v26  ;;  %8237 = vrot.lane.b32.xlu1 %v15252_v18, %s12279_s21  ;;  %v18717_v50 = vmax.f32 %v15255_v24, 0.0  ;;  %v2527_v10 = vmax.f32 %v2399_v47, 0.0  ;;  %v3291_v59 = vperm.slane %v15204_v36, 1 }
 0x345   : > { %19194 = vst [vmem:[#allocation75_spill] sm:$0xff] %v15255_v24  ;;  %v15262_v39 = vmax.f32 %v2617_v11, %v19197_v37  ;;  %v15266_v51 = vmax.f32 %v2618_v44, %v19199_v34  ;;  %v3293_v52 = vperm.slane %v15240_v4, 1  ;;  %vm19202_vm9 = vcmask 1042434  }
 0x346   : > { %19195 = vst [vmem:[#allocation76_spill] sm:$0xff] %v15257_v16  ;;  %7691 = vrot.lane.b32.xlu2 %v15171_v3, %s12277_s0  ;;  %v3520_v6 = vsel %vm19202_vm9, %v3292_v53, %v3291_v59  ;;  %v2619_v40 = vmax.f32 %v2527_v10, %v18717_v50  ;;  %v11176_v63 = vor.u32 %v12098_v17, %v11173_v43  ;;  %v15297_v46 = vrot.slane %v15204_v36, 6  ;;  %v15327_v17 = vpop.f32.mrf.mxu1  ;;  %v15331_v43 = vpop.f32.mrf.mxu0  ;;  %v15352_v50 = vld [vmem:[%s12397_s26 + $0x314] sm:$0xf0] }
 0x347   : > { %7587 = vst.msk [vmem:[#allocation2 + $0xb4] sm:$0xf] %vm19200_vm7, %v15252_v18  ;;  %v15284_v41 = vrot.slane %v15266_v51, 2  ;;  %v15294_v38 = vrot.slane %v15266_v51, 4  ;;  %v15300_v13 = vrot.slane %v15262_v39, 2  ;;  %v19204_v56 = vmax.f32 %v19203_v7, 0.0 }
 0x348   : > { %9020 = vst.msk [vmem:[#allocation2 + $0x80] sm:$0xf] %vm19201_vm3, %v15257_v16  ;;  %7693 = vrot.lane.b32.xlu0 %v15231_v21, %s12277_s0  ;;  %v11164_v54 = vor.u32 %v12097_v25, %v11163_v32  ;;  %v15307_v11 = vrot.slane %v15262_v39, 4  ;;  %v15310_v1 = vrot.slane %v15262_v39, 6  ;;  %v3295_v47 = vperm.slane %v15262_v39, 1 }
 0x349   : > { %v15304_v30 = vmax.f32 %v2619_v40, %v19204_v56  ;;  %v3299_v61 = vperm.slane %v15266_v51, 1  ;;  %v3300_v26 = vperm.slane %v15284_v41, 1  ;;  %vm19205_vm5 = vcmask 1043459   ;;  %19206 = vst [vmem:[#allocation59_spill] sm:$0xff] %v15327_v17  ;;  %v15341_v40 = vld [vmem:[%s12397_s26 + $0x328] sm:$0xf0] }
 0x34a   : > { %v3521_v44 = vsel %vm19205_vm5, %v3293_v52, %v3520_v6  ;;  %v15317_v53 = vrot.slane %v15266_v51, 6  ;;  %v3294_v37 = vperm.slane %v15297_v46, 1  ;;  %v3296_v27 = vperm.slane %v15300_v13, 1  ;;  %v15338_v6 = vld [vmem:[%s12397_s26 + $0x324] sm:$0xf] }
 0x34b   : > { %v15320_v29 = vrot.slane %v15304_v30, 2  ;;  %v3301_v34 = vperm.slane %v15294_v38, 1  ;;  %v3298_v10 = vperm.slane %v15310_v1, 1  ;;  %v2069_v59 = vadd.f32 %v15148_v12, %v1739_v22  ;;  %v15349_v22 = vld [vmem:[%s12397_s26 + $0x310] sm:$0xf] }
 0x34c   : > { %8007 = vrot.lane.b32.xlu1 %v15257_v16, %s12278_s19  ;;  %v3297_v52 = vperm.slane %v15307_v11, 1  ;;  %vm19207_vm6 = vcmask 1044484   ;;  %v3303_v25 = vperm.slane %v15304_v30, 1  ;;  %vm19208_vm7 = vcmask 154624  }
 0x34d   : > { %v3522_v32 = vsel %vm19207_vm6, %v3294_v37, %v3521_v44  ;;  %v15344_v7 = vrot.slane %v15304_v30, 4  ;;  %vm19209_vm3 = vcmask 1045509   ;;  %vm19210_vm9 = vcmask 1041409   ;;  %1778 = vmatmul.bf16.gmra.mxu0 %v11164_v54 }
 0x34e   : > { %v3523_v56 = vsel %vm19209_vm3, %v3295_v47, %v3522_v32  ;;  %v3526_v12 = vsel %vm19210_vm9, %v3299_v61, %v3298_v10  ;;  %v3302_v44 = vperm.slane %v15317_v53, 1  ;;  %vm19211_vm5 = vcmask 1046534  }
 0x34f   : > { %11374 = vmatmul.msk.bf16.gmra.mxu1 %vm19208_vm7, %v11176_v63  ;;  %v3304_v63 = vperm.slane %v15320_v29, 1  ;;  %v3524_v37 = vsel %vm19211_vm5, %v3296_v27, %v3523_v56  ;;  %vm19212_vm6 = vcmask 1042434   ;;  %vm19213_vm7 = vcmask 1043459  }
 0x350   : > { %v3527_v19 = vsel %vm19212_vm6, %v3300_v26, %v3526_v12  ;;  %v11533_v23 = vrot.slane %v15204_v36, 9  ;;  %v11184_v47 = vor.u32 %v15338_v6, %v15341_v40  ;;  %vm19214_vm3 = vcmask 1047559   ;;  %v8002_v40 = vpop.permute.xlu2 %8001 }
 0x351   : > { %v3528_v14 = vsel %vm19213_vm7, %v3301_v34, %v3527_v19  ;;  %v3525_v54 = vsel %vm19214_vm3, %v3297_v52, %v3524_v37  ;;  %vm19215_vm9 = vcmask 1044484   ;;  %v11541_v10 = vrot.slane %v15266_v51, 9 }
 0x352   : > { %v3529_v61 = vsel %vm19215_vm9, %v3302_v44, %v3528_v14  ;;  %v11172_v32 = vor.u32 %v15352_v50, %v15349_v22  ;;  %v3305_v27 = vperm.slane %v15344_v7, 1  ;;  %vm19216_vm5 = vcmask 1045509   ;;  %v15375_v14 = vpop.f32.mrf.mxu1 }
 0x353   : > { %v3530_v26 = vsel %vm19216_vm5, %v3303_v25, %v3529_v61  ;;  %v15370_v19 = vmul.f32 %v14784_v8, %v2069_v59  ;;  %v2891_v34 = vrot.slane %v15304_v30, 6  ;;  %vm19217_vm6 = vcmask 1046534   ;;  %v15382_v8 = vpop.f32.mrf.mxu0 }
 0x354   : > { %v3531_v6 = vsel %vm19217_vm6, %v3304_v63, %v3530_v26  ;;  %v11534_v52 = vrot.slane %v15225_v20, 9  ;;  %vm19218_vm7 = vcmask 1040384   ;;  %v11535_v50 = vrot.slane %v15240_v4, 9 }
 0x355   : > { %v3636_v56 = vsel %vm19218_vm7, 0.0, %v3525_v54  ;;  %v11536_v12 = vrot.slane %v15297_v46, 9  ;;  %v11537_v25 = vrot.slane %v15262_v39, 9  ;;  %vm19219_vm3 = vcmask 781824  }
 0x356   : > { %8087 = vst.msk [vmem:[#allocation2 + $0x84] sm:$0xf] %vm19219_vm3, %v8002_v40  ;;  %v11538_v59 = vrot.slane %v15300_v13, 9  ;;  %v11539_v22 = vrot.slane %v15307_v11, 9  ;;  %v11540_v44 = vrot.slane %v15310_v1, 9  ;;  %v11542_v63 = vrot.slane %v15284_v41, 9 }
 0x357   : > { %vm19220_vm9 = vcmask 1047559   ;;  %v11543_v54 = vrot.slane %v15294_v38, 9  ;;  %v11544_v61 = vrot.slane %v15317_v53, 9  ;;  %v11545_v26 = vrot.slane %v15304_v30, 9 }
 0x358   : > { %v3532_v37 = vsel %vm19220_vm9, %v3305_v27, %v3531_v6  ;;  %v11546_v40 = vrot.slane %v15320_v29, 9  ;;  %v11547_v60 = vrot.slane %v15344_v7, 9  ;;  %v11548_v45 = vrot.slane %v2891_v34, 9 }
 0x359   : > { %v4555_v58 = vmax.f32 %v15204_v36, %v11533_v23  ;;  %v4556_v49 = vmax.f32 %v15225_v20, %v11534_v52  ;;  %v4557_v16 = vmax.f32 %v15240_v4, %v11535_v50  ;;  %v4558_v21 = vmax.f32 %v15297_v46, %v11536_v12  ;;  %v7688_v50 = vpop.permute.xlu2 %7687 }
 0x35a   : > { %v4559_v27 = vmax.f32 %v15262_v39, %v11537_v25  ;;  %v4560_v6 = vmax.f32 %v15300_v13, %v11538_v59  ;;  %v4561_v18 = vmax.f32 %v15307_v11, %v11539_v22  ;;  %v4562_v3 = vmax.f32 %v15310_v1, %v11540_v44  ;;  %v15409_v25 = vpop.f32.mrf.mxu1 }
 0x35b   : > { %v4737_v9 = vrot.slane %v3636_v56, 2  ;;  %v4563_v55 = vmax.f32 %v15266_v51, %v11541_v10  ;;  %v4738_v2 = vrot.slane %v3636_v56, 4  ;;  %v4739_v5 = vrot.slane %v3636_v56, 6 }
 0x35c   : > { %v4740_v36 = vrot.slane %v3532_v37, 2  ;;  %v4741_v23 = vrot.slane %v3532_v37, 4  ;;  %v4742_v20 = vrot.slane %v3532_v37, 6  ;;  %v4851_v52 = vrot.slane %v3636_v56, 1 }
 0x35d   : > { %v4852_v4 = vrot.slane %v4737_v9, 1  ;;  %v4564_v46 = vmax.f32 %v15284_v41, %v11542_v63  ;;  %v4565_v39 = vmax.f32 %v15294_v38, %v11543_v54  ;;  %v4566_v13 = vmax.f32 %v15317_v53, %v11544_v61  ;;  %1783 = vmatmul.bf16.gmra.mxu0 %v11172_v32  ;;  %v15413_v53 = vpop.f32.mrf.mxu0 }
 0x35e   : > { %v4853_v11 = vrot.slane %v4738_v2, 1  ;;  %vm19221_vm5 = vcmask 519424   ;;  %v4567_v1 = vmax.f32 %v15304_v30, %v11545_v26  ;;  %v4854_v51 = vrot.slane %v4739_v5, 1 }
 0x35f   : > { %7771 = vst.msk [vmem:[#allocation2 + $0x90] sm:$0xf] %vm19221_vm5, %v7688_v50  ;;  %v4855_v10 = vrot.slane %v3532_v37, 1  ;;  %v4856_v12 = vrot.slane %v4740_v36, 1  ;;  %vm19222_vm6 = vcmask 154624   ;;  %v4568_v59 = vmax.f32 %v15320_v29, %v11546_v40 }
 0x360   : > { %11375 = vmatmul.msk.bf16.gmra.mxu1 %vm19222_vm6, %v11184_v47  ;;  %v4569_v41 = vmax.f32 %v15344_v7, %v11547_v60  ;;  %v4570_v22 = vmax.f32 %v2891_v34, %v11548_v45  ;;  %v4857_v38 = vrot.slane %v4741_v23, 1  ;;  %v4858_v44 = vrot.slane %v4742_v20, 1 }
 0x361   : > { %v5308_v63 = vmax.f32 %v4556_v49, %v4851_v52  ;;  %v5309_v54 = vmax.f32 %v4557_v16, %v4737_v9  ;;  %v5310_v30 = vmax.f32 %v4558_v21, %v4852_v4  ;;  %v5307_v61 = vmax.f32 %v4555_v58, %v3636_v56 }
 0x362   : > { %v5311_v26 = vmax.f32 %v4559_v27, %v4738_v2  ;;  %v5312_v50 = vmax.f32 %v4560_v6, %v4853_v11  ;;  %v5313_v24 = vmax.f32 %v4561_v18, %v4739_v5  ;;  %v5314_v47 = vmax.f32 %v4562_v3, %v4854_v51 }
 0x363   : > { %v5316_v15 = vmax.f32 %v4564_v46, %v4855_v10  ;;  %v5317_v42 = vmax.f32 %v4565_v39, %v4740_v36  ;;  %v5318_v31 = vmax.f32 %v4566_v13, %v4856_v12  ;;  %v5315_v29 = vmax.f32 %v4563_v55, %v3532_v37 }
 0x364   : > { %v5319_v40 = vmax.f32 %v4567_v1, %v4741_v23  ;;  %v5320_v60 = vmax.f32 %v4568_v59, %v4857_v38  ;;  %v5321_v45 = vmax.f32 %v4569_v41, %v4742_v20  ;;  %v5322_v7 = vmax.f32 %v4570_v22, %v4858_v44  ;;  %v15415_v23 = vpop.f32.mrf.mxu1  ;;  %v12102_v59 = vld [vmem:[%s12397_s26 + $0x334] sm:$0xf]  ;;  %v11189_v41 = vld [vmem:[%s12397_s26 + $0x338] sm:$0xf0] }
 0x365   : > { %v5564_v32 = vpack.c.bf16 %v5308_v63, %v5308_v63  ;;  %v5565_v34 = vpack.c.bf16 %v5309_v54, %v5309_v54  ;;  %v5566_v33 = vpack.c.bf16 %v5310_v30, %v5310_v30  ;;  %v5563_v17 = vpack.c.bf16 %v5307_v61, %v5307_v61  ;;  %v1749_v39 = vpop.f32.mrf.mxu0  ;;  %v11179_v54 = vld [vmem:[%s12397_s26 + $0x320] sm:$0xf] }
 0x366   : > { %v5567_v49 = vpack.c.bf16 %v5311_v26, %v5311_v26  ;;  %v5568_v9 = vpack.c.bf16 %v5312_v50, %v5312_v50  ;;  %v5569_v21 = vpack.c.bf16 %v5313_v24, %v5313_v24  ;;  %v5570_v58 = vpack.c.bf16 %v5314_v47, %v5314_v47  ;;  %v12101_v47 = vld [vmem:[%s12397_s26 + $0x324] sm:$0xf0] }
 0x367   : > { %v5572_v2 = vpack.c.bf16 %v5316_v15, %v5316_v15  ;;  %v5573_v16 = vpack.c.bf16 %v5317_v42, %v5317_v42  ;;  %v5574_v5 = vpack.c.bf16 %v5318_v31, %v5318_v31  ;;  %v5571_v3 = vpack.c.bf16 %v5315_v29, %v5315_v29 }
 0x368   : > { %v5575_v18 = vpack.c.bf16 %v5319_v40, %v5319_v40  ;;  %v5576_v56 = vpack.c.bf16 %v5320_v60, %v5320_v60  ;;  %v5577_v27 = vpack.c.bf16 %v5321_v45, %v5321_v45  ;;  %v5578_v55 = vpack.c.bf16 %v5322_v7, %v5322_v7 }
 0x369   : > { %v6080_v37 = vunpack.c.l.b16 %v5564_v32  ;;  %v6081_v6 = vunpack.c.l.b16 %v5565_v34  ;;  %v6082_v36 = vunpack.c.l.b16 %v5566_v33  ;;  %v6079_v20 = vunpack.c.l.b16 %v5563_v17  ;;  %v8232_v7 = vpop.permute.xlu0 %8231 }
 0x36a   : > { %v6083_v52 = vunpack.c.l.b16 %v5567_v49  ;;  %v6084_v4 = vunpack.c.l.b16 %v5568_v9  ;;  %v6085_v24 = vunpack.c.l.b16 %v5569_v21  ;;  %v6086_v46 = vunpack.c.l.b16 %v5570_v58 }
 0x36b   : > { %v6088_v15 = vunpack.c.l.b16 %v5572_v2  ;;  %v6089_v42 = vunpack.c.l.b16 %v5573_v16  ;;  %v6090_v31 = vunpack.c.l.b16 %v5574_v5  ;;  %v6087_v13 = vunpack.c.l.b16 %v5571_v3 }
 0x36c   : > { %v6091_v11 = vunpack.c.l.b16 %v5575_v18  ;;  %v6092_v1 = vunpack.c.l.b16 %v5576_v56  ;;  %v6443_v51 = vrot.slane %v6080_v37, 7  ;;  %v6093_v33 = vunpack.c.l.b16 %v5577_v27  ;;  %v15431_v5 = vpop.f32.mrf.mxu1 }
 0x36d   : > { %v6094_v10 = vunpack.c.l.b16 %v5578_v55  ;;  %v6445_v12 = vrot.slane %v6081_v6, 6  ;;  %v6447_v17 = vrot.slane %v6082_v36, 5  ;;  %vm19223_vm7 = vcmask 1041409   ;;  %v1751_v27 = vpop.f32.mrf.mxu0 }
 0x36e   : > { %v6444_v22 = vsel %vm19223_vm7, %v6443_v51, %v6079_v20  ;;  %v6449_v38 = vrot.slane %v6083_v52, 4  ;;  %v6451_v44 = vrot.slane %v6084_v4, 3  ;;  %v6457_v63 = vrot.slane %v6088_v15, 7  ;;  %vm19226_vm5 = vmmov %vm19223_vm7  ;;  %v15448_v52 = vld [vmem:[%s18554_s3] ss:$0 sm:$0xff]  ;;  %v8234_v15 = vpop.permute.xlu1 %8233 }
 0x36f   : > { %vm19224_vm3 = vcmask 1042434   ;;  %v6453_v61 = vrot.slane %v6085_v24, 2  ;;  %v6459_v26 = vrot.slane %v6089_v42, 6  ;;  %v6461_v50 = vrot.slane %v6090_v31, 5 }
 0x370   : > { %v6446_v30 = vsel %vm19224_vm3, %v6445_v12, %v6444_v22  ;;  %vm19225_vm9 = vcmask 1043459   ;;  %v6455_v40 = vrot.slane %v6086_v46, 1  ;;  %v6458_v60 = vsel %vm19226_vm5, %v6457_v63, %v6087_v13  ;;  %vm19228_vm7 = vmmov %vm19224_vm3  ;;  %v6760_v13 = vpop.f32.mrf.mxu2 }
 0x371   : > { %v6448_v29 = vsel %vm19225_vm9, %v6447_v17, %v6446_v30  ;;  %v6463_v45 = vrot.slane %v6091_v11, 4  ;;  %vm19227_vm6 = vcmask 1044484   ;;  %v6460_v34 = vsel %vm19228_vm7, %v6459_v26, %v6458_v60  ;;  %vm19231_vm8 = vmmov %vm19225_vm9  ;;  %v12104_v30 = vld [vmem:[%s12397_s26 + $0x344] sm:$0xf]  ;;  %v12103_v60 = vld [vmem:[%s12397_s26 + $0x334] sm:$0xf0] }
 0x372   : > { %v6450_v32 = vsel %vm19227_vm6, %v6449_v38, %v6448_v29  ;;  %v6465_v49 = vrot.slane %v6092_v1, 3  ;;  %v11192_v9 = vor.u32 %v12102_v59, %v11189_v41  ;;  %vm19229_vm12 = vcmask 1044224   ;;  %vm19233_vm5 = vmmov %vm19227_vm6 }
 0x373   : > { %8318 = vst.msk [vmem:[#allocation2 + $0x78] sm:$0xf] %vm19229_vm12, %v8232_v7  ;;  %vm19230_vm3 = vcmask 1045509   ;;  %v6462_v58 = vsel %vm19231_vm8, %v6461_v50, %v6460_v34  ;;  %v2079_v2 = vadd.f32 %v15375_v14, %v1749_v39  ;;  %v11180_v16 = vor.u32 %v12101_v47, %v11179_v54  ;;  %v15441_v14 = vld [vmem:[%s18553_s2] ss:$0 sm:$0xff]  ;;  %v19250_v7 = vld [vmem:[#allocation59_spill] sm:$0xff] }
 0x374   : > { %v6452_v21 = vsel %vm19230_vm3, %v6451_v44, %v6450_v32  ;;  %vm19232_vm9 = vcmask 1046534   ;;  %v6464_v18 = vsel %vm19233_vm5, %v6463_v45, %v6462_v58  ;;  %v6467_v56 = vrot.slane %v6093_v33, 2  ;;  %vm19235_vm12 = vmmov %vm19230_vm3  ;;  %v7690_v33 = vpop.permute.xlu0 %7689  ;;  %v15481_v22 = vpop.f32.mrf.mxu1 }
 0x375   : > { %v6454_v3 = vsel %vm19232_vm9, %v6453_v61, %v6452_v21  ;;  %vm19234_vm6 = vcmask 154624   ;;  %v6924_v55 = vadd.s32 112, %v13098_v35  ;;  %v6466_v37 = vsel %vm19235_vm12, %v6465_v49, %v6464_v18  ;;  %1788 = vmatmul.bf16.gmra.mxu0 %v11180_v16  ;;  %vm19236_vm8 = vmmov %vm19232_vm9  ;;  %v11197_v61 = vld [vmem:[%s12397_s26 + $0x348] sm:$0xf0] }
 0x376   : > { %11376 = vmatmul.msk.bf16.gmra.mxu1 %vm19234_vm6, %v11192_v9  ;;  %v6469_v6 = vrot.slane %v6094_v10, 1  ;;  %v2276_v36 = vmul.f32 %v15441_v14, %v2079_v2  ;;  %v2081_v20 = vadd.f32 %v15409_v25, %v1751_v27  ;;  %v2404_v4 = vadd.f32 %v15448_v52, %v15370_v19  ;;  %v8004_v29 = vpop.permute.xlu1 %8003  ;;  %v19255_v2 = vld [vmem:[#allocation46_spill] sm:$0xff] }
 0x377   : > { %v2071_v24 = vadd.f32 %v15212_v62, %v15331_v43  ;;  %v6468_v46 = vsel %vm19236_vm8, %v6467_v56, %v6466_v37  ;;  %v7044_v42 = vand.u32 15, %v6924_v55  ;;  %vm19237_vm7 = vcmask 1047559  }
 0x378   : > { %v6456_v31 = vsel %vm19237_vm7, %v6455_v40, %v6454_v3  ;;  %vm19238_vm3 = vmmov %vm19237_vm7  ;;  %v15458_v25 = vadd.f32 %v15448_v52, %v2276_v36  ;;  %vm19240_vm9 = vcmask 1044224   ;;  %v6925_v11 = vadd.s32 120, %v13098_v35  ;;  %v11187_v40 = vld [vmem:[%s12397_s26 + $0x330] sm:$0xf]  ;;  %v6762_v49 = vpop.f32.mrf.mxu2 }
 0x379   : > { %v6470_v39 = vsel %vm19238_vm3, %v6469_v6, %v6468_v46  ;;  %8319 = vst.msk [vmem:[#allocation2 + $0x84] sm:$0xf] %vm19240_vm9, %v8234_v15  ;;  %v6823_v62 = vmul.f32 %v15125_v48, %v6760_v13  ;;  %v2277_v43 = vmul.f32 %v15441_v14, %v2081_v20  ;;  %vm15466_vm5 = vcmp.ge.s32.totalorder %v7044_v42, 1 }
 0x37a   : > { %19239 = vst [vmem:[#allocation62_spill] sm:$0xff] %v15458_v25  ;;  %v15462_v19 = vpack.c.b16 %v6470_v39, %v6456_v31  ;;  %v19242_v1 = vmov 0  ;;  %v18745_v51 = vmax.f32 %v15458_v25, 0.0  ;;  %v2273_v10 = vmul.f32 %v15441_v14, %v2071_v24 }
 0x37b   : > { %v19243_v1 = vsel %vm15466_vm5, 4294967295, %v19242_v1  ;;  %v2074_v12 = vadd.f32 %v15273_v28, %v15382_v8  ;;  %vm19245_vm6 = vcmask 261120   ;;  %v6859_v17 = vadd.f32 %v15135_v57, %v6823_v62  ;;  %v1754_v8 = vpop.f32.mrf.mxu0 }
 0x37c   : > { %19241 = vst [vmem:[#allocation65_spill] sm:$0xff] %v15462_v19  ;;  %11662 = vmatmul.msk.bf16.gmra.mxu2 %vm19245_vm6, %v15462_v19  ;;  %vm19246_vm12 = vcmask 519424   ;;  %v7522_v59 = vsel %vm15466_vm5, %v15191_v0, 0.0  ;;  %v2532_v41 = vmax.f32 %v2404_v4, 0.0  ;;  %v7051_v38 = vand.u32 15, %v6925_v11  ;;  %v15538_v39 = vpop.f32.mrf.mxu1 }
 0x37d   : > { %19244 = vst [vmem:[#allocation77_spill] sm:$0xff] %v19243_v1  ;;  %v7553_v44 = vpack.c.bf16 %v7522_v59, %v7522_v59  ;;  %v15483_v63 = vmax.f32 %v6859_v17, 0.0  ;;  %v15486_v28 = vadd.f32 %v15448_v52, %v2277_v43  ;;  %vm19248_vm8 = vcmask 257024   ;;  %v11731_v43 = vld [vmem:[#allocation2 + $0x78] sm:$0xf] }
 0x37e   : > { %7772 = vst.msk [vmem:[#allocation2 + $0x9c] sm:$0xf] %vm19246_vm12, %v7690_v33  ;;  %v2620_v54 = vmax.f32 %v2532_v41, %v18745_v51  ;;  %v2405_v26 = vadd.f32 %v15448_v52, %v2273_v10  ;;  %v2274_v50 = vmul.f32 %v15441_v14, %v2074_v12  ;;  %v2076_v32 = vadd.f32 %v19250_v7, %v15413_v53  ;;  %vm19259_vm6 = vmmov %vm19248_vm8  ;;  %v19260_v53 = vld [vmem:[#allocation37_spill] sm:$0xff] }
 0x37f   : > { %19247 = vst [vmem:[#allocation78_spill] sm:$0xff] %v15486_v28  ;;  %v7820_v47 = vrot.slane %v15483_v63, 1  ;;  %v15500_v45 = vpack.c.bf16 %v15483_v63, %v15483_v63  ;;  %v7447_v34 = vrot.slane %v15483_v63, 7  ;;  %vm15505_vm7 = vcmp.le.s32.totalorder %v7051_v38, 14 }
 0x380   : > { %7586 = vst.msk [vmem:[#allocation2 + $0xa8] sm:$0xf] %vm19248_vm8, %v7553_v44  ;;  %v19251_v9 = vmov 0  ;;  %vm19254_vm3 = vcmask 781824   ;;  %v18743_v21 = vmax.f32 %v15486_v28, 0.0  ;;  %v6824_v58 = vmul.f32 %v15125_v48, %v6762_v49 }
 0x381   : > { %19249 = vst [vmem:[#allocation79_spill] sm:$0xff] %v15500_v45  ;;  %v19252_v9 = vsel %vm15505_vm7, 4294967295, %v19251_v9  ;;  %v19256_v16 = vrot.slane %v19255_v2, 1  ;;  %vm19257_vm9 = vcmask 1046528   ;;  %v11200_v18 = vor.u32 %v12104_v30, %v11197_v61  ;;  %v12155_v4 = vld [vmem:[#allocation2 + $0x80] sm:$0xf0] }
 0x382   : > { %19253 = vst [vmem:[#allocation59_spill] sm:$0xff] %v19252_v9  ;;  %v19261_v56 = vmax.f32 %v19260_v53, 0.0  ;;  %v2084_v55 = vadd.f32 %v15415_v23, %v1754_v8  ;;  %v11188_v37 = vor.u32 %v12103_v60, %v11187_v40  ;;  %v2533_v6 = vmax.f32 %v2405_v26, 0.0 }
 0x383   : > { %8088 = vst.msk [vmem:[#allocation2 + $0x90] sm:$0xf] %vm19254_vm3, %v8004_v29  ;;  %v15515_v3 = vsel %vm19257_vm9, %v19256_v16, %v7820_v47  ;;  %v2406_v36 = vadd.f32 %v15448_v52, %v2274_v50  ;;  %v6860_v48 = vadd.f32 %v15135_v57, %v6824_v58  ;;  %v2275_v24 = vmul.f32 %v15441_v14, %v2076_v32  ;;  %v1756_v33 = vpop.f32.mrf.mxu0  ;;  %vm19268_vm3 = vmmov %vm19259_vm6  ;;  %v19276_v32 = vld [vmem:[#allocation69_spill] sm:$0xff]  ;;  %v12106_v16 = vld [vmem:[%s12397_s26 + $0x354] sm:$0xf] }
 0x384   : > { %19258 = vst [vmem:[#allocation46_spill] sm:$0xff] %v15515_v3  ;;  %v15521_v27 = vmax.f32 %v2620_v54, %v19261_v56  ;;  %v7900_v20 = vsel %vm15505_vm7, %v15515_v3, 0.0  ;;  %v8961_v42 = vsel %vm14831_vm4, %v15515_v3, 0.0  ;;  %v19263_v23 = vrot.slane %v19255_v2, 7  ;;  %v15597_v2 = vpop.f32.mrf.mxu1 }
 0x385   : > { %8356 = vst.msk [vmem:[#allocation2 + $0xac] sm:$0xf] %vm19259_vm6, %v15500_v45  ;;  %v7931_v46 = vpack.c.bf16 %v7900_v20, %v7900_v20  ;;  %vm19264_vm12 = vcmask 1040384   ;;  %v2621_v57 = vmax.f32 %v2533_v6, %v18743_v21  ;;  %v15542_v13 = vmax.f32 %v6860_v48, 0.0  ;;  %1793 = vmatmul.bf16.gmra.mxu0 %v11188_v37  ;;  %vm19272_vm6 = vmmov %vm19268_vm3  ;;  %v19280_v48 = vld [vmem:[#allocation72_spill] sm:$0xff] }
 0x386   : > { %v15536_v31 = vsel %vm19264_vm12, %v19263_v23, %v7447_v34  ;;  %v8991_v11 = vpack.c.bf16 %v8961_v42, %v8961_v42  ;;  %vm19267_vm8 = vcmask 154624   ;;  %v15549_v10 = vrot.slane %v15521_v27, 2  ;;  %vm19271_vm9 = vmmov %vm19264_vm12 }
 0x387   : > { %19265 = vst [vmem:[#allocation37_spill] sm:$0xff] %v15536_v31  ;;  %v8129_v62 = vsel %vm15466_vm5, %v15536_v31, 0.0  ;;  %11377 = vmatmul.msk.bf16.gmra.mxu1 %vm19267_vm8, %v11200_v18  ;;  %8009 = vrot.lane.b32.xlu2 %v7931_v46, %s12278_s19  ;;  %v2278_v17 = vmul.f32 %v15441_v14, %v2084_v55  ;;  %v11732_v59 = vor.u32 %v12155_v4, %v11731_v43  ;;  %v18744_v41 = vrot.slane %v15542_v13, 7  ;;  %vm19279_vm8 = vmmov %vm19268_vm3  ;;  %v11205_v18 = vld [vmem:[%s12397_s26 + $0x358] sm:$0xf0] }
 0x388   : > { %19266 = vst [vmem:[#allocation80_spill] sm:$0xff] %v15542_v13  ;;  %v8161_v12 = vpack.c.bf16 %v8129_v62, %v8129_v62  ;;  %v15557_v38 = vpack.c.bf16 %v15542_v13, %v15542_v13  ;;  %v2086_v44 = vadd.f32 %v15431_v5, %v1756_v33  ;;  %v18746_v63 = vrot.slane %v15542_v13, 1  ;;  %v12105_v46 = vld [vmem:[%s12397_s26 + $0x344] sm:$0xf0] }
 0x389   : > { %9021 = vst.msk [vmem:[#allocation2 + $0x8c] sm:$0xf] %vm19268_vm3, %v8991_v11  ;;  %v2534_v8 = vmax.f32 %v2406_v36, 0.0  ;;  %v15563_v54 = vadd.f32 %v15448_v52, %v2278_v17  ;;  %9571 = vmatmul.bf16.gmra.mxu3 %v11732_v59  ;;  %v2407_v30 = vadd.f32 %v15448_v52, %v2275_v24  ;;  %v7450_v61 = vsel %vm19271_vm9, %v7447_v34, %v18744_v41  ;;  %v11195_v24 = vld [vmem:[%s12397_s26 + $0x340] sm:$0xf] }
 0x38a   : > { %19269 = vst [vmem:[#allocation81_spill] sm:$0xff] %v15557_v38  ;;  %8239 = vrot.lane.b32.xlu0 %v8161_v12, %s12279_s21  ;;  %v2279_v5 = vmul.f32 %v15441_v14, %v2086_v44  ;;  %vm19273_vm12 = vcmask 1046528   ;;  %v15576_v50 = vrot.slane %v15521_v27, 4  ;;  %v15579_v40 = vpack.c.bf16 %v7450_v61, %v7450_v61  ;;  %v19283_v12 = vld [vmem:[#allocation75_spill] sm:$0xff] }
 0x38b   : > { %19270 = vst [vmem:[#allocation82_spill] sm:$0xff] %v15563_v54  ;;  %v7823_v26 = vsel %vm19273_vm12, %v7820_v47, %v18746_v63  ;;  %v18742_v29 = vmax.f32 %v15563_v54, 0.0  ;;  %v3307_v7 = vperm.slane %v15549_v10, 1  ;;  %v19277_v34 = vmax.f32 %v19276_v32, 0.0  ;;  %v1759_v6 = vpop.f32.mrf.mxu0 }
 0x38c   : > { %8357 = vst.msk [vmem:[#allocation2 + $0xb8] sm:$0xf] %vm19272_vm6, %v15557_v38  ;;  %v15581_v60 = vpack.c.bf16 %v7823_v26, %v7823_v26  ;;  %v15589_v58 = vadd.f32 %v15448_v52, %v2279_v5  ;;  %8241 = vrot.lane.b32.xlu1 %v15579_v40, %s12279_s21  ;;  %v2535_v53 = vmax.f32 %v2407_v30, 0.0  ;;  %v15602_v56 = vrot.slane %v15521_v27, 6 }
 0x38d   : > { %19274 = vst [vmem:[#allocation83_spill] sm:$0xff] %v15579_v40  ;;  %v15586_v49 = vmax.f32 %v2621_v57, %v19277_v34  ;;  %v2622_v47 = vmax.f32 %v2534_v8, %v18742_v29  ;;  %v3306_v55 = vperm.slane %v15521_v27, 1  ;;  %v3308_v36 = vperm.slane %v15576_v50, 1 }
 0x38e   : > { %19275 = vst [vmem:[#allocation84_spill] sm:$0xff] %v15581_v60  ;;  %v18741_v37 = vmax.f32 %v15589_v58, 0.0  ;;  %v19281_v20 = vmax.f32 %v19280_v48, 0.0  ;;  %vm19282_vm9 = vcmask 1042434   ;;  %v3309_v33 = vperm.slane %v15602_v56, 1 }
 0x38f   : > { %19278 = vst [vmem:[#allocation69_spill] sm:$0xff] %v15589_v58  ;;  %7695 = vrot.lane.b32.xlu2 %v15500_v45, %s12277_s0  ;;  %v3533_v42 = vsel %vm19282_vm9, %v3307_v7, %v3306_v55  ;;  %v15621_v57 = vrot.slane %v15586_v49, 2  ;;  %v15632_v43 = vrot.slane %v15586_v49, 6  ;;  %v19284_v17 = vmax.f32 %v19283_v12, 0.0  ;;  %v15676_v12 = vld [vmem:[%s12397_s26 + $0x354] sm:$0xf0] }
 0x390   : > { %7589 = vst.msk [vmem:[#allocation2 + $0xcc] sm:$0xf] %vm19279_vm8, %v15579_v40  ;;  %v15611_v4 = vmax.f32 %v2622_v47, %v19281_v20  ;;  %v2623_v23 = vmax.f32 %v2535_v53, %v18741_v37  ;;  %v11208_v44 = vor.u32 %v12106_v16, %v11205_v18  ;;  %v11196_v8 = vor.u32 %v12105_v46, %v11195_v24  ;;  %v15656_v18 = vpop.f32.mrf.mxu1  ;;  %v15666_v24 = vld [vmem:[%s12397_s26 + $0x364] sm:$0xf]  ;;  %v15669_v46 = vld [vmem:[%s12397_s26 + $0x368] sm:$0xf0] }
 0x391   : > { %9022 = vst.msk [vmem:[#allocation2 + $0x98] sm:$0xf] %vm19268_vm3, %v15581_v60  ;;  %vm19285_vm6 = vcmask 1043459   ;;  %v3310_v61 = vperm.slane %v15586_v49, 1  ;;  %v15643_v26 = vrot.slane %v15586_v49, 4  ;;  %v3311_v47 = vperm.slane %v15621_v57, 1 }
 0x392   : > { %v15624_v11 = vrot.slane %v15611_v4, 2  ;;  %v15627_v62 = vrot.slane %v15611_v4, 4  ;;  %7697 = vrot.lane.b32.xlu0 %v15557_v38, %s12277_s0  ;;  %v15637_v59 = vmax.f32 %v2623_v23, %v19284_v17  ;;  %v3534_v30 = vsel %vm19285_vm6, %v3308_v36, %v3533_v42  ;;  %v15673_v23 = vld [vmem:[%s12397_s26 + $0x350] sm:$0xf] }
 0x393   : > { %v3314_v5 = vperm.slane %v15611_v4, 1  ;;  %v15646_v7 = vrot.slane %v15611_v4, 6  ;;  %v3313_v53 = vperm.slane %v15632_v43, 1  ;;  %v11549_v55 = vrot.slane %v15521_v27, 9  ;;  %v15663_v20 = vpop.f32.mrf.mxu0 }
 0x394   : > { %v3315_v32 = vperm.slane %v15624_v11, 1  ;;  %v15650_v34 = vrot.slane %v15637_v59, 2  ;;  %v3316_v16 = vperm.slane %v15627_v62, 1  ;;  %8011 = vrot.lane.b32.xlu1 %v15581_v60, %s12278_s19  ;;  %v3318_v36 = vperm.slane %v15637_v59, 1 }
 0x395   : > { %vm19286_vm12 = vcmask 154624   ;;  %v2089_v48 = vadd.f32 %v15481_v22, %v1759_v6  ;;  %vm19287_vm8 = vcmask 1044484   ;;  %1798 = vmatmul.bf16.gmra.mxu0 %v11196_v8  ;;  %v15679_v17 = vrot.slane %v15637_v59, 4 }
 0x396   : > { %v3535_v42 = vsel %vm19287_vm8, %v3309_v33, %v3534_v30  ;;  %vm19288_vm3 = vcmask 1045509   ;;  %vm19289_vm9 = vcmask 1041409   ;;  %v3317_v37 = vperm.slane %v15646_v7, 1 }
 0x397   : > { %11378 = vmatmul.msk.bf16.gmra.mxu1 %vm19286_vm12, %v11208_v44  ;;  %v3312_v44 = vperm.slane %v15643_v26, 1  ;;  %v3536_v22 = vsel %vm19288_vm3, %v3310_v61, %v3535_v42  ;;  %v3539_v6 = vsel %vm19289_vm9, %v3314_v5, %v3313_v53  ;;  %v3319_v29 = vperm.slane %v15650_v34, 1 }
 0x398   : > { %vm19290_vm6 = vcmask 1046534   ;;  %vm19291_vm12 = vcmask 1042434   ;;  %v11550_v30 = vrot.slane %v15549_v10, 9  ;;  %v11557_v21 = vrot.slane %v15611_v4, 9 }
 0x399   : > { %v3537_v33 = vsel %vm19290_vm6, %v3311_v47, %v3536_v22  ;;  %v3540_v8 = vsel %vm19291_vm12, %v3315_v32, %v3539_v6  ;;  %v11216_v41 = vor.u32 %v15666_v24, %v15669_v46  ;;  %vm19292_vm8 = vcmask 1043459  }
 0x39a   : > { %v3541_v51 = vsel %vm19292_vm8, %v3316_v16, %v3540_v8  ;;  %v15694_v61 = vmax.f32 %v15521_v27, %v11549_v55  ;;  %v15697_v5 = vmul.f32 %v15441_v14, %v2089_v48  ;;  %v11204_v47 = vor.u32 %v15676_v12, %v15673_v23  ;;  %v8006_v16 = vpop.permute.xlu2 %8005 }
 0x39b   : > { %vm19293_vm3 = vcmask 1044484   ;;  %v11558_v53 = vrot.slane %v15624_v11, 9  ;;  %v3320_v42 = vperm.slane %v15679_v17, 1  ;;  %vm19294_vm9 = vcmask 1047559  }
 0x39c   : > { %v3542_v32 = vsel %vm19293_vm3, %v3317_v37, %v3541_v51  ;;  %v3538_v22 = vsel %vm19294_vm9, %v3312_v44, %v3537_v33  ;;  %vm19295_vm6 = vcmask 1045509   ;;  %v2903_v27 = vrot.slane %v15637_v59, 6  ;;  %v15712_v51 = vpop.f32.mrf.mxu1  ;;  %v15717_v44 = vpop.f32.mrf.mxu0 }
 0x39d   : > { %v3543_v24 = vsel %vm19295_vm6, %v3318_v36, %v3542_v32  ;;  %vm19296_vm12 = vcmask 1046534   ;;  %v11551_v48 = vrot.slane %v15576_v50, 9  ;;  %v11552_v46 = vrot.slane %v15602_v56, 9 }
 0x39e   : > { %v3544_v55 = vsel %vm19296_vm12, %v3319_v29, %v3543_v24  ;;  %v4579_v23 = vmax.f32 %v15611_v4, %v11557_v21  ;;  %vm19297_vm8 = vcmask 781824   ;;  %v11553_v37 = vrot.slane %v15586_v49, 9 }
 0x39f   : > { %8089 = vst.msk [vmem:[#allocation2 + $0x9c] sm:$0xf] %vm19297_vm8, %v8006_v16  ;;  %v11554_v12 = vrot.slane %v15621_v57, 9  ;;  %v11555_v36 = vrot.slane %v15643_v26, 9  ;;  %vm19298_vm3 = vcmask 1040384   ;;  %v11556_v6 = vrot.slane %v15632_v43, 9 }
 0x3a0   : > { %v3637_v29 = vsel %vm19298_vm3, 0.0, %v3538_v22  ;;  %v11559_v33 = vrot.slane %v15627_v62, 9  ;;  %v11560_v21 = vrot.slane %v15646_v7, 9  ;;  %v3545_v4 = vsel %vm19294_vm9, %v3320_v42, %v3544_v55 }
 0x3a1   : > { %v11561_v8 = vrot.slane %v15637_v59, 9  ;;  %v11562_v32 = vrot.slane %v15650_v34, 9  ;;  %v11563_v24 = vrot.slane %v15679_v17, 9  ;;  %v11564_v16 = vrot.slane %v2903_v27, 9 }
 0x3a2   : > { %v4572_v63 = vmax.f32 %v15549_v10, %v11550_v30  ;;  %v4573_v19 = vmax.f32 %v15576_v50, %v11551_v48  ;;  %v4574_v22 = vmax.f32 %v15602_v56, %v11552_v46  ;;  %v4575_v1 = vmax.f32 %v15586_v49, %v11553_v37  ;;  %v7692_v30 = vpop.permute.xlu2 %7691 }
 0x3a3   : > { %v4576_v60 = vmax.f32 %v15621_v57, %v11554_v12  ;;  %v4577_v38 = vmax.f32 %v15643_v26, %v11555_v36  ;;  %v4743_v42 = vrot.slane %v3637_v29, 2  ;;  %v4744_v55 = vrot.slane %v3637_v29, 4 }
 0x3a4   : > { %v4745_v40 = vrot.slane %v3637_v29, 6  ;;  %v4746_v45 = vrot.slane %v3545_v4, 2  ;;  %v4747_v3 = vrot.slane %v3545_v4, 4  ;;  %v4578_v0 = vmax.f32 %v15632_v43, %v11556_v6  ;;  %v15740_v43 = vpop.f32.mrf.mxu1 }
 0x3a5   : > { %v4748_v15 = vrot.slane %v3545_v4, 6  ;;  %v4859_v9 = vrot.slane %v3637_v29, 1  ;;  %v4860_v10 = vrot.slane %v4743_v42, 1  ;;  %v4580_v50 = vmax.f32 %v15624_v11, %v11558_v53  ;;  %1803 = vmatmul.bf16.gmra.mxu0 %v11204_v47 }
 0x3a6   : > { %v4581_v56 = vmax.f32 %v15627_v62, %v11559_v33  ;;  %v4582_v49 = vmax.f32 %v15646_v7, %v11560_v21  ;;  %v4861_v57 = vrot.slane %v4744_v55, 1  ;;  %vm19299_vm6 = vcmask 519424   ;;  %v15744_v7 = vpop.f32.mrf.mxu0 }
 0x3a7   : > { %7773 = vst.msk [vmem:[#allocation2 + $0xa8] sm:$0xf] %vm19299_vm6, %v7692_v30  ;;  %v4583_v26 = vmax.f32 %v15637_v59, %v11561_v8  ;;  %v4862_v48 = vrot.slane %v4745_v40, 1  ;;  %v4863_v46 = vrot.slane %v3545_v4, 1  ;;  %v4864_v37 = vrot.slane %v4746_v45, 1 }
 0x3a8   : > { %vm19300_vm12 = vcmask 154624   ;;  %v4584_v12 = vmax.f32 %v15650_v34, %v11562_v32  ;;  %v4585_v11 = vmax.f32 %v15679_v17, %v11563_v24  ;;  %v4586_v53 = vmax.f32 %v2903_v27, %v11564_v16 }
 0x3a9   : > { %11379 = vmatmul.msk.bf16.gmra.mxu1 %vm19300_vm12, %v11216_v41  ;;  %v4865_v62 = vrot.slane %v4747_v3, 1  ;;  %v4866_v36 = vrot.slane %v4748_v15, 1  ;;  %v5324_v6 = vmax.f32 %v4572_v63, %v4859_v9  ;;  %v5325_v33 = vmax.f32 %v4573_v19, %v4743_v42 }
 0x3aa   : > { %v5326_v59 = vmax.f32 %v4574_v22, %v4860_v10  ;;  %v5323_v21 = vmax.f32 %v15694_v61, %v3637_v29  ;;  %v5327_v8 = vmax.f32 %v4575_v1, %v4744_v55  ;;  %v5328_v30 = vmax.f32 %v4576_v60, %v4861_v57 }
 0x3ab   : > { %v5329_v41 = vmax.f32 %v4577_v38, %v4745_v40  ;;  %v5330_v58 = vmax.f32 %v4578_v0, %v4862_v48  ;;  %v5332_v54 = vmax.f32 %v4580_v50, %v4863_v46  ;;  %v5333_v28 = vmax.f32 %v4581_v56, %v4746_v45 }
 0x3ac   : > { %v5334_v34 = vmax.f32 %v4582_v49, %v4864_v37  ;;  %v5331_v32 = vmax.f32 %v4579_v23, %v3545_v4  ;;  %v5335_v17 = vmax.f32 %v4583_v26, %v4747_v3  ;;  %v5336_v27 = vmax.f32 %v4584_v12, %v4865_v62  ;;  %v15747_v42 = vpop.f32.mrf.mxu1  ;;  %v11221_v62 = vld [vmem:[%s12397_s26 + $0x378] sm:$0xf0] }
 0x3ad   : > { %v5337_v24 = vmax.f32 %v4585_v11, %v4748_v15  ;;  %v5338_v47 = vmax.f32 %v4586_v53, %v4866_v36  ;;  %v5580_v16 = vpack.c.bf16 %v5324_v6, %v5324_v6  ;;  %v5581_v25 = vpack.c.bf16 %v5325_v33, %v5325_v33  ;;  %v12110_v53 = vld [vmem:[%s12397_s26 + $0x374] sm:$0xf] }
 0x3ae   : > { %v5582_v13 = vpack.c.bf16 %v5326_v59, %v5326_v59  ;;  %v5579_v9 = vpack.c.bf16 %v5323_v21, %v5323_v21  ;;  %v5583_v19 = vpack.c.bf16 %v5327_v8, %v5327_v8  ;;  %v5584_v63 = vpack.c.bf16 %v5328_v30, %v5328_v30  ;;  %v1769_v57 = vpop.f32.mrf.mxu0  ;;  %v11211_v21 = vld [vmem:[%s12397_s26 + $0x360] sm:$0xf] }
 0x3af   : > { %v5585_v22 = vpack.c.bf16 %v5329_v41, %v5329_v41  ;;  %v5586_v61 = vpack.c.bf16 %v5330_v58, %v5330_v58  ;;  %v5588_v1 = vpack.c.bf16 %v5332_v54, %v5332_v54  ;;  %v5589_v60 = vpack.c.bf16 %v5333_v28, %v5333_v28 }
 0x3b0   : > { %v5590_v38 = vpack.c.bf16 %v5334_v34, %v5334_v34  ;;  %v5587_v0 = vpack.c.bf16 %v5331_v32, %v5331_v32  ;;  %v5591_v40 = vpack.c.bf16 %v5335_v17, %v5335_v17  ;;  %v5592_v45 = vpack.c.bf16 %v5336_v27, %v5336_v27  ;;  %v12109_v32 = vld [vmem:[%s12397_s26 + $0x364] sm:$0xf0] }
 0x3b1   : > { %v5593_v29 = vpack.c.bf16 %v5337_v24, %v5337_v24  ;;  %v5594_v23 = vpack.c.bf16 %v5338_v47, %v5338_v47  ;;  %v6096_v3 = vunpack.c.l.b16 %v5580_v16  ;;  %v6097_v4 = vunpack.c.l.b16 %v5581_v25 }
 0x3b2   : > { %v6098_v15 = vunpack.c.l.b16 %v5582_v13  ;;  %v6095_v55 = vunpack.c.l.b16 %v5579_v9  ;;  %v6099_v10 = vunpack.c.l.b16 %v5583_v19  ;;  %v6100_v50 = vunpack.c.l.b16 %v5584_v63  ;;  %v8236_v16 = vpop.permute.xlu0 %8235 }
 0x3b3   : > { %v6101_v56 = vunpack.c.l.b16 %v5585_v22  ;;  %v6102_v58 = vunpack.c.l.b16 %v5586_v61  ;;  %v6104_v54 = vunpack.c.l.b16 %v5588_v1  ;;  %v6105_v28 = vunpack.c.l.b16 %v5589_v60 }
 0x3b4   : > { %v6106_v49 = vunpack.c.l.b16 %v5590_v38  ;;  %v6103_v26 = vunpack.c.l.b16 %v5587_v0  ;;  %v6107_v48 = vunpack.c.l.b16 %v5591_v40  ;;  %v6108_v46 = vunpack.c.l.b16 %v5592_v45  ;;  %v15763_v0 = vpop.f32.mrf.mxu1 }
 0x3b5   : > { %v6471_v37 = vrot.slane %v6096_v3, 7  ;;  %v6109_v25 = vunpack.c.l.b16 %v5593_v29  ;;  %v6110_v13 = vunpack.c.l.b16 %v5594_v23  ;;  %v6473_v12 = vrot.slane %v6097_v4, 6 }
 0x3b6   : > { %v6475_v11 = vrot.slane %v6098_v15, 5  ;;  %vm19301_vm8 = vcmask 1041409   ;;  %v6477_v6 = vrot.slane %v6099_v10, 4  ;;  %v6479_v33 = vrot.slane %v6100_v50, 3  ;;  %v1771_v23 = vpop.f32.mrf.mxu0 }
 0x3b7   : > { %v6472_v36 = vsel %vm19301_vm8, %v6471_v37, %v6095_v55  ;;  %v6485_v59 = vrot.slane %v6104_v54, 7  ;;  %vm19302_vm3 = vcmask 1042434   ;;  %v6481_v30 = vrot.slane %v6101_v56, 2  ;;  %vm19304_vm6 = vmmov %vm19301_vm8 }
 0x3b8   : > { %v6474_v8 = vsel %vm19302_vm3, %v6473_v12, %v6472_v36  ;;  %v6487_v41 = vrot.slane %v6105_v28, 6  ;;  %v6489_v34 = vrot.slane %v6106_v49, 5  ;;  %vm19303_vm9 = vcmask 1043459   ;;  %vm19306_vm8 = vmmov %vm19302_vm3 }
 0x3b9   : > { %v6476_v17 = vsel %vm19303_vm9, %v6475_v11, %v6474_v8  ;;  %v6483_v27 = vrot.slane %v6102_v58, 1  ;;  %v6486_v24 = vsel %vm19304_vm6, %v6485_v59, %v6103_v26  ;;  %v6491_v47 = vrot.slane %v6107_v48, 4  ;;  %vm19309_vm4 = vmmov %vm19303_vm9  ;;  %v8238_v58 = vpop.permute.xlu1 %8237  ;;  %v6765_v26 = vpop.f32.mrf.mxu2  ;;  %v15806_v11 = vld [vmem:[%s18557_s6] ss:$0 sm:$0xff] }
 0x3ba   : > { %vm19305_vm12 = vcmask 1044484   ;;  %v6488_v19 = vsel %vm19306_vm8, %v6487_v41, %v6486_v24  ;;  %v6493_v63 = vrot.slane %v6108_v46, 3  ;;  %v11224_v22 = vor.u32 %v12110_v53, %v11221_v62  ;;  %v11229_v41 = vld [vmem:[%s12397_s26 + $0x388] sm:$0xf0]  ;;  %v11219_v24 = vld [vmem:[%s12397_s26 + $0x370] sm:$0xf] }
 0x3bb   : > { %v6478_v9 = vsel %vm19305_vm12, %v6477_v6, %v6476_v17  ;;  %vm19307_vm5 = vcmask 1044224   ;;  %vm19308_vm3 = vcmask 1045509   ;;  %v6490_v1 = vsel %vm19309_vm4, %v6489_v34, %v6488_v19  ;;  %vm19311_vm6 = vmmov %vm19305_vm12 }
 0x3bc   : > { %8320 = vst.msk [vmem:[#allocation2 + $0x90] sm:$0xf] %vm19307_vm5, %v8236_v16  ;;  %v6480_v61 = vsel %vm19308_vm3, %v6479_v33, %v6478_v9  ;;  %v2099_v60 = vadd.f32 %v15712_v51, %v1769_v57  ;;  %v11212_v38 = vor.u32 %v12109_v32, %v11211_v21  ;;  %vm19310_vm9 = vcmask 1046534   ;;  %vm19313_vm5 = vmmov %vm19308_vm3 }
 0x3bd   : > { %v6482_v40 = vsel %vm19310_vm9, %v6481_v30, %v6480_v61  ;;  %v6492_v45 = vsel %vm19311_vm6, %v6491_v47, %v6490_v1  ;;  %v6495_v29 = vrot.slane %v6109_v25, 2  ;;  %vm19312_vm12 = vcmask 154624   ;;  %vm19314_vm4 = vmmov %vm19310_vm9  ;;  %v7694_v25 = vpop.permute.xlu0 %7693  ;;  %v12112_v30 = vld [vmem:[%s12397_s26 + $0x384] sm:$0xf]  ;;  %v12111_v47 = vld [vmem:[%s12397_s26 + $0x374] sm:$0xf0] }
 0x3be   : > { %11380 = vmatmul.msk.bf16.gmra.mxu1 %vm19312_vm12, %v11224_v22  ;;  %v6926_v3 = vadd.s32 128, %v13098_v35  ;;  %v6494_v4 = vsel %vm19313_vm5, %v6493_v63, %v6492_v45  ;;  %v6497_v15 = vrot.slane %v6110_v13, 1  ;;  %v2284_v55 = vmul.f32 %v15441_v14, %v2099_v60  ;;  %1808 = vmatmul.bf16.gmra.mxu0 %v11212_v38  ;;  %v1774_v21 = vpop.f32.mrf.mxu0  ;;  %v19331_v60 = vld [vmem:[#allocation80_spill] sm:$0xff] }
 0x3bf   : > { %v2101_v51 = vadd.f32 %v15740_v43, %v1771_v23  ;;  %v2412_v10 = vadd.f32 %v15448_v52, %v15697_v5  ;;  %v2091_v50 = vadd.f32 %v15538_v39, %v15663_v20  ;;  %v6496_v56 = vsel %vm19314_vm4, %v6495_v29, %v6494_v4  ;;  %v15789_v39 = vld [vmem:[%s18556_s5] ss:$0 sm:$0xff] }
 0x3c0   : > { %v7058_v54 = vand.u32 15, %v6926_v3  ;;  %vm19315_vm8 = vcmask 1047559   ;;  %v15780_v57 = vadd.f32 %v15448_v52, %v2284_v55  ;;  %vm19317_vm9 = vcmask 1044224  }
 0x3c1   : > { %v6484_v28 = vsel %vm19315_vm8, %v6483_v27, %v6482_v40  ;;  %vm19316_vm3 = vmmov %vm19315_vm8  ;;  %8321 = vst.msk [vmem:[#allocation2 + $0x9c] sm:$0xf] %vm19317_vm9, %v8238_v58  ;;  %v6927_v43 = vadd.s32 136, %v13098_v35  ;;  %v6825_v20 = vmul.f32 %v15789_v39, %v6765_v26  ;;  %v2285_v48 = vmul.f32 %v15441_v14, %v2101_v51  ;;  %v8008_v27 = vpop.permute.xlu1 %8007  ;;  %v6767_v63 = vpop.f32.mrf.mxu2 }
 0x3c2   : > { %v6498_v49 = vsel %vm19316_vm3, %v6497_v15, %v6496_v56  ;;  %vm15793_vm6 = vcmp.ge.s32.totalorder %v7058_v54, 1  ;;  %v19319_v46 = vmov 0  ;;  %v18769_v37 = vmax.f32 %v15780_v57, 0.0 }
 0x3c3   : > { %v15784_v5 = vpack.c.b16 %v6498_v49, %v6484_v28  ;;  %v19320_v46 = vsel %vm15793_vm6, 4294967295, %v19319_v46  ;;  %v2281_v13 = vmul.f32 %v15441_v14, %v2091_v50  ;;  %v2094_v12 = vadd.f32 %v15597_v2, %v15717_v44  ;;  %v15813_v2 = vpop.f32.mrf.mxu1 }
 0x3c4   : > { %19321 = vst [vmem:[#allocation75_spill] sm:$0xff] %v19320_v46  ;;  %vm19322_vm12 = vcmask 261120   ;;  %v6861_v53 = vadd.f32 %v15806_v11, %v6825_v20  ;;  %vm19323_vm5 = vcmask 519424   ;;  %v7524_v62 = vsel %vm15793_vm6, %v15536_v31, 0.0 }
 0x3c5   : > { %19318 = vst [vmem:[#allocation72_spill] sm:$0xff] %v15784_v5  ;;  %11663 = vmatmul.msk.bf16.gmra.mxu2 %vm19322_vm12, %v15784_v5  ;;  %v2540_v36 = vmax.f32 %v2412_v10, 0.0  ;;  %v7065_v44 = vand.u32 15, %v6927_v43  ;;  %v7555_v6 = vpack.c.bf16 %v7524_v62, %v7524_v62  ;;  %v15818_v59 = vadd.f32 %v15448_v52, %v2285_v48 }
 0x3c6   : > { %7774 = vst.msk [vmem:[#allocation2 + $0xb4] sm:$0xf] %vm19323_vm5, %v7694_v25  ;;  %v15815_v33 = vmax.f32 %v6861_v53, 0.0  ;;  %vm19325_vm4 = vcmask 257024   ;;  %v2413_v34 = vadd.f32 %v15448_v52, %v2281_v13  ;;  %v2282_v32 = vmul.f32 %v15441_v14, %v2094_v12  ;;  %v11743_v25 = vld [vmem:[#allocation2 + $0x90] sm:$0xf]  ;;  %v1776_v13 = vpop.f32.mrf.mxu0 }
 0x3c7   : > { %19324 = vst [vmem:[#allocation85_spill] sm:$0xff] %v15818_v59  ;;  %v2624_v8 = vmax.f32 %v2540_v36, %v18769_v37  ;;  %v2096_v9 = vadd.f32 %v15656_v18, %v15744_v7  ;;  %vm15837_vm8 = vcmp.le.s32.totalorder %v7065_v44, 14  ;;  %v19327_v22 = vmov 0  ;;  %vm19335_vm12 = vmmov %vm19325_vm4  ;;  %v19336_v18 = vld [vmem:[#allocation62_spill] sm:$0xff] }
 0x3c8   : > { %7588 = vst.msk [vmem:[#allocation2 + $0xc0] sm:$0xf] %vm19325_vm4, %v7555_v6  ;;  %v7824_v17 = vrot.slane %v15815_v33, 1  ;;  %v15832_v16 = vpack.c.bf16 %v15815_v33, %v15815_v33  ;;  %v7451_v19 = vrot.slane %v15815_v33, 7  ;;  %v19328_v22 = vsel %vm15837_vm8, 4294967295, %v19327_v22 }
 0x3c9   : > { %19329 = vst [vmem:[#allocation87_spill] sm:$0xff] %v19328_v22  ;;  %vm19330_vm3 = vcmask 781824   ;;  %v18767_v61 = vmax.f32 %v15818_v59, 0.0  ;;  %v6826_v1 = vmul.f32 %v15789_v39, %v6767_v63  ;;  %v19332_v38 = vrot.slane %v19331_v60, 1  ;;  %v12158_v10 = vld [vmem:[#allocation2 + $0x98] sm:$0xf0] }
 0x3ca   : > { %19326 = vst [vmem:[#allocation86_spill] sm:$0xff] %v15832_v16  ;;  %vm19333_vm9 = vcmask 1046528   ;;  %v11232_v45 = vor.u32 %v12112_v30, %v11229_v41  ;;  %v19337_v7 = vmax.f32 %v19336_v18, 0.0  ;;  %v2104_v23 = vadd.f32 %v15747_v42, %v1774_v21  ;;  %v19351_v63 = vld [vmem:[#allocation78_spill] sm:$0xff] }
 0x3cb   : > { %8090 = vst.msk [vmem:[#allocation2 + $0xa8] sm:$0xf] %vm19330_vm3, %v8008_v27  ;;  %v15847_v40 = vsel %vm19333_vm9, %v19332_v38, %v7824_v17  ;;  %v11220_v3 = vor.u32 %v12111_v47, %v11219_v24  ;;  %v2541_v4 = vmax.f32 %v2413_v34, 0.0  ;;  %v2414_v15 = vadd.f32 %v15448_v52, %v2282_v32  ;;  %v15870_v49 = vpop.f32.mrf.mxu1  ;;  %vm19343_vm3 = vmmov %vm19335_vm12  ;;  %v12114_v18 = vld [vmem:[%s12397_s26 + $0x394] sm:$0xf] }
 0x3cc   : > { %19334 = vst [vmem:[#allocation80_spill] sm:$0xff] %v15847_v40  ;;  %v15853_v29 = vmax.f32 %v2624_v8, %v19337_v7  ;;  %v6862_v55 = vadd.f32 %v15806_v11, %v6826_v1  ;;  %v7902_v51 = vsel %vm15837_vm8, %v15847_v40, 0.0  ;;  %v2283_v50 = vmul.f32 %v15441_v14, %v2096_v9  ;;  %v11237_v7 = vld [vmem:[%s12397_s26 + $0x398] sm:$0xf0] }
 0x3cd   : > { %8358 = vst.msk [vmem:[#allocation2 + $0xc4] sm:$0xf] %vm19335_vm12, %v15832_v16  ;;  %v7933_v56 = vpack.c.bf16 %v7902_v51, %v7902_v51  ;;  %v8963_v54 = vsel %vm15158_vm0, %v15847_v40, 0.0  ;;  %v19339_v42 = vrot.slane %v19331_v60, 7  ;;  %vm19340_vm5 = vcmask 1040384   ;;  %vm19347_vm12 = vmmov %vm19343_vm3  ;;  %v19355_v51 = vld [vmem:[#allocation82_spill] sm:$0xff] }
 0x3ce   : > { %v2625_v26 = vmax.f32 %v2541_v4, %v18767_v61  ;;  %v15874_v43 = vmax.f32 %v6862_v55, 0.0  ;;  %v8993_v20 = vpack.c.bf16 %v8963_v54, %v8963_v54  ;;  %vm19342_vm4 = vcmask 154624   ;;  %1813 = vmatmul.bf16.gmra.mxu0 %v11220_v3  ;;  %vm19346_vm9 = vmmov %vm19340_vm5  ;;  %v12113_v54 = vld [vmem:[%s12397_s26 + $0x384] sm:$0xf0] }
 0x3cf   : > { %v15868_v28 = vsel %vm19340_vm5, %v19339_v42, %v7451_v19  ;;  %11381 = vmatmul.msk.bf16.gmra.mxu1 %vm19342_vm4, %v11232_v45  ;;  %v15881_v12 = vrot.slane %v15853_v29, 2  ;;  %8013 = vrot.lane.b32.xlu2 %v7933_v56, %s12278_s19  ;;  %v2286_v62 = vmul.f32 %v15441_v14, %v2104_v23  ;;  %v11744_v36 = vor.u32 %v12158_v10, %v11743_v25  ;;  %vm19354_vm4 = vmmov %vm19343_vm3  ;;  %v11227_v56 = vld [vmem:[%s12397_s26 + $0x380] sm:$0xf] }
 0x3d0   : > { %19341 = vst [vmem:[#allocation62_spill] sm:$0xff] %v15868_v28  ;;  %v8131_v48 = vsel %vm15793_vm6, %v15868_v28, 0.0  ;;  %v18768_v44 = vrot.slane %v15874_v43, 7  ;;  %v15889_v6 = vpack.c.bf16 %v15874_v43, %v15874_v43  ;;  %v2106_v33 = vadd.f32 %v15763_v0, %v1776_v13 }
 0x3d1   : > { %v8163_v53 = vpack.c.bf16 %v8131_v48, %v8131_v48  ;;  %9023 = vst.msk [vmem:[#allocation2 + $0xa4] sm:$0xf] %vm19343_vm3, %v8993_v20  ;;  %v18770_v21 = vrot.slane %v15874_v43, 1  ;;  %v2542_v8 = vmax.f32 %v2414_v15, 0.0  ;;  %v15895_v30 = vadd.f32 %v15448_v52, %v2286_v62  ;;  %9576 = vmatmul.bf16.gmra.mxu3 %v11744_v36  ;;  %v1779_v15 = vpop.f32.mrf.mxu0  ;;  %v19358_v62 = vld [vmem:[#allocation69_spill] sm:$0xff] }
 0x3d2   : > { %19344 = vst [vmem:[#allocation88_spill] sm:$0xff] %v15889_v6  ;;  %v2415_v41 = vadd.f32 %v15448_v52, %v2283_v50  ;;  %v7454_v34 = vsel %vm19346_vm9, %v7451_v19, %v18768_v44  ;;  %v2287_v0 = vmul.f32 %v15441_v14, %v2106_v33  ;;  %vm19348_vm5 = vcmask 1046528  }
 0x3d3   : > { %8243 = vrot.lane.b32.xlu0 %v8163_v53, %s12279_s21  ;;  %19345 = vst [vmem:[#allocation89_spill] sm:$0xff] %v15895_v30  ;;  %v7827_v32 = vsel %vm19348_vm5, %v7824_v17, %v18770_v21  ;;  %v15908_v27 = vrot.slane %v15853_v29, 4  ;;  %v18766_v24 = vmax.f32 %v15895_v30, 0.0  ;;  %v15911_v47 = vpack.c.bf16 %v7454_v34, %v7454_v34  ;;  %v15929_v45 = vpop.f32.mrf.mxu1  ;;  %v15972_v34 = vld [vmem:[%s12397_s26 + $0x3a4] sm:$0xf] }
 0x3d4   : > { %8359 = vst.msk [vmem:[#allocation2 + $0xd0] sm:$0xf] %vm19347_vm12, %v15889_v6  ;;  %v15913_v9 = vpack.c.bf16 %v7827_v32, %v7827_v32  ;;  %v3322_v19 = vperm.slane %v15881_v12, 1  ;;  %v19352_v1 = vmax.f32 %v19351_v63, 0.0  ;;  %v15921_v38 = vadd.f32 %v15448_v52, %v2287_v0  ;;  %v15978_v63 = vld [vmem:[%s12397_s26 + $0x3a8] sm:$0xf0] }
 0x3d5   : > { %19349 = vst [vmem:[#allocation90_spill] sm:$0xff] %v15911_v47  ;;  %v2626_v17 = vmax.f32 %v2542_v8, %v18766_v24  ;;  %8245 = vrot.lane.b32.xlu1 %v15911_v47, %s12279_s21  ;;  %v2543_v23 = vmax.f32 %v2415_v41, 0.0  ;;  %v15934_v3 = vrot.slane %v15853_v29, 6  ;;  %v3321_v52 = vperm.slane %v15853_v29, 1 }
 0x3d6   : > { %19350 = vst [vmem:[#allocation91_spill] sm:$0xff] %v15913_v9  ;;  %v15918_v60 = vmax.f32 %v2625_v26, %v19352_v1  ;;  %v18765_v4 = vmax.f32 %v15921_v38, 0.0  ;;  %v3323_v55 = vperm.slane %v15908_v27, 1  ;;  %v19356_v10 = vmax.f32 %v19355_v51, 0.0 }
 0x3d7   : > { %19353 = vst [vmem:[#allocation78_spill] sm:$0xff] %v15921_v38  ;;  %7699 = vrot.lane.b32.xlu2 %v15832_v16, %s12277_s0  ;;  %vm19357_vm9 = vcmask 1042434   ;;  %v3324_v53 = vperm.slane %v15934_v3, 1  ;;  %v19359_v36 = vmax.f32 %v19358_v62, 0.0  ;;  %v11240_v8 = vor.u32 %v12114_v18, %v11237_v7 }
 0x3d8   : > { %7591 = vst.msk [vmem:[#allocation2 + $0xe4] sm:$0xf] %vm19354_vm4, %v15911_v47  ;;  %v15943_v50 = vmax.f32 %v2626_v17, %v19356_v10  ;;  %v3546_v42 = vsel %vm19357_vm9, %v3322_v19, %v3321_v52  ;;  %v2627_v26 = vmax.f32 %v2543_v23, %v18765_v4  ;;  %v15953_v20 = vrot.slane %v15918_v60, 2  ;;  %v16010_v4 = vld [vmem:[%s12397_s26 + $0x394] sm:$0xf0] }
 0x3d9   : > { %9024 = vst.msk [vmem:[#allocation2 + $0xb0] sm:$0xf] %vm19343_vm3, %v15913_v9  ;;  %v15964_v13 = vrot.slane %v15918_v60, 6  ;;  %v11228_v41 = vor.u32 %v12113_v54, %v11227_v56  ;;  %vm19360_vm12 = vcmask 1043459   ;;  %v3325_v32 = vperm.slane %v15918_v60, 1 }
 0x3da   : > { %v15956_v48 = vrot.slane %v15943_v50, 2  ;;  %v15959_v25 = vrot.slane %v15943_v50, 4  ;;  %v15969_v33 = vmax.f32 %v2627_v26, %v19359_v36  ;;  %v3547_v0 = vsel %vm19360_vm12, %v3323_v55, %v3546_v42  ;;  %v16001_v42 = vpop.f32.mrf.mxu0  ;;  %v16007_v36 = vld [vmem:[%s12397_s26 + $0x390] sm:$0xf] }
 0x3db   : > { %7701 = vrot.lane.b32.xlu0 %v15889_v6, %s12277_s0  ;;  %v3329_v19 = vperm.slane %v15943_v50, 1  ;;  %v15981_v1 = vrot.slane %v15918_v60, 4  ;;  %v15984_v17 = vrot.slane %v15943_v50, 6  ;;  %v3326_v23 = vperm.slane %v15953_v20, 1  ;;  %v15995_v51 = vpop.f32.mrf.mxu1 }
 0x3dc   : > { %v3330_v18 = vperm.slane %v15956_v48, 1  ;;  %v15988_v7 = vrot.slane %v15969_v33, 2  ;;  %v11565_v52 = vrot.slane %v15853_v29, 9  ;;  %v3331_v55 = vperm.slane %v15959_v25, 1 }
 0x3dd   : > { %8015 = vrot.lane.b32.xlu1 %v15913_v9, %s12278_s19  ;;  %v3328_v10 = vperm.slane %v15964_v13, 1  ;;  %v3333_v56 = vperm.slane %v15969_v33, 1  ;;  %vm19361_vm5 = vcmask 154624   ;;  %v2109_v54 = vadd.f32 %v15813_v2, %v1779_v15 }
 0x3de   : > { %vm19362_vm4 = vcmask 1044484   ;;  %1818 = vmatmul.bf16.gmra.mxu0 %v11228_v41  ;;  %v16013_v24 = vrot.slane %v15969_v33, 4  ;;  %v3327_v61 = vperm.slane %v15981_v1, 1  ;;  %vm19363_vm3 = vcmask 1045509  }
 0x3df   : > { %11382 = vmatmul.msk.bf16.gmra.mxu1 %vm19361_vm5, %v11240_v8  ;;  %v3548_v62 = vsel %vm19362_vm4, %v3324_v53, %v3547_v0  ;;  %vm19364_vm9 = vcmask 1041409   ;;  %v3332_v15 = vperm.slane %v15984_v17, 1  ;;  %v3334_v44 = vperm.slane %v15988_v7, 1 }
 0x3e0   : > { %v3549_v8 = vsel %vm19363_vm3, %v3325_v32, %v3548_v62  ;;  %v3552_v2 = vsel %vm19364_vm9, %v3329_v19, %v3328_v10  ;;  %vm19365_vm12 = vcmask 1046534   ;;  %vm19366_vm5 = vcmask 1042434  }
 0x3e1   : > { %v3550_v53 = vsel %vm19365_vm12, %v3326_v23, %v3549_v8  ;;  %v3553_v41 = vsel %vm19366_vm5, %v3330_v18, %v3552_v2  ;;  %v11566_v0 = vrot.slane %v15881_v12, 9  ;;  %v4587_v37 = vmax.f32 %v15853_v29, %v11565_v52 }
 0x3e2   : > { %v11573_v21 = vrot.slane %v15943_v50, 9  ;;  %vm19367_vm4 = vcmask 1043459   ;;  %v11574_v32 = vrot.slane %v15956_v48, 9  ;;  %v16028_v19 = vmul.f32 %v15441_v14, %v2109_v54 }
 0x3e3   : > { %v3554_v26 = vsel %vm19367_vm4, %v3331_v55, %v3553_v41  ;;  %v11236_v10 = vor.u32 %v16010_v4, %v16007_v36  ;;  %vm19368_vm3 = vcmask 1044484   ;;  %v2915_v18 = vrot.slane %v15969_v33, 6  ;;  %v16042_v36 = vpop.f32.mrf.mxu1 }
 0x3e4   : > { %v3555_v23 = vsel %vm19368_vm3, %v3332_v15, %v3554_v26  ;;  %v3335_v62 = vperm.slane %v16013_v24, 1  ;;  %vm19369_vm9 = vcmask 1047559   ;;  %vm19370_vm12 = vcmask 1045509   ;;  %v8010_v15 = vpop.permute.xlu2 %8009 }
 0x3e5   : > { %v3551_v29 = vsel %vm19369_vm9, %v3327_v61, %v3550_v53  ;;  %v3556_v52 = vsel %vm19370_vm12, %v3333_v56, %v3555_v23  ;;  %vm19371_vm5 = vcmask 1046534   ;;  %v11567_v8 = vrot.slane %v15908_v27, 9  ;;  %v16047_v56 = vpop.f32.mrf.mxu0 }
 0x3e6   : > { %v3557_v55 = vsel %vm19371_vm5, %v3334_v44, %v3556_v52  ;;  %v11568_v14 = vrot.slane %v15934_v3, 9  ;;  %v11569_v54 = vrot.slane %v15918_v60, 9  ;;  %v4595_v4 = vmax.f32 %v15943_v50, %v11573_v21 }
 0x3e7   : > { %v11570_v26 = vrot.slane %v15953_v20, 9  ;;  %v11571_v2 = vrot.slane %v15981_v1, 9  ;;  %v11572_v61 = vrot.slane %v15964_v13, 9  ;;  %vm19372_vm4 = vcmask 1040384  }
 0x3e8   : > { %v3638_v44 = vsel %vm19372_vm4, 0.0, %v3551_v29  ;;  %v11575_v53 = vrot.slane %v15959_v25, 9  ;;  %v11576_v41 = vrot.slane %v15984_v17, 9  ;;  %v11577_v23 = vrot.slane %v15969_v33, 9 }
 0x3e9   : > { %vm19373_vm3 = vcmask 781824   ;;  %v3558_v21 = vsel %vm19369_vm9, %v3335_v62, %v3557_v55  ;;  %v11578_v50 = vrot.slane %v15988_v7, 9  ;;  %v11579_v52 = vrot.slane %v16013_v24, 9 }
 0x3ea   : > { %8091 = vst.msk [vmem:[#allocation2 + $0xb4] sm:$0xf] %vm19373_vm3, %v8010_v15  ;;  %v11580_v5 = vrot.slane %v2915_v18, 9  ;;  %v4588_v46 = vmax.f32 %v15881_v12, %v11566_v0  ;;  %v4589_v9 = vmax.f32 %v15908_v27, %v11567_v8  ;;  %v4590_v29 = vmax.f32 %v15934_v3, %v11568_v14 }
 0x3eb   : > { %v4591_v6 = vmax.f32 %v15918_v60, %v11569_v54  ;;  %v4592_v47 = vmax.f32 %v15953_v20, %v11570_v26  ;;  %v4593_v16 = vmax.f32 %v15981_v1, %v11571_v2  ;;  %v4594_v15 = vmax.f32 %v15964_v13, %v11572_v61 }
 0x3ec   : > { %v4749_v62 = vrot.slane %v3638_v44, 2  ;;  %v4750_v55 = vrot.slane %v3638_v44, 4  ;;  %v4751_v40 = vrot.slane %v3638_v44, 6  ;;  %v4752_v31 = vrot.slane %v3558_v21, 2 }
 0x3ed   : > { %v4753_v58 = vrot.slane %v3558_v21, 4  ;;  %v4596_v22 = vmax.f32 %v15956_v48, %v11574_v32  ;;  %v4754_v12 = vrot.slane %v3558_v21, 6  ;;  %v4867_v0 = vrot.slane %v3638_v44, 1  ;;  %v7696_v48 = vpop.permute.xlu2 %7695  ;;  %v16073_v32 = vpop.f32.mrf.mxu1 }
 0x3ee   : > { %v4868_v27 = vrot.slane %v4749_v62, 1  ;;  %v4597_v3 = vmax.f32 %v15959_v25, %v11575_v53  ;;  %v4598_v60 = vmax.f32 %v15984_v17, %v11576_v41  ;;  %v4599_v20 = vmax.f32 %v15969_v33, %v11577_v23  ;;  %1823 = vmatmul.bf16.gmra.mxu0 %v11236_v10  ;;  %v16077_v33 = vpop.f32.mrf.mxu0 }
 0x3ef   : > { %v4869_v8 = vrot.slane %v4750_v55, 1  ;;  %v4600_v1 = vmax.f32 %v15988_v7, %v11578_v50  ;;  %v4870_v13 = vrot.slane %v4751_v40, 1  ;;  %v4871_v14 = vrot.slane %v3558_v21, 1 }
 0x3f0   : > { %v4872_v54 = vrot.slane %v4752_v31, 1  ;;  %v19374_v26 = vor.u32 %v15972_v34, %v15978_v63  ;;  %vm19375_vm12 = vcmask 154624   ;;  %v4601_v25 = vmax.f32 %v16013_v24, %v11579_v52 }
 0x3f1   : > { %v4602_v2 = vmax.f32 %v2915_v18, %v11580_v5  ;;  %v4873_v17 = vrot.slane %v4753_v58, 1  ;;  %v5339_v61 = vmax.f32 %v4587_v37, %v3638_v44  ;;  %vm19376_vm5 = vcmask 519424  }
 0x3f2   : > { %11383 = vmatmul.msk.bf16.gmra.mxu1 %vm19375_vm12, %v19374_v26  ;;  %7775 = vst.msk [vmem:[#allocation2 + $0xc0] sm:$0xf] %vm19376_vm5, %v7696_v48  ;;  %v4874_v7 = vrot.slane %v4754_v12, 1  ;;  %v5340_v53 = vmax.f32 %v4588_v46, %v4867_v0  ;;  %v5341_v41 = vmax.f32 %v4589_v9, %v4749_v62  ;;  %v5342_v23 = vmax.f32 %v4590_v29, %v4868_v27 }
 0x3f3   : > { %v5343_v34 = vmax.f32 %v4591_v6, %v4750_v55  ;;  %v5344_v63 = vmax.f32 %v4592_v47, %v4869_v8  ;;  %v5345_v50 = vmax.f32 %v4593_v16, %v4751_v40  ;;  %v16080_v26 = vadd.s32 144, %v13098_v35 }
 0x3f4   : > { %v5346_v38 = vmax.f32 %v4594_v15, %v4870_v13  ;;  %v5348_v24 = vmax.f32 %v4596_v22, %v4871_v14  ;;  %v5349_v5 = vmax.f32 %v4597_v3, %v4752_v31  ;;  %v5350_v18 = vmax.f32 %v4598_v60, %v4872_v54 }
 0x3f5   : > { %v5347_v37 = vmax.f32 %v4595_v4, %v3558_v21  ;;  %v5351_v44 = vmax.f32 %v4599_v20, %v4753_v58  ;;  %v5352_v52 = vmax.f32 %v4600_v1, %v4873_v17  ;;  %v5353_v10 = vmax.f32 %v4601_v25, %v4754_v12  ;;  %v16082_v27 = vpop.f32.mrf.mxu1 }
 0x3f6   : > { %v5354_v48 = vmax.f32 %v4602_v2, %v4874_v7  ;;  %v5596_v30 = vpack.c.bf16 %v5340_v53, %v5340_v53  ;;  %v5597_v59 = vpack.c.bf16 %v5341_v41, %v5341_v41  ;;  %v5598_v46 = vpack.c.bf16 %v5342_v23, %v5342_v23  ;;  %v1789_v54 = vpop.f32.mrf.mxu0  ;;  %v11253_v23 = vld [vmem:[%s12397_s26 + $0x3b8] sm:$0xf0] }
 0x3f7   : > { %v5595_v9 = vpack.c.bf16 %v5339_v61, %v5339_v61  ;;  %v5599_v29 = vpack.c.bf16 %v5343_v34, %v5343_v34  ;;  %v5600_v6 = vpack.c.bf16 %v5344_v63, %v5344_v63  ;;  %v5601_v47 = vpack.c.bf16 %v5345_v50, %v5345_v50 }
 0x3f8   : > { %v5602_v16 = vpack.c.bf16 %v5346_v38, %v5346_v38  ;;  %v5604_v40 = vpack.c.bf16 %v5348_v24, %v5348_v24  ;;  %v5605_v62 = vpack.c.bf16 %v5349_v5, %v5349_v5  ;;  %v5606_v55 = vpack.c.bf16 %v5350_v18, %v5350_v18  ;;  %v11243_v5 = vld [vmem:[%s12397_s26 + $0x3a0] sm:$0xf] }
 0x3f9   : > { %v5603_v15 = vpack.c.bf16 %v5347_v37, %v5347_v37  ;;  %v5607_v22 = vpack.c.bf16 %v5351_v44, %v5351_v44  ;;  %v5608_v31 = vpack.c.bf16 %v5352_v52, %v5352_v52  ;;  %v5609_v0 = vpack.c.bf16 %v5353_v10, %v5353_v10  ;;  %v12117_v10 = vld [vmem:[%s12397_s26 + $0x3a4] sm:$0xf0] }
 0x3fa   : > { %v5610_v4 = vpack.c.bf16 %v5354_v48, %v5354_v48  ;;  %v6112_v58 = vunpack.c.l.b16 %v5596_v30  ;;  %v6113_v21 = vunpack.c.l.b16 %v5597_v59  ;;  %v6114_v12 = vunpack.c.l.b16 %v5598_v46  ;;  %v12118_v59 = vld [vmem:[%s12397_s26 + $0x3b4] sm:$0xf] }
 0x3fb   : > { %v6111_v3 = vunpack.c.l.b16 %v5595_v9  ;;  %v6115_v60 = vunpack.c.l.b16 %v5599_v29  ;;  %v6116_v20 = vunpack.c.l.b16 %v5600_v6  ;;  %v6117_v8 = vunpack.c.l.b16 %v5601_v47 }
 0x3fc   : > { %v6118_v38 = vunpack.c.l.b16 %v5602_v16  ;;  %v6120_v1 = vunpack.c.l.b16 %v5604_v40  ;;  %v6121_v13 = vunpack.c.l.b16 %v5605_v62  ;;  %v6122_v14 = vunpack.c.l.b16 %v5606_v55 }
 0x3fd   : > { %v6119_v25 = vunpack.c.l.b16 %v5603_v15  ;;  %v6123_v2 = vunpack.c.l.b16 %v5607_v22  ;;  %v6124_v17 = vunpack.c.l.b16 %v5608_v31  ;;  %v6125_v30 = vunpack.c.l.b16 %v5609_v0  ;;  %v8240_v22 = vpop.permute.xlu0 %8239  ;;  %v16096_v0 = vpop.f32.mrf.mxu1 }
 0x3fe   : > { %v6126_v61 = vunpack.c.l.b16 %v5610_v4  ;;  %v6499_v7 = vrot.slane %v6112_v58, 7  ;;  %v6501_v53 = vrot.slane %v6113_v21, 6  ;;  %v6503_v41 = vrot.slane %v6114_v12, 5  ;;  %v1791_v12 = vpop.f32.mrf.mxu0 }
 0x3ff   : > { %v6505_v34 = vrot.slane %v6115_v60, 4  ;;  %v6507_v63 = vrot.slane %v6116_v20, 3  ;;  %v6509_v50 = vrot.slane %v6117_v8, 2  ;;  %v6513_v24 = vrot.slane %v6120_v1, 7  ;;  %v16108_v20 = vld [vmem:[%s18553_s2] ss:$0 sm:$0xff] }
 0x400   : > { %vm19377_vm4 = vcmask 1041409   ;;  %v6511_v37 = vrot.slane %v6118_v38, 1  ;;  %v6515_v44 = vrot.slane %v6121_v13, 6  ;;  %v6517_v52 = vrot.slane %v6122_v14, 5  ;;  %v16115_v1 = vld [vmem:[%s18554_s3] ss:$0 sm:$0xff] }
 0x401   : > { %v6500_v18 = vsel %vm19377_vm4, %v6499_v7, %v6111_v3  ;;  %vm19378_vm3 = vcmask 1042434   ;;  %vm19379_vm9 = vmmov %vm19377_vm4  ;;  %v6519_v9 = vrot.slane %v6123_v2, 4  ;;  %v6521_v29 = vrot.slane %v6124_v17, 3  ;;  %v6770_v17 = vpop.f32.mrf.mxu2 }
 0x402   : > { %v6502_v48 = vsel %vm19378_vm3, %v6501_v53, %v6500_v18  ;;  %v6514_v46 = vsel %vm19379_vm9, %v6513_v24, %v6119_v25  ;;  %vm19380_vm12 = vcmask 1043459   ;;  %vm19381_vm5 = vmmov %vm19378_vm3  ;;  %v6523_v16 = vrot.slane %v6125_v30, 2  ;;  %v8242_v30 = vpop.permute.xlu1 %8241 }
 0x403   : > { %v6504_v6 = vsel %vm19380_vm12, %v6503_v41, %v6502_v48  ;;  %v6516_v47 = vsel %vm19381_vm5, %v6515_v44, %v6514_v46  ;;  %v11256_v40 = vor.u32 %v12118_v59, %v11253_v23  ;;  %vm19382_vm6 = vcmask 1044484   ;;  %vm19383_vm0 = vmmov %vm19380_vm12  ;;  %v12120_v44 = vld [vmem:[%s12397_s26 + $0x3c4] sm:$0xf] }
 0x404   : > { %v6506_v62 = vsel %vm19382_vm6, %v6505_v34, %v6504_v6  ;;  %v6518_v55 = vsel %vm19383_vm0, %v6517_v52, %v6516_v47  ;;  %v2119_v15 = vadd.f32 %v16042_v36, %v1789_v54  ;;  %v11244_v31 = vor.u32 %v12117_v10, %v11243_v5  ;;  %vm19385_vm3 = vmmov %vm19382_vm6  ;;  %v11261_v52 = vld [vmem:[%s12397_s26 + $0x3c8] sm:$0xf0] }
 0x405   : > { %vm19384_vm4 = vcmask 1045509   ;;  %v6520_v58 = vsel %vm19385_vm3, %v6519_v9, %v6518_v55  ;;  %v6525_v21 = vrot.slane %v6126_v61, 1  ;;  %vm19386_vm9 = vcmask 154624   ;;  %v11251_v9 = vld [vmem:[%s12397_s26 + $0x3b0] sm:$0xf] }
 0x406   : > { %v6508_v4 = vsel %vm19384_vm4, %v6507_v63, %v6506_v62  ;;  %11384 = vmatmul.msk.bf16.gmra.mxu1 %vm19386_vm9, %v11256_v40  ;;  %vm19387_vm12 = vcmask 1044224   ;;  %v7072_v3 = vand.u32 15, %v16080_v26  ;;  %vm19388_vm6 = vcmask 1046534   ;;  %vm19389_vm0 = vmmov %vm19384_vm4  ;;  %1828 = vmatmul.bf16.gmra.mxu0 %v11244_v31  ;;  %v7698_v63 = vpop.permute.xlu0 %7697 }
 0x407   : > { %8322 = vst.msk [vmem:[#allocation2 + $0xa8] sm:$0xf] %vm19387_vm12, %v8240_v22  ;;  %v6510_v60 = vsel %vm19388_vm6, %v6509_v50, %v6508_v4  ;;  %v6522_v36 = vsel %vm19389_vm0, %v6521_v29, %v6520_v58  ;;  %v2292_v8 = vmul.f32 %v16108_v20, %v2119_v15  ;;  %v2121_v38 = vadd.f32 %v16073_v32, %v1791_v12  ;;  %vm19390_vm5 = vmmov %vm19388_vm6  ;;  %v16147_v50 = vpop.f32.mrf.mxu1  ;;  %v12119_v29 = vld [vmem:[%s12397_s26 + $0x3b4] sm:$0xf0] }
 0x408   : > { %v2420_v26 = vadd.f32 %v16115_v1, %v16028_v19  ;;  %v2111_v13 = vadd.f32 %v15870_v49, %v16001_v42  ;;  %v6524_v14 = vsel %vm19390_vm5, %v6523_v16, %v6522_v36  ;;  %v6929_v54 = vadd.s32 152, %v13098_v35  ;;  %8323 = vst.msk [vmem:[#allocation2 + $0xb4] sm:$0xf] %vm19387_vm12, %v8242_v30 }
 0x409   : > { %vm19391_vm4 = vcmask 1047559   ;;  %v16126_v32 = vadd.f32 %v16115_v1, %v2292_v8  ;;  %vm16128_vm9 = vcmp.ge.s32.totalorder %v7072_v3, 1  ;;  %v19393_v59 = vmov 0  ;;  %v6772_v40 = vpop.f32.mrf.mxu2 }
 0x40a   : > { %v6512_v25 = vsel %vm19391_vm4, %v6511_v37, %v6510_v60  ;;  %vm19392_vm3 = vmmov %vm19391_vm4  ;;  %v19394_v59 = vsel %vm16128_vm9, 4294967295, %v19393_v59  ;;  %v6827_v49 = vmul.f32 %v15789_v39, %v6770_v17  ;;  %v2293_v42 = vmul.f32 %v16108_v20, %v2121_v38  ;;  %v8012_v55 = vpop.permute.xlu1 %8011 }
 0x40b   : > { %v6526_v2 = vsel %vm19392_vm3, %v6525_v21, %v6524_v14  ;;  %19395 = vst [vmem:[#allocation82_spill] sm:$0xff] %v19394_v59  ;;  %v18791_v61 = vmax.f32 %v16126_v32, 0.0  ;;  %v2289_v7 = vmul.f32 %v16108_v20, %v2111_v13  ;;  %v2114_v53 = vadd.f32 %v15929_v45, %v16047_v56  ;;  %v1794_v56 = vpop.f32.mrf.mxu0 }
 0x40c   : > { %v16132_v19 = vpack.c.b16 %v6526_v2, %v6512_v25  ;;  %vm19397_vm6 = vcmask 261120   ;;  %v6863_v41 = vadd.f32 %v15806_v11, %v6827_v49  ;;  %v7526_v23 = vsel %vm16128_vm9, %v15868_v28, 0.0 }
 0x40d   : > { %v2548_v34 = vmax.f32 %v2420_v26, 0.0  ;;  %v7079_v24 = vand.u32 15, %v6929_v54  ;;  %v7557_v5 = vpack.c.bf16 %v7526_v23, %v7526_v23  ;;  %v16152_v45 = vadd.f32 %v16115_v1, %v2293_v42 }
 0x40e   : > { %19396 = vst [vmem:[#allocation69_spill] sm:$0xff] %v16132_v19  ;;  %11664 = vmatmul.msk.bf16.gmra.mxu2 %vm19397_vm6, %v16132_v19  ;;  %v16149_v18 = vmax.f32 %v6863_v41, 0.0  ;;  %vm19398_vm0 = vcmask 519424   ;;  %vm19399_vm5 = vcmask 257024   ;;  %v2421_v10 = vadd.f32 %v16115_v1, %v2289_v7  ;;  %v11755_v30 = vld [vmem:[#allocation2 + $0xa8] sm:$0xf] }
 0x40f   : > { %7776 = vst.msk [vmem:[#allocation2 + $0xcc] sm:$0xf] %vm19398_vm0, %v7698_v63  ;;  %v2628_v37 = vmax.f32 %v2548_v34, %v18791_v61  ;;  %v2290_v48 = vmul.f32 %v16108_v20, %v2114_v53  ;;  %v2116_v47 = vadd.f32 %v15995_v51, %v16077_v33  ;;  %vm16172_vm4 = vcmp.le.s32.totalorder %v7079_v24, 14  ;;  %vm19409_vm6 = vmmov %vm19399_vm5  ;;  %v12161_v8 = vld [vmem:[#allocation2 + $0xb0] sm:$0xf0]  ;;  %v16205_v54 = vpop.f32.mrf.mxu1 }
 0x410   : > { %7590 = vst.msk [vmem:[#allocation2 + $0xd8] sm:$0xf] %vm19399_vm5, %v7557_v5  ;;  %v7828_v46 = vrot.slane %v16149_v18, 1  ;;  %v16167_v6 = vpack.c.bf16 %v16149_v18, %v16149_v18  ;;  %v7455_v16 = vrot.slane %v16149_v18, 7  ;;  %v19401_v62 = vmov 0 }
 0x411   : > { %v19402_v62 = vsel %vm16172_vm4, 4294967295, %v19401_v62  ;;  %v18788_v15 = vmax.f32 %v16152_v45, 0.0  ;;  %v6828_v22 = vmul.f32 %v15789_v39, %v6772_v40  ;;  %v19404_v31 = vrot.slane %v15874_v43, 1 }
 0x412   : > { %19400 = vst [vmem:[#allocation92_spill] sm:$0xff] %v16167_v6  ;;  %vm19405_vm3 = vcmask 1046528   ;;  %v11264_v58 = vor.u32 %v12120_v44, %v11261_v52  ;;  %vm19407_vm12 = vcmask 781824   ;;  %v19408_v51 = vmax.f32 %v15780_v57, 0.0 }
 0x413   : > { %19403 = vst [vmem:[#allocation93_spill] sm:$0xff] %v19402_v62  ;;  %v16181_v4 = vsel %vm19405_vm3, %v19404_v31, %v7828_v46  ;;  %v2124_v21 = vadd.f32 %v16082_v27, %v1794_v56  ;;  %v11252_v12 = vor.u32 %v12119_v29, %v11251_v9  ;;  %v2549_v3 = vmax.f32 %v2421_v10, 0.0  ;;  %v1796_v49 = vpop.f32.mrf.mxu0  ;;  %vm19415_vm3 = vmmov %vm19409_vm6  ;;  %v19422_v29 = vld [vmem:[#allocation85_spill] sm:$0xff]  ;;  %v11269_v31 = vld [vmem:[%s12397_s26 + $0x3d8] sm:$0xf0] }
 0x414   : > { %19406 = vst [vmem:[#allocation94_spill] sm:$0xff] %v16181_v4  ;;  %v16186_v33 = vmax.f32 %v2628_v37, %v19408_v51  ;;  %v2422_v39 = vadd.f32 %v16115_v1, %v2290_v48  ;;  %v6864_v60 = vadd.f32 %v15806_v11, %v6828_v22  ;;  %v7904_v36 = vsel %vm16172_vm4, %v16181_v4, 0.0  ;;  %v12122_v22 = vld [vmem:[%s12397_s26 + $0x3d4] sm:$0xf] }
 0x415   : > { %8092 = vst.msk [vmem:[#allocation2 + $0xc0] sm:$0xf] %vm19407_vm12, %v8012_v55  ;;  %v2291_v57 = vmul.f32 %v16108_v20, %v2116_v47  ;;  %v7935_v38 = vpack.c.bf16 %v7904_v36, %v7904_v36  ;;  %v8965_v27 = vsel %vm15505_vm7, %v16181_v4, 0.0  ;;  %v19411_v13 = vrot.slane %v15874_v43, 7 }
 0x416   : > { %8360 = vst.msk [vmem:[#allocation2 + $0xdc] sm:$0xf] %vm19409_vm6, %v16167_v6  ;;  %vm19412_vm0 = vcmask 1040384   ;;  %v2629_v11 = vmax.f32 %v2549_v3, %v18788_v15  ;;  %v16209_v25 = vmax.f32 %v6864_v60, 0.0  ;;  %v8995_v2 = vpack.c.bf16 %v8965_v27, %v8965_v27  ;;  %1833 = vmatmul.bf16.gmra.mxu0 %v11252_v12  ;;  %vm19418_vm6 = vmmov %vm19415_vm3  ;;  %v19425_v60 = vld [vmem:[#allocation89_spill] sm:$0xff] }
 0x417   : > { %v16203_v14 = vsel %vm19412_vm0, %v19411_v13, %v7455_v16  ;;  %vm19414_vm5 = vcmask 154624   ;;  %v16216_v43 = vrot.slane %v16186_v33, 2  ;;  %8017 = vrot.lane.b32.xlu2 %v7935_v38, %s12278_s19  ;;  %v2294_v7 = vmul.f32 %v16108_v20, %v2124_v21  ;;  %vm19417_vm12 = vmmov %vm19412_vm0  ;;  %v16264_v55 = vpop.f32.mrf.mxu1  ;;  %v12121_v38 = vld [vmem:[%s12397_s26 + $0x3c4] sm:$0xf0] }
 0x418   : > { %19413 = vst [vmem:[#allocation95_spill] sm:$0xff] %v16203_v14  ;;  %v8133_v17 = vsel %vm16128_vm9, %v16203_v14, 0.0  ;;  %11385 = vmatmul.msk.bf16.gmra.mxu1 %vm19414_vm5, %v11264_v58  ;;  %v11756_v53 = vor.u32 %v12161_v8, %v11755_v30  ;;  %v18789_v41 = vrot.slane %v16209_v25, 7  ;;  %v16224_v23 = vpack.c.bf16 %v16209_v25, %v16209_v25  ;;  %vm19424_vm5 = vmmov %vm19415_vm3 }
 0x419   : > { %v8165_v42 = vpack.c.bf16 %v8133_v17, %v8133_v17  ;;  %9025 = vst.msk [vmem:[#allocation2 + $0xbc] sm:$0xf] %vm19415_vm3, %v8995_v2  ;;  %v2126_v34 = vadd.f32 %v16096_v0, %v1796_v49  ;;  %v18790_v63 = vrot.slane %v16209_v25, 1  ;;  %v2550_v24 = vmax.f32 %v2422_v39, 0.0 }
 0x41a   : > { %19416 = vst [vmem:[#allocation96_spill] sm:$0xff] %v16224_v23  ;;  %v16230_v5 = vadd.f32 %v16115_v1, %v2294_v7  ;;  %9581 = vmatmul.bf16.gmra.mxu3 %v11756_v53  ;;  %v2423_v18 = vadd.f32 %v16115_v1, %v2291_v57  ;;  %v7458_v56 = vsel %vm19417_vm12, %v7455_v16, %v18789_v41  ;;  %vm19419_vm0 = vcmask 1046528   ;;  %v11259_v57 = vld [vmem:[%s12397_s26 + $0x3c0] sm:$0xf]  ;;  %v19428_v7 = vld [vmem:[#allocation78_spill] sm:$0xff] }
 0x41b   : > { %8247 = vrot.lane.b32.xlu0 %v8165_v42, %s12279_s21  ;;  %8361 = vst.msk [vmem:[#allocation2 + $0xe8] sm:$0xf] %vm19418_vm6, %v16224_v23  ;;  %v2295_v0 = vmul.f32 %v16108_v20, %v2126_v34  ;;  %v7831_v37 = vsel %vm19419_vm0, %v7828_v46, %v18790_v63  ;;  %v16243_v44 = vrot.slane %v16186_v33, 4  ;;  %v16246_v10 = vpack.c.bf16 %v7458_v56, %v7458_v56  ;;  %v1799_v3 = vpop.f32.mrf.mxu0 }
 0x41c   : > { %v18787_v52 = vmax.f32 %v16230_v5, 0.0  ;;  %v16248_v48 = vpack.c.bf16 %v7831_v37, %v7831_v37  ;;  %v3337_v9 = vperm.slane %v16216_v43, 1  ;;  %v19423_v47 = vmax.f32 %v19422_v29, 0.0 }
 0x41d   : > { %19420 = vst [vmem:[#allocation97_spill] sm:$0xff] %v16246_v10  ;;  %v16256_v40 = vadd.f32 %v16115_v1, %v2295_v0  ;;  %8249 = vrot.lane.b32.xlu1 %v16246_v10, %s12279_s21  ;;  %v2551_v58 = vmax.f32 %v2423_v18, 0.0  ;;  %v16269_v51 = vrot.slane %v16186_v33, 6  ;;  %v3336_v21 = vperm.slane %v16186_v33, 1 }
 0x41e   : > { %19421 = vst [vmem:[#allocation98_spill] sm:$0xff] %v16248_v48  ;;  %v16253_v16 = vmax.f32 %v2629_v11, %v19423_v47  ;;  %v2630_v46 = vmax.f32 %v2550_v24, %v18787_v52  ;;  %v3338_v39 = vperm.slane %v16243_v44, 1  ;;  %v19426_v36 = vmax.f32 %v19425_v60, 0.0 }
 0x41f   : > { %7593 = vst.msk [vmem:[#allocation2 + $0xfc] sm:$0xf] %vm19424_vm5, %v16246_v10  ;;  %v18786_v12 = vmax.f32 %v16256_v40, 0.0  ;;  %7703 = vrot.lane.b32.xlu2 %v16167_v6, %s12277_s0  ;;  %vm19427_vm12 = vcmask 1042434   ;;  %v11272_v30 = vor.u32 %v12122_v22, %v11269_v31  ;;  %v3339_v42 = vperm.slane %v16269_v51, 1 }
 0x420   : > { %9026 = vst.msk [vmem:[#allocation2 + $0xc8] sm:$0xf] %vm19415_vm3, %v16248_v48  ;;  %v2694_v8 = vmax.f32 %v2630_v46, %v19426_v36  ;;  %v3559_v27 = vsel %vm19427_vm12, %v3337_v9, %v3336_v21  ;;  %v16286_v11 = vrot.slane %v16253_v16, 2  ;;  %v16295_v49 = vrot.slane %v16253_v16, 6 }
 0x421   : > { %v2631_v13 = vmax.f32 %v2551_v58, %v18786_v12  ;;  %v19429_v53 = vmax.f32 %v19428_v7, 0.0  ;;  %v2129_v24 = vadd.f32 %v16147_v50, %v1799_v3  ;;  %v11260_v18 = vor.u32 %v12121_v38, %v11259_v57  ;;  %v16319_v58 = vpop.f32.mrf.mxu1  ;;  %v16326_v57 = vld [vmem:[%s12397_s26 + $0x3e4] sm:$0xf]  ;;  %v16329_v38 = vld [vmem:[%s12397_s26 + $0x3e8] sm:$0xf0] }
 0x422   : > { %v16288_v2 = vrot.slane %v2694_v8, 2  ;;  %v16290_v17 = vrot.slane %v2694_v8, 4  ;;  %vm19430_vm6 = vcmask 1043459   ;;  %v3340_v0 = vperm.slane %v16253_v16, 1  ;;  %v16336_v7 = vld [vmem:[%s12397_s26 + $0x3d4] sm:$0xf0] }
 0x423   : > { %7705 = vrot.lane.b32.xlu0 %v16224_v23, %s12277_s0  ;;  %v16300_v34 = vmax.f32 %v2631_v13, %v19429_v53  ;;  %v3560_v56 = vsel %vm19430_vm6, %v3338_v39, %v3559_v27  ;;  %v3344_v37 = vperm.slane %v2694_v8, 1  ;;  %v16306_v9 = vrot.slane %v16253_v16, 4  ;;  %v1801_v36 = vpop.f32.mrf.mxu0  ;;  %v16333_v13 = vld [vmem:[%s12397_s26 + $0x3d0] sm:$0xf] }
 0x424   : > { %v16308_v29 = vrot.slane %v2694_v8, 6  ;;  %v3345_v47 = vperm.slane %v16288_v2, 1  ;;  %v3341_v50 = vperm.slane %v16286_v11, 1  ;;  %v11581_v22 = vrot.slane %v16186_v33, 9 }
 0x425   : > { %v16312_v46 = vrot.slane %v16300_v34, 2  ;;  %v3346_v31 = vperm.slane %v16290_v17, 1  ;;  %8019 = vrot.lane.b32.xlu1 %v16248_v48, %s12278_s19  ;;  %v3343_v21 = vperm.slane %v16295_v49, 1  ;;  %v11589_v3 = vrot.slane %v2694_v8, 9 }
 0x426   : > { %v3348_v39 = vperm.slane %v16300_v34, 1  ;;  %vm19431_vm0 = vcmask 154624   ;;  %v2296_v60 = vmul.f32 %v16108_v20, %v2129_v24  ;;  %vm19432_vm5 = vcmask 1044484   ;;  %1838 = vmatmul.bf16.gmra.mxu0 %v11260_v18 }
 0x427   : > { %v3561_v27 = vsel %vm19432_vm5, %v3339_v42, %v3560_v56  ;;  %v16339_v53 = vrot.slane %v16300_v34, 4  ;;  %v3342_v12 = vperm.slane %v16306_v9, 1  ;;  %vm19433_vm3 = vcmask 1045509  }
 0x428   : > { %11386 = vmatmul.msk.bf16.gmra.mxu1 %vm19431_vm0, %v11272_v30  ;;  %v3562_v30 = vsel %vm19433_vm3, %v3340_v0, %v3561_v27  ;;  %vm19434_vm12 = vcmask 1041409   ;;  %v3347_v52 = vperm.slane %v16308_v29, 1  ;;  %v3349_v15 = vperm.slane %v16312_v46, 1 }
 0x429   : > { %v3565_v24 = vsel %vm19434_vm12, %v3344_v37, %v3343_v21  ;;  %vm19435_vm6 = vcmask 1046534   ;;  %vm19436_vm0 = vcmask 1042434   ;;  %v11582_v56 = vrot.slane %v16216_v43, 9 }
 0x42a   : > { %v3563_v42 = vsel %vm19435_vm6, %v3341_v50, %v3562_v30  ;;  %v3566_v18 = vsel %vm19436_vm0, %v3345_v47, %v3565_v24  ;;  %v11280_v41 = vor.u32 %v16326_v57, %v16329_v38  ;;  %vm19437_vm5 = vcmask 1043459  }
 0x42b   : > { %v3567_v63 = vsel %vm19437_vm5, %v3346_v31, %v3566_v18  ;;  %v16353_v61 = vmax.f32 %v16186_v33, %v11581_v22  ;;  %v11590_v0 = vrot.slane %v16288_v2, 9  ;;  %v11268_v37 = vor.u32 %v16336_v7, %v16333_v13 }
 0x42c   : > { %vm19438_vm3 = vcmask 1044484   ;;  %v16359_v50 = vmax.f32 %v2694_v8, %v11589_v3  ;;  %v3350_v47 = vperm.slane %v16339_v53, 1  ;;  %vm19439_vm12 = vcmask 1047559   ;;  %v8014_v3 = vpop.permute.xlu2 %8013 }
 0x42d   : > { %v3568_v21 = vsel %vm19438_vm3, %v3347_v52, %v3567_v63  ;;  %v3564_v27 = vsel %vm19439_vm12, %v3342_v12, %v3563_v42  ;;  %vm19440_vm6 = vcmask 1045509   ;;  %v16365_v31 = vadd.f32 %v16115_v1, %v2296_v60  ;;  %v16373_v63 = vpop.f32.mrf.mxu1 }
 0x42e   : > { %v3569_v57 = vsel %vm19440_vm6, %v3348_v39, %v3568_v21  ;;  %v2927_v33 = vrot.slane %v16300_v34, 6  ;;  %vm19441_vm0 = vcmask 1046534   ;;  %v11583_v38 = vrot.slane %v16243_v44, 9  ;;  %v16378_v39 = vpop.f32.mrf.mxu0 }
 0x42f   : > { %v3570_v22 = vsel %vm19441_vm0, %v3349_v15, %v3569_v57  ;;  %v16371_v13 = vadd.f32 %v16205_v54, %v1801_v36  ;;  %v11584_v52 = vrot.slane %v16269_v51, 9  ;;  %v11585_v12 = vrot.slane %v16253_v16, 9 }
 0x430   : > { %v11586_v8 = vrot.slane %v16286_v11, 9  ;;  %vm19442_vm5 = vcmask 1040384   ;;  %v11587_v15 = vrot.slane %v16306_v9, 9  ;;  %v11588_v7 = vrot.slane %v16295_v49, 9 }
 0x431   : > { %v3639_v60 = vsel %vm19442_vm5, 0.0, %v3564_v27  ;;  %v11591_v54 = vrot.slane %v16290_v17, 9  ;;  %vm19443_vm3 = vcmask 781824   ;;  %v3571_v36 = vsel %vm19439_vm12, %v3350_v47, %v3570_v22 }
 0x432   : > { %8093 = vst.msk [vmem:[#allocation2 + $0xcc] sm:$0xf] %vm19443_vm3, %v8014_v3  ;;  %v11592_v30 = vrot.slane %v16308_v29, 9  ;;  %v11593_v24 = vrot.slane %v16300_v34, 9  ;;  %v11594_v42 = vrot.slane %v16312_v46, 9  ;;  %v11595_v18 = vrot.slane %v16339_v53, 9 }
 0x433   : > { %v11596_v21 = vrot.slane %v2927_v33, 9  ;;  %v4604_v27 = vmax.f32 %v16216_v43, %v11582_v56  ;;  %v4605_v57 = vmax.f32 %v16243_v44, %v11583_v38  ;;  %v4606_v19 = vmax.f32 %v16269_v51, %v11584_v52 }
 0x434   : > { %v4607_v59 = vmax.f32 %v16253_v16, %v11585_v12  ;;  %v4608_v3 = vmax.f32 %v16286_v11, %v11586_v8  ;;  %v4755_v47 = vrot.slane %v3639_v60, 2  ;;  %v4609_v22 = vmax.f32 %v16306_v9, %v11587_v15  ;;  %v7700_v52 = vpop.permute.xlu2 %7699 }
 0x435   : > { %v4756_v48 = vrot.slane %v3639_v60, 4  ;;  %v4757_v23 = vrot.slane %v3639_v60, 6  ;;  %v4758_v10 = vrot.slane %v3571_v36, 2  ;;  %v4610_v6 = vmax.f32 %v16295_v49, %v11588_v7  ;;  %v16402_v12 = vpop.f32.mrf.mxu1 }
 0x436   : > { %v4759_v4 = vrot.slane %v3571_v36, 4  ;;  %v4875_v28 = vrot.slane %v3639_v60, 1  ;;  %v4876_v26 = vrot.slane %v4755_v47, 1  ;;  %v4612_v43 = vmax.f32 %v16288_v2, %v11590_v0  ;;  %1843 = vmatmul.bf16.gmra.mxu0 %v11268_v37 }
 0x437   : > { %v4613_v44 = vmax.f32 %v16290_v17, %v11591_v54  ;;  %v4760_v51 = vrot.slane %v3571_v36, 6  ;;  %v4877_v56 = vrot.slane %v4756_v48, 1  ;;  %v4614_v16 = vmax.f32 %v16308_v29, %v11592_v30  ;;  %v16407_v17 = vpop.f32.mrf.mxu0 }
 0x438   : > { %v4615_v11 = vmax.f32 %v16300_v34, %v11593_v24  ;;  %v4879_v38 = vrot.slane %v3571_v36, 1  ;;  %v4880_v9 = vrot.slane %v4758_v10, 1  ;;  %vm19444_vm6 = vcmask 154624  }
 0x439   : > { %11387 = vmatmul.msk.bf16.gmra.mxu1 %vm19444_vm6, %v11280_v41  ;;  %v4616_v49 = vmax.f32 %v16312_v46, %v11594_v42  ;;  %v4617_v8 = vmax.f32 %v16339_v53, %v11595_v18  ;;  %v4618_v2 = vmax.f32 %v2927_v33, %v11596_v21  ;;  %v4878_v0 = vrot.slane %v4757_v23, 1 }
 0x43a   : > { %vm19445_vm0 = vcmask 519424   ;;  %v4881_v29 = vrot.slane %v4759_v4, 1  ;;  %v5356_v34 = vmax.f32 %v4604_v27, %v4875_v28  ;;  %v5357_v15 = vmax.f32 %v4605_v57, %v4755_v47 }
 0x43b   : > { %7777 = vst.msk [vmem:[#allocation2 + $0xd8] sm:$0xf] %vm19445_vm0, %v7700_v52  ;;  %v5358_v7 = vmax.f32 %v4606_v19, %v4876_v26  ;;  %v4882_v54 = vrot.slane %v4760_v51, 1  ;;  %v5355_v41 = vmax.f32 %v16353_v61, %v3639_v60  ;;  %v5359_v30 = vmax.f32 %v4607_v59, %v4756_v48 }
 0x43c   : > { %v5360_v24 = vmax.f32 %v4608_v3, %v4877_v56  ;;  %v5361_v62 = vmax.f32 %v4609_v22, %v4757_v23  ;;  %v5364_v46 = vmax.f32 %v4612_v43, %v4879_v38  ;;  %v5365_v42 = vmax.f32 %v4613_v44, %v4758_v10 }
 0x43d   : > { %v5366_v53 = vmax.f32 %v4614_v16, %v4880_v9  ;;  %v5362_v33 = vmax.f32 %v4610_v6, %v4878_v0  ;;  %v5363_v18 = vmax.f32 %v16359_v50, %v3571_v36  ;;  %v5367_v21 = vmax.f32 %v4615_v11, %v4759_v4  ;;  %v16414_v44 = vpop.f32.mrf.mxu1 }
 0x43e   : > { %v16412_v37 = vadd.s32 160, %v13098_v35  ;;  %v5368_v52 = vmax.f32 %v4616_v49, %v4881_v29  ;;  %v5612_v28 = vpack.c.bf16 %v5356_v34, %v5356_v34  ;;  %v5613_v27 = vpack.c.bf16 %v5357_v15, %v5357_v15 }
 0x43f   : > { %v5614_v19 = vpack.c.bf16 %v5358_v7, %v5358_v7  ;;  %v5369_v26 = vmax.f32 %v4617_v8, %v4760_v51  ;;  %v5370_v57 = vmax.f32 %v4618_v2, %v4882_v54  ;;  %v5611_v61 = vpack.c.bf16 %v5355_v41, %v5355_v41 }
 0x440   : > { %v5615_v59 = vpack.c.bf16 %v5359_v30, %v5359_v30  ;;  %v5616_v48 = vpack.c.bf16 %v5360_v24, %v5360_v24  ;;  %v5620_v23 = vpack.c.bf16 %v5364_v46, %v5364_v46  ;;  %v5621_v60 = vpack.c.bf16 %v5365_v42, %v5365_v42 }
 0x441   : > { %v5622_v10 = vpack.c.bf16 %v5366_v53, %v5366_v53  ;;  %v5617_v3 = vpack.c.bf16 %v5361_v62, %v5361_v62  ;;  %v5618_v6 = vpack.c.bf16 %v5362_v33, %v5362_v33  ;;  %v5619_v47 = vpack.c.bf16 %v5363_v18, %v5363_v18  ;;  %v1809_v62 = vpop.f32.mrf.mxu0  ;;  %v12126_v53 = vld [vmem:[%s12397_s26 + $0x3f4] sm:$0xf]  ;;  %v11285_v33 = vld [vmem:[%s12397_s26 + $0x3f8] sm:$0xf0] }
 0x442   : > { %v5623_v50 = vpack.c.bf16 %v5367_v21, %v5367_v21  ;;  %v5624_v4 = vpack.c.bf16 %v5368_v52, %v5368_v52  ;;  %v6128_v36 = vunpack.c.l.b16 %v5612_v28  ;;  %v6129_v22 = vunpack.c.l.b16 %v5613_v27 }
 0x443   : > { %v6130_v43 = vunpack.c.l.b16 %v5614_v19  ;;  %v5625_v56 = vpack.c.bf16 %v5369_v26, %v5369_v26  ;;  %v5626_v16 = vpack.c.bf16 %v5370_v57, %v5370_v57  ;;  %v6127_v51 = vunpack.c.l.b16 %v5611_v61 }
 0x444   : > { %v6131_v11 = vunpack.c.l.b16 %v5615_v59  ;;  %v6132_v38 = vunpack.c.l.b16 %v5616_v48  ;;  %v6136_v9 = vunpack.c.l.b16 %v5620_v23  ;;  %v6137_v49 = vunpack.c.l.b16 %v5621_v60 }
 0x445   : > { %v6138_v8 = vunpack.c.l.b16 %v5622_v10  ;;  %v6133_v2 = vunpack.c.l.b16 %v5617_v3  ;;  %v6134_v0 = vunpack.c.l.b16 %v5618_v6  ;;  %v6135_v29 = vunpack.c.l.b16 %v5619_v47  ;;  %v8244_v47 = vpop.permute.xlu0 %8243 }
 0x446   : > { %v6139_v34 = vunpack.c.l.b16 %v5623_v50  ;;  %v6140_v15 = vunpack.c.l.b16 %v5624_v4  ;;  %v6527_v7 = vrot.slane %v6128_v36, 7  ;;  %v6529_v54 = vrot.slane %v6129_v22, 6  ;;  %v16426_v50 = vpop.f32.mrf.mxu1 }
 0x447   : > { %v6531_v41 = vrot.slane %v6130_v43, 5  ;;  %v6141_v30 = vunpack.c.l.b16 %v5625_v56  ;;  %v6142_v24 = vunpack.c.l.b16 %v5626_v16  ;;  %v6533_v46 = vrot.slane %v6131_v11, 4 }
 0x448   : > { %v6541_v42 = vrot.slane %v6136_v9, 7  ;;  %vm19446_vm5 = vcmask 1041409   ;;  %v6535_v21 = vrot.slane %v6132_v38, 3  ;;  %v6543_v52 = vrot.slane %v6137_v49, 6 }
 0x449   : > { %v6528_v18 = vsel %vm19446_vm5, %v6527_v7, %v6127_v51  ;;  %v6545_v28 = vrot.slane %v6138_v8, 5  ;;  %vm19447_vm3 = vcmask 1042434   ;;  %v6537_v19 = vrot.slane %v6133_v2, 2  ;;  %vm19448_vm12 = vmmov %vm19446_vm5  ;;  %v1811_v43 = vpop.f32.mrf.mxu0 }
 0x44a   : > { %v6530_v27 = vsel %vm19447_vm3, %v6529_v54, %v6528_v18  ;;  %v6539_v26 = vrot.slane %v6134_v0, 1  ;;  %v6542_v57 = vsel %vm19448_vm12, %v6541_v42, %v6135_v29  ;;  %vm19449_vm6 = vcmask 1043459   ;;  %vm19450_vm0 = vmmov %vm19447_vm3  ;;  %v6775_v0 = vpop.f32.mrf.mxu2  ;;  %v8246_v29 = vpop.permute.xlu1 %8245  ;;  %v16471_v42 = vld [vmem:[%s18557_s6] ss:$0 sm:$0xff] }
 0x44b   : > { %v6532_v61 = vsel %vm19449_vm6, %v6531_v41, %v6530_v27  ;;  %v6544_v59 = vsel %vm19450_vm0, %v6543_v52, %v6542_v57  ;;  %v6547_v48 = vrot.slane %v6139_v34, 4  ;;  %v11288_v23 = vor.u32 %v12126_v53, %v11285_v33  ;;  %vm19452_vm7 = vmmov %vm19449_vm6 }
 0x44c   : > { %vm19451_vm9 = vcmask 1044484   ;;  %v6546_v10 = vsel %vm19452_vm7, %v6545_v28, %v6544_v59  ;;  %v6549_v3 = vrot.slane %v6140_v15, 3  ;;  %v2139_v6 = vadd.f32 %v16373_v63, %v1809_v62  ;;  %v16456_v15 = vld [vmem:[%s18556_s5] ss:$0 sm:$0xff] }
 0x44d   : > { %v6534_v60 = vsel %vm19451_vm9, %v6533_v46, %v6532_v61  ;;  %vm19453_vm5 = vcmask 1045509   ;;  %vm19454_vm3 = vmmov %vm19451_vm9  ;;  %v6551_v22 = vrot.slane %v6141_v30, 2  ;;  %vm19455_vm12 = vcmask 154624  }
 0x44e   : > { %v6536_v4 = vsel %vm19453_vm5, %v6535_v21, %v6534_v60  ;;  %v6548_v36 = vsel %vm19454_vm3, %v6547_v48, %v6546_v10  ;;  %11388 = vmatmul.msk.bf16.gmra.mxu1 %vm19455_vm12, %v11288_v23  ;;  %vm19456_vm6 = vcmask 1044224   ;;  %v7086_v56 = vand.u32 15, %v16412_v37  ;;  %vm19458_vm7 = vmmov %vm19453_vm5  ;;  %v16476_v18 = vpop.f32.mrf.mxu1 }
 0x44f   : > { %8324 = vst.msk [vmem:[#allocation2 + $0xc0] sm:$0xf] %vm19456_vm6, %v8244_v47  ;;  %vm19457_vm9 = vcmask 1046534   ;;  %v6550_v51 = vsel %vm19458_vm7, %v6549_v3, %v6548_v36  ;;  %v6553_v63 = vrot.slane %v6142_v24, 1  ;;  %v2300_v11 = vmul.f32 %v16108_v20, %v2139_v6 }
 0x450   : > { %v6538_v16 = vsel %vm19457_vm9, %v6537_v19, %v6536_v4  ;;  %vm19459_vm0 = vmmov %vm19457_vm9  ;;  %v2141_v9 = vadd.f32 %v16402_v12, %v1811_v43  ;;  %v6931_v49 = vadd.s32 168, %v13098_v35  ;;  %vm16439_vm5 = vcmp.ge.s32.totalorder %v7086_v56, 1  ;;  %8325 = vst.msk [vmem:[#allocation2 + $0xcc] sm:$0xf] %vm19456_vm6, %v8246_v29 }
 0x451   : > { %v6552_v38 = vsel %vm19459_vm0, %v6551_v22, %v6550_v51  ;;  %v19460_v8 = vmov 0  ;;  %vm19463_vm3 = vcmask 1047559   ;;  %v16446_v2 = vadd.f32 %v16115_v1, %v2300_v11  ;;  %v1814_v21 = vpop.f32.mrf.mxu0 }
 0x452   : > { %v19461_v8 = vsel %vm16439_vm5, 4294967295, %v19460_v8  ;;  %v6540_v62 = vsel %vm19463_vm3, %v6539_v26, %v6538_v16  ;;  %vm19464_vm12 = vmmov %vm19463_vm3  ;;  %v7528_v34 = vsel %vm16439_vm5, %v16203_v14, 0.0  ;;  %v6829_v7 = vmul.f32 %v16456_v15, %v6775_v0  ;;  %v6777_v59 = vpop.f32.mrf.mxu2  ;;  %v8016_v23 = vpop.permute.xlu1 %8015 }
 0x453   : > { %19462 = vst [vmem:[#allocation85_spill] sm:$0xff] %v19461_v8  ;;  %v6554_v37 = vsel %vm19464_vm12, %v6553_v63, %v6552_v38  ;;  %v7559_v54 = vpack.c.bf16 %v7528_v34, %v7528_v34  ;;  %v2297_v41 = vmul.f32 %v16108_v20, %v16371_v13  ;;  %v18809_v30 = vmax.f32 %v16446_v2, 0.0  ;;  %v7702_v13 = vpop.permute.xlu0 %7701 }
 0x454   : > { %19465 = vst [vmem:[#allocation89_spill] sm:$0xff] %v16446_v2  ;;  %v16451_v12 = vpack.c.b16 %v6554_v37, %v6540_v62  ;;  %v2556_v24 = vmax.f32 %v16365_v31, 0.0  ;;  %v2134_v46 = vadd.f32 %v16264_v55, %v16378_v39  ;;  %vm19467_vm9 = vcmask 261120  }
 0x455   : > { %v6865_v53 = vadd.f32 %v16471_v42, %v6829_v7  ;;  %v2301_v33 = vmul.f32 %v16108_v20, %v2141_v9  ;;  %vm19468_vm7 = vcmask 257024   ;;  %v7093_v31 = vand.u32 15, %v6931_v49 }
 0x456   : > { %19466 = vst [vmem:[#allocation78_spill] sm:$0xff] %v16451_v12  ;;  %11665 = vmatmul.msk.bf16.gmra.mxu2 %vm19467_vm9, %v16451_v12  ;;  %v2632_v55 = vmax.f32 %v2556_v24, %v18809_v30  ;;  %vm19469_vm0 = vcmask 519424   ;;  %v2429_v52 = vadd.f32 %v16115_v1, %v2297_v41  ;;  %v2298_v28 = vmul.f32 %v16108_v20, %v2134_v46  ;;  %vm19480_vm9 = vmmov %vm19468_vm7  ;;  %v16523_v38 = vpop.f32.mrf.mxu1  ;;  %v11767_v0 = vld [vmem:[#allocation2 + $0xc0] sm:$0xf] }
 0x457   : > { %7592 = vst.msk [vmem:[#allocation2 + $0xf0] sm:$0xf] %vm19468_vm7, %v7559_v54  ;;  %v6897_v39 = vmax.f32 %v6865_v53, 0.0  ;;  %v16484_v19 = vadd.f32 %v16115_v1, %v2301_v33  ;;  %v2136_v57 = vadd.f32 %v16319_v58, %v16407_v17  ;;  %vm16490_vm3 = vcmp.le.s32.totalorder %v7093_v31, 14  ;;  %v12164_v43 = vld [vmem:[#allocation2 + $0xc8] sm:$0xf0] }
 0x458   : > { %7778 = vst.msk [vmem:[#allocation2 + $0xe4] sm:$0xf] %vm19469_vm0, %v7702_v13  ;;  %v19472_v48 = vmov 0  ;;  %v19475_v60 = vmax.f32 %v16126_v32, 0.0  ;;  %v6830_v3 = vmul.f32 %v16456_v15, %v6777_v59  ;;  %v19476_v6 = vrot.slane %v16209_v25, 1  ;;  %vm19485_vm0 = vmmov %vm19480_vm9 }
 0x459   : > { %v7832_v27 = vrot.slane %v6897_v39, 1  ;;  %19470 = vst [vmem:[#allocation99_spill] sm:$0xff] %v16484_v19  ;;  %v16486_v26 = vpack.c.bf16 %v6897_v39, %v6897_v39  ;;  %v7459_v61 = vrot.slane %v6897_v39, 7  ;;  %v19473_v48 = vsel %vm16490_vm3, 4294967295, %v19472_v48  ;;  %v1816_v29 = vpop.f32.mrf.mxu0 }
 0x45a   : > { %19474 = vst [vmem:[#allocation101_spill] sm:$0xff] %v19473_v48  ;;  %v16496_v10 = vmax.f32 %v2632_v55, %v19475_v60  ;;  %vm19477_vm12 = vcmask 1046528   ;;  %vm19479_vm6 = vcmask 781824   ;;  %v2557_v58 = vmax.f32 %v2429_v52, 0.0 }
 0x45b   : > { %19471 = vst [vmem:[#allocation100_spill] sm:$0xff] %v16486_v26  ;;  %v16502_v47 = vsel %vm19477_vm12, %v19476_v6, %v7832_v27  ;;  %v2144_v17 = vadd.f32 %v16414_v44, %v1814_v21  ;;  %v2430_v4 = vadd.f32 %v16115_v1, %v2298_v28  ;;  %v18807_v32 = vmax.f32 %v16484_v19, 0.0 }
 0x45c   : > { %19478 = vst [vmem:[#allocation102_spill] sm:$0xff] %v16502_v47  ;;  %v6866_v36 = vadd.f32 %v16471_v42, %v6830_v3  ;;  %v7906_v22 = vsel %vm16490_vm3, %v16502_v47, 0.0  ;;  %v2299_v56 = vmul.f32 %v16108_v20, %v2136_v57  ;;  %v8967_v44 = vsel %vm15837_vm8, %v16502_v47, 0.0 }
 0x45d   : > { %8094 = vst.msk [vmem:[#allocation2 + $0xd8] sm:$0xf] %vm19479_vm6, %v8016_v23  ;;  %v7937_v16 = vpack.c.bf16 %v7906_v22, %v7906_v22  ;;  %v19482_v63 = vrot.slane %v16209_v25, 7  ;;  %vm19483_vm7 = vcmask 1040384   ;;  %v16526_v9 = vrot.slane %v16496_v10, 2  ;;  %vm19489_vm6 = vmmov %vm19485_vm0 }
 0x45e   : > { %8362 = vst.msk [vmem:[#allocation2 + $0xf4] sm:$0xf] %vm19480_vm9, %v16486_v26  ;;  %v16528_v49 = vmax.f32 %v6866_v36, 0.0  ;;  %v8997_v62 = vpack.c.bf16 %v8967_v44, %v8967_v44  ;;  %v2302_v34 = vmul.f32 %v16108_v20, %v2144_v17  ;;  %v11768_v7 = vor.u32 %v12164_v43, %v11767_v0  ;;  %vm19488_vm12 = vmmov %vm19483_vm7 }
 0x45f   : > { %v16521_v11 = vsel %vm19483_vm7, %v19482_v63, %v7459_v61  ;;  %8021 = vrot.lane.b32.xlu2 %v7937_v16, %s12278_s19  ;;  %v2146_v54 = vadd.f32 %v16426_v50, %v1816_v29  ;;  %v2633_v41 = vmax.f32 %v2557_v58, %v18807_v32  ;;  %v2558_v33 = vmax.f32 %v2430_v4, 0.0  ;;  %vm19495_vm7 = vmmov %vm19485_vm0 }
 0x460   : > { %19484 = vst [vmem:[#allocation103_spill] sm:$0xff] %v16521_v11  ;;  %v8135_v37 = vsel %vm16439_vm5, %v16521_v11, 0.0  ;;  %v18810_v24 = vrot.slane %v16528_v49, 7  ;;  %v16542_v46 = vpack.c.bf16 %v16528_v49, %v16528_v49  ;;  %v18811_v53 = vrot.slane %v16528_v49, 1  ;;  %9586 = vmatmul.bf16.gmra.mxu3 %v11768_v7 }
 0x461   : > { %v8167_v25 = vpack.c.bf16 %v8135_v37, %v8135_v37  ;;  %9027 = vst.msk [vmem:[#allocation2 + $0xd4] sm:$0xf] %vm19485_vm0, %v8997_v62  ;;  %v2431_v13 = vadd.f32 %v16115_v1, %v2299_v56  ;;  %v16548_v50 = vadd.f32 %v16115_v1, %v2302_v34  ;;  %v2303_v31 = vmul.f32 %v16108_v20, %v2146_v54  ;;  %v16588_v58 = vpop.f32.mrf.mxu0 }
 0x462   : > { %19486 = vst [vmem:[#allocation104_spill] sm:$0xff] %v16542_v46  ;;  %v16552_v55 = vrot.slane %v16496_v10, 4  ;;  %v3352_v39 = vperm.slane %v16526_v9, 1  ;;  %v7462_v21 = vsel %vm19488_vm12, %v7459_v61, %v18810_v24  ;;  %vm19490_vm9 = vcmask 1046528  }
 0x463   : > { %8251 = vrot.lane.b32.xlu0 %v8167_v25, %s12279_s21  ;;  %19487 = vst [vmem:[#allocation105_spill] sm:$0xff] %v16548_v50  ;;  %v7835_v52 = vsel %vm19490_vm9, %v7832_v27, %v18811_v53  ;;  %v18808_v28 = vmax.f32 %v16548_v50, 0.0  ;;  %v16564_v57 = vpack.c.bf16 %v7462_v21, %v7462_v21  ;;  %v16567_v20 = vadd.f32 %v16115_v1, %v2303_v31  ;;  %v16583_v27 = vpop.f32.mrf.mxu1 }
 0x464   : > { %8363 = vst.msk [vmem:[#allocation2 + $0x100] sm:$0xf] %vm19489_vm6, %v16542_v46  ;;  %v16569_v59 = vpack.c.bf16 %v7835_v52, %v7835_v52  ;;  %v19494_v23 = vmax.f32 %v16152_v45, 0.0  ;;  %v2559_v61 = vmax.f32 %v2431_v13, 0.0  ;;  %v3351_v3 = vperm.slane %v16496_v10, 1 }
 0x465   : > { %19491 = vst [vmem:[#allocation106_spill] sm:$0xff] %v16564_v57  ;;  %v2634_v6 = vmax.f32 %v2558_v33, %v18808_v28  ;;  %8253 = vrot.lane.b32.xlu1 %v16564_v57, %s12279_s21  ;;  %v18805_v1 = vmax.f32 %v16567_v20, 0.0  ;;  %v3353_v45 = vperm.slane %v16552_v55, 1  ;;  %v16591_v17 = vrot.slane %v16496_v10, 6 }
 0x466   : > { %19492 = vst [vmem:[#allocation107_spill] sm:$0xff] %v16567_v20  ;;  %v16573_v60 = vmax.f32 %v2633_v41, %v19494_v23  ;;  %vm19496_vm12 = vcmask 1042434   ;;  %v19497_v36 = vmax.f32 %v16230_v5, 0.0  ;;  %vm19498_vm6 = vcmask 1043459  }
 0x467   : > { %19493 = vst [vmem:[#allocation108_spill] sm:$0xff] %v16569_v59  ;;  %v3572_v4 = vsel %vm19496_vm12, %v3352_v39, %v3351_v3  ;;  %7707 = vrot.lane.b32.xlu2 %v16486_v26, %s12277_s0  ;;  %v2635_v43 = vmax.f32 %v2559_v61, %v18805_v1  ;;  %v19499_v37 = vmax.f32 %v16256_v40, 0.0  ;;  %v3354_v29 = vperm.slane %v16591_v17, 1 }
 0x468   : > { %7595 = vst.msk [vmem:[#allocation2 + $0x114] sm:$0xf] %vm19495_vm7, %v16564_v57  ;;  %v2698_v22 = vmax.f32 %v2634_v6, %v19497_v36  ;;  %v16601_v56 = vrot.slane %v16573_v60, 2  ;;  %v16610_v63 = vrot.slane %v16573_v60, 6  ;;  %v3573_v5 = vsel %vm19498_vm6, %v3353_v45, %v3572_v4 }
 0x469   : > { %9028 = vst.msk [vmem:[#allocation2 + $0xe0] sm:$0xf] %vm19485_vm0, %v16569_v59  ;;  %v3355_v62 = vperm.slane %v16573_v60, 1  ;;  %v16616_v0 = vmax.f32 %v2635_v43, %v19499_v37  ;;  %v2932_v34 = vrot.slane %v16573_v60, 4  ;;  %vm19501_vm9 = vcmask 1044484   ;;  %v16635_v52 = vpop.f32.mrf.mxu0 }
 0x46a   : > { %v16603_v16 = vrot.slane %v2698_v22, 2  ;;  %v16605_v44 = vrot.slane %v2698_v22, 4  ;;  %v3359_v25 = vperm.slane %v2698_v22, 1  ;;  %v16620_v7 = vrot.slane %v2698_v22, 6 }
 0x46b   : > { %7709 = vrot.lane.b32.xlu0 %v16542_v46, %s12277_s0  ;;  %v16624_v41 = vrot.slane %v16616_v0, 2  ;;  %v3356_v33 = vperm.slane %v16601_v56, 1  ;;  %v16630_v40 = vpop.f32.mrf.mxu1  ;;  %v3358_v31 = vperm.slane %v16610_v63, 1  ;;  %v3574_v39 = vsel %vm19501_vm9, %v3354_v29, %v3573_v5 }
 0x46c   : > { %v3360_v54 = vperm.slane %v16603_v16, 1  ;;  %v3361_v13 = vperm.slane %v16605_v44, 1  ;;  %19500 = vst [vmem:[#allocation109_spill] sm:$0xff] %v16630_v40  ;;  %v11597_v21 = vrot.slane %v16496_v10, 9  ;;  %vm19502_vm7 = vcmask 1045509  }
 0x46d   : > { %8023 = vrot.lane.b32.xlu1 %v16569_v59, %s12278_s19  ;;  %v3575_v23 = vsel %vm19502_vm7, %v3355_v62, %v3574_v39  ;;  %v3363_v61 = vperm.slane %v16616_v0, 1  ;;  %v16640_v3 = vrot.slane %v16616_v0, 4  ;;  %v3357_v6 = vperm.slane %v2932_v34, 1 }
 0x46e   : > { %vm19503_vm0 = vcmask 1041409   ;;  %v3362_v4 = vperm.slane %v16620_v7, 1  ;;  %v3364_v36 = vperm.slane %v16624_v41, 1  ;;  %vm19504_vm12 = vcmask 1046534  }
 0x46f   : > { %v3578_v45 = vsel %vm19503_vm0, %v3359_v25, %v3358_v31  ;;  %v3576_v43 = vsel %vm19504_vm12, %v3356_v33, %v3575_v23  ;;  %vm19505_vm6 = vcmask 1042434   ;;  %v11605_v37 = vrot.slane %v2698_v22, 9  ;;  %vm19510_vm0 = vmmov %vm19504_vm12 }
 0x470   : > { %v3579_v5 = vsel %vm19505_vm6, %v3360_v54, %v3578_v45  ;;  %vm19506_vm9 = vcmask 1043459   ;;  %vm19507_vm7 = vcmask 1044484   ;;  %v3365_v39 = vperm.slane %v16640_v3, 1 }
 0x471   : > { %v3580_v29 = vsel %vm19506_vm9, %v3361_v13, %v3579_v5  ;;  %vm19508_vm5 = vcmask 1047559   ;;  %vm19509_vm8 = vcmask 1045509   ;;  %v11598_v25 = vrot.slane %v16526_v9, 9 }
 0x472   : > { %v3581_v62 = vsel %vm19507_vm7, %v3362_v4, %v3580_v29  ;;  %v3577_v1 = vsel %vm19508_vm5, %v3357_v6, %v3576_v43  ;;  %v4619_v31 = vmax.f32 %v16496_v10, %v11597_v21  ;;  %v2939_v28 = vrot.slane %v16616_v0, 6  ;;  %v8018_v4 = vpop.permute.xlu2 %8017 }
 0x473   : > { %v3582_v32 = vsel %vm19509_vm8, %v3363_v61, %v3581_v62  ;;  %v11606_v54 = vrot.slane %v16603_v16, 9  ;;  %v16657_v23 = vmax.f32 %v2698_v22, %v11605_v37  ;;  %v16659_v13 = vpop.f32.mrf.mxu1  ;;  %v11599_v45 = vrot.slane %v16552_v55, 9  ;;  %v16663_v61 = vpop.f32.mrf.mxu0 }
 0x474   : > { %v3583_v33 = vsel %vm19510_vm0, %v3364_v36, %v3582_v32  ;;  %v11600_v6 = vrot.slane %v16591_v17, 9  ;;  %vm19511_vm8 = vcmask 1040384   ;;  %v11601_v10 = vrot.slane %v16573_v60, 9 }
 0x475   : > { %v3640_v43 = vsel %vm19511_vm8, 0.0, %v3577_v1  ;;  %v11602_v21 = vrot.slane %v16601_v56, 9  ;;  %v11603_v32 = vrot.slane %v2932_v34, 9  ;;  %vm19512_vm5 = vcmask 781824  }
 0x476   : > { %8095 = vst.msk [vmem:[#allocation2 + $0xe4] sm:$0xf] %vm19512_vm5, %v8018_v4  ;;  %vm19513_vm12 = vcmask 1047559   ;;  %v11604_v36 = vrot.slane %v16610_v63, 9  ;;  %v11607_v5 = vrot.slane %v16605_v44, 9  ;;  %v11608_v37 = vrot.slane %v16620_v7, 9 }
 0x477   : > { %v3584_v22 = vsel %vm19513_vm12, %v3365_v39, %v3583_v33  ;;  %v11609_v29 = vrot.slane %v16616_v0, 9  ;;  %v11610_v62 = vrot.slane %v16624_v41, 9  ;;  %v11611_v1 = vrot.slane %v16640_v3, 9 }
 0x478   : > { %v11612_v30 = vrot.slane %v2939_v28, 9  ;;  %v4620_v24 = vmax.f32 %v16526_v9, %v11598_v25  ;;  %v4621_v53 = vmax.f32 %v16552_v55, %v11599_v45  ;;  %v4622_v4 = vmax.f32 %v16591_v17, %v11600_v6 }
 0x479   : > { %v4761_v39 = vrot.slane %v3640_v43, 2  ;;  %v4623_v33 = vmax.f32 %v16573_v60, %v11601_v10  ;;  %v4762_v12 = vrot.slane %v3640_v43, 4  ;;  %v4763_v8 = vrot.slane %v3640_v43, 6 }
 0x47a   : > { %v4764_v59 = vrot.slane %v3584_v22, 2  ;;  %v4624_v46 = vmax.f32 %v16601_v56, %v11602_v21  ;;  %v4625_v57 = vmax.f32 %v2932_v34, %v11603_v32  ;;  %v4883_v26 = vrot.slane %v3640_v43, 1  ;;  %v7704_v45 = vpop.permute.xlu2 %7703 }
 0x47b   : > { %v4884_v47 = vrot.slane %v4761_v39, 1  ;;  %v4626_v14 = vmax.f32 %v16610_v63, %v11604_v36  ;;  %v4765_v51 = vrot.slane %v3584_v22, 4  ;;  %v4766_v48 = vrot.slane %v3584_v22, 6  ;;  %v16685_v6 = vpop.f32.mrf.mxu1  ;;  %v16689_v63 = vpop.f32.mrf.mxu0 }
 0x47c   : > { %v4887_v9 = vrot.slane %v3584_v22, 1  ;;  %v4628_v55 = vmax.f32 %v16603_v16, %v11606_v54  ;;  %v4629_v17 = vmax.f32 %v16605_v44, %v11607_v5  ;;  %v4630_v25 = vmax.f32 %v16620_v7, %v11608_v37 }
 0x47d   : > { %v4888_v60 = vrot.slane %v4764_v59, 1  ;;  %v4631_v56 = vmax.f32 %v16616_v0, %v11609_v29  ;;  %v4885_v34 = vrot.slane %v4762_v12, 1  ;;  %v4886_v10 = vrot.slane %v4763_v8, 1 }
 0x47e   : > { %v5372_v21 = vmax.f32 %v4620_v24, %v4883_v26  ;;  %vm19514_vm6 = vcmask 519424   ;;  %v4632_v32 = vmax.f32 %v16624_v41, %v11610_v62  ;;  %v4633_v16 = vmax.f32 %v16640_v3, %v11611_v1 }
 0x47f   : > { %7779 = vst.msk [vmem:[#allocation2 + $0xf0] sm:$0xf] %vm19514_vm6, %v7704_v45  ;;  %v5373_v44 = vmax.f32 %v4621_v53, %v4761_v39  ;;  %v5374_v54 = vmax.f32 %v4622_v4, %v4884_v47  ;;  %v4634_v7 = vmax.f32 %v2939_v28, %v11612_v30  ;;  %v4889_v36 = vrot.slane %v4765_v51, 1 }
 0x480   : > { %v4890_v5 = vrot.slane %v4766_v48, 1  ;;  %v5380_v37 = vmax.f32 %v4628_v55, %v4887_v9  ;;  %v5371_v20 = vmax.f32 %v4619_v31, %v3640_v43  ;;  %v5375_v19 = vmax.f32 %v4623_v33, %v4762_v12 }
 0x481   : > { %v5381_v0 = vmax.f32 %v4629_v17, %v4764_v59  ;;  %v5382_v29 = vmax.f32 %v4630_v25, %v4888_v60  ;;  %v5376_v50 = vmax.f32 %v4624_v46, %v4885_v34  ;;  %v5377_v26 = vmax.f32 %v4625_v57, %v4763_v8 }
 0x482   : > { %v5378_v24 = vmax.f32 %v4626_v14, %v4886_v10  ;;  %v5628_v45 = vpack.c.bf16 %v5372_v21, %v5372_v21  ;;  %v5379_v2 = vmax.f32 %v16657_v23, %v3584_v22  ;;  %v5383_v40 = vmax.f32 %v4631_v56, %v4765_v51 }
 0x483   : > { %v5629_v41 = vpack.c.bf16 %v5373_v44, %v5373_v44  ;;  %v5630_v62 = vpack.c.bf16 %v5374_v54, %v5374_v54  ;;  %v5384_v3 = vmax.f32 %v4632_v32, %v4889_v36  ;;  %v5385_v53 = vmax.f32 %v4633_v16, %v4766_v48  ;;  %v16694_v23 = vpop.f32.mrf.mxu1  ;;  %v1829_v17 = vpop.f32.mrf.mxu0 }
 0x484   : > { %v5386_v47 = vmax.f32 %v4634_v7, %v4890_v5  ;;  %v5636_v30 = vpack.c.bf16 %v5380_v37, %v5380_v37  ;;  %v5627_v28 = vpack.c.bf16 %v5371_v20, %v5371_v20  ;;  %v5631_v1 = vpack.c.bf16 %v5375_v19, %v5375_v19 }
 0x485   : > { %v5637_v4 = vpack.c.bf16 %v5381_v0, %v5381_v0  ;;  %v5638_v31 = vpack.c.bf16 %v5382_v29, %v5382_v29  ;;  %v5632_v12 = vpack.c.bf16 %v5376_v50, %v5376_v50  ;;  %v5633_v59 = vpack.c.bf16 %v5377_v26, %v5377_v26 }
 0x486   : > { %v5634_v43 = vpack.c.bf16 %v5378_v24, %v5378_v24  ;;  %v6144_v46 = vunpack.c.l.b16 %v5628_v45  ;;  %v5635_v8 = vpack.c.bf16 %v5379_v2, %v5379_v2  ;;  %v5639_v14 = vpack.c.bf16 %v5383_v40, %v5383_v40 }
 0x487   : > { %v6145_v57 = vunpack.c.l.b16 %v5629_v41  ;;  %v6146_v39 = vunpack.c.l.b16 %v5630_v62  ;;  %v5640_v51 = vpack.c.bf16 %v5384_v3, %v5384_v3  ;;  %v5641_v22 = vpack.c.bf16 %v5385_v53, %v5385_v53 }
 0x488   : > { %v5642_v33 = vpack.c.bf16 %v5386_v47, %v5386_v47  ;;  %v6152_v48 = vunpack.c.l.b16 %v5636_v30  ;;  %v6143_v9 = vunpack.c.l.b16 %v5627_v28  ;;  %v6147_v55 = vunpack.c.l.b16 %v5631_v1 }
 0x489   : > { %v6153_v20 = vunpack.c.l.b16 %v5637_v4  ;;  %v6154_v19 = vunpack.c.l.b16 %v5638_v31  ;;  %v6148_v25 = vunpack.c.l.b16 %v5632_v12  ;;  %v6149_v50 = vunpack.c.l.b16 %v5633_v59 }
 0x48a   : > { %v6555_v60 = vrot.slane %v6144_v46, 7  ;;  %v6557_v56 = vrot.slane %v6145_v57, 6  ;;  %v6150_v34 = vunpack.c.l.b16 %v5634_v43  ;;  %v6151_v2 = vunpack.c.l.b16 %v5635_v8 }
 0x48b   : > { %v6155_v40 = vunpack.c.l.b16 %v5639_v14  ;;  %v6559_v10 = vrot.slane %v6146_v39, 5  ;;  %v6156_v21 = vunpack.c.l.b16 %v5640_v51  ;;  %vm19515_vm9 = vcmask 1041409   ;;  %v16704_v28 = vpop.f32.mrf.mxu1  ;;  %v1831_v43 = vpop.f32.mrf.mxu0 }
 0x48c   : > { %v6556_v32 = vsel %vm19515_vm9, %v6555_v60, %v6143_v9  ;;  %v6569_v16 = vrot.slane %v6152_v48, 7  ;;  %v6571_v44 = vrot.slane %v6153_v20, 6  ;;  %v6157_v54 = vunpack.c.l.b16 %v5641_v22  ;;  %vm19518_vm8 = vmmov %vm19515_vm9 }
 0x48d   : > { %vm19516_vm7 = vcmask 1042434   ;;  %v6561_v36 = vrot.slane %v6147_v55, 4  ;;  %v6573_v5 = vrot.slane %v6154_v19, 5  ;;  %v6158_v37 = vunpack.c.l.b16 %v5642_v33  ;;  %v8248_v30 = vpop.permute.xlu0 %8247  ;;  %v16725_v55 = vld [vmem:[%s18553_s2] ss:$0 sm:$0xff] }
 0x48e   : > { %v6558_v7 = vsel %vm19516_vm7, %v6557_v56, %v6556_v32  ;;  %vm19517_vm0 = vcmask 1043459   ;;  %v6563_v29 = vrot.slane %v6148_v25, 3  ;;  %v6570_v26 = vsel %vm19518_vm8, %v6569_v16, %v6151_v2  ;;  %vm19520_vm12 = vmmov %vm19516_vm7 }
 0x48f   : > { %v6560_v0 = vsel %vm19517_vm0, %v6559_v10, %v6558_v7  ;;  %vm19519_vm5 = vcmask 1044484   ;;  %v6565_v45 = vrot.slane %v6149_v50, 2  ;;  %v6572_v41 = vsel %vm19520_vm12, %v6571_v44, %v6570_v26  ;;  %vm19522_vm9 = vmmov %vm19517_vm0  ;;  %v8250_v33 = vpop.permute.xlu1 %8249 }
 0x490   : > { %v6562_v24 = vsel %vm19519_vm5, %v6561_v36, %v6560_v0  ;;  %v6575_v62 = vrot.slane %v6155_v40, 4  ;;  %vm19521_vm6 = vcmask 1045509   ;;  %v6574_v53 = vsel %vm19522_vm9, %v6573_v5, %v6572_v41  ;;  %vm19524_vm0 = vmmov %vm19519_vm5  ;;  %v16745_v40 = vld [vmem:[%s18554_s3] ss:$0 sm:$0xff] }
 0x491   : > { %v6564_v3 = vsel %vm19521_vm6, %v6563_v29, %v6562_v24  ;;  %v6577_v47 = vrot.slane %v6156_v21, 3  ;;  %v6932_v1 = vadd.s32 176, %v13098_v35  ;;  %v2149_v4 = vadd.f32 %v16476_v18, %v16588_v58  ;;  %vm19526_vm5 = vmmov %vm19521_vm6  ;;  %v6780_v58 = vpop.f32.mrf.mxu2 }
 0x492   : > { %vm19523_vm7 = vcmask 1046534   ;;  %v6576_v12 = vsel %vm19524_vm0, %v6575_v62, %v6574_v53  ;;  %v6579_v59 = vrot.slane %v6157_v54, 2  ;;  %vm19525_vm8 = vcmask 1044224  }
 0x493   : > { %v6566_v31 = vsel %vm19523_vm7, %v6565_v45, %v6564_v3  ;;  %8326 = vst.msk [vmem:[#allocation2 + $0xd8] sm:$0xf] %vm19525_vm8, %v8248_v30  ;;  %v6567_v46 = vrot.slane %v6150_v34, 1  ;;  %v6578_v8 = vsel %vm19526_vm5, %v6577_v47, %v6576_v12  ;;  %v6581_v14 = vrot.slane %v6158_v37, 1  ;;  %vm19527_vm12 = vmmov %vm19523_vm7  ;;  %v1834_v32 = vpop.f32.mrf.mxu0 }
 0x494   : > { %v7100_v57 = vand.u32 15, %v6932_v1  ;;  %v6580_v39 = vsel %vm19527_vm12, %v6579_v59, %v6578_v8  ;;  %v2159_v51 = vadd.f32 %v16659_v13, %v1829_v17  ;;  %vm19528_vm6 = vcmask 1047559   ;;  %vm19534_vm0 = vmmov %vm19525_vm8 }
 0x495   : > { %v6568_v22 = vsel %vm19528_vm6, %v6567_v46, %v6566_v31  ;;  %vm19529_vm9 = vmmov %vm19528_vm6  ;;  %v6933_v48 = vadd.s32 184, %v13098_v35  ;;  %v19530_v9 = vmov 0  ;;  %v2304_v20 = vmul.f32 %v16725_v55, %v2149_v4  ;;  %8327 = vst.msk [vmem:[#allocation2 + $0xe4] sm:$0xf] %vm19534_vm0, %v8250_v33  ;;  %v7706_v56 = vpop.permute.xlu0 %7705  ;;  %v16739_v34 = vpop.f32.mrf.mxu1  ;;  %v19551_v33 = vld [vmem:[#allocation109_spill] sm:$0xff] }
 0x496   : > { %v6582_v18 = vsel %vm19529_vm9, %v6581_v14, %v6580_v39  ;;  %vm16718_vm7 = vcmp.ge.s32.totalorder %v7100_v57, 1  ;;  %v6831_v19 = vmul.f32 %v16456_v15, %v6780_v58  ;;  %vm19535_vm8 = vcmask 261120  }
 0x497   : > { %v19531_v9 = vsel %vm16718_vm7, 4294967295, %v19530_v9  ;;  %v16728_v13 = vpack.c.b16 %v6582_v18, %v6568_v22  ;;  %v7530_v17 = vsel %vm16718_vm7, %v16521_v11, 0.0  ;;  %v2308_v50 = vmul.f32 %v16725_v55, %v2159_v51  ;;  %v8020_v5 = vpop.permute.xlu1 %8019 }
 0x498   : > { %19532 = vst [vmem:[#allocation110_spill] sm:$0xff] %v19531_v9  ;;  %v7561_v25 = vpack.c.bf16 %v7530_v17, %v7530_v17  ;;  %v6867_v60 = vadd.f32 %v16471_v42, %v6831_v19  ;;  %v7107_v2 = vand.u32 15, %v6933_v48  ;;  %vm19536_vm5 = vcmask 257024  }
 0x499   : > { %19533 = vst [vmem:[#allocation111_spill] sm:$0xff] %v16728_v13  ;;  %11666 = vmatmul.msk.bf16.gmra.mxu2 %vm19535_vm8, %v16728_v13  ;;  %v2436_v10 = vadd.f32 %v16745_v40, %v2304_v20  ;;  %vm19537_vm12 = vcmask 519424   ;;  %v16750_v16 = vadd.f32 %v16745_v40, %v2308_v50  ;;  %v6782_v7 = vpop.f32.mrf.mxu2  ;;  %vm19540_vm9 = vcmask 781824  }
 0x49a   : > { %7594 = vst.msk [vmem:[#allocation2 + $0x108] sm:$0xf] %vm19536_vm5, %v7561_v25  ;;  %v6899_v21 = vmax.f32 %v6867_v60, 0.0  ;;  %vm16752_vm6 = vcmp.le.s32.totalorder %v7107_v2, 14  ;;  %v2164_v0 = vadd.f32 %v16694_v23, %v1834_v32  ;;  %v2154_v29 = vadd.f32 %v16583_v27, %v16663_v61  ;;  %v19544_v23 = vld [vmem:[#allocation93_spill] sm:$0xff] }
 0x49b   : > { %7780 = vst.msk [vmem:[#allocation2 + $0xfc] sm:$0xf] %vm19537_vm12, %v7706_v56  ;;  %v2564_v37 = vmax.f32 %v2436_v10, 0.0  ;;  %v2161_v26 = vadd.f32 %v16685_v6, %v1831_v43  ;;  %v6832_v24 = vmul.f32 %v16456_v15, %v6782_v7  ;;  %v19541_v45 = vrot.slane %v16528_v49, 1  ;;  %v11779_v4 = vld [vmem:[#allocation2 + $0xd8] sm:$0xf]  ;;  %v1836_v46 = vpop.f32.mrf.mxu0  ;;  %vm19549_vm12 = vmmov %vm19536_vm5 }
 0x49c   : > { %v7463_v44 = vrot.slane %v6899_v21, 7  ;;  %v7836_v54 = vrot.slane %v6899_v21, 1  ;;  %8096 = vst.msk [vmem:[#allocation2 + $0xf0] sm:$0xf] %vm19540_vm9, %v8020_v5  ;;  %vm19542_vm0 = vcmask 1046528   ;;  %v18832_v3 = vmax.f32 %v16750_v16, 0.0 }
 0x49d   : > { %v12167_v62 = vld [vmem:[#allocation2 + $0xe0] sm:$0xf0]  ;;  %v19545_v61 = vrot.slane %v16528_v49, 7  ;;  %vm19546_vm8 = vcmask 1040384   ;;  %v2151_v6 = vadd.f32 %v16523_v38, %v16635_v52  ;;  %v6868_v47 = vadd.f32 %v16471_v42, %v6832_v24  ;;  %v2170_v31 = vpop.f32.mrf.mxu1 }
 0x49e   : > { %v16765_v41 = vsel %vm19542_vm0, %v19541_v45, %v7836_v54  ;;  %v2310_v59 = vmul.f32 %v16725_v55, %v2164_v0  ;;  %v11780_v43 = vor.u32 %v12167_v62, %v11779_v4  ;;  %v16786_v49 = vpack.c.bf16 %v6899_v21, %v6899_v21  ;;  %vm19552_vm9 = vmmov %vm19546_vm8 }
 0x49f   : > { %19543 = vst [vmem:[#allocation112_spill] sm:$0xff] %v16765_v41  ;;  %v7908_v53 = vsel %vm16752_vm6, %v16765_v41, 0.0  ;;  %v8969_v27 = vsel %vm16172_vm4, %v16765_v41, 0.0  ;;  %v16777_v15 = vsel %vm19546_vm8, %v19545_v61, %v7463_v44  ;;  %v16788_v8 = vmax.f32 %v6868_v47, 0.0  ;;  %vm19553_vm0 = vmmov %vm19536_vm5 }
 0x4a0   : > { %19547 = vst [vmem:[#allocation93_spill] sm:$0xff] %v16777_v15  ;;  %v7939_v30 = vpack.c.bf16 %v7908_v53, %v7908_v53  ;;  %v8999_v1 = vpack.c.bf16 %v8969_v27, %v8969_v27  ;;  %v8137_v12 = vsel %vm16718_vm7, %v16777_v15, 0.0  ;;  %v2306_v38 = vmul.f32 %v16725_v55, %v2154_v29  ;;  %9591 = vmatmul.bf16.gmra.mxu3 %v11780_v43 }
 0x4a1   : > { %19548 = vst [vmem:[#allocation113_spill] sm:$0xff] %v16786_v49  ;;  %v8169_v42 = vpack.c.bf16 %v8137_v12, %v8137_v12  ;;  %v2636_v52 = vmax.f32 %v2564_v37, %v18832_v3  ;;  %v2309_v14 = vmul.f32 %v16725_v55, %v2161_v26  ;;  %v18827_v57 = vrot.slane %v16788_v8, 7 }
 0x4a2   : > { %9029 = vst.msk [vmem:[#allocation2 + $0xec] sm:$0xf] %vm19536_vm5, %v8999_v1  ;;  %8025 = vrot.lane.b32.xlu2 %v7939_v30, %s12278_s19  ;;  %v16802_v39 = vpack.c.bf16 %v16788_v8, %v16788_v8  ;;  %v2166_v51 = vadd.f32 %v16704_v28, %v1836_v46  ;;  %v18828_v22 = vrot.slane %v16788_v8, 1  ;;  %v2305_v18 = vmul.f32 %v16725_v55, %v2151_v6  ;;  %vm19559_vm5 = vmmov %vm19553_vm0  ;;  %v19561_v30 = vld [vmem:[#allocation105_spill] sm:$0xff] }
 0x4a3   : > { %8364 = vst.msk [vmem:[#allocation2 + $0x10c] sm:$0xf] %vm19549_vm12, %v16786_v49  ;;  %8255 = vrot.lane.b32.xlu0 %v8169_v42, %s12279_s21  ;;  %v16808_v58 = vadd.f32 %v16745_v40, %v2310_v59  ;;  %v2156_v48 = vadd.f32 %v19551_v33, %v16689_v63  ;;  %v7466_v20 = vsel %vm19552_vm9, %v7463_v44, %v18827_v57  ;;  %vm19554_vm8 = vcmask 1046528   ;;  %v19557_v63 = vld [vmem:[#allocation89_spill] sm:$0xff]  ;;  %v1839_v44 = vpop.f32.mrf.mxu0  ;;  %vm19560_vm12 = vmmov %vm19553_vm0 }
 0x4a4   : > { %19550 = vst [vmem:[#allocation114_spill] sm:$0xff] %v16802_v39  ;;  %v7839_v28 = vsel %vm19554_vm8, %v7836_v54, %v18828_v22  ;;  %v2438_v19 = vadd.f32 %v16745_v40, %v2306_v38  ;;  %v16822_v17 = vadd.f32 %v16745_v40, %v2309_v14  ;;  %v16824_v25 = vpack.c.bf16 %v7466_v20, %v7466_v20  ;;  %v19563_v14 = vld [vmem:[#allocation99_spill] sm:$0xff] }
 0x4a5   : > { %8365 = vst.msk [vmem:[#allocation2 + $0x118] sm:$0xf] %vm19553_vm0, %v16802_v39  ;;  %v16826_v50 = vpack.c.bf16 %v7839_v28, %v7839_v28  ;;  %v19558_v60 = vmax.f32 %v19557_v63, 0.0  ;;  %v2311_v2 = vmul.f32 %v16725_v55, %v2166_v51  ;;  %v16831_v10 = vpop.f32.mrf.mxu1  ;;  %v2437_v21 = vadd.f32 %v16745_v40, %v2305_v18 }
 0x4a6   : > { %19555 = vst [vmem:[#allocation109_spill] sm:$0xff] %v16824_v25  ;;  %v18829_v32 = vmax.f32 %v16808_v58, 0.0  ;;  %8257 = vrot.lane.b32.xlu1 %v16824_v25, %s12279_s21  ;;  %v2307_v54 = vmul.f32 %v16725_v55, %v2156_v48  ;;  %v2566_v7 = vmax.f32 %v2438_v19, 0.0  ;;  %v18831_v5 = vmax.f32 %v16822_v17, 0.0 }
 0x4a7   : > { %19556 = vst [vmem:[#allocation115_spill] sm:$0xff] %v16826_v50  ;;  %v2700_v56 = vmax.f32 %v2636_v52, %v19558_v60  ;;  %v16850_v0 = vadd.f32 %v16745_v40, %v2311_v2  ;;  %v2565_v29 = vmax.f32 %v2437_v21, 0.0  ;;  %v2169_v61 = vadd.f32 %v16739_v34, %v1839_v44 }
 0x4a8   : > { %7597 = vst.msk [vmem:[#allocation2 + $0x12c] sm:$0xf] %vm19559_vm5, %v16824_v25  ;;  %v2638_v26 = vmax.f32 %v2566_v7, %v18829_v32  ;;  %v2439_v24 = vadd.f32 %v16745_v40, %v2307_v54  ;;  %v6934_v47 = vadd.s32 192, %v13098_v35  ;;  %v19562_v1 = vmax.f32 %v19561_v30, 0.0  ;;  %v19578_v7 = vld [vmem:[#allocation8_spill] sm:$0xff] }
 0x4a9   : > { %9030 = vst.msk [vmem:[#allocation2 + $0xf8] sm:$0xf] %vm19560_vm12, %v16826_v50  ;;  %v16845_v37 = vrot.slane %v2700_v56, 2  ;;  %v16855_v45 = vrot.slane %v2700_v56, 4  ;;  %v2637_v62 = vmax.f32 %v2565_v29, %v18831_v5  ;;  %v18826_v27 = vmax.f32 %v16850_v0, 0.0 }
 0x4aa   : > { %7711 = vrot.lane.b32.xlu2 %v16786_v49, %s12277_s0  ;;  %v16867_v4 = vmax.f32 %v2638_v26, %v19562_v1  ;;  %v2567_v59 = vmax.f32 %v2439_v24, 0.0  ;;  %v3366_v43 = vperm.slane %v2700_v56, 1  ;;  %v7114_v42 = vand.u32 15, %v6934_v47 }
 0x4ab   : > { %7713 = vrot.lane.b32.xlu0 %v16802_v39, %s12277_s0  ;;  %v3367_v53 = vperm.slane %v16845_v37, 1  ;;  %v1841_v12 = vpop.f32.mrf.mxu0  ;;  %v16871_v38 = vrot.slane %v2700_v56, 6  ;;  %v3368_v34 = vperm.slane %v16855_v45, 1  ;;  %v11613_v52 = vrot.slane %v2700_v56, 9 }
 0x4ac   : > { %v2171_v46 = vadd.f32 %v2170_v31, %v1841_v12  ;;  %v19564_v51 = vmax.f32 %v19563_v14, 0.0  ;;  %vm19565_vm9 = vcmask 1042434   ;;  %v2639_v48 = vmax.f32 %v2567_v59, %v18826_v27 }
 0x4ad   : > { %v16862_v6 = vpop.f32.mrf.mxu1  ;;  %v3585_v33 = vsel %vm19565_vm9, %v3367_v53, %v3366_v43  ;;  %v2312_v20 = vmul.f32 %v16725_v55, %v2169_v61  ;;  %vm16882_vm0 = vcmp.ge.s32.totalorder %v7114_v42, 1  ;;  %v19566_v28 = vmov 0  ;;  %v19569_v53 = vld [vmem:[#allocation107_spill] sm:$0xff] }
 0x4ae   : > { %8027 = vrot.lane.b32.xlu1 %v16826_v50, %s12278_s19  ;;  %v16876_v18 = vmax.f32 %v2637_v62, %v19564_v51  ;;  %v19567_v28 = vsel %vm16882_vm0, 4294967295, %v19566_v28  ;;  %v16887_v31 = vrot.slane %v16867_v4, 2  ;;  %v16890_v19 = vrot.slane %v16867_v4, 4 }
 0x4af   : > { %v16893_v63 = vrot.slane %v16867_v4, 6  ;;  %v7532_v60 = vsel %vm16882_vm0, %v16777_v15, 0.0  ;;  %v11621_v2 = vrot.slane %v16867_v4, 9  ;;  %v2313_v21 = vmul.f32 %v16725_v55, %v2171_v46  ;;  %v19571_v46 = vld [vmem:[#allocation7_spill] sm:$0xff] }
 0x4b0   : > { %v7563_v44 = vpack.c.bf16 %v7532_v60, %v7532_v60  ;;  %v3369_v54 = vperm.slane %v16871_v38, 1  ;;  %v16902_v29 = vmax.f32 %v2700_v56, %v11613_v52  ;;  %v3370_v26 = vperm.slane %v16876_v18, 1 }
 0x4b1   : > { %vm19568_vm8 = vcmask 1043459   ;;  %v3374_v62 = vperm.slane %v16867_v4, 1  ;;  %v19570_v61 = vmax.f32 %v19569_v53, 0.0  ;;  %v2444_v30 = vadd.f32 %v16745_v40, %v2312_v20 }
 0x4b2   : > { %v3586_v24 = vsel %vm19568_vm8, %v3368_v34, %v3585_v33  ;;  %7596 = vst.msk [vmem:[#allocation2 + $0x120] sm:$0xf] %vm19559_vm5, %v7563_v44  ;;  %v3375_v12 = vperm.slane %v16887_v31, 1  ;;  %v3376_v56 = vperm.slane %v16890_v19, 1  ;;  %v3377_v59 = vperm.slane %v16893_v63, 1 }
 0x4b3   : > { %v16909_v47 = vmax.f32 %v2639_v48, %v19570_v61  ;;  %v1844_v34 = vpop.f32.mrf.mxu0  ;;  %v16919_v14 = vmax.f32 %v16867_v4, %v11621_v2  ;;  %v16922_v51 = vadd.f32 %v16745_v40, %v2313_v21  ;;  %vm19572_vm12 = vcmask 781824  }
 0x4b4   : > { %v2174_v33 = vadd.f32 %v16831_v10, %v1844_v34  ;;  %v16928_v20 = vrot.slane %v16876_v18, 2  ;;  %v16931_v60 = vrot.slane %v16876_v18, 4  ;;  %v16934_v44 = vrot.slane %v16876_v18, 6 }
 0x4b5   : > { %v3378_v4 = vperm.slane %v16909_v47, 1  ;;  %v2572_v2 = vmax.f32 %v2444_v30, 0.0  ;;  %v16939_v53 = vrot.slane %v16909_v47, 2  ;;  %vm19573_vm9 = vcmask 1044484  }
 0x4b6   : > { %v2178_v1 = vpop.f32.mrf.mxu1  ;;  %v2314_v21 = vmul.f32 %v16725_v55, %v2174_v33  ;;  %v3371_v61 = vperm.slane %v16928_v20, 1  ;;  %v3587_v30 = vsel %vm19573_vm9, %v3369_v54, %v3586_v24  ;;  %v11615_v34 = vrot.slane %v16855_v45, 9 }
 0x4b7   : > { %v2179_v42 = vadd.f32 %v2178_v1, %v19571_v46  ;;  %v3372_v1 = vperm.slane %v16931_v60, 1  ;;  %v2573_v46 = vmax.f32 %v16922_v51, 0.0  ;;  %vm19574_vm8 = vcmask 1045509  }
 0x4b8   : > { %v3588_v27 = vsel %vm19574_vm8, %v3370_v26, %v3587_v30  ;;  %vm19575_vm5 = vcmask 1041409   ;;  %v11616_v57 = vrot.slane %v16871_v38, 9  ;;  %v16955_v22 = vadd.f32 %v16745_v40, %v2314_v21 }
 0x4b9   : > { %v8022_v43 = vpop.permute.xlu2 %8021  ;;  %v2316_v48 = vmul.f32 %v16725_v55, %v2179_v42  ;;  %v16947_v42 = vrot.slane %v16909_v47, 4  ;;  %v3379_v51 = vperm.slane %v16939_v53, 1  ;;  %vm19577_vm7 = vcmask 1042434  }
 0x4ba   : > { %8097 = vst.msk [vmem:[#allocation2 + $0xfc] sm:$0xf] %vm19572_vm12, %v8022_v43  ;;  %v3373_v43 = vperm.slane %v16934_v44, 1  ;;  %vm19576_vm12 = vcmask 1046534   ;;  %vm19579_vm9 = vcmask 1047559   ;;  %vm19580_vm8 = vcmask 1043459  }
 0x4bb   : > { %v2448_v10 = vadd.f32 %v16745_v40, %v2316_v48  ;;  %v3589_v52 = vsel %vm19576_vm12, %v3371_v61, %v3588_v27  ;;  %v1846_v3 = vpop.f32.mrf.mxu0  ;;  %v3380_v30 = vperm.slane %v16947_v42, 1  ;;  %vm19582_vm12 = vcmask 1044484  }
 0x4bc   : > { %v3591_v48 = vsel %vm19575_vm5, %v3374_v62, %v3373_v43  ;;  %v3590_v26 = vsel %vm19579_vm9, %v3372_v1, %v3589_v52  ;;  %vm19581_vm5 = vcmask 519424   ;;  %v2176_v21 = vadd.f32 %v16862_v6, %v1846_v3 }
 0x4bd   : > { %v2576_v33 = vmax.f32 %v2448_v10, 0.0  ;;  %v3592_v5 = vsel %vm19577_vm7, %v3375_v12, %v3591_v48  ;;  %v19583_v12 = vmax.f32 %v16750_v16, 0.0  ;;  %vm19584_vm7 = vcmask 1045509  }
 0x4be   : > { %v2180_v32 = vpop.f32.mrf.mxu1  ;;  %v3593_v62 = vsel %vm19580_vm8, %v3376_v56, %v3592_v5  ;;  %v11617_v52 = vrot.slane %v16876_v18, 9  ;;  %v2315_v56 = vmul.f32 %v16725_v55, %v2176_v21  ;;  %vm19585_vm9 = vcmask 1040384  }
 0x4bf   : > { %v2640_v54 = vmax.f32 %v2572_v2, %v2576_v33  ;;  %v2181_v10 = vadd.f32 %v2180_v32, %v19578_v7  ;;  %v3594_v27 = vsel %vm19582_vm12, %v3377_v59, %v3593_v62  ;;  %v16976_v3 = vsel %vm19585_vm9, 0.0, %v3590_v26 }
 0x4c0   : > { %v3595_v7 = vsel %vm19584_vm7, %v3378_v4, %v3594_v27  ;;  %v11618_v6 = vrot.slane %v16928_v20, 9  ;;  %vm19586_vm8 = vcmask 1046534   ;;  %v16988_v48 = vadd.f32 %v16745_v40, %v2315_v56 }
 0x4c1   : > { %v7708_v24 = vpop.permute.xlu2 %7707  ;;  %v2704_v2 = vmax.f32 %v2640_v54, %v19583_v12  ;;  %v2317_v32 = vmul.f32 %v16725_v55, %v2181_v10  ;;  %v3596_v1 = vsel %vm19586_vm8, %v3379_v51, %v3595_v7  ;;  %v11619_v54 = vrot.slane %v16931_v60, 9 }
 0x4c2   : > { %7781 = vst.msk [vmem:[#allocation2 + $0x108] sm:$0xf] %vm19581_vm5, %v7708_v24  ;;  %v11620_v62 = vrot.slane %v16934_v44, 9  ;;  %vm19587_vm5 = vcmask 1047559   ;;  %v11623_v51 = vrot.slane %v16890_v19, 9  ;;  %v11624_v12 = vrot.slane %v16893_v63, 9 }
 0x4c3   : > { %v16979_v61 = vrot.slane %v2704_v2, 2  ;;  %v16981_v59 = vrot.slane %v2704_v2, 4  ;;  %v16983_v16 = vrot.slane %v2704_v2, 6  ;;  %v11629_v4 = vrot.slane %v2704_v2, 9 }
 0x4c4   : > { %v2449_v33 = vadd.f32 %v16745_v40, %v2317_v32  ;;  %v3381_v24 = vperm.slane %v2704_v2, 1  ;;  %v16995_v27 = vsel %vm19587_vm5, %v3380_v30, %v3596_v1  ;;  %vm19588_vm12 = vcmask 1042434  }
 0x4c5   : > { %v3382_v10 = vperm.slane %v16979_v61, 1  ;;  %v3383_v26 = vperm.slane %v16981_v59, 1  ;;  %v17002_v5 = vmax.f32 %v2704_v2, %v11629_v4  ;;  %v11626_v30 = vrot.slane %v16939_v53, 9 }
 0x4c6   : > { %v2577_v21 = vmax.f32 %v2449_v33, 0.0  ;;  %v11625_v33 = vrot.slane %v16909_v47, 9  ;;  %vm19589_vm7 = vcmask 1043459   ;;  %v11627_v50 = vrot.slane %v16947_v42, 9 }
 0x4c7   : > { %v3598_v7 = vsel %vm19588_vm12, %v3382_v10, %v3381_v24  ;;  %v19590_v32 = vrot.slane %v16909_v47, 6  ;;  %v19591_v10 = vrot.slane %v16845_v37, 9  ;;  %v4638_v56 = vmax.f32 %v16871_v38, %v11616_v57 }
 0x4c8   : > { %v2641_v43 = vmax.f32 %v2573_v46, %v2577_v21  ;;  %v17008_v1 = vsel %vm19589_vm7, %v3383_v26, %v3598_v7  ;;  %v19592_v46 = vld [vmem:[#allocation9_spill] sm:$0xff]  ;;  %v4637_v21 = vmax.f32 %v16855_v45, %v11615_v34  ;;  %v4639_v13 = vmax.f32 %v16876_v18, %v11617_v52 }
 0x4c9   : > { %v11628_v24 = vrot.slane %v19590_v32, 9  ;;  %v4636_v2 = vmax.f32 %v16845_v37, %v19591_v10  ;;  %v19593_v26 = vmax.f32 %v16822_v17, 0.0  ;;  %v4640_v39 = vmax.f32 %v16928_v20, %v11618_v6 }
 0x4ca   : > { %v4641_v32 = vmax.f32 %v16931_v60, %v11619_v54  ;;  %v4642_v25 = vmax.f32 %v16934_v44, %v11620_v62  ;;  %v4645_v57 = vmax.f32 %v16890_v19, %v11623_v51  ;;  %v4646_v38 = vmax.f32 %v16893_v63, %v11624_v12 }
 0x4cb   : > { %v2183_v9 = vpop.f32.mrf.mxu1  ;;  %v17022_v7 = vmax.f32 %v2641_v43, %v19593_v26  ;;  %v4767_v17 = vrot.slane %v16976_v3, 2  ;;  %v4768_v18 = vrot.slane %v16976_v3, 4  ;;  %v4769_v20 = vrot.slane %v16976_v3, 6 }
 0x4cc   : > { %v2184_v4 = vadd.f32 %v2183_v9, %v19592_v46  ;;  %v19594_v9 = vrot.slane %v16887_v31, 9  ;;  %v4770_v60 = vrot.slane %v16995_v27, 2  ;;  %v4771_v34 = vrot.slane %v16995_v27, 4 }
 0x4cd   : > { %v4772_v43 = vrot.slane %v16995_v27, 6  ;;  %v4647_v19 = vmax.f32 %v16909_v47, %v11625_v33  ;;  %v4648_v63 = vmax.f32 %v16939_v53, %v11626_v30  ;;  %v4892_v52 = vrot.slane %v4767_v17, 1 }
 0x4ce   : > { %v2318_v37 = vmul.f32 %v16725_v55, %v2184_v4  ;;  %v4644_v45 = vmax.f32 %v16887_v31, %v19594_v9  ;;  %v4891_v31 = vrot.slane %v16976_v3, 1  ;;  %v4893_v6 = vrot.slane %v4768_v18, 1 }
 0x4cf   : > { %v4649_v51 = vmax.f32 %v16947_v42, %v11627_v50  ;;  %v4894_v12 = vrot.slane %v4769_v20, 1  ;;  %v19595_v10 = vrot.slane %v16909_v47, 6  ;;  %v4895_v4 = vrot.slane %v16995_v27, 1 }
 0x4d0   : > { %v2450_v44 = vadd.f32 %v16745_v40, %v2318_v37  ;;  %v4896_v26 = vrot.slane %v4770_v60, 1  ;;  %v4897_v37 = vrot.slane %v4771_v34, 1  ;;  %v19596_v33 = vmax.f32 %v16955_v22, 0.0 }
 0x4d1   : > { %v4650_v46 = vmax.f32 %v19595_v10, %v11628_v24  ;;  %v4898_v53 = vrot.slane %v4772_v43, 1  ;;  %v5387_v30 = vmax.f32 %v16902_v29, %v16976_v3  ;;  %v5388_v54 = vmax.f32 %v4636_v2, %v4891_v31 }
 0x4d2   : > { %v2578_v62 = vmax.f32 %v2450_v44, 0.0  ;;  %vm19597_vm9 = vcmask 1044224   ;;  %v5389_v50 = vmax.f32 %v4637_v21, %v4767_v17  ;;  %v5390_v42 = vmax.f32 %v4638_v56, %v4892_v52 }
 0x4d3   : > { %v5391_v44 = vmax.f32 %v4639_v13, %v4768_v18  ;;  %v5392_v47 = vmax.f32 %v4640_v39, %v4893_v6  ;;  %v19598_v24 = vmax.f32 %v16808_v58, 0.0  ;;  %v5393_v15 = vmax.f32 %v4641_v32, %v4769_v20  ;;  %vm19599_vm8 = vmmov %vm19597_vm9 }
 0x4d4   : > { %v2642_v49 = vmax.f32 %v19596_v33, %v2578_v62  ;;  %v5394_v41 = vmax.f32 %v4642_v25, %v4894_v12  ;;  %v5395_v22 = vmax.f32 %v16919_v14, %v16995_v27  ;;  %v5396_v62 = vmax.f32 %v4644_v45, %v4895_v4 }
 0x4d5   : > { %v8252_v9 = vpop.permute.xlu0 %8251  ;;  %v5397_v33 = vmax.f32 %v4645_v57, %v4770_v60  ;;  %v5398_v11 = vmax.f32 %v4646_v38, %v4896_v26  ;;  %v5399_v29 = vmax.f32 %v4647_v19, %v4771_v34  ;;  %v5400_v2 = vmax.f32 %v4648_v63, %v4897_v37 }
 0x4d6   : > { %8328 = vst.msk [vmem:[#allocation2 + $0xf0] sm:$0xf] %vm19597_vm9, %v8252_v9  ;;  %v17055_v10 = vmax.f32 %v2642_v49, %v19598_v24  ;;  %v5401_v31 = vmax.f32 %v4649_v51, %v4772_v43  ;;  %v5402_v21 = vmax.f32 %v4650_v46, %v4898_v53  ;;  %v5643_v56 = vpack.c.bf16 %v5387_v30, %v5387_v30 }
 0x4d7   : > { %v8254_v3 = vpop.permute.xlu1 %8253  ;;  %v5644_v58 = vpack.c.bf16 %v5388_v54, %v5388_v54  ;;  %v5645_v27 = vpack.c.bf16 %v5389_v50, %v5389_v50  ;;  %v5646_v32 = vpack.c.bf16 %v5390_v42, %v5390_v42  ;;  %v5647_v57 = vpack.c.bf16 %v5391_v44, %v5391_v44 }
 0x4d8   : > { %8329 = vst.msk [vmem:[#allocation2 + $0xfc] sm:$0xf] %vm19599_vm8, %v8254_v3  ;;  %v17061_v13 = vrot.slane %v17055_v10, 2  ;;  %v17064_v49 = vrot.slane %v17055_v10, 4  ;;  %v17067_v39 = vrot.slane %v17055_v10, 6  ;;  %v3389_v25 = vperm.slane %v17055_v10, 1 }
 0x4d9   : > { %v11637_v14 = vrot.slane %v17055_v10, 9  ;;  %v6785_v45 = vpop.f32.mrf.mxu2  ;;  %v5648_v38 = vpack.c.bf16 %v5392_v47, %v5392_v47  ;;  %v5649_v17 = vpack.c.bf16 %v5393_v15, %v5393_v15  ;;  %v5650_v18 = vpack.c.bf16 %v5394_v41, %v5394_v41 }
 0x4da   : > { %v5651_v60 = vpack.c.bf16 %v5395_v22, %v5395_v22  ;;  %v5652_v34 = vpack.c.bf16 %v5396_v62, %v5396_v62  ;;  %v5653_v43 = vpack.c.bf16 %v5397_v33, %v5397_v33  ;;  %v5654_v19 = vpack.c.bf16 %v5398_v11, %v5398_v11 }
 0x4db   : > { %vm19600_vm5 = vcmask 519424   ;;  %v5655_v63 = vpack.c.bf16 %v5399_v29, %v5399_v29  ;;  %v5656_v52 = vpack.c.bf16 %v5400_v2, %v5400_v2  ;;  %v5657_v6 = vpack.c.bf16 %v5401_v31, %v5401_v31 }
 0x4dc   : > { %v5658_v54 = vpack.c.bf16 %v5402_v21, %v5402_v21  ;;  %v6159_v51 = vunpack.c.l.b16 %v5643_v56  ;;  %v6160_v12 = vunpack.c.l.b16 %v5644_v58  ;;  %v6161_v46 = vunpack.c.l.b16 %v5645_v27 }
 0x4dd   : > { %v7710_v20 = vpop.permute.xlu0 %7709  ;;  %v6162_v4 = vunpack.c.l.b16 %v5646_v32  ;;  %v6163_v26 = vunpack.c.l.b16 %v5647_v57  ;;  %v6164_v37 = vunpack.c.l.b16 %v5648_v38  ;;  %v6165_v9 = vunpack.c.l.b16 %v5649_v17  ;;  %v2185_v57 = vpop.f32.mrf.mxu1 }
 0x4de   : > { %7782 = vst.msk [vmem:[#allocation2 + $0x114] sm:$0xf] %vm19600_vm5, %v7710_v20  ;;  %v6166_v15 = vunpack.c.l.b16 %v5650_v18  ;;  %v6167_v53 = vunpack.c.l.b16 %v5651_v60  ;;  %v6168_v30 = vunpack.c.l.b16 %v5652_v34  ;;  %v6169_v50 = vunpack.c.l.b16 %v5653_v43 }
 0x4df   : > { %v8024_v41 = vpop.permute.xlu1 %8023  ;;  %v6170_v42 = vunpack.c.l.b16 %v5654_v19  ;;  %vm19601_vm12 = vcmask 781824   ;;  %v6171_v11 = vunpack.c.l.b16 %v5655_v63  ;;  %v6172_v44 = vunpack.c.l.b16 %v5656_v52  ;;  %v17081_v63 = vld [vmem:[%s18556_s5] ss:$0 sm:$0xff] }
 0x4e0   : > { %8098 = vst.msk [vmem:[#allocation2 + $0x108] sm:$0xf] %vm19601_vm12, %v8024_v41  ;;  %v6173_v47 = vunpack.c.l.b16 %v5657_v6  ;;  %v6174_v24 = vunpack.c.l.b16 %v5658_v54  ;;  %v6583_v22 = vrot.slane %v6160_v12, 7  ;;  %v6585_v62 = vrot.slane %v6161_v46, 6 }
 0x4e1   : > { %v6587_v33 = vrot.slane %v6162_v4, 5  ;;  %v6589_v29 = vrot.slane %v6163_v26, 4  ;;  %v6591_v3 = vrot.slane %v6164_v37, 3  ;;  %v6593_v2 = vrot.slane %v6165_v9, 2  ;;  %v6787_v38 = vpop.f32.mrf.mxu2  ;;  %v17093_v37 = vld [vmem:[%s18557_s6] ss:$0 sm:$0xff] }
 0x4e2   : > { %v6595_v31 = vrot.slane %v6166_v15, 1  ;;  %v6597_v21 = vrot.slane %v6168_v30, 7  ;;  %vm19602_vm7 = vcmask 1041409   ;;  %v6599_v58 = vrot.slane %v6169_v50, 6  ;;  %v12170_v15 = vld [vmem:[#allocation2 + $0xf8] sm:$0xf0] }
 0x4e3   : > { %v6584_v56 = vsel %vm19602_vm7, %v6583_v22, %v6159_v51  ;;  %v6601_v27 = vrot.slane %v6170_v42, 5  ;;  %v6603_v32 = vrot.slane %v6171_v11, 4  ;;  %vm19603_vm9 = vcmask 1042434   ;;  %vm19604_vm8 = vmmov %vm19602_vm7  ;;  %v19609_v51 = vld [vmem:[#allocation10_spill] sm:$0xff] }
 0x4e4   : > { %v6586_v17 = vsel %vm19603_vm9, %v6585_v62, %v6584_v56  ;;  %v6598_v18 = vsel %vm19604_vm8, %v6597_v21, %v6167_v53  ;;  %v6605_v20 = vrot.slane %v6172_v44, 3  ;;  %v6607_v60 = vrot.slane %v6173_v47, 2  ;;  %vm19606_vm12 = vmmov %vm19603_vm9 }
 0x4e5   : > { %vm19605_vm5 = vcmask 1043459   ;;  %v6600_v43 = vsel %vm19606_vm12, %v6599_v58, %v6598_v18  ;;  %v6609_v19 = vrot.slane %v6174_v24, 1  ;;  %v6833_v52 = vmul.f32 %v17081_v63, %v6785_v45  ;;  %v11791_v24 = vld [vmem:[#allocation2 + $0xf0] sm:$0xf] }
 0x4e6   : > { %v6588_v34 = vsel %vm19605_vm5, %v6587_v33, %v6586_v17  ;;  %vm19607_vm7 = vcmask 1044484   ;;  %vm19608_vm4 = vmmov %vm19605_vm5  ;;  %v2186_v12 = vadd.f32 %v2185_v57, %v19609_v51  ;;  %v6834_v46 = vmul.f32 %v17081_v63, %v6787_v38 }
 0x4e7   : > { %v6590_v6 = vsel %vm19607_vm7, %v6589_v29, %v6588_v34  ;;  %v6602_v54 = vsel %vm19608_vm4, %v6601_v27, %v6600_v43  ;;  %vm19610_vm9 = vcmask 1045509   ;;  %vm19611_vm8 = vmmov %vm19607_vm7  ;;  %v6869_v9 = vadd.f32 %v17093_v37, %v6833_v52  ;;  %v19626_v43 = vld [vmem:[#allocation101_spill] sm:$0xff] }
 0x4e8   : > { %v6592_v4 = vsel %vm19610_vm9, %v6591_v3, %v6590_v6  ;;  %v6604_v26 = vsel %vm19611_vm8, %v6603_v32, %v6602_v54  ;;  %v6935_v45 = vadd.s32 200, %v13098_v35  ;;  %vm19612_vm5 = vcmask 1046534   ;;  %vm19613_vm4 = vmmov %vm19610_vm9 }
 0x4e9   : > { %v6594_v41 = vsel %vm19612_vm5, %v6593_v2, %v6592_v4  ;;  %v6606_v53 = vsel %vm19613_vm4, %v6605_v20, %v6604_v26  ;;  %v2319_v30 = vmul.f32 %v16725_v55, %v2186_v12  ;;  %v6870_v50 = vadd.f32 %v17093_v37, %v6834_v46  ;;  %vm19615_vm7 = vmmov %vm19612_vm5 }
 0x4ea   : > { %vm19614_vm12 = vcmask 1047559   ;;  %v6608_v11 = vsel %vm19615_vm7, %v6607_v60, %v6606_v53  ;;  %v6901_v44 = vmax.f32 %v6869_v9, 0.0  ;;  %v7121_v47 = vand.u32 15, %v6935_v45 }
 0x4eb   : > { %v6596_v42 = vsel %vm19614_vm12, %v6595_v31, %v6594_v41  ;;  %vm19616_vm9 = vmmov %vm19614_vm12  ;;  %v2451_v62 = vadd.f32 %v16745_v40, %v2319_v30  ;;  %v17105_v33 = vmax.f32 %v6870_v50, 0.0  ;;  %v11792_v29 = vor.u32 %v12170_v15, %v11791_v24 }
 0x4ec   : > { %v6610_v22 = vsel %vm19616_vm9, %v6609_v19, %v6608_v11  ;;  %v7467_v2 = vrot.slane %v6901_v44, 7  ;;  %v7840_v55 = vrot.slane %v6901_v44, 1  ;;  %vm17109_vm8 = vcmp.le.s32.totalorder %v7121_v47, 14 }
 0x4ed   : > { %v17107_v3 = vpack.c.b16 %v6610_v22, %v6596_v42  ;;  %v19618_v21 = vmov 0  ;;  %v2579_v31 = vmax.f32 %v2451_v62, 0.0  ;;  %9596 = vmatmul.bf16.gmra.mxu3 %v11792_v29  ;;  %v18843_v56 = vrot.slane %v17105_v33, 7 }
 0x4ee   : > { %v19619_v21 = vsel %vm17109_vm8, 4294967295, %v19618_v21  ;;  %v17114_v58 = vpack.c.bf16 %v6901_v44, %v6901_v44  ;;  %v17118_v40 = vpack.c.bf16 %v17105_v33, %v17105_v33  ;;  %vm19620_vm5 = vcmask 261120  }
 0x4ef   : > { %19617 = vst [vmem:[#allocation89_spill] sm:$0xff] %v17107_v3  ;;  %11667 = vmatmul.msk.bf16.gmra.mxu2 %vm19620_vm5, %v17107_v3  ;;  %v19621_v27 = vrot.slane %v16788_v8, 1  ;;  %vm19622_vm4 = vcmask 1046528   ;;  %v19623_v57 = vrot.slane %v16788_v8, 7  ;;  %vm19624_vm12 = vcmask 1040384  }
 0x4f0   : > { %v18844_v17 = vrot.slane %v17105_v33, 1  ;;  %v17134_v18 = vrot.slane %v17022_v7, 2  ;;  %v19625_v20 = vmax.f32 %v16988_v48, 0.0  ;;  %vm19627_vm7 = vcmask 257024   ;;  %vm19628_vm9 = vmmov %vm19624_vm12 }
 0x4f1   : > { %v17125_v32 = vsel %vm19622_vm4, %v19621_v27, %v7840_v55  ;;  %v17130_v38 = vsel %vm19624_vm12, %v19623_v57, %v7467_v2  ;;  %8366 = vst.msk [vmem:[#allocation2 + $0x124] sm:$0xf] %vm19627_vm7, %v17114_v58  ;;  %v7470_v48 = vsel %vm19628_vm9, %v7467_v2, %v18843_v56  ;;  %vm19629_vm5 = vmmov %vm19627_vm7  ;;  %v19630_v51 = vmax.f32 %v16850_v0, 0.0 }
 0x4f2   : > { %v2643_v60 = vmax.f32 %v19625_v20, %v2579_v31  ;;  %v7910_v34 = vsel %vm17109_vm8, %v17125_v32, 0.0  ;;  %v8971_v19 = vsel %vm16490_vm3, %v17125_v32, 0.0  ;;  %v8139_v8 = vsel %vm16882_vm0, %v17130_v38, 0.0  ;;  %8367 = vst.msk [vmem:[#allocation2 + $0x130] sm:$0xf] %vm19629_vm5, %v17118_v40  ;;  %vm19631_vm12 = vmmov %vm19629_vm5 }
 0x4f3   : > { %v7941_v52 = vpack.c.bf16 %v7910_v34, %v7910_v34  ;;  %v9001_v6 = vpack.c.bf16 %v8971_v19, %v8971_v19  ;;  %v8171_v54 = vpack.c.bf16 %v8139_v8, %v8139_v8  ;;  %v17158_v46 = vpack.c.bf16 %v7470_v48, %v7470_v48  ;;  %vm19632_vm7 = vmmov %vm19629_vm5 }
 0x4f4   : > { %v17156_v12 = vmax.f32 %v2643_v60, %v19630_v51  ;;  %v7843_v4 = vsel %vm19622_vm4, %v7840_v55, %v18844_v17  ;;  %v2956_v26 = vrot.slane %v17022_v7, 4  ;;  %v3390_v9 = vperm.slane %v17061_v13, 1 }
 0x4f5   : > { %9031 = vst.msk [vmem:[#allocation2 + $0x104] sm:$0xf] %vm19631_vm12, %v9001_v6  ;;  %8029 = vrot.lane.b32.xlu2 %v7941_v52, %s12278_s19  ;;  %8259 = vrot.lane.b32.xlu0 %v8171_v54, %s12279_s21  ;;  %v17168_v45 = vpack.c.bf16 %v7843_v4, %v7843_v4  ;;  %v2957_v0 = vrot.slane %v17022_v7, 6  ;;  %v3386_v15 = vperm.slane %v17134_v18, 1  ;;  %v3391_v41 = vperm.slane %v17064_v49, 1 }
 0x4f6   : > { %8261 = vrot.lane.b32.xlu1 %v17158_v46, %s12279_s21  ;;  %7599 = vst.msk [vmem:[#allocation2 + $0x144] sm:$0xf] %vm19632_vm7, %v17158_v46  ;;  %v2961_v53 = vrot.slane %v17156_v12, 2  ;;  %v17179_v30 = vrot.slane %v17156_v12, 4  ;;  %v19633_v50 = vperm.slane %v16983_v16, 1  ;;  %vm19634_vm9 = vcmask 1044484  }
 0x4f7   : > { %v3392_v11 = vperm.slane %v17067_v39, 1  ;;  %9032 = vst.msk [vmem:[#allocation2 + $0x110] sm:$0xf] %vm19629_vm5, %v17168_v45  ;;  %v3387_v44 = vperm.slane %v2956_v26, 1  ;;  %v3388_v47 = vperm.slane %v2957_v0, 1  ;;  %v19635_v24 = vperm.slane %v17022_v7, 1 }
 0x4f8   : > { %v3600_v42 = vsel %vm19634_vm9, %v19633_v50, %v17008_v1  ;;  %vm19636_vm4 = vcmask 1045509   ;;  %v11638_v62 = vrot.slane %v17061_v13, 9  ;;  %v17195_v29 = vmax.f32 %v17055_v10, %v11637_v14 }
 0x4f9   : > { %v3601_v22 = vsel %vm19636_vm4, %v19635_v24, %v3600_v42  ;;  %v3393_v1 = vperm.slane %v17156_v12, 1  ;;  %vm19637_vm12 = vcmask 1046534   ;;  %v2963_v55 = vrot.slane %v17156_v12, 6 }
 0x4fa   : > { %v3602_v2 = vsel %vm19637_vm12, %v3386_v15, %v3601_v22  ;;  %vm19638_vm7 = vcmask 1047559   ;;  %vm19639_vm9 = vcmask 1041409   ;;  %v11631_v57 = vrot.slane %v16981_v59, 9 }
 0x4fb   : > { %v3603_v31 = vsel %vm19638_vm7, %v3387_v44, %v3602_v2  ;;  %v3604_v27 = vsel %vm19639_vm9, %v3389_v25, %v3388_v47  ;;  %v3394_v20 = vperm.slane %v2961_v53, 1  ;;  %v3395_v60 = vperm.slane %v17179_v30, 1 }
 0x4fc   : > { %vm19640_vm5 = vcmask 1042434   ;;  %v11632_v34 = vrot.slane %v16983_v16, 9  ;;  %vm19641_vm4 = vcmask 1043459   ;;  %vm19642_vm12 = vcmask 1040384   ;;  %v8026_v47 = vpop.permute.xlu2 %8025 }
 0x4fd   : > { %v3605_v14 = vsel %vm19640_vm5, %v3390_v9, %v3604_v27  ;;  %v3642_v8 = vsel %vm19642_vm12, 0.0, %v3603_v31  ;;  %v11633_v52 = vrot.slane %v17022_v7, 9  ;;  %v11634_v6 = vrot.slane %v17134_v18, 9  ;;  %7715 = vrot.lane.b32.xlu2 %v17114_v58, %s12277_s0  ;;  %7717 = vrot.lane.b32.xlu0 %v17118_v40, %s12277_s0 }
 0x4fe   : > { %v3606_v19 = vsel %vm19641_vm4, %v3391_v41, %v3605_v14  ;;  %vm19643_vm7 = vcmask 1044484   ;;  %v11635_v25 = vrot.slane %v2956_v26, 9  ;;  %v11636_v54 = vrot.slane %v2957_v0, 9  ;;  %8031 = vrot.lane.b32.xlu1 %v17168_v45, %s12278_s19 }
 0x4ff   : > { %v3607_v10 = vsel %vm19643_vm7, %v3392_v11, %v3606_v19  ;;  %v11639_v48 = vrot.slane %v17064_v49, 9  ;;  %vm19644_vm9 = vcmask 1045509   ;;  %v11640_v4 = vrot.slane %v17067_v39, 9 }
 0x500   : > { %v3608_v51 = vsel %vm19644_vm9, %v3393_v1, %v3607_v10  ;;  %v11641_v9 = vrot.slane %v17156_v12, 9  ;;  %v11642_v15 = vrot.slane %v2961_v53, 9  ;;  %vm19645_vm5 = vcmask 1046534  }
 0x501   : > { %v3609_v41 = vsel %vm19645_vm5, %v3394_v20, %v3608_v51  ;;  %v11643_v50 = vrot.slane %v17179_v30, 9  ;;  %v11644_v42 = vrot.slane %v2963_v55, 9  ;;  %v19646_v11 = vrot.slane %v16979_v61, 9 }
 0x502   : > { %vm19647_vm4 = vcmask 1047559   ;;  %v4653_v22 = vmax.f32 %v16981_v59, %v11631_v57  ;;  %v4654_v1 = vmax.f32 %v16983_v16, %v11632_v34  ;;  %v4773_v2 = vrot.slane %v3642_v8, 2 }
 0x503   : > { %v4652_v44 = vmax.f32 %v16979_v61, %v19646_v11  ;;  %v3610_v24 = vsel %vm19647_vm4, %v3395_v60, %v3609_v41  ;;  %vm19648_vm12 = vcmask 781824   ;;  %v4655_v31 = vmax.f32 %v17022_v7, %v11633_v52 }
 0x504   : > { %8099 = vst.msk [vmem:[#allocation2 + $0x114] sm:$0xf] %vm19648_vm12, %v8026_v47  ;;  %v4656_v27 = vmax.f32 %v17134_v18, %v11634_v6  ;;  %v4657_v20 = vmax.f32 %v2956_v26, %v11635_v25  ;;  %v4658_v14 = vmax.f32 %v2957_v0, %v11636_v54  ;;  %v4660_v19 = vmax.f32 %v17061_v13, %v11638_v62 }
 0x505   : > { %v4661_v61 = vmax.f32 %v17064_v49, %v11639_v48  ;;  %v4774_v10 = vrot.slane %v3642_v8, 4  ;;  %v4775_v51 = vrot.slane %v3642_v8, 6  ;;  %v4776_v60 = vrot.slane %v3610_v24, 2 }
 0x506   : > { %v4777_v41 = vrot.slane %v3610_v24, 4  ;;  %v4778_v59 = vrot.slane %v3610_v24, 6  ;;  %v4899_v57 = vrot.slane %v3642_v8, 1  ;;  %v4662_v16 = vmax.f32 %v17067_v39, %v11640_v4 }
 0x507   : > { %v4663_v34 = vmax.f32 %v17156_v12, %v11641_v9  ;;  %v4900_v11 = vrot.slane %v4773_v2, 1  ;;  %v4903_v7 = vrot.slane %v3610_v24, 1  ;;  %v4664_v52 = vmax.f32 %v2961_v53, %v11642_v15  ;;  %v7712_v9 = vpop.permute.xlu2 %7711 }
 0x508   : > { %v4901_v18 = vrot.slane %v4774_v10, 1  ;;  %v4902_v26 = vrot.slane %v4775_v51, 1  ;;  %v4904_v0 = vrot.slane %v4776_v60, 1  ;;  %v4665_v13 = vmax.f32 %v17179_v30, %v11643_v50 }
 0x509   : > { %v5404_v62 = vmax.f32 %v4652_v44, %v4899_v57  ;;  %v5405_v49 = vmax.f32 %v4653_v22, %v4773_v2  ;;  %v5406_v6 = vmax.f32 %v4654_v1, %v4900_v11  ;;  %v4666_v25 = vmax.f32 %v2963_v55, %v11644_v42 }
 0x50a   : > { %v4905_v54 = vrot.slane %v4777_v41, 1  ;;  %v4906_v48 = vrot.slane %v4778_v59, 1  ;;  %v5403_v47 = vmax.f32 %v17002_v5, %v3642_v8  ;;  %v5407_v56 = vmax.f32 %v4655_v31, %v4774_v10 }
 0x50b   : > { %v5412_v39 = vmax.f32 %v4660_v19, %v4903_v7  ;;  %v5413_v4 = vmax.f32 %v4661_v61, %v4776_v60  ;;  %v5414_v12 = vmax.f32 %v4662_v16, %v4904_v0  ;;  %v5408_v17 = vmax.f32 %v4656_v27, %v4901_v18 }
 0x50c   : > { %v5409_v53 = vmax.f32 %v4657_v20, %v4775_v51  ;;  %v5410_v15 = vmax.f32 %v4658_v14, %v4902_v26  ;;  %v5411_v3 = vmax.f32 %v17195_v29, %v3610_v24  ;;  %vm19649_vm7 = vcmask 519424  }
 0x50d   : > { %7783 = vst.msk [vmem:[#allocation2 + $0x120] sm:$0xf] %vm19649_vm7, %v7712_v9  ;;  %v5415_v30 = vmax.f32 %v4663_v34, %v4777_v41  ;;  %v5660_v50 = vpack.c.bf16 %v5404_v62, %v5404_v62  ;;  %v5661_v44 = vpack.c.bf16 %v5405_v49, %v5405_v49  ;;  %v5662_v55 = vpack.c.bf16 %v5406_v6, %v5406_v6 }
 0x50e   : > { %v5416_v42 = vmax.f32 %v4664_v52, %v4905_v54  ;;  %v5417_v22 = vmax.f32 %v4665_v13, %v4778_v59  ;;  %v5418_v1 = vmax.f32 %v4666_v25, %v4906_v48  ;;  %v5659_v5 = vpack.c.bf16 %v5403_v47, %v5403_v47 }
 0x50f   : > { %v5663_v8 = vpack.c.bf16 %v5407_v56, %v5407_v56  ;;  %v5668_v2 = vpack.c.bf16 %v5412_v39, %v5412_v39  ;;  %v5669_v31 = vpack.c.bf16 %v5413_v4, %v5413_v4  ;;  %v5670_v19 = vpack.c.bf16 %v5414_v12, %v5414_v12 }
 0x510   : > { %v5664_v61 = vpack.c.bf16 %v5408_v17, %v5408_v17  ;;  %v5665_v27 = vpack.c.bf16 %v5409_v53, %v5409_v53  ;;  %v5666_v20 = vpack.c.bf16 %v5410_v15, %v5410_v15  ;;  %v5667_v14 = vpack.c.bf16 %v5411_v3, %v5411_v3 }
 0x511   : > { %v5671_v10 = vpack.c.bf16 %v5415_v30, %v5415_v30  ;;  %v6176_v29 = vunpack.c.l.b16 %v5660_v50  ;;  %v6177_v24 = vunpack.c.l.b16 %v5661_v44  ;;  %v6178_v51 = vunpack.c.l.b16 %v5662_v55 }
 0x512   : > { %v5672_v60 = vpack.c.bf16 %v5416_v42, %v5416_v42  ;;  %v5673_v41 = vpack.c.bf16 %v5417_v22, %v5417_v22  ;;  %v5674_v57 = vpack.c.bf16 %v5418_v1, %v5418_v1  ;;  %v6175_v16 = vunpack.c.l.b16 %v5659_v5 }
 0x513   : > { %v6179_v34 = vunpack.c.l.b16 %v5663_v8  ;;  %v6184_v59 = vunpack.c.l.b16 %v5668_v2  ;;  %v6185_v11 = vunpack.c.l.b16 %v5669_v31  ;;  %v6186_v7 = vunpack.c.l.b16 %v5670_v19 }
 0x514   : > { %v6180_v56 = vunpack.c.l.b16 %v5664_v61  ;;  %v6181_v52 = vunpack.c.l.b16 %v5665_v27  ;;  %v6182_v18 = vunpack.c.l.b16 %v5666_v20  ;;  %v6611_v26 = vrot.slane %v6176_v29, 7 }
 0x515   : > { %v6183_v17 = vunpack.c.l.b16 %v5667_v14  ;;  %v6187_v0 = vunpack.c.l.b16 %v5671_v10  ;;  %v6613_v13 = vrot.slane %v6177_v24, 6  ;;  %v6615_v3 = vrot.slane %v6178_v51, 5  ;;  %v8256_v14 = vpop.permute.xlu0 %8255 }
 0x516   : > { %v6188_v62 = vunpack.c.l.b16 %v5672_v60  ;;  %v6189_v49 = vunpack.c.l.b16 %v5673_v41  ;;  %vm19650_vm9 = vcmask 1041409   ;;  %v6625_v25 = vrot.slane %v6184_v59, 7 }
 0x517   : > { %v6612_v6 = vsel %vm19650_vm9, %v6611_v26, %v6175_v16  ;;  %vm19651_vm5 = vcmask 1042434   ;;  %v6617_v48 = vrot.slane %v6179_v34, 4  ;;  %v6627_v47 = vrot.slane %v6185_v11, 6  ;;  %vm19653_vm12 = vmmov %vm19650_vm9 }
 0x518   : > { %v6614_v54 = vsel %vm19651_vm5, %v6613_v13, %v6612_v6  ;;  %v6629_v39 = vrot.slane %v6186_v7, 5  ;;  %v6190_v4 = vunpack.c.l.b16 %v5674_v57  ;;  %vm19652_vm4 = vcmask 1043459   ;;  %vm19655_vm0 = vmmov %vm19651_vm5  ;;  %v8258_v59 = vpop.permute.xlu1 %8257 }
 0x519   : > { %v6616_v12 = vsel %vm19652_vm4, %v6615_v3, %v6614_v54  ;;  %v6619_v9 = vrot.slane %v6180_v56, 3  ;;  %v6626_v53 = vsel %vm19653_vm12, %v6625_v25, %v6183_v17  ;;  %vm19654_vm7 = vcmask 1044484   ;;  %vm19657_vm9 = vmmov %vm19652_vm4 }
 0x51a   : > { %v6618_v15 = vsel %vm19654_vm7, %v6617_v48, %v6616_v12  ;;  %v6621_v30 = vrot.slane %v6181_v52, 2  ;;  %v6628_v50 = vsel %vm19655_vm0, %v6627_v47, %v6626_v53  ;;  %v6631_v44 = vrot.slane %v6187_v0, 4  ;;  %vm19659_vm2 = vmmov %vm19654_vm7 }
 0x51b   : > { %vm19656_vm3 = vcmask 1045509   ;;  %v6630_v42 = vsel %vm19657_vm9, %v6629_v39, %v6628_v50  ;;  %v6633_v22 = vrot.slane %v6188_v62, 3  ;;  %v6936_v1 = vadd.s32 208, %v13098_v35 }
 0x51c   : > { %v6620_v55 = vsel %vm19656_vm3, %v6619_v9, %v6618_v15  ;;  %vm19658_vm5 = vcmask 1046534   ;;  %v6632_v8 = vsel %vm19659_vm2, %v6631_v44, %v6630_v42  ;;  %v6635_v2 = vrot.slane %v6189_v49, 2  ;;  %vm19660_vm4 = vmmov %vm19656_vm3  ;;  %v6790_v16 = vpop.f32.mrf.mxu2 }
 0x51d   : > { %v6622_v5 = vsel %vm19658_vm5, %v6621_v30, %v6620_v55  ;;  %v6623_v31 = vrot.slane %v6182_v18, 1  ;;  %v6634_v19 = vsel %vm19660_vm4, %v6633_v22, %v6632_v8  ;;  %v6637_v61 = vrot.slane %v6190_v4, 1  ;;  %vm19661_vm12 = vmmov %vm19658_vm5  ;;  %v7714_v56 = vpop.permute.xlu0 %7713 }
 0x51e   : > { %v7128_v27 = vand.u32 15, %v6936_v1  ;;  %v6636_v20 = vsel %vm19661_vm12, %v6635_v2, %v6634_v19  ;;  %vm19662_vm0 = vcmask 1047559   ;;  %vm19664_vm7 = vcmask 1044224  }
 0x51f   : > { %v6624_v10 = vsel %vm19662_vm0, %v6623_v31, %v6622_v5  ;;  %vm19663_vm3 = vmmov %vm19662_vm0  ;;  %8330 = vst.msk [vmem:[#allocation2 + $0x108] sm:$0xf] %vm19664_vm7, %v8256_v14  ;;  %v19665_v24 = vmov 0  ;;  %v6937_v41 = vadd.s32 216, %v13098_v35  ;;  %vm19668_vm2 = vcmask 261120  }
 0x520   : > { %v6638_v29 = vsel %vm19663_vm3, %v6637_v61, %v6636_v20  ;;  %vm17258_vm9 = vcmp.ge.s32.totalorder %v7128_v27, 1  ;;  %v6835_v34 = vmul.f32 %v17081_v63, %v6790_v16  ;;  %vm19669_vm5 = vcmask 257024   ;;  %vm19670_vm4 = vmmov %vm19664_vm7  ;;  %v8028_v54 = vpop.permute.xlu1 %8027 }
 0x521   : > { %v19666_v24 = vsel %vm17258_vm9, 4294967295, %v19665_v24  ;;  %v17262_v51 = vpack.c.b16 %v6638_v29, %v6624_v10  ;;  %v7534_v60 = vsel %vm17258_vm9, %v17130_v38, 0.0  ;;  %8331 = vst.msk [vmem:[#allocation2 + $0x114] sm:$0xf] %vm19670_vm4, %v8258_v59  ;;  %v7135_v7 = vand.u32 15, %v6937_v41 }
 0x522   : > { %v7565_v57 = vpack.c.bf16 %v7534_v60, %v7534_v60  ;;  %v6871_v11 = vadd.f32 %v17093_v37, %v6835_v34  ;;  %vm19671_vm12 = vcmask 519424   ;;  %v19672_v17 = vmov 0  ;;  %v17342_v60 = vpop.f32.mrf.mxu3 }
 0x523   : > { %19667 = vst [vmem:[#allocation105_spill] sm:$0xff] %v17262_v51  ;;  %11668 = vmatmul.msk.bf16.gmra.mxu2 %vm19668_vm2, %v17262_v51  ;;  %vm17275_vm0 = vcmp.le.s32.totalorder %v7135_v7, 14  ;;  %v19674_v62 = vrot.slane %v17105_v33, 1  ;;  %vm19675_vm3 = vcmask 1046528   ;;  %v19676_v6 = vrot.slane %v17105_v33, 7  ;;  %vm19678_vm2 = vmmov %vm19669_vm5 }
 0x524   : > { %7598 = vst.msk [vmem:[#allocation2 + $0x138] sm:$0xf] %vm19669_vm5, %v7565_v57  ;;  %v6903_v52 = vmax.f32 %v6871_v11, 0.0  ;;  %v19673_v17 = vsel %vm17275_vm0, 4294967295, %v19672_v17  ;;  %v6792_v13 = vpop.f32.mrf.mxu2  ;;  %vm19677_vm7 = vcmask 1040384   ;;  %vm19679_vm5 = vcmask 781824   ;;  %vm19680_vm4 = vmmov %vm19678_vm2 }
 0x525   : > { %7784 = vst.msk [vmem:[#allocation2 + $0x12c] sm:$0xf] %vm19671_vm12, %v7714_v56  ;;  %v6836_v3 = vmul.f32 %v17081_v63, %v6792_v13  ;;  %vm19681_vm12 = vmmov %vm19677_vm7  ;;  %v6938_v2 = vadd.s32 224, %v13098_v35  ;;  %v19685_v19 = vmov 0  ;;  %v6939_v11 = vadd.s32 232, %v13098_v35 }
 0x526   : > { %v7471_v18 = vrot.slane %v6903_v52, 7  ;;  %v7844_v26 = vrot.slane %v6903_v52, 1  ;;  %v17279_v0 = vpack.c.bf16 %v6903_v52, %v6903_v52  ;;  %v11803_v48 = vld [vmem:[#allocation2 + $0x108] sm:$0xf]  ;;  %8100 = vst.msk [vmem:[#allocation2 + $0x120] sm:$0xf] %vm19679_vm5, %v8028_v54  ;;  %vm19684_vm5 = vmmov %vm19678_vm2 }
 0x527   : > { %v6872_v9 = vadd.f32 %v17093_v37, %v6836_v3  ;;  %v7142_v31 = vand.u32 15, %v6938_v2 }
 0x528   : > { %v17285_v49 = vsel %vm19675_vm3, %v19674_v62, %v7844_v26  ;;  %v17290_v25 = vsel %vm19677_vm7, %v19676_v6, %v7471_v18  ;;  %v12173_v47 = vld [vmem:[#allocation2 + $0x110] sm:$0xf0]  ;;  %8368 = vst.msk [vmem:[#allocation2 + $0x13c] sm:$0xf] %vm19678_vm2, %v17279_v0  ;;  %vm19682_vm3 = vmmov %vm19678_vm2  ;;  %vm19683_vm7 = vcmask 1046528  }
 0x529   : > { %v7912_v39 = vsel %vm17275_vm0, %v17285_v49, 0.0  ;;  %v8973_v4 = vsel %vm16752_vm6, %v17285_v49, 0.0  ;;  %v8141_v33 = vsel %vm17258_vm9, %v17290_v25, 0.0  ;;  %v11804_v12 = vor.u32 %v12173_v47, %v11803_v48  ;;  %v19726_v6 = vld [vmem:[#allocation6_spill] sm:$0xff] }
 0x52a   : > { %v7943_v53 = vpack.c.bf16 %v7912_v39, %v7912_v39  ;;  %v9003_v15 = vpack.c.bf16 %v8973_v4, %v8973_v4  ;;  %v8173_v30 = vpack.c.bf16 %v8141_v33, %v8141_v33  ;;  %v6904_v50 = vmax.f32 %v6872_v9, 0.0  ;;  %v17348_v7 = vpop.f32.mrf.mxu3 }
 0x52b   : > { %9601 = vmatmul.bf16.gmra.mxu3 %v11804_v12 }
 0x52c   : > { %9033 = vst.msk [vmem:[#allocation2 + $0x11c] sm:$0xf] %vm19680_vm4, %v9003_v15  ;;  %8033 = vrot.lane.b32.xlu2 %v7943_v53, %s12278_s19  ;;  %8263 = vrot.lane.b32.xlu0 %v8173_v30, %s12279_s21  ;;  %v7473_v44 = vrot.slane %v6904_v50, 7  ;;  %v17308_v55 = vpack.c.bf16 %v6904_v50, %v6904_v50  ;;  %v7846_v42 = vrot.slane %v6904_v50, 1  ;;  %vm17331_vm4 = vcmp.ge.s32.totalorder %v7142_v31, 1 }
 0x52d   : > { %v19686_v19 = vsel %vm17331_vm4, 4294967295, %v19685_v19  ;;  %v7536_v61 = vsel %vm17331_vm4, %v17290_v25, 0.0 }
 0x52e   : > { %v7474_v22 = vsel %vm19681_vm12, %v7471_v18, %v7473_v44  ;;  %8369 = vst.msk [vmem:[#allocation2 + $0x148] sm:$0xf] %vm19682_vm3, %v17308_v55  ;;  %v7847_v1 = vsel %vm19683_vm7, %v7844_v26, %v7846_v42  ;;  %v7567_v27 = vpack.c.bf16 %v7536_v61, %v7536_v61  ;;  %vm19687_vm12 = vmmov %vm19678_vm2  ;;  %vm19688_vm3 = vcmask 781824  }
 0x52f   : > { %v17314_v5 = vpack.c.bf16 %v7474_v22, %v7474_v22  ;;  %v17316_v8 = vpack.c.bf16 %v7847_v1, %v7847_v1  ;;  %vm19689_vm7 = vcmask 519424   ;;  %v7149_v18 = vand.u32 15, %v6939_v11 }
 0x530   : > { %7600 = vst.msk [vmem:[#allocation2 + $0x150] sm:$0xf] %vm19687_vm12, %v7567_v27  ;;  %vm19692_vm9 = vmmov %vm19689_vm7  ;;  %v6940_v26 = vadd.s32 240, %v13098_v35 }
 0x531   : > { %8265 = vrot.lane.b32.xlu1 %v17314_v5, %s12279_s21  ;;  %7601 = vst.msk [vmem:[#allocation2 + $0x15c] sm:$0xf] %vm19678_vm2, %v17314_v5  ;;  %vm19690_vm2 = vcmask 1044224   ;;  %vm19693_vm12 = vmmov %vm19688_vm3 }
 0x532   : > { %9034 = vst.msk [vmem:[#allocation2 + $0x128] sm:$0xf] %vm19684_vm5, %v17316_v8  ;;  %vm19691_vm5 = vmmov %vm19690_vm2  ;;  %v7156_v3 = vand.u32 15, %v6940_v26 }
 0x534   : > { %7719 = vrot.lane.b32.xlu2 %v17279_v0, %s12277_s0  ;;  %7721 = vrot.lane.b32.xlu0 %v17308_v55, %s12277_s0 }
 0x539   : > { %8035 = vrot.lane.b32.xlu1 %v17316_v8, %s12278_s19 }
 0x54f   : > { %v8030_v20 = vpop.permute.xlu2 %8029 }
 0x550   : > { %8101 = vst.msk [vmem:[#allocation2 + $0x12c] sm:$0xf] %vm19688_vm3, %v8030_v20  ;;  %vm17359_vm3 = vcmp.ge.s32.totalorder %v7156_v3, 1 }
 0x557   : > { %v7716_v14 = vpop.permute.xlu2 %7715 }
 0x558   : > { %7785 = vst.msk [vmem:[#allocation2 + $0x138] sm:$0xf] %vm19689_vm7, %v7716_v14  ;;  %vm19698_vm7 = vcmask 1046528  }
 0x567   : > { %v8260_v10 = vpop.permute.xlu0 %8259 }
 0x568   : > { %8332 = vst.msk [vmem:[#allocation2 + $0x120] sm:$0xf] %vm19690_vm2, %v8260_v10  ;;  %v8262_v29 = vpop.permute.xlu1 %8261  ;;  %vm19699_vm2 = vcmask 1040384  }
 0x569   : > { %8333 = vst.msk [vmem:[#allocation2 + $0x12c] sm:$0xf] %vm19691_vm5, %v8262_v29  ;;  %vm19700_vm5 = vcmask 257024  }
 0x56f   : > { %v7718_v41 = vpop.permute.xlu0 %7717  ;;  %v11815_v16 = vld [vmem:[#allocation2 + $0x120] sm:$0xf] }
 0x570   : > { %7786 = vst.msk [vmem:[#allocation2 + $0x144] sm:$0xf] %vm19692_vm9, %v7718_v41  ;;  %v8032_v57 = vpop.permute.xlu1 %8031  ;;  %v12176_v34 = vld [vmem:[#allocation2 + $0x128] sm:$0xf0]  ;;  %vm17353_vm9 = vcmp.le.s32.totalorder %v7149_v18, 14 }
 0x571   : > { %8102 = vst.msk [vmem:[#allocation2 + $0x138] sm:$0xf] %vm19693_vm12, %v8032_v57  ;;  %v11816_v59 = vor.u32 %v12176_v34, %v11815_v16  ;;  %vm19701_vm12 = vmmov %vm19700_vm5 }
 0x572   : > { %v6795_v56 = vpop.f32.mrf.mxu2 }
 0x573   : > { %9606 = vmatmul.bf16.gmra.mxu3 %v11816_v59  ;;  %v6837_v52 = vmul.f32 %v17081_v63, %v6795_v56  ;;  %v6941_v59 = vadd.s32 248, %v13098_v35 }
 0x575   : > { %v6873_v13 = vadd.f32 %v17093_v37, %v6837_v52  ;;  %v7163_v18 = vand.u32 15, %v6941_v59 }
 0x577   : > { %v6905_v62 = vmax.f32 %v6873_v13, 0.0  ;;  %v17417_v13 = vpop.f32.mrf.mxu3 }
 0x579   : > { %v7475_v54 = vrot.slane %v6905_v62, 7  ;;  %v7848_v48 = vrot.slane %v6905_v62, 1  ;;  %v17357_v47 = vpack.c.bf16 %v6905_v62, %v6905_v62 }
 0x57a   : > { %v6797_v4 = vpop.f32.mrf.mxu2 }
 0x57b   : > { %v6838_v33 = vmul.f32 %v17081_v63, %v6797_v4  ;;  %v17365_v12 = vsel %vm19698_vm7, %v7846_v42, %v7848_v48  ;;  %v17368_v9 = vsel %vm19699_vm2, %v7473_v44, %v7475_v54  ;;  %8370 = vst.msk [vmem:[#allocation2 + $0x154] sm:$0xf] %vm19700_vm5, %v17357_v47  ;;  %vm19702_vm7 = vmmov %vm19700_vm5  ;;  %v19743_v4 = vld [vmem:[#allocation42_spill] sm:$0xff] }
 0x57c   : > { %v7914_v53 = vsel %vm17353_vm9, %v17365_v12, 0.0  ;;  %v8975_v15 = vsel %vm17109_vm8, %v17365_v12, 0.0  ;;  %v8143_v30 = vsel %vm17331_vm4, %v17368_v9, 0.0  ;;  %v7538_v50 = vsel %vm17359_vm3, %v17368_v9, 0.0 }
 0x57d   : > { %v6874_v44 = vadd.f32 %v17093_v37, %v6838_v33  ;;  %v7945_v42 = vpack.c.bf16 %v7914_v53, %v7914_v53  ;;  %v9005_v22 = vpack.c.bf16 %v8975_v15, %v8975_v15  ;;  %v8175_v1 = vpack.c.bf16 %v8143_v30, %v8143_v30 }
 0x57e   : > { %v7569_v2 = vpack.c.bf16 %v7538_v50, %v7538_v50  ;;  %vm19703_vm4 = vcmask 1046528  }
 0x57f   : > { %v6906_v31 = vmax.f32 %v6874_v44, 0.0  ;;  %9035 = vst.msk [vmem:[#allocation2 + $0x134] sm:$0xf] %vm19701_vm12, %v9005_v22  ;;  %8037 = vrot.lane.b32.xlu2 %v7945_v42, %s12278_s19  ;;  %8267 = vrot.lane.b32.xlu0 %v8175_v1, %s12279_s21  ;;  %vm19704_vm12 = vcmask 781824  }
 0x580   : > { %7602 = vst.msk [vmem:[#allocation2 + $0x168] sm:$0xf] %vm19702_vm7, %v7569_v2  ;;  %vm19705_vm7 = vmmov %vm19700_vm5 }
 0x581   : > { %v7477_v61 = vrot.slane %v6906_v31, 7  ;;  %v17389_v27 = vpack.c.bf16 %v6906_v31, %v6906_v31  ;;  %v7850_v20 = vrot.slane %v6906_v31, 1 }
 0x583   : > { %v7478_v10 = vsel %vm19699_vm2, %v7475_v54, %v7477_v61  ;;  %8371 = vst.msk [vmem:[#allocation2 + $0x160] sm:$0xf] %vm19700_vm5, %v17389_v27  ;;  %v7851_v29 = vsel %vm19703_vm4, %v7848_v48, %v7850_v20  ;;  %vm19706_vm4 = vmmov %vm19700_vm5  ;;  %vm19707_vm2 = vcmask 519424   ;;  %vm19708_vm5 = vcmask 1044224  }
 0x584   : > { %v17395_v41 = vpack.c.bf16 %v7478_v10, %v7478_v10  ;;  %v17397_v57 = vpack.c.bf16 %v7851_v29, %v7851_v29 }
 0x586   : > { %v8034_v14 = vpop.permute.xlu2 %8033  ;;  %8269 = vrot.lane.b32.xlu1 %v17395_v41, %s12279_s21  ;;  %7603 = vst.msk [vmem:[#allocation2 + $0x174] sm:$0xf] %vm19705_vm7, %v17395_v41  ;;  %vm19710_vm7 = vmmov %vm19707_vm2 }
 0x587   : > { %8103 = vst.msk [vmem:[#allocation2 + $0x144] sm:$0xf] %vm19704_vm12, %v8034_v14  ;;  %7723 = vrot.lane.b32.xlu2 %v17357_v47, %s12277_s0  ;;  %7725 = vrot.lane.b32.xlu0 %v17389_v27, %s12277_s0  ;;  %vm19709_vm12 = vmmov %vm19708_vm5 }
 0x588   : > { %9036 = vst.msk [vmem:[#allocation2 + $0x140] sm:$0xf] %vm19706_vm4, %v17397_v57  ;;  %vm17421_vm4 = vcmp.le.s32.totalorder %v7163_v18, 14 }
 0x58e   : > { %v7720_v16 = vpop.permute.xlu2 %7719  ;;  %8039 = vrot.lane.b32.xlu1 %v17397_v57, %s12278_s19 }
 0x58f   : > { %7787 = vst.msk [vmem:[#allocation2 + $0x150] sm:$0xf] %vm19707_vm2, %v7720_v16  ;;  %vm19713_vm2 = vcmask 1040384   ;;  %v17449_v16 = vpop.f32.mrf.mxu3 }
 0x59e   : > { %v8264_v34 = vpop.permute.xlu0 %8263 }
 0x59f   : > { %8334 = vst.msk [vmem:[#allocation2 + $0x138] sm:$0xf] %vm19708_vm5, %v8264_v34  ;;  %vm19714_vm5 = vcmask 1046528  }
 0x5a3   : > { %v8266_v26 = vpop.permute.xlu1 %8265 }
 0x5a4   : > { %8335 = vst.msk [vmem:[#allocation2 + $0x144] sm:$0xf] %vm19709_vm12, %v8266_v26  ;;  %vm19715_vm12 = vcmask 257024  }
 0x5a6   : > { %v6800_v11 = vpop.f32.mrf.mxu2  ;;  %v7722_v3 = vpop.permute.xlu0 %7721  ;;  %v11827_v31 = vld [vmem:[#allocation2 + $0x138] sm:$0xf] }
 0x5a7   : > { %v6839_v56 = vmul.f32 %v17081_v63, %v6800_v11  ;;  %7788 = vst.msk [vmem:[#allocation2 + $0x15c] sm:$0xf] %vm19710_vm7, %v7722_v3  ;;  %vm19716_vm7 = vcmask 781824   ;;  %v19718_v11 = vld [vmem:[#allocation16_spill] sm:$0xff] }
 0x5a9   : > { %v6875_v52 = vadd.f32 %v17093_v37, %v6839_v56  ;;  %v17504_v56 = vpop.f32.mrf.mxu3 }
 0x5ab   : > { %v6907_v62 = vmax.f32 %v6875_v52, 0.0  ;;  %v8036_v2 = vpop.permute.xlu1 %8035  ;;  %v8380_v52 = vsel %vm13161_vm13, %v19718_v11, 0.0 }
 0x5ac   : > { %8104 = vst.msk [vmem:[#allocation2 + $0x150] sm:$0xf] %vm19716_vm7, %v8036_v2  ;;  %v19731_v2 = vld [vmem:[#allocation31_spill] sm:$0xff] }
 0x5ad   : > { %v7852_v54 = vrot.slane %v6907_v62, 1  ;;  %v8109_v48 = vrot.slane %v6907_v62, 7  ;;  %v17425_v35 = vpack.c.bf16 %v6907_v62, %v6907_v62 }
 0x5ae   : > { %v6802_v33 = vpop.f32.mrf.mxu2 }
 0x5af   : > { %v6840_v53 = vmul.f32 %v17081_v63, %v6802_v33  ;;  %v17429_v15 = vsel %vm19713_vm2, %v7477_v61, %v8109_v48  ;;  %v7853_v30 = vsel %vm19714_vm5, %v7850_v20, %v7852_v54  ;;  %8372 = vst.msk [vmem:[#allocation2 + $0x16c] sm:$0xf] %vm19715_vm12, %v17425_v35  ;;  %v12179_v61 = vld [vmem:[#allocation2 + $0x140] sm:$0xf0]  ;;  %vm19717_vm2 = vmmov %vm19715_vm12  ;;  %vm19720_vm12 = vcmask 1040384  }
 0x5b0   : > { %v8145_v50 = vsel %vm17359_vm3, %v17429_v15, 0.0  ;;  %v7916_v44 = vsel %vm17421_vm4, %v7853_v30, 0.0  ;;  %v8977_v42 = vsel %vm17275_vm0, %v7853_v30, 0.0  ;;  %v11828_v14 = vor.u32 %v12179_v61, %v11827_v31  ;;  %vm19721_vm7 = vmmov %vm19717_vm2  ;;  %v19746_v31 = vld [vmem:[#allocation39_spill] sm:$0xff] }
 0x5b1   : > { %v6876_v63 = vadd.f32 %v17093_v37, %v6840_v53  ;;  %v8177_v22 = vpack.c.bf16 %v8145_v50, %v8145_v50  ;;  %v7947_v1 = vpack.c.bf16 %v7916_v44, %v7916_v44  ;;  %v9007_v20 = vpack.c.bf16 %v8977_v42, %v8977_v42  ;;  %vm19722_vm0 = vmmov %vm19714_vm5 }
 0x5b2   : > { %v17445_v10 = vsel %vm17353_vm9, %v7853_v30, 0.0  ;;  %9611 = vmatmul.bf16.gmra.mxu3 %v11828_v14  ;;  %vm19723_vm8 = vmmov %vm19720_vm12  ;;  %v8382_v61 = vsel %vm13468_vm1, %v19731_v2, 0.0  ;;  %v19733_v14 = vld [vmem:[#allocation24_spill] sm:$0xff] }
 0x5b3   : > { %v6908_v29 = vmax.f32 %v6876_v63, 0.0  ;;  %8271 = vrot.lane.b32.xlu0 %v8177_v22, %s12279_s21  ;;  %8041 = vrot.lane.b32.xlu2 %v7947_v1, %s12278_s19  ;;  %9037 = vst.msk [vmem:[#allocation2 + $0x14c] sm:$0xf] %vm19717_vm2, %v9007_v20  ;;  %vm19724_vm13 = vmmov %vm19717_vm2  ;;  %v19729_v22 = vld [vmem:[#allocation21_spill] sm:$0xff]  ;;  %v19730_v1 = vld [vmem:[#allocation14_spill] sm:$0xff]  ;;  %v8414_v20 = vpack.c.bf16 %v8382_v61, %v8382_v61 }
 0x5b4   : > { %v19747_v61 = vld [vmem:[#allocation45_spill] sm:$0xff] }
 0x5b5   : > { %v8374_v37 = vrot.slane %v6908_v29, 1  ;;  %v8111_v34 = vrot.slane %v6908_v29, 7  ;;  %v17452_v59 = vpack.c.bf16 %v6908_v29, %v6908_v29  ;;  %v19734_v29 = vld [vmem:[#allocation25_spill] sm:$0xff] }
 0x5b7   : > { %v8378_v18 = vsel %vm19714_vm5, %v8374_v37, 0.0  ;;  %v8112_v26 = vsel %vm19720_vm12, %v8109_v48, %v8111_v34  ;;  %8373 = vst.msk [vmem:[#allocation2 + $0x178] sm:$0xf] %vm19721_vm7, %v17452_v59  ;;  %v8375_v3 = vsel %vm19722_vm0, %v7852_v54, %v8374_v37  ;;  %v8604_v62 = vsel %vm19723_vm8, %v8111_v34, 0.0  ;;  %vm19725_vm8 = vmmov %vm19717_vm2  ;;  %v19727_v54 = vld [vmem:[#allocation22_spill] sm:$0xff]  ;;  %v19735_v37 = vld [vmem:[#allocation32_spill] sm:$0xff] }
 0x5b8   : > { %v17465_v33 = vsel %vm17421_vm4, %v8378_v18, 0.0  ;;  %v8979_v53 = vsel %vm17353_vm9, %v8378_v18, 0.0  ;;  %v17469_v30 = vpack.c.bf16 %v8112_v26, %v8112_v26  ;;  %v17471_v50 = vpack.c.bf16 %v8375_v3, %v8375_v3  ;;  %v19737_v18 = vld [vmem:[#allocation29_spill] sm:$0xff]  ;;  %v19738_v26 = vld [vmem:[#allocation35_spill] sm:$0xff]  ;;  %v19739_v3 = vld [vmem:[#allocation40_spill] sm:$0xff] }
 0x5b9   : > { %v9009_v44 = vpack.c.bf16 %v8979_v53, %v8979_v53  ;;  %v8412_v48 = vpack.c.bf16 %v8380_v52, %v8380_v52  ;;  %v17475_v42 = vsel %vm17359_vm3, %v8604_v62, 0.0  ;;  %v8605_v63 = vsel %vm13199_vm14, %v19727_v54, 0.0  ;;  %v19742_v54 = vld [vmem:[#allocation36_spill] sm:$0xff] }
 0x5ba   : > { %8273 = vrot.lane.b32.xlu1 %v17469_v30, %s12279_s21  ;;  %9038 = vst.msk [vmem:[#allocation2 + $0x158] sm:$0xf] %vm19724_vm13, %v17471_v50  ;;  %v8636_v39 = vpack.c.bf16 %v8605_v63, %v8605_v63  ;;  %v8607_v11 = vsel %vm13392_vm15, %v19735_v37, 0.0  ;;  %v8384_v53 = vsel %vm13819_vm11, %v19739_v3, 0.0  ;;  %vm19745_vm11 = vcmask 781824   ;;  %v19755_v3 = vld [vmem:[#allocation38_spill] sm:$0xff] }
 0x5bb   : > { %9039 = vst.msk [vmem:[#allocation2 + $0x164] sm:$0xf] %vm19725_vm8, %v9009_v44  ;;  %8477 = vrot.lane.b32.xlu0 %v8412_v48, %s12277_s0  ;;  %8475 = vrot.lane.b32.xlu2 %v19726_v6, %s12277_s0  ;;  %v8638_v52 = vpack.c.bf16 %v8607_v11, %v8607_v11  ;;  %v8416_v44 = vpack.c.bf16 %v8384_v53, %v8384_v53  ;;  %v17514_v48 = vpop.f32.mrf.mxu3  ;;  %v19741_v6 = vld [vmem:[#allocation34_spill] sm:$0xff]  ;;  %v19752_v11 = vld [vmem:[#allocation44_spill] sm:$0xff]  ;;  %vm19756_vm15 = vnez %v19755_v3  ;;  %vm19762_vm0 = vcmask 1044224   ;;  %vm19775_vm5 = vmmov %vm19745_vm11 }
 0x5bc   : > { %v19760_v63 = vld [vmem:[#allocation48_spill] sm:$0xff]  ;;  %vm19768_vm3 = vmmov %vm19762_vm0 }
 0x5bd   : > { %vm19761_vm1 = vnez %v19760_v63  ;;  %v19771_v3 = vld [vmem:[#allocation64_spill] sm:$0xff]  ;;  %v12204_v63 = vld [vmem:[%s18558_s7 + $0x88] sm:$0xff]  ;;  %vm19781_vm7 = vmmov %vm19775_vm5 }
 0x5be   : > { %9722 = vmatpush.bf16.msrb.mxu3 %v12204_v63  ;;  %v12199_v63 = vld [vmem:[%s18558_s7 + $0x60] sm:$0xff] }
 0x5c2   : > { %8698 = vrot.lane.b32.xlu1 %v8636_v39, %s12278_s19  ;;  %v8609_v39 = vsel %vm13834_vm10, %v19743_v4, 0.0  ;;  %vm19751_vm10 = vcmask 519424   ;;  %v19759_v4 = vld [vmem:[#allocation51_spill] sm:$0xff] }
 0x5c3   : > { %8825 = vrot.lane.b32.xlu0 %v19729_v22, %s12279_s21  ;;  %8700 = vrot.lane.b32.xlu2 %v19730_v1, %s12278_s19  ;;  %v8640_v22 = vpack.c.bf16 %v8609_v39, %v8609_v39  ;;  %v17524_v2 = vpop.f32.mrf.mxu3  ;;  %v8388_v39 = vsel %vm19761_vm1, %v19759_v4, 0.0  ;;  %vm19769_vm4 = vmmov %vm19751_vm10  ;;  %v12202_v4 = vld [vmem:[%s18558_s7 + $0x78] sm:$0xff] }
 0x5c4   : > { %9627 = vmatpush.bf16.msra.mxu2 %v12202_v4  ;;  %v19783_v4 = vld [vmem:[#allocation74_spill] sm:$0xff]  ;;  %vm19784_vm13 = vmmov %vm19769_vm4 }
 0x5c5   : > { %vm19802_vm1 = vmmov %vm19762_vm0 }
 0x5ca   : > { %8827 = vrot.lane.b32.xlu1 %v19733_v14, %s12279_s21  ;;  %v19749_v14 = vld [vmem:[#allocation12_spill] sm:$0xff] }
 0x5cb   : > { %8481 = vrot.lane.b32.xlu0 %v8414_v20, %s12277_s0  ;;  %8479 = vrot.lane.b32.xlu2 %v19734_v29, %s12277_s0  ;;  %v19748_v20 = vld [vmem:[#allocation49_spill] sm:$0xff]  ;;  %vm19750_vm14 = vnez %v19749_v14  ;;  %v19766_v14 = vld [vmem:[#allocation27_spill] sm:$0xff] }
 0x5cc   : > { %v8386_v29 = vsel %vm19750_vm14, %v19748_v20, 0.0  ;;  %v19765_v20 = vld [vmem:[#allocation61_spill] sm:$0xff]  ;;  %vm19767_vm9 = vnez %v19766_v14  ;;  %v19777_v14 = vld [vmem:[#allocation66_spill] sm:$0xff]  ;;  %vm19795_vm14 = vmmov %vm19762_vm0 }
 0x5cd   : > { %v8418_v34 = vpack.c.bf16 %v8386_v29, %v8386_v29  ;;  %v8613_v29 = vsel %vm19767_vm9, %v19765_v20, 0.0  ;;  %v19776_v20 = vld [vmem:[#allocation63_spill] sm:$0xff]  ;;  %vm19806_vm9 = vmmov %vm19769_vm4 }
 0x5d2   : > { %8702 = vrot.lane.b32.xlu1 %v8638_v52, %s12278_s19  ;;  %v19753_v52 = vld [vmem:[#allocation47_spill] sm:$0xff] }
 0x5d3   : > { %8829 = vrot.lane.b32.xlu0 %v19737_v18, %s12279_s21  ;;  %8704 = vrot.lane.b32.xlu2 %v19738_v26, %s12278_s19  ;;  %v17541_v18 = vpop.f32.mrf.mxu3  ;;  %v19754_v26 = vld [vmem:[#allocation50_spill] sm:$0xff] }
 0x5d4   : > { %v8611_v62 = vsel %vm19756_vm15, %v19754_v26, 0.0  ;;  %v19770_v26 = vld [vmem:[#allocation60_spill] sm:$0xff]  ;;  %vm19799_vm15 = vmmov %vm19769_vm4 }
 0x5d5   : > { %v8642_v53 = vpack.c.bf16 %v8611_v62, %v8611_v62 }
 0x5d9   : > { %v8038_v1 = vpop.permute.xlu2 %8037 }
 0x5da   : > { %8831 = vrot.lane.b32.xlu1 %v19741_v6, %s12279_s21  ;;  %8105 = vst.msk [vmem:[#allocation2 + $0x15c] sm:$0xf] %vm19745_vm11, %v8038_v1  ;;  %v19758_v6 = vld [vmem:[#allocation41_spill] sm:$0xff]  ;;  %v8420_v1 = vpack.c.bf16 %v8388_v39, %v8388_v39 }
 0x5db   : > { %8485 = vrot.lane.b32.xlu0 %v8416_v44, %s12277_s0  ;;  %8483 = vrot.lane.b32.xlu2 %v19742_v54, %s12277_s0  ;;  %v19757_v44 = vld [vmem:[#allocation53_spill] sm:$0xff]  ;;  %v17551_v54 = vpop.f32.mrf.mxu3 }
 0x5e1   : > { %v7724_v37 = vpop.permute.xlu2 %7723 }
 0x5e2   : > { %8706 = vrot.lane.b32.xlu1 %v8640_v22, %s12278_s19  ;;  %7789 = vst.msk [vmem:[#allocation2 + $0x168] sm:$0xf] %vm19751_vm10, %v7724_v37 }
 0x5e3   : > { %8833 = vrot.lane.b32.xlu0 %v19746_v31, %s12279_s21  ;;  %8708 = vrot.lane.b32.xlu2 %v19747_v61, %s12278_s19  ;;  %v19763_v31 = vld [vmem:[#allocation54_spill] sm:$0xff]  ;;  %v19764_v61 = vld [vmem:[#allocation55_spill] sm:$0xff]  ;;  %v17565_v37 = vpop.f32.mrf.mxu3 }
 0x5ea   : > { %8835 = vrot.lane.b32.xlu1 %v19752_v11, %s12279_s21  ;;  %v8644_v11 = vpack.c.bf16 %v8613_v29, %v8613_v29  ;;  %v12201_v29 = vld [vmem:[%s18558_s7 + $0x70] sm:$0xff] }
 0x5eb   : > { %8489 = vrot.lane.b32.xlu0 %v8418_v34, %s12277_s0  ;;  %8487 = vrot.lane.b32.xlu2 %v19753_v52, %s12277_s0  ;;  %v17574_v62 = vpop.f32.mrf.mxu3 }
 0x5ec   : > { %9628 = vmatpush.bf16.msra.mxu2 %v12201_v29  ;;  %v19788_v29 = vld [vmem:[#allocation73_spill] sm:$0xff] }
 0x5f1   : > { %v8268_v22 = vpop.permute.xlu0 %8267 }
 0x5f2   : > { %8710 = vrot.lane.b32.xlu1 %v8642_v53, %s12278_s19  ;;  %8336 = vst.msk [vmem:[#allocation2 + $0x150] sm:$0xf] %vm19762_vm0, %v8268_v22  ;;  %v19772_v53 = vld [vmem:[#allocation70_spill] sm:$0xff] }
 0x5f3   : > { %8837 = vrot.lane.b32.xlu0 %v19757_v44, %s12279_s21  ;;  %8712 = vrot.lane.b32.xlu2 %v19758_v6, %s12278_s19  ;;  %v19773_v44 = vld [vmem:[#allocation58_spill] sm:$0xff] }
 0x5f4   : > { %vm19774_vm2 = vnez %v19773_v44 }
 0x5f5   : > { %v8390_v6 = vsel %vm19774_vm2, %v19772_v53, 0.0  ;;  %v17601_v53 = vpop.f32.mrf.mxu3  ;;  %vm19811_vm2 = vmmov %vm19802_vm1 }
 0x5f8   : > { %v8270_v34 = vpop.permute.xlu1 %8269 }
 0x5f9   : > { %8337 = vst.msk [vmem:[#allocation2 + $0x15c] sm:$0xf] %vm19768_vm3, %v8270_v34  ;;  %v7726_v52 = vpop.permute.xlu0 %7725  ;;  %v11839_v22 = vld [vmem:[#allocation2 + $0x150] sm:$0xf]  ;;  %vm19807_vm3 = vmmov %vm19775_vm5 }
 0x5fa   : > { %8839 = vrot.lane.b32.xlu1 %v19763_v31, %s12279_s21  ;;  %7790 = vst.msk [vmem:[#allocation2 + $0x174] sm:$0xf] %vm19769_vm4, %v7726_v52  ;;  %v19779_v52 = vld [vmem:[#allocation57_spill] sm:$0xff]  ;;  %vm19810_vm4 = vmmov %vm19807_vm3 }
 0x5fb   : > { %8493 = vrot.lane.b32.xlu0 %v8420_v1, %s12277_s0  ;;  %8491 = vrot.lane.b32.xlu2 %v19764_v61, %s12277_s0  ;;  %v8422_v61 = vpack.c.bf16 %v8390_v6, %v8390_v6  ;;  %vm19780_vm12 = vnez %v19779_v52  ;;  %v19782_v6 = vld [vmem:[#allocation68_spill] sm:$0xff] }
 0x600   : > { %v8040_v39 = vpop.permute.xlu1 %8039  ;;  %v12182_v1 = vld [vmem:[#allocation2 + $0x158] sm:$0xf0] }
 0x601   : > { %8106 = vst.msk [vmem:[#allocation2 + $0x168] sm:$0xf] %vm19775_vm5, %v8040_v39  ;;  %v11840_v31 = vor.u32 %v12182_v1, %v11839_v22  ;;  %v19785_v22 = vld [vmem:[#allocation46_spill] sm:$0xff]  ;;  %v19786_v1 = vld [vmem:[#allocation67_spill] sm:$0xff] }
 0x602   : > { %8714 = vrot.lane.b32.xlu1 %v8644_v11, %s12278_s19  ;;  %v19778_v11 = vld [vmem:[#allocation71_spill] sm:$0xff]  ;;  %vm19787_vm8 = vnez %v19786_v1  ;;  %v12195_v1 = vld [vmem:[%s18558_s7 + $0x40] sm:$0xff] }
 0x603   : > { %8841 = vrot.lane.b32.xlu0 %v19770_v26, %s12279_s21  ;;  %8716 = vrot.lane.b32.xlu2 %v19771_v3, %s12278_s19  ;;  %v8615_v26 = vsel %vm19780_vm12, %v19778_v11, 0.0  ;;  %v12200_v3 = vld [vmem:[%s18558_s7 + $0x68] sm:$0xff]  ;;  %v12197_v11 = vld [vmem:[%s18558_s7 + $0x50] sm:$0xff]  ;;  %vm19815_vm12 = vmmov %vm19806_vm9 }
 0x604   : > { %9616 = vmatmul.bf16.gmra.mxu3 %v11840_v31  ;;  %v8646_v44 = vpack.c.bf16 %v8615_v26, %v8615_v26  ;;  %9629 = vmatpush.bf16.msra.mxu2 %v12200_v3  ;;  %v8392_v31 = vsel %vm19787_vm8, %v19785_v22, 0.0  ;;  %v19790_v26 = vld [vmem:[#allocation37_spill] sm:$0xff]  ;;  %v19791_v3 = vld [vmem:[#allocation43_spill] sm:$0xff]  ;;  %vm19823_vm8 = vmmov %vm19806_vm9 }
 0x605   : > { %vm19792_vm11 = vnez %v19791_v3  ;;  %v19794_v22 = vld [vmem:[#allocation83_spill] sm:$0xff] }
 0x608   : > { %9630 = vmatpush.bf16.msra.mxu2 %v12199_v63 }
 0x60a   : > { %8843 = vrot.lane.b32.xlu1 %v19776_v20, %s12279_s21  ;;  %v17618_v20 = vpop.f32.mrf.mxu3 }
 0x60b   : > { %8497 = vrot.lane.b32.xlu0 %v8422_v61, %s12277_s0  ;;  %8495 = vrot.lane.b32.xlu2 %v19777_v14, %s12277_s0  ;;  %v12198_v61 = vld [vmem:[%s18558_s7 + $0x58] sm:$0xff]  ;;  %v8424_v14 = vpack.c.bf16 %v8392_v31, %v8392_v31  ;;  %v12203_v31 = vld [vmem:[%s18558_s7 + $0x80] sm:$0xff] }
 0x60c   : > { %9631 = vmatpush.bf16.msra.mxu2 %v12198_v61  ;;  %9723 = vmatpush.bf16.msrb.mxu3 %v12203_v31  ;;  %v19804_v31 = vld [vmem:[#allocation77_spill] sm:$0xff] }
 0x60d   : > { %v8042_v34 = vpop.permute.xlu2 %8041  ;;  %vm19805_vm0 = vnez %v19804_v31  ;;  %v19813_v31 = vld [vmem:[#allocation87_spill] sm:$0xff] }
 0x60e   : > { %8107 = vst.msk [vmem:[#allocation2 + $0x174] sm:$0xf] %vm19781_vm7, %v8042_v34  ;;  %v19789_v34 = vld [vmem:[#allocation76_spill] sm:$0xff]  ;;  %vm19814_vm5 = vnez %v19813_v31  ;;  %vm19819_vm7 = vmmov %vm19802_vm1  ;;  %v19821_v31 = vld [vmem:[#allocation75_spill] sm:$0xff] }
 0x610   : > { %9632 = vmatpush.bf16.msra.mxu2 %v12197_v11 }
 0x612   : > { %8718 = vrot.lane.b32.xlu1 %v8646_v44, %s12278_s19  ;;  %v8617_v44 = vsel %vm19792_vm11, %v19790_v26, 0.0  ;;  %v17634_v63 = vpop.f32.mrf.mxu3  ;;  %vm19824_vm11 = vmmov %vm19807_vm3 }
 0x613   : > { %8845 = vrot.lane.b32.xlu0 %v19782_v6, %s12279_s21  ;;  %8720 = vrot.lane.b32.xlu2 %v19783_v4, %s12278_s19  ;;  %v12196_v6 = vld [vmem:[%s18558_s7 + $0x48] sm:$0xff]  ;;  %v8648_v4 = vpack.c.bf16 %v8617_v44, %v8617_v44 }
 0x614   : > { %9633 = vmatpush.bf16.msra.mxu2 %v12196_v6  ;;  %v19800_v44 = vld [vmem:[#allocation81_spill] sm:$0xff]  ;;  %v19801_v6 = vld [vmem:[#allocation84_spill] sm:$0xff] }
 0x615   : > { %v8476_v39 = vpop.permute.xlu2 %8475 }
 0x616   : > { %8571 = vst.msk [vmem:[#allocation2 + $0x4] sm:$0xf] %vm19784_vm13, %v8476_v39  ;;  %v19793_v39 = vld [vmem:[#allocation79_spill] sm:$0xff]  ;;  %vm19822_vm13 = vnez %v19821_v31 }
 0x618   : > { %9634 = vmatpush.bf16.msra.mxu2 %v12195_v1  ;;  %v19803_v1 = vld [vmem:[#allocation62_spill] sm:$0xff] }
 0x61a   : > { %8847 = vrot.lane.b32.xlu1 %v19788_v29, %s12279_s21  ;;  %v19796_v29 = vld [vmem:[#allocation80_spill] sm:$0xff]  ;;  %v17652_v3 = vpop.f32.mrf.mxu3 }
 0x61b   : > { %8501 = vrot.lane.b32.xlu0 %v8424_v14, %s12277_s0  ;;  %8499 = vrot.lane.b32.xlu2 %v19789_v34, %s12277_s0  ;;  %v19797_v34 = vld [vmem:[#allocation59_spill] sm:$0xff] }
 0x61c   : > { %vm19798_vm10 = vnez %v19797_v34 }
 0x61d   : > { %v8701_v52 = vpop.permute.xlu2 %8700  ;;  %v8394_v11 = vsel %vm19798_vm10, %v19796_v29, 0.0  ;;  %v19808_v29 = vld [vmem:[#allocation86_spill] sm:$0xff]  ;;  %vm19828_vm10 = vmmov %vm19802_vm1 }
 0x61e   : > { %v8426_v26 = vpack.c.bf16 %v8394_v11, %v8394_v11  ;;  %v19809_v11 = vld [vmem:[#allocation90_spill] sm:$0xff] }
 0x622   : > { %8722 = vrot.lane.b32.xlu1 %v8648_v4, %s12278_s19  ;;  %v17668_v34 = vpop.f32.mrf.mxu3 }
 0x623   : > { %8849 = vrot.lane.b32.xlu0 %v19793_v39, %s12279_s21  ;;  %8724 = vrot.lane.b32.xlu2 %v19794_v22, %s12278_s19 }
 0x625   : > { %v8272_v61 = vpop.permute.xlu0 %8271  ;;  %v8480_v14 = vpop.permute.xlu2 %8479 }
 0x626   : > { %8338 = vst.msk [vmem:[#allocation2 + $0x168] sm:$0xf] %vm19795_vm14, %v8272_v61  ;;  %v8619_v61 = vsel %vm19805_vm0, %v19803_v1, 0.0  ;;  %vm19827_vm14 = vmmov %vm19807_vm3  ;;  %vm19832_vm0 = vcmask 261120  }
 0x627   : > { %8573 = vst.msk [vmem:[#allocation2 + $0x1c] sm:$0xf] %vm19799_vm15, %v8480_v14  ;;  %v8650_v14 = vpack.c.bf16 %v8619_v61, %v8619_v61  ;;  %vm19830_vm15 = vnez %v19544_v23 }
 0x62a   : > { %8851 = vrot.lane.b32.xlu1 %v19800_v44, %s12279_s21 }
 0x62b   : > { %8505 = vrot.lane.b32.xlu0 %v8426_v26, %s12277_s0  ;;  %8503 = vrot.lane.b32.xlu2 %v19801_v6, %s12277_s0 }
 0x62c   : > { %v8274_v4 = vpop.permute.xlu1 %8273 }
 0x62d   : > { %8339 = vst.msk [vmem:[#allocation2 + $0x174] sm:$0xf] %vm19802_vm1, %v8274_v4  ;;  %v8478_v39 = vpop.permute.xlu0 %8477  ;;  %v8705_v22 = vpop.permute.xlu2 %8704  ;;  %v11851_v44 = vld [vmem:[#allocation2 + $0x168] sm:$0xf]  ;;  %vm19831_vm1 = vmmov %vm19823_vm8 }
 0x62e   : > { %8572 = vst.msk [vmem:[#allocation2 + $0x10] sm:$0xf] %vm19806_vm9, %v8478_v39  ;;  %vm19835_vm9 = vmmov %vm19811_vm2 }
 0x62f   : > { %8792 = vst.msk [vmem:[#allocation2 + $0x10] sm:$0xf] %vm19807_vm3, %v8701_v52  ;;  %v19812_v52 = vld [vmem:[#allocation94_spill] sm:$0xff] }
 0x630   : > { %v8396_v61 = vsel %vm19814_vm5, %v19812_v52, 0.0  ;;  %v19820_v52 = vld [vmem:[#allocation95_spill] sm:$0xff] }
 0x632   : > { %8726 = vrot.lane.b32.xlu1 %v8650_v14, %s12278_s19  ;;  %v8428_v14 = vpack.c.bf16 %v8396_v61, %v8396_v61  ;;  %v12141_v61 = vld [vmem:[#allocation2 + $0x10] sm:$0xf0] }
 0x633   : > { %8853 = vrot.lane.b32.xlu0 %v19808_v29, %s12279_s21  ;;  %8728 = vrot.lane.b32.xlu2 %v19809_v11, %s12278_s19  ;;  %v19816_v29 = vld [vmem:[#allocation88_spill] sm:$0xff]  ;;  %v17681_v11 = vpop.f32.mrf.mxu3 }
 0x634   : > { %v8699_v26 = vpop.permute.xlu1 %8698  ;;  %v12185_v6 = vld [vmem:[#allocation2 + $0x170] sm:$0xf0]  ;;  %19817 = vst [vmem:[#allocation99_spill] sm:$0xff] %v17681_v11  ;;  %v11679_v11 = vld [vmem:[#allocation2 + $0x8] sm:$0xf] }
 0x635   : > { %8791 = vst.msk [vmem:[#allocation2 + $0x4] sm:$0xf] %vm19810_vm4, %v8699_v26  ;;  %v8826_v4 = vpop.permute.xlu0 %8825  ;;  %v8484_v39 = vpop.permute.xlu2 %8483  ;;  %v11852_v1 = vor.u32 %v12185_v6, %v11851_v44  ;;  %v19818_v26 = vld [vmem:[#allocation91_spill] sm:$0xff]  ;;  %vm19840_vm4 = vmmov %vm19831_vm1 }
 0x636   : > { %8918 = vst.msk [vmem:[#allocation2 + $0x4] sm:$0xf] %vm19811_vm2, %v8826_v4  ;;  %vm19841_vm2 = vmmov %vm19824_vm11 }
 0x637   : > { %8575 = vst.msk [vmem:[#allocation2 + $0x34] sm:$0xf] %vm19815_vm12, %v8484_v39  ;;  %9621 = vmatmul.bf16.gmra.mxu3 %v11852_v1  ;;  %v8621_v39 = vsel %vm19822_vm13, %v19820_v52, 0.0  ;;  %vm19844_vm5 = vmmov %vm19841_vm2 }
 0x638   : > { %v8652_v1 = vpack.c.bf16 %v8621_v39, %v8621_v39  ;;  %vm19845_vm12 = vmmov %vm19819_vm7 }
 0x639   : > { %vm19848_vm13 = vmmov %vm19831_vm1 }
 0x63a   : > { %8855 = vrot.lane.b32.xlu1 %v19816_v29, %s12279_s21  ;;  %v19826_v29 = vld [vmem:[#allocation97_spill] sm:$0xff] }
 0x63b   : > { %8509 = vrot.lane.b32.xlu0 %v8428_v14, %s12277_s0  ;;  %8507 = vrot.lane.b32.xlu2 %v19818_v26, %s12277_s0  ;;  %v19825_v14 = vld [vmem:[#allocation92_spill] sm:$0xff]  ;;  %v17697_v39 = vpop.f32.mrf.mxu3 }
 0x63c   : > { %v8828_v44 = vpop.permute.xlu1 %8827 }
 0x63d   : > { %8919 = vst.msk [vmem:[#allocation2 + $0x10] sm:$0xf] %vm19819_vm7, %v8828_v44  ;;  %v8482_v6 = vpop.permute.xlu0 %8481  ;;  %v8709_v4 = vpop.permute.xlu2 %8708  ;;  %v12139_v44 = vld [vmem:[#allocation2 + $0x4] sm:$0xf]  ;;  %vm19847_vm7 = vnez %v19626_v43 }
 0x63e   : > { %8574 = vst.msk [vmem:[#allocation2 + $0x28] sm:$0xf] %vm19823_vm8, %v8482_v6  ;;  %vm19849_vm8 = vmmov %vm19832_vm0 }
 0x63f   : > { %8794 = vst.msk [vmem:[#allocation2 + $0x28] sm:$0xf] %vm19824_vm11, %v8705_v22  ;;  %v11680_v22 = vor.u32 %v12141_v61, %v11679_v11  ;;  %vm19852_vm11 = vmmov %vm19835_vm9 }
 0x642   : > { %8730 = vrot.lane.b32.xlu1 %v8652_v1, %s12278_s19  ;;  %v19829_v1 = vld [vmem:[#allocation102_spill] sm:$0xff] }
 0x643   : > { %8857 = vrot.lane.b32.xlu0 %v19825_v14, %s12279_s21  ;;  %8732 = vrot.lane.b32.xlu2 %v19826_v29, %s12278_s19  ;;  %v8398_v14 = vsel %vm19830_vm15, %v19829_v1, 0.0  ;;  %v12144_v1 = vld [vmem:[#allocation2 + $0x28] sm:$0xf0]  ;;  %vm19857_vm15 = vmmov %vm19841_vm2 }
 0x644   : > { %v8703_v26 = vpop.permute.xlu1 %8702  ;;  %v11673_v51 = vld [vmem:[#allocation2 + $0xc] sm:$0xf0]  ;;  %v8430_v29 = vpack.c.bf16 %v8398_v14, %v8398_v14  ;;  %v19842_v14 = vld [vmem:[#allocation100_spill] sm:$0xff] }
 0x645   : > { %8793 = vst.msk [vmem:[#allocation2 + $0x1c] sm:$0xf] %vm19827_vm14, %v8703_v26  ;;  %v8830_v52 = vpop.permute.xlu0 %8829  ;;  %v8488_v6 = vpop.permute.xlu2 %8487  ;;  %v11676_v31 = vor.u32 %v12139_v44, %v11673_v51  ;;  %v19833_v26 = vld [vmem:[#allocation96_spill] sm:$0xff]  ;;  %v19834_v51 = vld [vmem:[#allocation98_spill] sm:$0xff]  ;;  %v19836_v44 = vld [vmem:[#allocation103_spill] sm:$0xff] }
 0x646   : > { %8920 = vst.msk [vmem:[#allocation2 + $0x1c] sm:$0xf] %vm19828_vm10, %v8830_v52  ;;  %v19837_v52 = vld [vmem:[#allocation82_spill] sm:$0xff]  ;;  %vm19856_vm10 = vmmov %vm19831_vm1 }
 0x647   : > { %8577 = vst.msk [vmem:[#allocation2 + $0x4c] sm:$0xf] %vm19831_vm1, %v8488_v6  ;;  %9635 = vmatmul.bf16.vlgmr.msra.gmra.mxu2 %v11676_v31  ;;  %11933 = vmatmul.msk.bf16.vlgmr.msrb.gmra.mxu3 %vm19832_vm0, %v11680_v22  ;;  %vm19838_vm3 = vnez %v19837_v52  ;;  %v17714_v31 = vpop.f32.mrf.mxu3  ;;  %vm19860_vm1 = vmmov %vm19841_vm2 }
 0x648   : > { %v8623_v6 = vsel %vm19838_vm3, %v19836_v44, 0.0  ;;  %19839 = vst [vmem:[#allocation107_spill] sm:$0xff] %v17714_v31  ;;  %v11691_v44 = vld [vmem:[#allocation2 + $0x20] sm:$0xf]  ;;  %vm19861_vm0 = vmmov %vm19835_vm9 }
 0x649   : > { %v8654_v22 = vpack.c.bf16 %v8623_v6, %v8623_v6  ;;  %v19846_v6 = vld [vmem:[#allocation112_spill] sm:$0xff]  ;;  %vm19863_vm3 = vmmov %vm19849_vm8 }
 0x64a   : > { %8859 = vrot.lane.b32.xlu1 %v19833_v26, %s12279_s21 }
 0x64b   : > { %8513 = vrot.lane.b32.xlu0 %v8430_v29, %s12277_s0  ;;  %8511 = vrot.lane.b32.xlu2 %v19834_v51, %s12277_s0  ;;  %v19843_v29 = vld [vmem:[#allocation106_spill] sm:$0xff] }
 0x64c   : > { %v8832_v11 = vpop.permute.xlu1 %8831 }
 0x64d   : > { %8921 = vst.msk [vmem:[#allocation2 + $0x28] sm:$0xf] %vm19835_vm9, %v8832_v11  ;;  %v8486_v61 = vpop.permute.xlu0 %8485  ;;  %v8713_v23 = vpop.permute.xlu2 %8712  ;;  %v12142_v51 = vld [vmem:[#allocation2 + $0x1c] sm:$0xf]  ;;  %vm19862_vm9 = vmmov %vm19840_vm4 }
 0x64e   : > { %8576 = vst.msk [vmem:[#allocation2 + $0x40] sm:$0xf] %vm19840_vm4, %v8486_v61  ;;  %vm19866_vm4 = vmmov %vm19861_vm0 }
 0x64f   : > { %8796 = vst.msk [vmem:[#allocation2 + $0x40] sm:$0xf] %vm19841_vm2, %v8709_v4  ;;  %v11692_v4 = vor.u32 %v12144_v1, %v11691_v44  ;;  %v19851_v1 = vld [vmem:[#allocation108_spill] sm:$0xff]  ;;  %v19853_v44 = vld [vmem:[#allocation93_spill] sm:$0xff]  ;;  %vm19869_vm2 = vmmov %vm19862_vm9 }
 0x652   : > { %8734 = vrot.lane.b32.xlu1 %v8654_v22, %s12278_s19  ;;  %v8400_v22 = vsel %vm19847_vm7, %v19846_v6, 0.0  ;;  %v12147_v6 = vld [vmem:[#allocation2 + $0x40] sm:$0xf0]  ;;  %vm19872_vm7 = vmmov %vm19861_vm0 }
 0x653   : > { %8861 = vrot.lane.b32.xlu0 %v19842_v14, %s12279_s21  ;;  %8736 = vrot.lane.b32.xlu2 %v19843_v29, %s12278_s19  ;;  %v17730_v14 = vpop.f32.mrf.mxu3  ;;  %v8432_v29 = vpack.c.bf16 %v8400_v22, %v8400_v22  ;;  %v19858_v22 = vld [vmem:[#allocation113_spill] sm:$0xff] }
 0x654   : > { %v8707_v26 = vpop.permute.xlu1 %8706  ;;  %v11685_v11 = vld [vmem:[#allocation2 + $0x24] sm:$0xf0] }
 0x655   : > { %8795 = vst.msk [vmem:[#allocation2 + $0x34] sm:$0xf] %vm19844_vm5, %v8707_v26  ;;  %v8834_v52 = vpop.permute.xlu0 %8833  ;;  %v8492_v61 = vpop.permute.xlu2 %8491  ;;  %v11688_v31 = vor.u32 %v12142_v51, %v11685_v11  ;;  %v19850_v26 = vld [vmem:[#allocation104_spill] sm:$0xff]  ;;  %vm19870_vm5 = vmmov %vm19860_vm1 }
 0x656   : > { %8922 = vst.msk [vmem:[#allocation2 + $0x34] sm:$0xf] %vm19845_vm12, %v8834_v52  ;;  %vm19871_vm12 = vmmov %vm19860_vm1 }
 0x657   : > { %8579 = vst.msk [vmem:[#allocation2 + $0x64] sm:$0xf] %vm19848_vm13, %v8492_v61  ;;  %9640 = vmatmul.bf16.gmra.mxu2 %v11688_v31  ;;  %11934 = vmatmul.msk.bf16.gmra.mxu3 %vm19849_vm8, %v11692_v4  ;;  %v19854_v31 = vld [vmem:[#allocation85_spill] sm:$0xff]  ;;  %vm19873_vm13 = vnez %v19619_v21  ;;  %vm19874_vm8 = vmmov %vm19869_vm2 }
 0x658   : > { %vm19855_vm14 = vnez %v19854_v31 }
 0x659   : > { %v8625_v52 = vsel %vm19855_vm14, %v19853_v44, 0.0  ;;  %v11703_v44 = vld [vmem:[#allocation2 + $0x38] sm:$0xf]  ;;  %vm19876_vm14 = vmmov %vm19861_vm0 }
 0x65a   : > { %8863 = vrot.lane.b32.xlu1 %v19850_v26, %s12279_s21  ;;  %v8656_v4 = vpack.c.bf16 %v8625_v52, %v8625_v52  ;;  %v11704_v31 = vor.u32 %v12147_v6, %v11703_v44  ;;  %v19865_v6 = vld [vmem:[#allocation115_spill] sm:$0xff] }
 0x65b   : > { %8517 = vrot.lane.b32.xlu0 %v8432_v29, %s12277_s0  ;;  %8515 = vrot.lane.b32.xlu2 %v19851_v1, %s12277_s0  ;;  %v17743_v61 = vpop.f32.mrf.mxu3  ;;  %v19859_v29 = vld [vmem:[#allocation109_spill] sm:$0xff] }
 0x65c   : > { %v8836_v51 = vpop.permute.xlu1 %8835 }
 0x65d   : > { %8923 = vst.msk [vmem:[#allocation2 + $0x40] sm:$0xf] %vm19852_vm11, %v8836_v51  ;;  %v8490_v43 = vpop.permute.xlu0 %8489  ;;  %v8717_v11 = vpop.permute.xlu2 %8716  ;;  %v12145_v1 = vld [vmem:[#allocation2 + $0x34] sm:$0xf]  ;;  %vm19875_vm11 = vmmov %vm19863_vm3 }
 0x65e   : > { %8578 = vst.msk [vmem:[#allocation2 + $0x58] sm:$0xf] %vm19856_vm10, %v8490_v43  ;;  %vm19877_vm10 = vnez %v19567_v28 }
 0x65f   : > { %8798 = vst.msk [vmem:[#allocation2 + $0x58] sm:$0xf] %vm19857_vm15, %v8713_v23  ;;  %vm19878_vm15 = vmmov %vm19869_vm2 }
 0x662   : > { %8738 = vrot.lane.b32.xlu1 %v8656_v4, %s12278_s19  ;;  %v8402_v4 = vsel %vm16752_vm6, %v17125_v32, 0.0  ;;  %v19867_v32 = vld [vmem:[#allocation110_spill] sm:$0xff] }
 0x663   : > { %8865 = vrot.lane.b32.xlu0 %v19858_v22, %s12279_s21  ;;  %8740 = vrot.lane.b32.xlu2 %v19859_v29, %s12278_s19  ;;  %v8434_v22 = vpack.c.bf16 %v8402_v4, %v8402_v4  ;;  %v17757_v29 = vpop.f32.mrf.mxu3  ;;  %vm19868_vm6 = vnez %v19867_v32 }
 0x664   : > { %v8711_v26 = vpop.permute.xlu1 %8710  ;;  %v11697_v51 = vld [vmem:[#allocation2 + $0x3c] sm:$0xf0] }
 0x665   : > { %8797 = vst.msk [vmem:[#allocation2 + $0x4c] sm:$0xf] %vm19860_vm1, %v8711_v26  ;;  %v8838_v43 = vpop.permute.xlu0 %8837  ;;  %v11700_v23 = vor.u32 %v12145_v1, %v11697_v51  ;;  %v8496_v52 = vpop.permute.xlu2 %8495  ;;  %v19864_v26 = vld [vmem:[#allocation114_spill] sm:$0xff]  ;;  %v8627_v51 = vsel %vm19868_vm6, %v17130_v38, 0.0  ;;  %vm19883_vm6 = vmmov %vm19875_vm11 }
 0x666   : > { %8924 = vst.msk [vmem:[#allocation2 + $0x4c] sm:$0xf] %vm19861_vm0, %v8838_v43  ;;  %v8658_v43 = vpack.c.bf16 %v8627_v51, %v8627_v51  ;;  %vm19879_vm0 = vmmov %vm19860_vm1 }
 0x667   : > { %8581 = vst.msk [vmem:[#allocation2 + $0x7c] sm:$0xf] %vm19862_vm9, %v8496_v52  ;;  %9645 = vmatmul.bf16.gmra.mxu2 %v11700_v23  ;;  %11935 = vmatmul.msk.bf16.gmra.mxu3 %vm19863_vm3, %v11704_v31  ;;  %v12150_v31 = vld [vmem:[#allocation2 + $0x58] sm:$0xf0]  ;;  %vm19880_vm9 = vmmov %vm19866_vm4  ;;  %vm19881_vm3 = vnez %v19673_v17 }
 0x66a   : > { %8867 = vrot.lane.b32.xlu1 %v19864_v26, %s12279_s21 }
 0x66b   : > { %8521 = vrot.lane.b32.xlu0 %v8434_v22, %s12277_s0  ;;  %8519 = vrot.lane.b32.xlu2 %v19865_v6, %s12277_s0  ;;  %v17770_v23 = vpop.f32.mrf.mxu3  ;;  %v11715_v22 = vld [vmem:[#allocation2 + $0x50] sm:$0xf] }
 0x66c   : > { %v8840_v1 = vpop.permute.xlu1 %8839  ;;  %v11716_v6 = vor.u32 %v12150_v31, %v11715_v22 }
 0x66d   : > { %8925 = vst.msk [vmem:[#allocation2 + $0x58] sm:$0xf] %vm19866_vm4, %v8840_v1  ;;  %v8494_v36 = vpop.permute.xlu0 %8493  ;;  %v8721_v44 = vpop.permute.xlu2 %8720  ;;  %v12148_v4 = vld [vmem:[#allocation2 + $0x4c] sm:$0xf]  ;;  %vm19882_vm4 = vmmov %vm19869_vm2 }
 0x66e   : > { %8580 = vst.msk [vmem:[#allocation2 + $0x70] sm:$0xf] %vm19869_vm2, %v8494_v36  ;;  %v8404_v36 = vsel %vm19873_vm13, %v17285_v49, 0.0  ;;  %v8629_v49 = vsel %vm19877_vm10, %v17290_v25, 0.0  ;;  %vm19884_vm2 = vmmov %vm19872_vm7  ;;  %vm19892_vm10 = vnez %v19686_v19 }
 0x66f   : > { %8800 = vst.msk [vmem:[#allocation2 + $0x70] sm:$0xf] %vm19870_vm5, %v8717_v11  ;;  %vm19885_vm5 = vnez %v19666_v24  ;;  %vm19888_vm13 = vmmov %vm19879_vm0 }
 0x670   : > { %v8631_v17 = vsel %vm19885_vm5, %v17368_v9, 0.0 }
 0x672   : > { %8742 = vrot.lane.b32.xlu1 %v8658_v43, %s12278_s19  ;;  %v12153_v43 = vld [vmem:[#allocation2 + $0x70] sm:$0xf0] }
 0x673   : > { %8869 = vrot.lane.b32.xlu0 %v17114_v58, %s12279_s21  ;;  %8744 = vrot.lane.b32.xlu2 %v17158_v46, %s12278_s19  ;;  %v8436_v58 = vpack.c.bf16 %v8404_v36, %v8404_v36  ;;  %v17787_v46 = vpop.f32.mrf.mxu3  ;;  %v11739_v36 = vld [vmem:[#allocation2 + $0x80] sm:$0xf] }
 0x674   : > { %v8715_v52 = vpop.permute.xlu1 %8714  ;;  %v11709_v38 = vld [vmem:[#allocation2 + $0x54] sm:$0xf0] }
 0x675   : > { %8799 = vst.msk [vmem:[#allocation2 + $0x64] sm:$0xf] %vm19871_vm12, %v8715_v52  ;;  %v8842_v26 = vpop.permute.xlu0 %8841  ;;  %v11712_v11 = vor.u32 %v12148_v4, %v11709_v38  ;;  %v8500_v1 = vpop.permute.xlu2 %8499  ;;  %v11727_v52 = vld [vmem:[#allocation2 + $0x68] sm:$0xf]  ;;  %vm19886_vm12 = vmmov %vm19882_vm4 }
 0x676   : > { %8926 = vst.msk [vmem:[#allocation2 + $0x64] sm:$0xf] %vm19872_vm7, %v8842_v26  ;;  %v11728_v38 = vor.u32 %v12153_v43, %v11727_v52  ;;  %vm19887_vm7 = vmmov %vm19879_vm0 }
 0x677   : > { %8583 = vst.msk [vmem:[#allocation2 + $0x94] sm:$0xf] %vm19874_vm8, %v8500_v1  ;;  %9650 = vmatmul.bf16.gmra.mxu2 %v11712_v11  ;;  %11936 = vmatmul.msk.bf16.gmra.mxu3 %vm19875_vm11, %v11716_v6  ;;  %v12156_v1 = vld [vmem:[#allocation2 + $0x88] sm:$0xf0]  ;;  %vm19889_vm8 = vmmov %vm19884_vm2 }
 0x678   : > { %vm19890_vm11 = vmmov %vm19882_vm4 }
 0x67a   : > { %8871 = vrot.lane.b32.xlu1 %v17118_v40, %s12279_s21  ;;  %v8660_v40 = vpack.c.bf16 %v8629_v49, %v8629_v49 }
 0x67b   : > { %8525 = vrot.lane.b32.xlu0 %v8436_v58, %s12277_s0  ;;  %8523 = vrot.lane.b32.xlu2 %v17168_v45, %s12277_s0  ;;  %v17800_v45 = vpop.f32.mrf.mxu3 }
 0x67c   : > { %v8844_v32 = vpop.permute.xlu1 %8843 }
 0x67d   : > { %8927 = vst.msk [vmem:[#allocation2 + $0x70] sm:$0xf] %vm19876_vm14, %v8844_v32  ;;  %v8498_v21 = vpop.permute.xlu0 %8497  ;;  %v8725_v51 = vpop.permute.xlu2 %8724  ;;  %v12151_v28 = vld [vmem:[#allocation2 + $0x64] sm:$0xf]  ;;  %vm19891_vm14 = vmmov %vm19883_vm6 }
 0x67e   : > { %8582 = vst.msk [vmem:[#allocation2 + $0x88] sm:$0xf] %vm19878_vm15, %v8498_v21  ;;  %v11740_v21 = vor.u32 %v12156_v1, %v11739_v36  ;;  %vm19893_vm15 = vmmov %vm19884_vm2 }
 0x67f   : > { %8802 = vst.msk [vmem:[#allocation2 + $0x88] sm:$0xf] %vm19860_vm1, %v8721_v44  ;;  %vm19894_vm1 = vmmov %vm19882_vm4 }
 0x680   : > { %vm19898_vm5 = vmmov %vm19894_vm1 }
 0x682   : > { %8746 = vrot.lane.b32.xlu1 %v8660_v40, %s12278_s19  ;;  %v8633_v40 = vsel %vm19892_vm10, %v17429_v15, 0.0  ;;  %vm19906_vm10 = vmmov %vm19894_vm1 }
 0x683   : > { %8873 = vrot.lane.b32.xlu0 %v17279_v0, %s12279_s21  ;;  %8748 = vrot.lane.b32.xlu2 %v17314_v5, %s12278_s19  ;;  %v8406_v0 = vsel %vm19881_vm3, %v17365_v12, 0.0  ;;  %v17820_v12 = vpop.f32.mrf.mxu3  ;;  %vm19896_vm3 = vmmov %vm19884_vm2 }
 0x684   : > { %v8719_v31 = vpop.permute.xlu1 %8718  ;;  %v11721_v25 = vld [vmem:[#allocation2 + $0x6c] sm:$0xf0]  ;;  %v8438_v5 = vpack.c.bf16 %v8406_v0, %v8406_v0 }
 0x685   : > { %8801 = vst.msk [vmem:[#allocation2 + $0x7c] sm:$0xf] %vm19879_vm0, %v8719_v31  ;;  %v8846_v4 = vpop.permute.xlu0 %8845  ;;  %v11724_v44 = vor.u32 %v12151_v28, %v11721_v25  ;;  %v8504_v22 = vpop.permute.xlu2 %8503  ;;  %v12159_v28 = vld [vmem:[#allocation2 + $0xa0] sm:$0xf0]  ;;  %v11751_v25 = vld [vmem:[#allocation2 + $0x98] sm:$0xf] }
 0x686   : > { %8928 = vst.msk [vmem:[#allocation2 + $0x7c] sm:$0xf] %vm19880_vm9, %v8846_v4  ;;  %vm19895_vm9 = vmmov %vm19879_vm0 }
 0x687   : > { %8585 = vst.msk [vmem:[#allocation2 + $0xac] sm:$0xf] %vm19882_vm4, %v8504_v22  ;;  %9655 = vmatmul.bf16.gmra.mxu2 %v11724_v44  ;;  %11937 = vmatmul.msk.bf16.gmra.mxu3 %vm19883_vm6, %v11728_v38  ;;  %v11752_v44 = vor.u32 %v12159_v28, %v11751_v25  ;;  %vm19897_vm4 = vmmov %vm19894_vm1 }
 0x68a   : > { %8875 = vrot.lane.b32.xlu1 %v17308_v55, %s12279_s21  ;;  %v8662_v55 = vpack.c.bf16 %v8631_v17, %v8631_v17 }
 0x68b   : > { %8529 = vrot.lane.b32.xlu0 %v8438_v5, %s12277_s0  ;;  %8527 = vrot.lane.b32.xlu2 %v17316_v8, %s12277_s0  ;;  %v17830_v49 = vpop.f32.mrf.mxu3 }
 0x68c   : > { %v8848_v26 = vpop.permute.xlu1 %8847 }
 0x68d   : > { %8929 = vst.msk [vmem:[#allocation2 + $0x88] sm:$0xf] %vm19884_vm2, %v8848_v26  ;;  %v8502_v11 = vpop.permute.xlu0 %8501  ;;  %v8729_v6 = vpop.permute.xlu2 %8728  ;;  %v12154_v24 = vld [vmem:[#allocation2 + $0x7c] sm:$0xf] }
 0x68e   : > { %8584 = vst.msk [vmem:[#allocation2 + $0xa0] sm:$0xf] %vm19886_vm12, %v8502_v11  ;;  %vm19899_vm12 = vmmov %vm19879_vm0 }
 0x68f   : > { %8804 = vst.msk [vmem:[#allocation2 + $0xa0] sm:$0xf] %vm19887_vm7, %v8725_v51  ;;  %vm19901_vm7 = vmmov %vm19879_vm0 }
 0x692   : > { %8750 = vrot.lane.b32.xlu1 %v8662_v55, %s12278_s19  ;;  %v19900_v55 = vmov 0.0|0.0  }
 0x693   : > { %8877 = vrot.lane.b32.xlu0 %v17357_v47, %s12279_s21  ;;  %8752 = vrot.lane.b32.xlu2 %v17395_v41, %s12278_s19  ;;  %v8440_v47 = vpack.c.bf16 %v17445_v10, %v17445_v10  ;;  %v8664_v10 = vpack.c.bf16 %v8633_v40, %v8633_v40 }
 0x694   : > { %v8723_v8 = vpop.permute.xlu1 %8722  ;;  %v11733_v9 = vld [vmem:[#allocation2 + $0x84] sm:$0xf0] }
 0x695   : > { %8803 = vst.msk [vmem:[#allocation2 + $0x94] sm:$0xf] %vm19888_vm13, %v8723_v8  ;;  %v8850_v58 = vpop.permute.xlu0 %8849  ;;  %v11736_v32 = vor.u32 %v12154_v24, %v11733_v9  ;;  %v8508_v51 = vpop.permute.xlu2 %8507  ;;  %vm19902_vm13 = vmmov %vm19884_vm2 }
 0x696   : > { %8930 = vst.msk [vmem:[#allocation2 + $0x94] sm:$0xf] %vm19889_vm8, %v8850_v58  ;;  %vm19903_vm8 = vmmov %vm19894_vm1 }
 0x697   : > { %8587 = vst.msk [vmem:[#allocation2 + $0xc4] sm:$0xf] %vm19890_vm11, %v8508_v51  ;;  %9660 = vmatmul.bf16.gmra.mxu2 %v11736_v32  ;;  %11938 = vmatmul.msk.bf16.gmra.mxu3 %vm19891_vm14, %v11740_v21  ;;  %vm19904_vm11 = vmmov %vm19883_vm6  ;;  %v12165_v51 = vld [vmem:[#allocation2 + $0xd0] sm:$0xf0] }
 0x698   : > { %vm19905_vm14 = vmmov %vm19884_vm2 }
 0x69a   : > { %8879 = vrot.lane.b32.xlu1 %v17389_v27, %s12279_s21  ;;  %v17848_v27 = vpop.f32.mrf.mxu3 }
 0x69b   : > { %8533 = vrot.lane.b32.xlu0 %v8440_v47, %s12277_s0  ;;  %8531 = vrot.lane.b32.xlu2 %v17397_v57, %s12277_s0 }
 0x69c   : > { %v8852_v41 = vpop.permute.xlu1 %8851 }
 0x69d   : > { %8931 = vst.msk [vmem:[#allocation2 + $0xa0] sm:$0xf] %vm19893_vm15, %v8852_v41  ;;  %v8506_v43 = vpop.permute.xlu0 %8505  ;;  %v8733_v31 = vpop.permute.xlu2 %8732  ;;  %v12157_v57 = vld [vmem:[#allocation2 + $0x94] sm:$0xf]  ;;  %vm19907_vm15 = vmmov %vm19879_vm0 }
 0x69e   : > { %8586 = vst.msk [vmem:[#allocation2 + $0xb8] sm:$0xf] %vm19894_vm1, %v8506_v43  ;;  %v11775_v43 = vld [vmem:[#allocation2 + $0xc8] sm:$0xf]  ;;  %vm19908_vm1 = vmmov %vm19879_vm0 }
 0x69f   : > { %8806 = vst.msk [vmem:[#allocation2 + $0xb8] sm:$0xf] %vm19879_vm0, %v8729_v6  ;;  %v11763_v6 = vld [vmem:[#allocation2 + $0xb0] sm:$0xf]  ;;  %v11776_v28 = vor.u32 %v12165_v51, %v11775_v43  ;;  %vm19909_vm0 = vmmov %vm19884_vm2 }
 0x6a2   : > { %8754 = vrot.lane.b32.xlu1 %v8664_v10, %s12278_s19 }
 0x6a3   : > { %8881 = vrot.lane.b32.xlu0 %v17425_v35, %s12279_s21  ;;  %8756 = vrot.lane.b32.xlu2 %v17469_v30, %s12278_s19  ;;  %v17859_v35 = vpop.f32.mrf.mxu3  ;;  %v8442_v30 = vpack.c.bf16 %v17465_v33, %v17465_v33  ;;  %v8666_v33 = vpack.c.bf16 %v17475_v42, %v17475_v42 }
 0x6a4   : > { %v8727_v19 = vpop.permute.xlu1 %8726  ;;  %v11745_v15 = vld [vmem:[#allocation2 + $0x9c] sm:$0xf0] }
 0x6a5   : > { %8805 = vst.msk [vmem:[#allocation2 + $0xac] sm:$0xf] %vm19895_vm9, %v8727_v19  ;;  %v8854_v52 = vpop.permute.xlu0 %8853  ;;  %v11748_v4 = vor.u32 %v12157_v57, %v11745_v15  ;;  %v8512_v38 = vpop.permute.xlu2 %8511  ;;  %vm19910_vm9 = vmmov %vm19897_vm4 }
 0x6a6   : > { %8932 = vst.msk [vmem:[#allocation2 + $0xac] sm:$0xf] %vm19896_vm3, %v8854_v52  ;;  %vm19911_vm3 = vmmov %vm19883_vm6 }
 0x6a7   : > { %8589 = vst.msk [vmem:[#allocation2 + $0xdc] sm:$0xf] %vm19897_vm4, %v8512_v38  ;;  %9665 = vmatmul.bf16.gmra.mxu2 %v11748_v4  ;;  %11939 = vmatmul.msk.bf16.gmra.mxu3 %vm19883_vm6, %v11752_v44  ;;  %vm19912_vm4 = vmmov %vm19909_vm0 }
 0x6a8   : > { %vm19913_vm6 = vmmov %vm19898_vm5 }
 0x6aa   : > { %8883 = vrot.lane.b32.xlu1 %v17452_v59, %s12279_s21  ;;  %v12162_v59 = vld [vmem:[#allocation2 + $0xb8] sm:$0xf0] }
 0x6ab   : > { %8537 = vrot.lane.b32.xlu0 %v8442_v30, %s12277_s0  ;;  %8535 = vrot.lane.b32.xlu2 %v17471_v50, %s12277_s0  ;;  %v17873_v26 = vpop.f32.mrf.mxu3  ;;  %v11764_v24 = vor.u32 %v12162_v59, %v11763_v6  ;;  %v17899_v30 = vld [vmem:[%s18559_s8] ss:$0 sm:$0xff]  ;;  %s12217_s0 = smul.u32 200, %s20005_s25 }
 0x6ac   : > { %v8856_v22 = vpop.permute.xlu1 %8855  ;;  %v11787_v6 = vld [vmem:[#allocation2 + $0xe0] sm:$0xf] }
 0x6ad   : > { %8933 = vst.msk [vmem:[#allocation2 + $0xb8] sm:$0xf] %vm19884_vm2, %v8856_v22  ;;  %v8510_v0 = vpop.permute.xlu0 %8509  ;;  %v8737_v5 = vpop.permute.xlu2 %8736  ;;  %v12160_v17 = vld [vmem:[#allocation2 + $0xac] sm:$0xf]  ;;  %vm19914_vm2 = vmmov %vm19908_vm1  ;;  %s18485_s22 = scalar_lea.vmem %s18568_s17, %s12217_s0 }
 0x6ae   : > { %8588 = vst.msk [vmem:[#allocation2 + $0xd0] sm:$0xf] %vm19898_vm5, %v8510_v0  ;;  %vm19915_vm5 = vmmov %vm19908_vm1 }
 0x6af   : > { %8808 = vst.msk [vmem:[#allocation2 + $0xd0] sm:$0xf] %vm19899_vm12, %v8733_v31  ;;  %vm19916_vm12 = vmmov %vm19909_vm0 }
 0x6b2   : > { %8758 = vrot.lane.b32.xlu1 %v8666_v33, %s12278_s19  ;;  %v17906_v33 = vld [vmem:[%s18560_s9] ss:$0 sm:$0xff] }
 0x6b3   : > { %8885 = vrot.lane.b32.xlu2 %v19900_v55, %s12279_s21 }
 0x6b4   : > { %v8731_v11 = vpop.permute.xlu1 %8730  ;;  %v11757_v50 = vld [vmem:[#allocation2 + $0xb4] sm:$0xf0] }
 0x6b5   : > { %8807 = vst.msk [vmem:[#allocation2 + $0xc4] sm:$0xf] %vm19901_vm7, %v8731_v11  ;;  %v8858_v1 = vpop.permute.xlu0 %8857  ;;  %v11760_v8 = vor.u32 %v12160_v17, %v11757_v50  ;;  %v8516_v42 = vpop.permute.xlu2 %8515  ;;  %vm19917_vm7 = vmmov %vm19913_vm6 }
 0x6b6   : > { %8934 = vst.msk [vmem:[#allocation2 + $0xc4] sm:$0xf] %vm19902_vm13, %v8858_v1  ;;  %vm19918_vm13 = vmmov %vm19911_vm3 }
 0x6b7   : > { %8591 = vst.msk [vmem:[#allocation2 + $0xf4] sm:$0xf] %vm19903_vm8, %v8516_v42  ;;  %9670 = vmatmul.bf16.gmra.mxu2 %v11760_v8  ;;  %11940 = vmatmul.msk.bf16.gmra.mxu3 %vm19904_vm11, %v11764_v24  ;;  %vm19919_vm8 = vmmov %vm19909_vm0 }
 0x6b8   : > { %vm19920_vm11 = vmmov %vm19913_vm6 }
 0x6ba   : > { %v17882_v9 = vpop.f32.mrf.mxu3 }
 0x6bc   : > { %v8860_v36 = vpop.permute.xlu1 %8859 }
 0x6bd   : > { %8935 = vst.msk [vmem:[#allocation2 + $0xd0] sm:$0xf] %vm19905_vm14, %v8860_v36  ;;  %v8514_v58 = vpop.permute.xlu0 %8513  ;;  %v8741_v32 = vpop.permute.xlu2 %8740  ;;  %v12163_v41 = vld [vmem:[#allocation2 + $0xc4] sm:$0xf]  ;;  %vm19921_vm14 = vmmov %vm19908_vm1 }
 0x6be   : > { %8590 = vst.msk [vmem:[#allocation2 + $0xe8] sm:$0xf] %vm19906_vm10, %v8514_v58  ;;  %vm19922_vm10 = vmmov %vm19908_vm1 }
 0x6bf   : > { %8810 = vst.msk [vmem:[#allocation2 + $0xe8] sm:$0xf] %vm19907_vm15, %v8737_v5  ;;  %v12168_v5 = vld [vmem:[#allocation2 + $0xe8] sm:$0xf0]  ;;  %vm19923_vm15 = vmmov %vm19909_vm0 }
 0x6c0   : > { %v11788_v24 = vor.u32 %v12168_v5, %v11787_v6 }
 0x6c2   : > { %v17887_v21 = vpop.f32.mrf.mxu3 }
 0x6c4   : > { %v8735_v47 = vpop.permute.xlu1 %8734  ;;  %v11769_v40 = vld [vmem:[#allocation2 + $0xcc] sm:$0xf0] }
 0x6c5   : > { %8809 = vst.msk [vmem:[#allocation2 + $0xdc] sm:$0xf] %vm19908_vm1, %v8735_v47  ;;  %v8862_v31 = vpop.permute.xlu0 %8861  ;;  %v11772_v10 = vor.u32 %v12163_v41, %v11769_v40  ;;  %v8520_v19 = vpop.permute.xlu2 %8519  ;;  %vm19924_vm1 = vmmov %vm19913_vm6 }
 0x6c6   : > { %8936 = vst.msk [vmem:[#allocation2 + $0xdc] sm:$0xf] %vm19909_vm0, %v8862_v31  ;;  %vm19925_vm0 = vmmov %vm19911_vm3 }
 0x6c7   : > { %8593 = vst.msk [vmem:[#allocation2 + $0x10c] sm:$0xf] %vm19910_vm9, %v8520_v19  ;;  %9675 = vmatmul.bf16.gmra.mxu2 %v11772_v10  ;;  %11941 = vmatmul.msk.bf16.gmra.mxu3 %vm19911_vm3, %v11776_v28  ;;  %vm19926_vm9 = vmmov %vm19912_vm4 }
 0x6c8   : > { %vm19927_vm3 = vmmov %vm19924_vm1 }
 0x6ca   : > { %v9636_v57 = vpop.f32.mrf.mxu2  ;;  %v9725_v15 = vpop.f32.mrf.mxu3 }
 0x6cb   : > { %v9637_v25 = vadd.f32 %v9636_v57, %v17342_v60 }
 0x6cc   : > { %v8864_v52 = vpop.permute.xlu1 %8863 }
 0x6cd   : > { %v9726_v4 = vadd.f32 %v9725_v15, %v9637_v25  ;;  %8937 = vst.msk [vmem:[#allocation2 + $0xe8] sm:$0xf] %vm19912_vm4, %v8864_v52  ;;  %v8518_v44 = vpop.permute.xlu0 %8517  ;;  %v8745_v38 = vpop.permute.xlu2 %8744  ;;  %v12166_v17 = vld [vmem:[#allocation2 + $0xdc] sm:$0xf]  ;;  %v12171_v25 = vld [vmem:[#allocation2 + $0x100] sm:$0xf0]  ;;  %vm19928_vm4 = vmmov %vm19914_vm2 }
 0x6ce   : > { %8592 = vst.msk [vmem:[#allocation2 + $0x100] sm:$0xf] %vm19913_vm6, %v8518_v44  ;;  %vm19929_vm6 = vmmov %vm19914_vm2 }
 0x6cf   : > { %8812 = vst.msk [vmem:[#allocation2 + $0x100] sm:$0xf] %vm19914_vm2, %v8741_v32  ;;  %v9809_v60 = vmul.f32 %v17899_v30, %v9726_v4  ;;  %vm19930_vm2 = vmmov %vm19919_vm8 }
 0x6d1   : > { %v9845_v36 = vadd.f32 %v17906_v33, %v9809_v60 }
 0x6d2   : > { %v9638_v22 = vpop.f32.mrf.mxu2  ;;  %v9727_v0 = vpop.f32.mrf.mxu3 }
 0x6d3   : > { %v9639_v59 = vadd.f32 %v9638_v22, %v17348_v7  ;;  %v9877_v47 = vmax.f32 %v9845_v36, 0.0  ;;  %v11799_v22 = vld [vmem:[#allocation2 + $0xf8] sm:$0xf] }
 0x6d4   : > { %v8739_v11 = vpop.permute.xlu1 %8738  ;;  %v11781_v50 = vld [vmem:[#allocation2 + $0xe4] sm:$0xf0] }
 0x6d5   : > { %v9728_v55 = vadd.f32 %v9727_v0, %v9639_v59  ;;  %8811 = vst.msk [vmem:[#allocation2 + $0xf4] sm:$0xf] %vm19915_vm5, %v8739_v11  ;;  %v8866_v1 = vpop.permute.xlu0 %8865  ;;  %v11784_v8 = vor.u32 %v12166_v17, %v11781_v50  ;;  %v8524_v42 = vpop.permute.xlu2 %8523  ;;  %v11800_v59 = vor.u32 %v12171_v25, %v11799_v22  ;;  %vm19931_vm5 = vmmov %vm19924_vm1 }
 0x6d6   : > { %8938 = vst.msk [vmem:[#allocation2 + $0xf4] sm:$0xf] %vm19916_vm12, %v8866_v1  ;;  %vm19932_vm12 = vmmov %vm19925_vm0 }
 0x6d7   : > { %v9810_v58 = vmul.f32 %v17899_v30, %v9728_v55  ;;  %8595 = vst.msk [vmem:[#allocation2 + $0x124] sm:$0xf] %vm19917_vm7, %v8524_v42  ;;  %9680 = vmatmul.bf16.gmra.mxu2 %v11784_v8  ;;  %11942 = vmatmul.msk.bf16.gmra.mxu3 %vm19918_vm13, %v11788_v24  ;;  %v12174_v42 = vld [vmem:[#allocation2 + $0x118] sm:$0xf0]  ;;  %vm19933_vm7 = vmmov %vm19930_vm2 }
 0x6d8   : > { %vm19934_vm13 = vmmov %vm19924_vm1 }
 0x6d9   : > { %v9846_v7 = vadd.f32 %v17906_v33, %v9810_v58 }
 0x6da   : > { %v9641_v32 = vpop.f32.mrf.mxu2  ;;  %v9730_v51 = vpop.f32.mrf.mxu3 }
 0x6db   : > { %v9878_v41 = vmax.f32 %v9846_v7, 0.0  ;;  %v9642_v40 = vadd.f32 %v9641_v32, %v17417_v13 }
 0x6dc   : > { %v8868_v43 = vpop.permute.xlu1 %8867 }
 0x6dd   : > { %v17917_v31 = vpack.c.bf16 %v9878_v41, %v9877_v47  ;;  %v17919_v10 = vadd.f32 %v9730_v51, %v9642_v40  ;;  %8939 = vst.msk [vmem:[#allocation2 + $0x100] sm:$0xf] %vm19919_vm8, %v8868_v43  ;;  %v8522_v28 = vpop.permute.xlu0 %8521  ;;  %v8749_v19 = vpop.permute.xlu2 %8748  ;;  %v12169_v13 = vld [vmem:[#allocation2 + $0xf4] sm:$0xf]  ;;  %vm19935_vm8 = vmmov %vm19928_vm4 }
 0x6de   : > { %8594 = vst.msk [vmem:[#allocation2 + $0x118] sm:$0xf] %vm19920_vm11, %v8522_v28  ;;  %vm19936_vm11 = vmmov %vm19928_vm4 }
 0x6df   : > { %8814 = vst.msk [vmem:[#allocation2 + $0x118] sm:$0xf] %vm19921_vm14, %v8745_v38  ;;  %vm19937_vm14 = vmmov %vm19930_vm2 }
 0x6e2   : > { %v9643_v57 = vpop.f32.mrf.mxu2  ;;  %v9732_v15 = vpop.f32.mrf.mxu3 }
 0x6e3   : > { %v9644_v52 = vadd.f32 %v9643_v57, %v17449_v16 }
 0x6e4   : > { %v8743_v4 = vpop.permute.xlu1 %8742  ;;  %v11793_v44 = vld [vmem:[#allocation2 + $0xfc] sm:$0xf0] }
 0x6e5   : > { %v17925_v0 = vadd.f32 %v9732_v15, %v9644_v52  ;;  %8813 = vst.msk [vmem:[#allocation2 + $0x10c] sm:$0xf] %vm19922_vm10, %v8743_v4  ;;  %v8870_v5 = vpop.permute.xlu0 %8869  ;;  %v11796_v60 = vor.u32 %v12169_v13, %v11793_v44  ;;  %v8528_v11 = vpop.permute.xlu2 %8527  ;;  %v12177_v44 = vld [vmem:[#allocation2 + $0x130] sm:$0xf0]  ;;  %vm19938_vm10 = vmmov %vm19924_vm1 }
 0x6e6   : > { %8940 = vst.msk [vmem:[#allocation2 + $0x10c] sm:$0xf] %vm19923_vm15, %v8870_v5  ;;  %vm19939_vm15 = vmmov %vm19925_vm0 }
 0x6e7   : > { %8597 = vst.msk [vmem:[#allocation2 + $0x13c] sm:$0xf] %vm19924_vm1, %v8528_v11  ;;  %9685 = vmatmul.bf16.gmra.mxu2 %v11796_v60  ;;  %11943 = vmatmul.msk.bf16.gmra.mxu3 %vm19925_vm0, %v11800_v59  ;;  %vm19940_vm1 = vmmov %vm19930_vm2 }
 0x6e8   : > { %vm19941_vm0 = vmmov %vm19927_vm3 }
 0x6ea   : > { %v9646_v16 = vpop.f32.mrf.mxu2  ;;  %v9735_v38 = vpop.f32.mrf.mxu3 }
 0x6eb   : > { %v9647_v17 = vadd.f32 %v9646_v16, %v17504_v56  ;;  %v11811_v56 = vld [vmem:[#allocation2 + $0x110] sm:$0xf] }
 0x6ec   : > { %v8872_v50 = vpop.permute.xlu1 %8871  ;;  %v11812_v40 = vor.u32 %v12174_v42, %v11811_v56  ;;  %v12180_v56 = vld [vmem:[#allocation2 + $0x148] sm:$0xf0] }
 0x6ed   : > { %v17932_v6 = vadd.f32 %v9735_v38, %v9647_v17  ;;  %8941 = vst.msk [vmem:[#allocation2 + $0x118] sm:$0xf] %vm19926_vm9, %v8872_v50  ;;  %v8526_v55 = vpop.permute.xlu0 %8525  ;;  %v8753_v1 = vpop.permute.xlu2 %8752  ;;  %v12172_v7 = vld [vmem:[#allocation2 + $0x10c] sm:$0xf]  ;;  %vm19942_vm9 = vmmov %vm19928_vm4 }
 0x6ee   : > { %8596 = vst.msk [vmem:[#allocation2 + $0x130] sm:$0xf] %vm19927_vm3, %v8526_v55  ;;  %vm19943_vm3 = vmmov %vm19928_vm4 }
 0x6ef   : > { %8816 = vst.msk [vmem:[#allocation2 + $0x130] sm:$0xf] %vm19928_vm4, %v8749_v19  ;;  %vm19944_vm4 = vmmov %vm19940_vm1 }
 0x6f2   : > { %v9648_v8 = vpop.f32.mrf.mxu2  ;;  %v9737_v24 = vpop.f32.mrf.mxu3 }
 0x6f3   : > { %v9649_v36 = vadd.f32 %v9648_v8, %v17514_v48  ;;  %v12206_v8 = vld [vmem:[%s18561_s10 + $0x8] sm:$0xff] }
 0x6f4   : > { %v8747_v58 = vpop.permute.xlu1 %8746  ;;  %v11805_v32 = vld [vmem:[#allocation2 + $0x114] sm:$0xf0]  ;;  %9995 = vmatpush.bf16.msrb.mxu2 %v12206_v8  ;;  %v9813_v8 = vmul.f32 %v17899_v30, %v17932_v6 }
 0x6f5   : > { %v17938_v51 = vadd.f32 %v9737_v24, %v9649_v36  ;;  %8815 = vst.msk [vmem:[#allocation2 + $0x124] sm:$0xf] %vm19929_vm6, %v8747_v58  ;;  %v8874_v47 = vpop.permute.xlu0 %8873  ;;  %v11808_v41 = vor.u32 %v12172_v7, %v11805_v32  ;;  %v8532_v43 = vpop.permute.xlu2 %8531  ;;  %v12208_v24 = vld [vmem:[%s18564_s13 + $0x8] sm:$0xff]  ;;  %vm19945_vm6 = vmmov %vm19932_vm12 }
 0x6f6   : > { %8942 = vst.msk [vmem:[#allocation2 + $0x124] sm:$0xf] %vm19930_vm2, %v8874_v47  ;;  %10172 = vmatpush.bf16.msra.mxu3 %v12208_v24  ;;  %vm19946_vm2 = vmmov %vm19940_vm1 }
 0x6f7   : > { %8599 = vst.msk [vmem:[#allocation2 + $0x154] sm:$0xf] %vm19931_vm5, %v8532_v43  ;;  %9690 = vmatmul.bf16.gmra.mxu2 %v11808_v41  ;;  %11944 = vmatmul.msk.bf16.gmra.mxu3 %vm19932_vm12, %v11812_v40  ;;  %v9811_v41 = vmul.f32 %v17899_v30, %v17919_v10  ;;  %vm19947_vm5 = vmmov %vm19941_vm0 }
 0x6f8   : > { %vm19949_vm12 = vmmov %vm19943_vm3 }
 0x6fa   : > { %v9651_v48 = vpop.f32.mrf.mxu2  ;;  %v9740_v28 = vpop.f32.mrf.mxu3 }
 0x6fb   : > { %v9652_v19 = vadd.f32 %v9651_v48, %v17524_v2  ;;  %v11823_v2 = vld [vmem:[#allocation2 + $0x128] sm:$0xf] }
 0x6fc   : > { %v8876_v57 = vpop.permute.xlu1 %8875  ;;  %v11824_v17 = vor.u32 %v12177_v44, %v11823_v2 }
 0x6fd   : > { %v17945_v15 = vadd.f32 %v9740_v28, %v9652_v19  ;;  %8943 = vst.msk [vmem:[#allocation2 + $0x130] sm:$0xf] %vm19933_vm7, %v8876_v57  ;;  %v8530_v25 = vpop.permute.xlu0 %8529  ;;  %v8757_v52 = vpop.permute.xlu2 %8756  ;;  %v12175_v60 = vld [vmem:[#allocation2 + $0x124] sm:$0xf]  ;;  %v11835_v28 = vld [vmem:[#allocation2 + $0x140] sm:$0xf]  ;;  %vm19950_vm7 = vmmov %vm19940_vm1 }
 0x6fe   : > { %8598 = vst.msk [vmem:[#allocation2 + $0x148] sm:$0xf] %vm19934_vm13, %v8530_v25  ;;  %vm19951_vm13 = vmmov %vm19943_vm3 }
 0x6ff   : > { %8818 = vst.msk [vmem:[#allocation2 + $0x148] sm:$0xf] %vm19935_vm8, %v8753_v1  ;;  %vm19952_vm8 = vmmov %vm19940_vm1 }
 0x702   : > { %v9653_v4 = vpop.f32.mrf.mxu2  ;;  %v9742_v13 = vpop.f32.mrf.mxu3 }
 0x703   : > { %v9654_v22 = vadd.f32 %v9653_v4, %v17541_v18 }
 0x704   : > { %v8751_v5 = vpop.permute.xlu1 %8750  ;;  %v11817_v59 = vld [vmem:[#allocation2 + $0x12c] sm:$0xf0] }
 0x705   : > { %v17951_v11 = vadd.f32 %v9742_v13, %v9654_v22  ;;  %8817 = vst.msk [vmem:[#allocation2 + $0x13c] sm:$0xf] %vm19936_vm11, %v8751_v5  ;;  %v8878_v16 = vpop.permute.xlu0 %8877  ;;  %v11820_v38 = vor.u32 %v12175_v60, %v11817_v59  ;;  %v8536_v50 = vpop.permute.xlu2 %8535  ;;  %vm19953_vm11 = vmmov %vm19945_vm6 }
 0x706   : > { %8944 = vst.msk [vmem:[#allocation2 + $0x13c] sm:$0xf] %vm19937_vm14, %v8878_v16  ;;  %vm19954_vm14 = vmmov %vm19945_vm6 }
 0x707   : > { %8601 = vst.msk [vmem:[#allocation2 + $0x16c] sm:$0xf] %vm19938_vm10, %v8536_v50  ;;  %9695 = vmatmul.bf16.gmra.mxu2 %v11820_v38  ;;  %11945 = vmatmul.msk.bf16.gmra.mxu3 %vm19939_vm15, %v11824_v17  ;;  %v19948_v38 = vld [vmem:[#allocation17_spill] sm:$0xff]  ;;  %vm19955_vm10 = vmmov %vm19945_vm6 }
 0x708   : > { %vm19957_vm15 = vmmov %vm19945_vm6 }
 0x70a   : > { %v9656_v18 = vpop.f32.mrf.mxu2  ;;  %v9745_v55 = vpop.f32.mrf.mxu3 }
 0x70b   : > { %v9657_v1 = vadd.f32 %v9656_v18, %v17551_v54  ;;  %v9812_v54 = vmul.f32 %v17899_v30, %v17925_v0  ;;  %v11847_v18 = vld [vmem:[#allocation2 + $0x158] sm:$0xf] }
 0x70c   : > { %v8880_v42 = vpop.permute.xlu1 %8879 }
 0x70d   : > { %v17964_v36 = vadd.f32 %v9745_v55, %v9657_v1  ;;  %8945 = vst.msk [vmem:[#allocation2 + $0x148] sm:$0xf] %vm19940_vm1, %v8880_v42  ;;  %v8534_v58 = vpop.permute.xlu0 %8533  ;;  %v12178_v43 = vld [vmem:[#allocation2 + $0x13c] sm:$0xf]  ;;  %v9848_v0 = vadd.f32 %v17906_v33, %v9812_v54  ;;  %v8886_v2 = vpop.permute.xlu2 %8885  ;;  %v12183_v55 = vld [vmem:[#allocation2 + $0x160] sm:$0xf0]  ;;  %vm19959_vm1 = vmmov %vm19945_vm6 }
 0x70e   : > { %8600 = vst.msk [vmem:[#allocation2 + $0x160] sm:$0xf] %vm19941_vm0, %v8534_v58  ;;  %vm19961_vm0 = vmmov %vm19959_vm1 }
 0x70f   : > { %8820 = vst.msk [vmem:[#allocation2 + $0x160] sm:$0xf] %vm19942_vm9, %v8757_v52  ;;  %v11836_v52 = vor.u32 %v12180_v56, %v11835_v28  ;;  %v9880_v10 = vmax.f32 %v9848_v0, 0.0  ;;  %vm19963_vm9 = vmmov %vm19961_vm0 }
 0x712   : > { %v9658_v7 = vpop.f32.mrf.mxu2  ;;  %v9747_v32 = vpop.f32.mrf.mxu3 }
 0x713   : > { %v9659_v47 = vadd.f32 %v9658_v7, %v17565_v37  ;;  %v9847_v37 = vadd.f32 %v17906_v33, %v9811_v41 }
 0x714   : > { %v8755_v40 = vpop.permute.xlu1 %8754  ;;  %v11829_v48 = vld [vmem:[#allocation2 + $0x144] sm:$0xf0] }
 0x715   : > { %v17974_v19 = vadd.f32 %v9747_v32, %v9659_v47  ;;  %8819 = vst.msk [vmem:[#allocation2 + $0x154] sm:$0xf] %vm19943_vm3, %v8755_v40  ;;  %v8882_v57 = vpop.permute.xlu0 %8881  ;;  %v11832_v25 = vor.u32 %v12178_v43, %v11829_v48  ;;  %v9879_v22 = vmax.f32 %v9847_v37, 0.0  ;;  %v11848_v32 = vor.u32 %v12183_v55, %v11847_v18  ;;  %v12205_v40 = vld [vmem:[%s18561_s10] sm:$0xff]  ;;  %v12186_v37 = vld [vmem:[#allocation2 + $0x178] sm:$0xf0]  ;;  %vm19965_vm3 = vmmov %vm19961_vm0 }
 0x716   : > { %8946 = vst.msk [vmem:[#allocation2 + $0x154] sm:$0xf] %vm19944_vm4, %v8882_v57  ;;  %v12207_v43 = vld [vmem:[%s18564_s13] sm:$0xff]  ;;  %9996 = vmatpush.bf16.msrb.mxu2 %v12205_v40  ;;  %vm19966_vm4 = vmmov %vm19961_vm0 }
 0x717   : > { %9700 = vmatmul.bf16.gmra.mxu2 %v11832_v25  ;;  %11946 = vmatmul.msk.bf16.gmra.mxu3 %vm19945_vm6, %v11836_v52  ;;  %v17986_v16 = vpack.c.bf16 %v9880_v10, %v9879_v22  ;;  %v11859_v25 = vld [vmem:[#allocation2 + $0x170] sm:$0xf]  ;;  %vm19968_vm6 = vmmov %vm19961_vm0 }
 0x718   : > { %10173 = vmatpush.bf16.msra.mxu3 %v12207_v43  ;;  %v11860_v22 = vor.u32 %v12186_v37, %v11859_v25 }
 0x71a   : > { %v9661_v4 = vpop.f32.mrf.mxu2  ;;  %v9750_v13 = vpop.f32.mrf.mxu3 }
 0x71b   : > { %v9662_v44 = vadd.f32 %v9661_v4, %v17574_v62  ;;  %v9814_v62 = vmul.f32 %v17899_v30, %v17938_v51 }
 0x71c   : > { %v8884_v5 = vpop.permute.xlu1 %8883 }
 0x71d   : > { %v17982_v60 = vadd.f32 %v9750_v13, %v9662_v44  ;;  %8947 = vst.msk [vmem:[#allocation2 + $0x160] sm:$0xf] %vm19946_vm2, %v8884_v5  ;;  %v8538_v59 = vpop.permute.xlu0 %8537  ;;  %v12181_v42 = vld [vmem:[#allocation2 + $0x154] sm:$0xf]  ;;  %v9850_v56 = vadd.f32 %v17906_v33, %v9814_v62  ;;  %v9815_v5 = vmul.f32 %v17899_v30, %v17945_v15  ;;  %vm19969_vm2 = vmmov %vm19961_vm0 }
 0x71e   : > { %8602 = vst.msk [vmem:[#allocation2 + $0x178] sm:$0xf] %vm19947_vm5, %v8538_v59  ;;  %vm19971_vm5 = vmmov %vm19961_vm0 }
 0x71f   : > { %8822 = vst.msk [vmem:[#allocation2 + $0x178] sm:$0xf] %vm19949_vm12, %v19948_v38  ;;  %v9882_v51 = vmax.f32 %v9850_v56, 0.0  ;;  %v9851_v38 = vadd.f32 %v17906_v33, %v9815_v5  ;;  %vm19972_vm12 = vmmov %vm19961_vm0 }
 0x720   : > { %8949 = vst.msk [vmem:[#allocation2 + $0x178] sm:$0xf] %vm19950_vm7, %v8886_v2  ;;  %vm19974_vm7 = vmmov %vm19961_vm0 }
 0x721   : > { %v9883_v18 = vmax.f32 %v9851_v38, 0.0 }
 0x722   : > { %v9663_v17 = vpop.f32.mrf.mxu2  ;;  %v9752_v50 = vpop.f32.mrf.mxu3 }
 0x723   : > { %v9664_v1 = vadd.f32 %v9663_v17, %v17601_v53  ;;  %v9849_v53 = vadd.f32 %v17906_v33, %v9813_v8 }
 0x724   : > { %v8759_v24 = vpop.permute.xlu1 %8758  ;;  %v11841_v58 = vld [vmem:[#allocation2 + $0x15c] sm:$0xf0] }
 0x725   : > { %v9753_v54 = vadd.f32 %v9752_v50, %v9664_v1  ;;  %8821 = vst.msk [vmem:[#allocation2 + $0x16c] sm:$0xf] %vm19951_vm13, %v8759_v24  ;;  %v11844_v7 = vor.u32 %v12181_v42, %v11841_v58  ;;  %v9881_v48 = vmax.f32 %v9849_v53, 0.0  ;;  %v9818_v1 = vmul.f32 %v17899_v30, %v17974_v19  ;;  %vm19975_vm13 = vmmov %vm19961_vm0 }
 0x726   : > { %8948 = vst.msk [vmem:[#allocation2 + $0x16c] sm:$0xf] %vm19952_vm8, %v8886_v2  ;;  %v9817_v42 = vmul.f32 %v17899_v30, %v17964_v36  ;;  %vm19977_vm8 = vmmov %vm19961_vm0 }
 0x727   : > { %9705 = vmatmul.bf16.gmra.mxu2 %v11844_v7  ;;  %11947 = vmatmul.msk.bf16.gmra.mxu3 %vm19953_vm11, %v11848_v32  ;;  %v18010_v57 = vpack.c.bf16 %v9882_v51, %v9881_v48  ;;  %v11853_v0 = vld [vmem:[#allocation2 + $0x174] sm:$0xf0]  ;;  %v9854_v7 = vadd.f32 %v17906_v33, %v9818_v1  ;;  %v9820_v36 = vmul.f32 %v17899_v30, %v9753_v54  ;;  %vm19978_vm11 = vmmov %vm19961_vm0 }
 0x728   : > { %v9853_v32 = vadd.f32 %v17906_v33, %v9817_v42  ;;  %v19958_v51 = vld [vmem:[#allocation99_spill] sm:$0xff] }
 0x729   : > { %v9886_v56 = vmax.f32 %v9854_v7, 0.0 }
 0x72a   : > { %v9666_v47 = vpop.f32.mrf.mxu2  ;;  %v9755_v6 = vpop.f32.mrf.mxu3 }
 0x72b   : > { %v9667_v41 = vadd.f32 %v9666_v47, %v17618_v20  ;;  %v9816_v20 = vmul.f32 %v17899_v30, %v17951_v11 }
 0x72d   : > { %v18008_v28 = vadd.f32 %v9755_v6, %v9667_v41  ;;  %v12184_v52 = vld [vmem:[#allocation2 + $0x16c] sm:$0xf]  ;;  %v9852_v2 = vadd.f32 %v17906_v33, %v9816_v20 }
 0x72e   : > { %v11856_v44 = vor.u32 %v12184_v52, %v11853_v0  ;;  %v9856_v52 = vadd.f32 %v17906_v33, %v9820_v36  ;;  %v19960_v0 = vld [vmem:[#allocation5_spill] sm:$0xff] }
 0x72f   : > { %v9884_v62 = vmax.f32 %v9852_v2, 0.0 }
 0x730   : > { %v9888_v20 = vmax.f32 %v9856_v52, 0.0 }
 0x731   : > { %v9912_v55 = vpack.c.bf16 %v9884_v62, %v9883_v18 }
 0x732   : > { %v9668_v10 = vpop.f32.mrf.mxu2  ;;  %v9757_v4 = vpop.f32.mrf.mxu3 }
 0x733   : > { %v9669_v13 = vadd.f32 %v9668_v10, %v17634_v63 }
 0x735   : > { %v9758_v59 = vadd.f32 %v9757_v4, %v9669_v13  ;;  %v19962_v4 = vld [vmem:[#allocation107_spill] sm:$0xff] }
 0x737   : > { %9710 = vmatmul.bf16.gmra.mxu2 %v11856_v44  ;;  %11948 = vmatmul.msk.bf16.gmra.mxu3 %vm19954_vm14, %v11860_v22  ;;  %vm19980_vm14 = vmmov %vm19961_vm0 }
 0x73a   : > { %v9671_v17 = vpop.f32.mrf.mxu2  ;;  %v9760_v11 = vpop.f32.mrf.mxu3 }
 0x73b   : > { %v9672_v50 = vadd.f32 %v9671_v17, %v17652_v3  ;;  %v19956_v3 = vld [vmem:[#allocation4_spill] sm:$0xff] }
 0x73d   : > { %v9761_v63 = vadd.f32 %v9760_v11, %v9672_v50  ;;  %v19964_v11 = vld [vmem:[#allocation11_spill] sm:$0xff] }
 0x742   : > { %v9673_v15 = vpop.f32.mrf.mxu2  ;;  %v9762_v8 = vpop.f32.mrf.mxu3 }
 0x743   : > { %v9674_v24 = vadd.f32 %v9673_v15, %v17668_v34  ;;  %v9885_v34 = vmax.f32 %v9853_v32, 0.0 }
 0x745   : > { %v9763_v58 = vadd.f32 %v9762_v8, %v9674_v24  ;;  %v9913_v41 = vpack.c.bf16 %v9886_v56, %v9885_v34 }
 0x747   : > { %11957 = vmatmul.msk.bf16.vlgmr.msrb.gmra.mxu2 %vm19955_vm10, %v17917_v31  ;;  %11981 = vmatmul.msk.bf16.vlgmr.msra.gmra.mxu3 %vm19957_vm15, %v19956_v3  ;;  %v9819_v31 = vmul.f32 %v17899_v30, %v17982_v60  ;;  %v9822_v60 = vmul.f32 %v17899_v30, %v9758_v59  ;;  %vm19981_vm10 = vmmov %vm19961_vm0 }
 0x748   : > { %vm19983_vm15 = vmmov %vm19961_vm0 }
 0x749   : > { %v9855_v37 = vadd.f32 %v17906_v33, %v9819_v31  ;;  %v9858_v17 = vadd.f32 %v17906_v33, %v9822_v60 }
 0x74a   : > { %v9676_v19 = vpop.f32.mrf.mxu2  ;;  %v9765_v53 = vpop.f32.mrf.mxu3 }
 0x74b   : > { %v9677_v47 = vadd.f32 %v9676_v19, %v19958_v51  ;;  %v9890_v18 = vmax.f32 %v9858_v17, 0.0  ;;  %v19967_v19 = vld [vmem:[#allocation19_spill] sm:$0xff] }
 0x74d   : > { %v9766_v6 = vadd.f32 %v9765_v53, %v9677_v47 }
 0x752   : > { %v9678_v40 = vpop.f32.mrf.mxu2  ;;  %v9767_v43 = vpop.f32.mrf.mxu3 }
 0x753   : > { %v9679_v48 = vadd.f32 %v9678_v40, %v17697_v39  ;;  %v9887_v39 = vmax.f32 %v9855_v37, 0.0 }
 0x755   : > { %v9768_v25 = vadd.f32 %v9767_v43, %v9679_v48  ;;  %v9914_v22 = vpack.c.bf16 %v9888_v20, %v9887_v39 }
 0x757   : > { %11958 = vmatmul.msk.bf16.gmra.mxu2 %vm19959_vm1, %v17986_v16  ;;  %11982 = vmatmul.msk.bf16.gmra.mxu3 %vm19961_vm0, %v19960_v0  ;;  %v9821_v16 = vmul.f32 %v17899_v30, %v18008_v28  ;;  %v9824_v28 = vmul.f32 %v17899_v30, %v9763_v58  ;;  %v19970_v0 = vld [vmem:[#allocation26_spill] sm:$0xff]  ;;  %vm19984_vm1 = vmmov %vm19961_vm0 }
 0x759   : > { %v9857_v50 = vadd.f32 %v17906_v33, %v9821_v16  ;;  %v9860_v56 = vadd.f32 %v17906_v33, %v9824_v28 }
 0x75a   : > { %v9681_v54 = vpop.f32.mrf.mxu2  ;;  %v9770_v10 = vpop.f32.mrf.mxu3 }
 0x75b   : > { %v9682_v13 = vadd.f32 %v9681_v54, %v19962_v4  ;;  %v9892_v53 = vmax.f32 %v9860_v56, 0.0 }
 0x75d   : > { %v9771_v44 = vadd.f32 %v9770_v10, %v9682_v13 }
 0x762   : > { %v9683_v5 = vpop.f32.mrf.mxu2  ;;  %v9772_v2 = vpop.f32.mrf.mxu3 }
 0x763   : > { %v9684_v38 = vadd.f32 %v9683_v5, %v17730_v14  ;;  %v9889_v14 = vmax.f32 %v9857_v50, 0.0 }
 0x765   : > { %v9773_v62 = vadd.f32 %v9772_v2, %v9684_v38  ;;  %v9915_v24 = vpack.c.bf16 %v9890_v18, %v9889_v14  ;;  %v19973_v38 = vld [vmem:[#allocation23_spill] sm:$0xff] }
 0x767   : > { %11959 = vmatmul.msk.bf16.gmra.mxu2 %vm19963_vm9, %v18010_v57  ;;  %11983 = vmatmul.msk.bf16.gmra.mxu3 %vm19965_vm3, %v19964_v11  ;;  %v9823_v57 = vmul.f32 %v17899_v30, %v9761_v63  ;;  %v9826_v63 = vmul.f32 %v17899_v30, %v9768_v25  ;;  %vm19986_vm9 = vmmov %vm19961_vm0 }
 0x768   : > { %vm19988_vm3 = vmmov %vm19961_vm0 }
 0x769   : > { %v9862_v52 = vadd.f32 %v17906_v33, %v9826_v63 }
 0x76a   : > { %v9686_v59 = vpop.f32.mrf.mxu2  ;;  %v9775_v1 = vpop.f32.mrf.mxu3 }
 0x76b   : > { %v9687_v15 = vadd.f32 %v9686_v59, %v17743_v61  ;;  %v9859_v61 = vadd.f32 %v17906_v33, %v9823_v57  ;;  %v9894_v37 = vmax.f32 %v9862_v52, 0.0 }
 0x76d   : > { %v9776_v8 = vadd.f32 %v9775_v1, %v9687_v15  ;;  %v9891_v34 = vmax.f32 %v9859_v61, 0.0 }
 0x772   : > { %v9688_v42 = vpop.f32.mrf.mxu2  ;;  %v9777_v7 = vpop.f32.mrf.mxu3 }
 0x773   : > { %v9689_v3 = vadd.f32 %v9688_v42, %v17757_v29  ;;  %v9916_v29 = vpack.c.bf16 %v9892_v53, %v9891_v34  ;;  %v19976_v42 = vld [vmem:[#allocation33_spill] sm:$0xff]  ;;  %v19979_v34 = vld [vmem:[#allocation56_spill] sm:$0xff] }
 0x775   : > { %v9778_v32 = vadd.f32 %v9777_v7, %v9689_v3 }
 0x777   : > { %11960 = vmatmul.msk.bf16.gmra.mxu2 %vm19966_vm4, %v9912_v55  ;;  %11984 = vmatmul.msk.bf16.gmra.mxu3 %vm19968_vm6, %v19967_v19  ;;  %v9825_v55 = vmul.f32 %v17899_v30, %v9766_v6  ;;  %v9828_v6 = vmul.f32 %v17899_v30, %v9773_v62  ;;  %vm19989_vm4 = vmmov %vm19961_vm0 }
 0x778   : > { %vm19991_vm6 = vmmov %vm19961_vm0 }
 0x779   : > { %v9864_v2 = vadd.f32 %v17906_v33, %v9828_v6 }
 0x77a   : > { %v9691_v51 = vpop.f32.mrf.mxu2  ;;  %v9780_v47 = vpop.f32.mrf.mxu3 }
 0x77b   : > { %v9692_v58 = vadd.f32 %v9691_v51, %v17770_v23  ;;  %v9861_v23 = vadd.f32 %v17906_v33, %v9825_v55  ;;  %v9896_v16 = vmax.f32 %v9864_v2, 0.0 }
 0x77d   : > { %v9781_v36 = vadd.f32 %v9780_v47, %v9692_v58  ;;  %v9893_v10 = vmax.f32 %v9861_v23, 0.0 }
 0x782   : > { %v9693_v40 = vpop.f32.mrf.mxu2  ;;  %v9782_v43 = vpop.f32.mrf.mxu3 }
 0x783   : > { %v9694_v48 = vadd.f32 %v9693_v40, %v17787_v46  ;;  %v9917_v46 = vpack.c.bf16 %v9894_v37, %v9893_v10 }
 0x785   : > { %v9783_v31 = vadd.f32 %v9782_v43, %v9694_v48 }
 0x787   : > { %11961 = vmatmul.msk.bf16.gmra.mxu2 %vm19969_vm2, %v9913_v41  ;;  %11985 = vmatmul.msk.bf16.gmra.mxu3 %vm19971_vm5, %v19970_v0  ;;  %v9827_v41 = vmul.f32 %v17899_v30, %v9771_v44  ;;  %v9830_v44 = vmul.f32 %v17899_v30, %v9778_v32  ;;  %vm19992_vm2 = vmmov %vm19961_vm0 }
 0x788   : > { %vm19994_vm5 = vmmov %vm19961_vm0 }
 0x789   : > { %v9866_v28 = vadd.f32 %v17906_v33, %v9830_v44 }
 0x78a   : > { %v9696_v20 = vpop.f32.mrf.mxu2  ;;  %v9785_v54 = vpop.f32.mrf.mxu3 }
 0x78b   : > { %v9697_v25 = vadd.f32 %v9696_v20, %v17800_v45  ;;  %v9863_v45 = vadd.f32 %v17906_v33, %v9827_v41  ;;  %v9898_v7 = vmax.f32 %v9866_v28, 0.0 }
 0x78d   : > { %v9786_v4 = vadd.f32 %v9785_v54, %v9697_v25  ;;  %v9895_v50 = vmax.f32 %v9863_v45, 0.0  ;;  %v19982_v54 = vld [vmem:[#allocation52_spill] sm:$0xff] }
 0x792   : > { %v9698_v13 = vpop.f32.mrf.mxu2  ;;  %v9787_v39 = vpop.f32.mrf.mxu3 }
 0x793   : > { %v9699_v60 = vadd.f32 %v9698_v13, %v17820_v12  ;;  %v9918_v12 = vpack.c.bf16 %v9896_v16, %v9895_v50 }
 0x795   : > { %v9788_v5 = vadd.f32 %v9787_v39, %v9699_v60 }
 0x797   : > { %11962 = vmatmul.msk.bf16.gmra.mxu2 %vm19972_vm12, %v9914_v22  ;;  %11986 = vmatmul.msk.bf16.gmra.mxu3 %vm19974_vm7, %v19973_v38  ;;  %v9829_v22 = vmul.f32 %v17899_v30, %v9776_v8  ;;  %v9832_v8 = vmul.f32 %v17899_v30, %v9783_v31  ;;  %vm19995_vm12 = vmmov %vm19961_vm0 }
 0x798   : > { %vm19997_vm7 = vmmov %vm19961_vm0 }
 0x799   : > { %v9868_v58 = vadd.f32 %v17906_v33, %v9832_v8 }
 0x79a   : > { %v9701_v17 = vpop.f32.mrf.mxu2  ;;  %v9790_v11 = vpop.f32.mrf.mxu3 }
 0x79b   : > { %v9702_v62 = vadd.f32 %v9701_v17, %v17830_v49  ;;  %v9865_v49 = vadd.f32 %v17906_v33, %v9829_v22  ;;  %v9900_v63 = vmax.f32 %v9868_v58, 0.0 }
 0x79d   : > { %v9791_v18 = vadd.f32 %v9790_v11, %v9702_v62  ;;  %v9897_v56 = vmax.f32 %v9865_v49, 0.0 }
 0x7a2   : > { %v9703_v59 = vpop.f32.mrf.mxu2  ;;  %v9792_v1 = vpop.f32.mrf.mxu3 }
 0x7a3   : > { %v9704_v15 = vadd.f32 %v9703_v59, %v17848_v27  ;;  %v9919_v27 = vpack.c.bf16 %v9898_v7, %v9897_v56  ;;  %v18132_v56 = vld [vmem:[%s18565_s14] ss:$0 sm:$0xff] }
 0x7a5   : > { %v9793_v14 = vadd.f32 %v9792_v1, %v9704_v15 }
 0x7a7   : > { %11963 = vmatmul.msk.bf16.gmra.mxu2 %vm19975_vm13, %v9915_v24  ;;  %11987 = vmatmul.msk.bf16.gmra.mxu3 %vm19977_vm8, %v19976_v42  ;;  %v9831_v24 = vmul.f32 %v17899_v30, %v9781_v36  ;;  %v9834_v36 = vmul.f32 %v17899_v30, %v9788_v5  ;;  %v9836_v60 = vmul.f32 %v17899_v30, %v9793_v14  ;;  %vm19998_vm13 = vmmov %vm19961_vm0 }
 0x7a8   : > { %vm20000_vm8 = vmmov %vm19961_vm0 }
 0x7a9   : > { %v9870_v20 = vadd.f32 %v17906_v33, %v9834_v36  ;;  %v9872_v5 = vadd.f32 %v17906_v33, %v9836_v60 }
 0x7aa   : > { %v9706_v3 = vpop.f32.mrf.mxu2  ;;  %v9795_v57 = vpop.f32.mrf.mxu3 }
 0x7ab   : > { %v9707_v32 = vadd.f32 %v9706_v3, %v17859_v35  ;;  %v9867_v35 = vadd.f32 %v17906_v33, %v9831_v24  ;;  %v9902_v25 = vmax.f32 %v9870_v20, 0.0  ;;  %v9904_v38 = vmax.f32 %v9872_v5, 0.0 }
 0x7ad   : > { %v9796_v19 = vadd.f32 %v9795_v57, %v9707_v32  ;;  %v9899_v55 = vmax.f32 %v9867_v35, 0.0  ;;  %v18127_v32 = vld [vmem:[%s18562_s11] ss:$0 sm:$0xff] }
 0x7b2   : > { %v9708_v61 = vpop.f32.mrf.mxu2  ;;  %v9797_v53 = vpop.f32.mrf.mxu3 }
 0x7b3   : > { %v9709_v51 = vadd.f32 %v9708_v61, %v17873_v26  ;;  %v9920_v26 = vpack.c.bf16 %v9900_v63, %v9899_v55  ;;  %v18143_v61 = vld [vmem:[%s18563_s12] ss:$0 sm:$0xff] }
 0x7b5   : > { %v9798_v47 = vadd.f32 %v9797_v53, %v9709_v51  ;;  %v18149_v51 = vld [vmem:[%s18566_s15] ss:$0 sm:$0xff] }
 0x7b7   : > { %11964 = vmatmul.msk.bf16.gmra.mxu2 %vm19978_vm11, %v9916_v29  ;;  %11988 = vmatmul.msk.bf16.gmra.mxu3 %vm19980_vm14, %v19979_v34  ;;  %v9833_v29 = vmul.f32 %v17899_v30, %v9786_v4  ;;  %v9835_v4 = vmul.f32 %v17899_v30, %v9791_v18  ;;  %v9838_v62 = vmul.f32 %v17899_v30, %v9798_v47  ;;  %vm20001_vm11 = vmmov %vm19961_vm0 }
 0x7b8   : > { %v9837_v18 = vmul.f32 %v17899_v30, %v9796_v19  ;;  %vm20003_vm14 = vmmov %vm19961_vm0 }
 0x7b9   : > { %v9871_v2 = vadd.f32 %v17906_v33, %v9835_v4  ;;  %v9874_v59 = vadd.f32 %v17906_v33, %v9838_v62 }
 0x7ba   : > { %v9711_v40 = vpop.f32.mrf.mxu2  ;;  %v9800_v43 = vpop.f32.mrf.mxu3  ;;  %v9873_v1 = vadd.f32 %v17906_v33, %v9837_v18 }
 0x7bb   : > { %v9712_v48 = vadd.f32 %v9711_v40, %v17882_v9  ;;  %v9869_v9 = vadd.f32 %v17906_v33, %v9833_v29  ;;  %v9903_v17 = vmax.f32 %v9871_v2, 0.0  ;;  %v9906_v15 = vmax.f32 %v9874_v59, 0.0 }
 0x7bc   : > { %v9905_v28 = vmax.f32 %v9873_v1, 0.0 }
 0x7bd   : > { %v9801_v31 = vadd.f32 %v9800_v43, %v9712_v48  ;;  %v9901_v13 = vmax.f32 %v9869_v9, 0.0  ;;  %v9922_v11 = vpack.c.bf16 %v9904_v38, %v9903_v17 }
 0x7be   : > { %v9923_v42 = vpack.c.bf16 %v9906_v15, %v9905_v28 }
 0x7bf   : > { %v9921_v39 = vpack.c.bf16 %v9902_v25, %v9901_v13  ;;  %v9839_v57 = vmul.f32 %v17899_v30, %v9801_v31 }
 0x7c1   : > { %v9875_v8 = vadd.f32 %v17906_v33, %v9839_v57 }
 0x7c2   : > { %v9713_v52 = vpop.f32.mrf.mxu2  ;;  %v9802_v0 = vpop.f32.mrf.mxu3 }
 0x7c3   : > { %v9714_v23 = vadd.f32 %v9713_v52, %v17887_v21  ;;  %v9907_v34 = vmax.f32 %v9875_v8, 0.0  ;;  %v19993_v52 = vld [vmem:[#allocation78_spill] sm:$0xff] }
 0x7c5   : > { %v9803_v37 = vadd.f32 %v9802_v0, %v9714_v23 }
 0x7c7   : > { %11965 = vmatmul.msk.bf16.gmra.mxu2 %vm19981_vm10, %v9917_v46  ;;  %11989 = vmatmul.msk.bf16.gmra.mxu3 %vm19983_vm15, %v19982_v54  ;;  %v19985_v46 = vld [vmem:[#allocation65_spill] sm:$0xff]  ;;  %v9840_v49 = vmul.f32 %v17899_v30, %v9803_v37 }
 0x7c9   : > { %v9876_v19 = vadd.f32 %v17906_v33, %v9840_v49 }
 0x7ca   : > { %v9998_v10 = vpop.f32.mrf.mxu2  ;;  %v10175_v6 = vpop.f32.mrf.mxu3 }
 0x7cb   : > { %v10082_v30 = vmul.f32 %v18127_v32, %v9998_v10  ;;  %v10259_v53 = vmul.f32 %v18132_v56, %v10175_v6  ;;  %v9908_v24 = vmax.f32 %v9876_v19, 0.0 }
 0x7cd   : > { %v10118_v33 = vadd.f32 %v18143_v61, %v10082_v30  ;;  %v10295_v35 = vadd.f32 %v18149_v51, %v10259_v53  ;;  %v9924_v63 = vpack.c.bf16 %v9908_v24, %v9907_v34  ;;  %v20002_v53 = vld [vmem:[#allocation105_spill] sm:$0xff] }
 0x7cf   : > { %v18155_v48 = vadd.f32 %v10295_v35, %v10118_v33 }
 0x7d2   : > { %v10000_v21 = vpop.f32.mrf.mxu2  ;;  %v10177_v41 = vpop.f32.mrf.mxu3 }
 0x7d3   : > { %v10083_v40 = vmul.f32 %v18127_v32, %v10000_v21  ;;  %v10260_v43 = vmul.f32 %v18132_v56, %v10177_v41  ;;  %v19996_v41 = vld [vmem:[#allocation111_spill] sm:$0xff] }
 0x7d5   : > { %v10296_v36 = vadd.f32 %v18149_v51, %v10260_v43 }
 0x7d7   : > { %11966 = vmatmul.msk.bf16.gmra.mxu2 %vm19984_vm1, %v9918_v12  ;;  %11990 = vmatmul.msk.bf16.gmra.mxu3 %vm19961_vm0, %v19985_v46  ;;  %v19987_v12 = vld [vmem:[#allocation72_spill] sm:$0xff] }
 0x7da   : > { %v10003_v45 = vpop.f32.mrf.mxu2  ;;  %v10180_v16 = vpop.f32.mrf.mxu3 }
 0x7db   : > { %v10084_v0 = vmul.f32 %v18127_v32, %v10003_v45  ;;  %v10261_v23 = vmul.f32 %v18132_v56, %v10180_v16 }
 0x7dd   : > { %v10120_v54 = vadd.f32 %v18143_v61, %v10084_v0  ;;  %v10297_v9 = vadd.f32 %v18149_v51, %v10261_v23 }
 0x7df   : > { %v18174_v6 = vadd.f32 %v10297_v9, %v10120_v54 }
 0x7e2   : > { %v10005_v50 = vpop.f32.mrf.mxu2  ;;  %v10182_v44 = vpop.f32.mrf.mxu3 }
 0x7e3   : > { %v10085_v25 = vmul.f32 %v18127_v32, %v10005_v50  ;;  %v10262_v10 = vmul.f32 %v18132_v56, %v10182_v44 }
 0x7e5   : > { %v10121_v60 = vadd.f32 %v18143_v61, %v10085_v25  ;;  %v10298_v21 = vadd.f32 %v18149_v51, %v10262_v10 }
 0x7e7   : > { %11967 = vmatmul.msk.bf16.gmra.mxu2 %vm19986_vm9, %v9919_v27  ;;  %11991 = vmatmul.msk.bf16.gmra.mxu3 %vm19988_vm3, %v19987_v12  ;;  %v19990_v27 = vld [vmem:[#allocation69_spill] sm:$0xff]  ;;  %v18187_v46 = vadd.f32 %v10298_v21, %v10121_v60 }
 0x7e8   : > { %v19999_v12 = vld [vmem:[#allocation89_spill] sm:$0xff] }
 0x7ea   : > { %v10008_v22 = vpop.f32.mrf.mxu2  ;;  %v10185_v14 = vpop.f32.mrf.mxu3 }
 0x7eb   : > { %v10086_v4 = vmul.f32 %v18127_v32, %v10008_v22  ;;  %v10263_v5 = vmul.f32 %v18132_v56, %v10185_v14 }
 0x7ed   : > { %v10122_v45 = vadd.f32 %v18143_v61, %v10086_v4  ;;  %v10299_v16 = vadd.f32 %v18149_v51, %v10263_v5 }
 0x7f2   : > { %v10010_v7 = vpop.f32.mrf.mxu2  ;;  %v10187_v3 = vpop.f32.mrf.mxu3 }
 0x7f3   : > { %v10087_v17 = vmul.f32 %v18127_v32, %v10010_v7  ;;  %v10264_v62 = vmul.f32 %v18132_v56, %v10187_v3 }
 0x7f5   : > { %v10123_v18 = vadd.f32 %v18143_v61, %v10087_v17  ;;  %v10300_v59 = vadd.f32 %v18149_v51, %v10264_v62 }
 0x7f7   : > { %11968 = vmatmul.msk.bf16.gmra.mxu2 %vm19989_vm4, %v9920_v26  ;;  %11992 = vmatmul.msk.bf16.gmra.mxu3 %vm19991_vm6, %v19990_v27  ;;  %v10119_v26 = vadd.f32 %v18143_v61, %v10083_v40  ;;  %v18202_v22 = vadd.f32 %v10300_v59, %v10123_v18 }
 0x7f9   : > { %v18164_v29 = vadd.f32 %v10296_v36, %v10119_v26 }
 0x7fa   : > { %v10013_v47 = vpop.f32.mrf.mxu2  ;;  %v10190_v58 = vpop.f32.mrf.mxu3 }
 0x7fb   : > { %v10088_v1 = vmul.f32 %v18127_v32, %v10013_v47  ;;  %v10265_v15 = vmul.f32 %v18132_v56, %v10190_v58 }
 0x7fd   : > { %v10124_v49 = vadd.f32 %v18143_v61, %v10088_v1  ;;  %v10301_v7 = vadd.f32 %v18149_v51, %v10265_v15 }
 0x802   : > { %v10015_v55 = vpop.f32.mrf.mxu2  ;;  %v10192_v31 = vpop.f32.mrf.mxu3 }
 0x803   : > { %v10089_v3 = vmul.f32 %v18127_v32, %v10015_v55  ;;  %v10266_v57 = vmul.f32 %v18132_v56, %v10192_v31 }
 0x805   : > { %v10125_v8 = vadd.f32 %v18143_v61, %v10089_v3  ;;  %v10302_v30 = vadd.f32 %v18149_v51, %v10266_v57 }
 0x807   : > { %11969 = vmatmul.msk.bf16.gmra.mxu2 %vm19992_vm2, %v9921_v39  ;;  %11993 = vmatmul.msk.bf16.gmra.mxu3 %vm19994_vm5, %v19993_v52  ;;  %v18215_v24 = vadd.f32 %v10302_v30, %v10125_v8 }
 0x80a   : > { %v18166_v37 = vpop.f32.mrf.mxu2  ;;  %v18168_v20 = vpop.f32.mrf.mxu3 }
 0x80b   : > { %v10267_v59 = vmul.f32 %v18132_v56, %v18168_v20 }
 0x80d   : > { %v10303_v3 = vadd.f32 %v18149_v51, %v10267_v59 }
 0x812   : > { %v18176_v13 = vpop.f32.mrf.mxu2  ;;  %v18178_v39 = vpop.f32.mrf.mxu3 }
 0x813   : > { %v10091_v17 = vmul.f32 %v18127_v32, %v18176_v13  ;;  %v10268_v62 = vmul.f32 %v18132_v56, %v18178_v39 }
 0x817   : > { %11970 = vmatmul.msk.bf16.gmra.mxu2 %vm19995_vm12, %v9922_v11  ;;  %11994 = vmatmul.msk.bf16.gmra.mxu3 %vm19997_vm7, %v19996_v41  ;;  %v18193_v11 = vadd.f32 %v10299_v16, %v10122_v45 }
 0x81a   : > { %v10023_v2 = vpop.f32.mrf.mxu2  ;;  %v10200_v38 = vpop.f32.mrf.mxu3 }
 0x81b   : > { %v10092_v21 = vmul.f32 %v18127_v32, %v10023_v2  ;;  %v10269_v41 = vmul.f32 %v18132_v56, %v10200_v38  ;;  %v10090_v38 = vmul.f32 %v18127_v32, %v18166_v37 }
 0x81d   : > { %v10128_v13 = vadd.f32 %v18143_v61, %v10092_v21  ;;  %v10305_v39 = vadd.f32 %v18149_v51, %v10269_v41  ;;  %v10126_v20 = vadd.f32 %v18143_v61, %v10090_v38 }
 0x822   : > { %v10025_v50 = vpop.f32.mrf.mxu2  ;;  %v10202_v44 = vpop.f32.mrf.mxu3 }
 0x823   : > { %v10093_v23 = vmul.f32 %v18127_v32, %v10025_v50  ;;  %v10270_v54 = vmul.f32 %v18132_v56, %v10202_v44 }
 0x825   : > { %v10129_v50 = vadd.f32 %v18143_v61, %v10093_v23  ;;  %v10306_v44 = vadd.f32 %v18149_v51, %v10270_v54 }
 0x827   : > { %11971 = vmatmul.msk.bf16.gmra.mxu2 %vm19998_vm13, %v9923_v42  ;;  %11995 = vmatmul.msk.bf16.gmra.mxu3 %vm20000_vm8, %v19999_v12  ;;  %v18208_v42 = vadd.f32 %v10301_v7, %v10124_v49  ;;  %v10304_v49 = vadd.f32 %v18149_v51, %v10268_v62  ;;  %v10338_v7 = vadd.f32 %v10306_v44, %v10129_v50 }
 0x82a   : > { %v10028_v14 = vpop.f32.mrf.mxu2  ;;  %v10205_v28 = vpop.f32.mrf.mxu3 }
 0x82b   : > { %v10094_v43 = vmul.f32 %v18127_v32, %v10028_v14  ;;  %v10271_v55 = vmul.f32 %v18132_v56, %v10205_v28  ;;  %v10127_v28 = vadd.f32 %v18143_v61, %v10091_v17 }
 0x82d   : > { %v10130_v4 = vadd.f32 %v18143_v61, %v10094_v43  ;;  %v10307_v5 = vadd.f32 %v18149_v51, %v10271_v55  ;;  %v10336_v8 = vadd.f32 %v10304_v49, %v10127_v28  ;;  %v10365_v55 = vmax.f32 %v18208_v42, 0.0 }
 0x82e   : > { %v10359_v42 = vmax.f32 %v18155_v48, 0.0 }
 0x82f   : > { %v10339_v14 = vadd.f32 %v10307_v5, %v10130_v4 }
 0x831   : > { %v10371_v57 = vmax.f32 %v10339_v14, 0.0 }
 0x832   : > { %v10030_v19 = vpop.f32.mrf.mxu2  ;;  %v10207_v27 = vpop.f32.mrf.mxu3 }
 0x833   : > { %v10095_v35 = vmul.f32 %v18127_v32, %v10030_v19  ;;  %v10272_v40 = vmul.f32 %v18132_v56, %v10207_v27  ;;  %v10337_v19 = vadd.f32 %v10305_v39, %v10128_v13  ;;  %v10370_v27 = vmax.f32 %v10338_v7, 0.0 }
 0x835   : > { %v10131_v9 = vadd.f32 %v18143_v61, %v10095_v35  ;;  %v10308_v25 = vadd.f32 %v18149_v51, %v10272_v40  ;;  %v10366_v35 = vmax.f32 %v18215_v24, 0.0  ;;  %v10361_v24 = vmax.f32 %v18174_v6, 0.0 }
 0x837   : > { %11972 = vmatmul.msk.bf16.gmra.mxu2 %vm20001_vm11, %v9924_v63  ;;  %11996 = vmatmul.msk.bf16.gmra.mxu3 %vm20003_vm14, %v20002_v53  ;;  %v10340_v2 = vadd.f32 %v10308_v25, %v10131_v9 }
 0x839   : > { %v10372_v37 = vmax.f32 %v10340_v2, 0.0 }
 0x83a   : > { %v10033_v47 = vpop.f32.mrf.mxu2  ;;  %v10210_v58 = vpop.f32.mrf.mxu3 }
 0x83b   : > { %v10096_v34 = vmul.f32 %v18127_v32, %v10033_v47  ;;  %v10273_v33 = vmul.f32 %v18132_v56, %v10210_v58  ;;  %v10369_v47 = vmax.f32 %v10337_v19, 0.0  ;;  %v10335_v58 = vadd.f32 %v10303_v3, %v10126_v20 }
 0x83d   : > { %v10132_v26 = vadd.f32 %v18143_v61, %v10096_v34  ;;  %v10309_v36 = vadd.f32 %v18149_v51, %v10273_v33  ;;  %v10368_v34 = vmax.f32 %v10336_v8, 0.0  ;;  %v10367_v33 = vmax.f32 %v10335_v58, 0.0 }
 0x83f   : > { %v10341_v16 = vadd.f32 %v10309_v36, %v10132_v26  ;;  %v10362_v26 = vmax.f32 %v18187_v46, 0.0 }
 0x841   : > { %v10373_v15 = vmax.f32 %v10341_v16, 0.0 }
 0x842   : > { %v10035_v63 = vpop.f32.mrf.mxu2  ;;  %v10212_v31 = vpop.f32.mrf.mxu3 }
 0x843   : > { %v10097_v52 = vmul.f32 %v18127_v32, %v10035_v63  ;;  %v10274_v0 = vmul.f32 %v18132_v56, %v10212_v31  ;;  %v10364_v63 = vmax.f32 %v18202_v22, 0.0  ;;  %v10363_v31 = vmax.f32 %v18193_v11, 0.0 }
 0x845   : > { %v10133_v10 = vadd.f32 %v18143_v61, %v10097_v52  ;;  %v10310_v60 = vadd.f32 %v18149_v51, %v10274_v0  ;;  %v10360_v0 = vmax.f32 %v18164_v29, 0.0 }
 0x847   : > { %v10342_v45 = vadd.f32 %v10310_v60, %v10133_v10 }
 0x849   : > { %v10374_v18 = vmax.f32 %v10342_v45, 0.0 }
 0x84a   : > { %v18247_v12 = vpop.f32.mrf.mxu2  ;;  %v18249_v1 = vpop.f32.mrf.mxu3 }
 0x84b   : > { %10505 = vmatpush.msra.mxu2 %v10374_v18 }
 0x84d   : > { %10506 = vmatpush.msra.mxu2 %v10373_v15 }
 0x84f   : > { %10507 = vmatpush.msra.mxu2 %v10372_v37 }
 0x851   : > { %10508 = vmatpush.msra.mxu2 %v10371_v57 }
 0x852   : > { %v18257_v30 = vpop.f32.mrf.mxu2  ;;  %v18259_v53 = vpop.f32.mrf.mxu3 }
 0x853   : > { %10509 = vmatpush.msra.mxu2 %v10370_v27 }
 0x855   : > { %10510 = vmatpush.msra.mxu2 %v10369_v47 }
 0x857   : > { %10511 = vmatpush.msra.mxu2 %v10368_v34 }
 0x859   : > { %10512 = vmatpush.msra.mxu2 %v10367_v33 }
 0x85a   : > { %v18262_v40 = vpop.f32.mrf.mxu2  ;;  %v18264_v43 = vpop.f32.mrf.mxu3 }
 0x85b   : > { %10513 = vmatpush.msra.mxu2 %v10366_v35 }
 0x85d   : > { %10514 = vmatpush.msra.mxu2 %v10365_v55 }
 0x85f   : > { %10515 = vmatpush.msra.mxu2 %v10364_v63 }
 0x861   : > { %10516 = vmatpush.msra.mxu2 %v10363_v31 }
 0x862   : > { %v18270_v36 = vpop.f32.mrf.mxu2  ;;  %v18272_v52 = vpop.f32.mrf.mxu3 }
 0x863   : > { %10517 = vmatpush.msra.mxu2 %v10362_v26 }
 0x865   : > { %10518 = vmatpush.msra.mxu2 %v10361_v24 }
 0x867   : > { %10519 = vmatpush.msra.mxu2 %v10360_v0 }
 0x869   : > { %10520 = vmatpush.msra.mxu2 %v10359_v42 }
 0x86a   : > { %v18277_v22 = vpop.f32.mrf.mxu2  ;;  %v18279_v11 = vpop.f32.mrf.mxu3 }
 0x872   : > { %v18281_v23 = vpop.f32.mrf.mxu2  ;;  %v18283_v46 = vpop.f32.mrf.mxu3 }
 0x87a   : > { %v18285_v54 = vpop.f32.mrf.mxu2  ;;  %v18287_v9 = vpop.f32.mrf.mxu3 }
 0x882   : > { %v10055_v6 = vpop.f32.mrf.mxu2  ;;  %v10232_v25 = vpop.f32.mrf.mxu3 }
 0x88a   : > { %v10058_v10 = vpop.f32.mrf.mxu2  ;;  %v10235_v29 = vpop.f32.mrf.mxu3 }
 0x892   : > { %v10060_v60 = vpop.f32.mrf.mxu2  ;;  %v10237_v21 = vpop.f32.mrf.mxu3 }
 0x893   : > { %v10107_v63 = vmul.f32 %v18127_v32, %v10060_v60  ;;  %v10284_v31 = vmul.f32 %v18132_v56, %v10237_v21 }
 0x89a   : > { %v10063_v48 = vpop.f32.mrf.mxu2  ;;  %v10240_v41 = vpop.f32.mrf.mxu3 }
 0x89b   : > { %v10108_v47 = vmul.f32 %v18127_v32, %v10063_v48  ;;  %v10285_v58 = vmul.f32 %v18132_v56, %v10240_v41  ;;  %v10423_v48 = vld [vmem:[%s18567_s16] sm:$0xff]  ;;  %v10106_v41 = vmul.f32 %v18127_v32, %v10058_v10 }
 0x89c   : > { %10521 = vmatmul.f32.vlgmr.msra.gmra.mxu2 %v10423_v48 }
 0x89d   : > { %v10321_v60 = vadd.f32 %v18149_v51, %v10285_v58 }
 0x8a2   : > { %v10065_v4 = vpop.f32.mrf.mxu2  ;;  %v10242_v5 = vpop.f32.mrf.mxu3 }
 0x8a3   : > { %v10109_v20 = vmul.f32 %v18127_v32, %v10065_v4  ;;  %v10286_v3 = vmul.f32 %v18132_v56, %v10242_v5  ;;  %v10283_v4 = vmul.f32 %v18132_v56, %v10235_v29  ;;  %v10144_v5 = vadd.f32 %v18143_v61, %v10108_v47 }
 0x8a4   : > { %v10104_v29 = vmul.f32 %v18127_v32, %v18285_v54  ;;  %v10280_v54 = vmul.f32 %v18132_v56, %v18283_v46 }
 0x8a5   : > { %v10145_v26 = vadd.f32 %v18143_v61, %v10109_v20  ;;  %v10322_v24 = vadd.f32 %v18149_v51, %v10286_v3  ;;  %v10101_v20 = vmul.f32 %v18127_v32, %v18270_v36  ;;  %v10278_v3 = vmul.f32 %v18132_v56, %v18272_v52 }
 0x8aa   : > { %v10068_v45 = vpop.f32.mrf.mxu2  ;;  %v10245_v16 = vpop.f32.mrf.mxu3 }
 0x8ab   : > { %v10110_v13 = vmul.f32 %v18127_v32, %v10068_v45  ;;  %v10287_v39 = vmul.f32 %v18132_v56, %v10245_v16  ;;  %v10105_v16 = vmul.f32 %v18127_v32, %v10055_v6 }
 0x8ad   : > { %v10146_v34 = vadd.f32 %v18143_v61, %v10110_v13  ;;  %v10323_v33 = vadd.f32 %v18149_v51, %v10287_v39  ;;  %v10103_v13 = vmul.f32 %v18127_v32, %v18281_v23  ;;  %v10141_v39 = vadd.f32 %v18143_v61, %v10105_v16 }
 0x8af   : > { %v10355_v45 = vadd.f32 %v10323_v33, %v10146_v34  ;;  %v10427_v34 = vld [vmem:[%s18567_s16 + $0x20] sm:$0xff]  ;;  %v10099_v33 = vmul.f32 %v18127_v32, %v18257_v30 }
 0x8b1   : > { %v10387_v6 = vmax.f32 %v10355_v45, 0.0 }
 0x8b2   : > { %v10070_v17 = vpop.f32.mrf.mxu2  ;;  %v10247_v62 = vpop.f32.mrf.mxu3 }
 0x8b3   : > { %v10111_v38 = vmul.f32 %v18127_v32, %v10070_v17  ;;  %v10288_v59 = vmul.f32 %v18132_v56, %v10247_v62  ;;  %v10282_v17 = vmul.f32 %v18132_v56, %v10232_v25  ;;  %v10143_v62 = vadd.f32 %v18143_v61, %v10107_v63 }
 0x8b4   : > { %v10353_v25 = vadd.f32 %v10321_v60, %v10144_v5  ;;  %v10429_v5 = vld [vmem:[%s18567_s16 + $0x30] sm:$0xff] }
 0x8b5   : > { %v10147_v57 = vadd.f32 %v18143_v61, %v10111_v38  ;;  %v10324_v19 = vadd.f32 %v18149_v51, %v10288_v59  ;;  %v10319_v38 = vadd.f32 %v18149_v51, %v10283_v4  ;;  %v10425_v59 = vld [vmem:[%s18567_s16 + $0x10] sm:$0xff] }
 0x8b6   : > { %10524 = vmatmul.f32.gmra.mxu2 %v10425_v59  ;;  %v10385_v46 = vmax.f32 %v10353_v25, 0.0  ;;  %v10434_v25 = vld [vmem:[%s18567_s16 + $0x58] sm:$0xff]  ;;  %v10441_v59 = vld [vmem:[%s18567_s16 + $0x90] sm:$0xff] }
 0x8b7   : > { %v10356_v42 = vadd.f32 %v10324_v19, %v10147_v57  ;;  %v10139_v57 = vadd.f32 %v18143_v61, %v10103_v13  ;;  %v10436_v13 = vld [vmem:[%s18567_s16 + $0x68] sm:$0xff] }
 0x8b9   : > { %v10388_v10 = vmax.f32 %v10356_v42, 0.0  ;;  %v10135_v42 = vadd.f32 %v18143_v61, %v10099_v33  ;;  %v10463_v33 = vld [vmem:[%s18567_s16 + $0x140] sm:$0xff] }
 0x8ba   : > { %v10073_v50 = vpop.f32.mrf.mxu2  ;;  %v10250_v44 = vpop.f32.mrf.mxu3 }
 0x8bb   : > { %v10112_v18 = vmul.f32 %v18127_v32, %v10073_v50  ;;  %v10289_v2 = vmul.f32 %v18132_v56, %v10250_v44  ;;  %v10320_v50 = vadd.f32 %v18149_v51, %v10284_v31  ;;  %v10354_v44 = vadd.f32 %v10322_v24, %v10145_v26 }
 0x8bc   : > { %v10098_v31 = vmul.f32 %v18127_v32, %v18247_v12  ;;  %v10275_v26 = vmul.f32 %v18132_v56, %v18249_v1 }
 0x8bd   : > { %v10148_v28 = vadd.f32 %v18143_v61, %v10112_v18  ;;  %v10325_v49 = vadd.f32 %v18149_v51, %v10289_v2  ;;  %v10281_v18 = vmul.f32 %v18132_v56, %v18287_v9  ;;  %v10142_v2 = vadd.f32 %v18143_v61, %v10106_v41 }
 0x8be   : > { %v10318_v9 = vadd.f32 %v18149_v51, %v10282_v17  ;;  %10527 = vmatmul.f32.gmra.mxu2 %v10427_v34  ;;  %v10311_v12 = vadd.f32 %v18149_v51, %v10275_v26  ;;  %v10456_v34 = vld [vmem:[%s18567_s16 + $0x108] sm:$0xff] }
 0x8bf   : > { %v10357_v55 = vadd.f32 %v10325_v49, %v10148_v28  ;;  %v10102_v28 = vmul.f32 %v18127_v32, %v18277_v22  ;;  %v10279_v49 = vmul.f32 %v18132_v56, %v18279_v11  ;;  %v10317_v23 = vadd.f32 %v18149_v51, %v10281_v18  ;;  %v10430_v18 = vld [vmem:[%s18567_s16 + $0x38] sm:$0xff] }
 0x8c0   : > { %v10316_v22 = vadd.f32 %v18149_v51, %v10280_v54  ;;  %v10350_v19 = vadd.f32 %v10318_v9, %v10141_v39  ;;  %v10443_v54 = vld [vmem:[%s18567_s16 + $0xa0] sm:$0xff]  ;;  %v10438_v39 = vld [vmem:[%s18567_s16 + $0x78] sm:$0xff]  ;;  %v10445_v9 = vld [vmem:[%s18567_s16 + $0xb0] sm:$0xff] }
 0x8c1   : > { %v10389_v21 = vmax.f32 %v10357_v55, 0.0  ;;  %v10138_v47 = vadd.f32 %v18143_v61, %v10102_v28  ;;  %v10315_v36 = vadd.f32 %v18149_v51, %v10279_v49  ;;  %v10442_v28 = vld [vmem:[%s18567_s16 + $0x98] sm:$0xff]  ;;  %v10449_v49 = vld [vmem:[%s18567_s16 + $0xd0] sm:$0xff] }
 0x8c2   : > { %v10075_v15 = vpop.f32.mrf.mxu2  ;;  %v10252_v14 = vpop.f32.mrf.mxu3  ;;  %v10382_v55 = vmax.f32 %v10350_v19, 0.0  ;;  %v10348_v63 = vadd.f32 %v10316_v22, %v10139_v57  ;;  %v10450_v22 = vld [vmem:[%s18567_s16 + $0xd8] sm:$0xff] }
 0x8c3   : > { %v10113_v37 = vmul.f32 %v18127_v32, %v10075_v15  ;;  %v10290_v7 = vmul.f32 %v18132_v56, %v10252_v14  ;;  %v10386_v15 = vmax.f32 %v10354_v44, 0.0  ;;  %v10352_v14 = vadd.f32 %v10320_v50, %v10143_v62  ;;  %v10431_v62 = vld [vmem:[%s18567_s16 + $0x40] sm:$0xff]  ;;  %v10426_v50 = vld [vmem:[%s18567_s16 + $0x18] sm:$0xff]  ;;  %v10428_v44 = vld [vmem:[%s18567_s16 + $0x28] sm:$0xff] }
 0x8c4   : > { %v10380_v41 = vmax.f32 %v10348_v63, 0.0  ;;  %v10465_v63 = vld [vmem:[%s18567_s16 + $0x150] sm:$0xff] }
 0x8c5   : > { %v10149_v27 = vadd.f32 %v18143_v61, %v10113_v37  ;;  %v10326_v8 = vadd.f32 %v18149_v51, %v10290_v7  ;;  %v10140_v37 = vadd.f32 %v18143_v61, %v10104_v29  ;;  %v10351_v7 = vadd.f32 %v10319_v38, %v10142_v2  ;;  %v10435_v29 = vld [vmem:[%s18567_s16 + $0x60] sm:$0xff]  ;;  %v10437_v2 = vld [vmem:[%s18567_s16 + $0x70] sm:$0xff]  ;;  %v10432_v38 = vld [vmem:[%s18567_s16 + $0x48] sm:$0xff] }
 0x8c6   : > { %v10384_v11 = vmax.f32 %v10352_v14, 0.0  ;;  %10530 = vmatmul.f32.gmra.mxu2 %v10429_v5  ;;  %v10447_v14 = vld [vmem:[%s18567_s16 + $0xc0] sm:$0xff] }
 0x8c7   : > { %v10358_v35 = vadd.f32 %v10326_v8, %v10149_v27  ;;  %v10100_v27 = vmul.f32 %v18127_v32, %v18262_v40  ;;  %v10277_v8 = vmul.f32 %v18132_v56, %v18264_v43  ;;  %v10383_v58 = vmax.f32 %v10351_v7, 0.0  ;;  %v10453_v7 = vld [vmem:[%s18567_s16 + $0xf0] sm:$0xff]  ;;  %v10471_v5 = vld [vmem:[%s18567_s16 + $0x180] sm:$0xf] }
 0x8c8   : > { %v10349_v52 = vadd.f32 %v10317_v23, %v10140_v37  ;;  %v10276_v40 = vmul.f32 %v18132_v56, %v18259_v53  ;;  %v10314_v43 = vadd.f32 %v18149_v51, %v10278_v3  ;;  %v10134_v32 = vadd.f32 %v18143_v61, %v10098_v31  ;;  %v10444_v37 = vld [vmem:[%s18567_s16 + $0xa8] sm:$0xff]  ;;  %v10451_v23 = vld [vmem:[%s18567_s16 + $0xe0] sm:$0xff] }
 0x8c9   : > { %v10390_v0 = vmax.f32 %v10358_v35, 0.0  ;;  %v10137_v35 = vadd.f32 %v18143_v61, %v10101_v20  ;;  %v10136_v24 = vadd.f32 %v18143_v61, %v10100_v27  ;;  %v10313_v30 = vadd.f32 %v18149_v51, %v10277_v8  ;;  %v10448_v20 = vld [vmem:[%s18567_s16 + $0xc8] sm:$0xff]  ;;  %v10455_v3 = vld [vmem:[%s18567_s16 + $0x100] sm:$0xff] }
 0x8ca   : > { %v10381_v53 = vmax.f32 %v10349_v52, 0.0  ;;  %v10312_v48 = vadd.f32 %v18149_v51, %v10276_v40  ;;  %v10343_v16 = vadd.f32 %v10311_v12, %v10134_v32  ;;  %v10424_v51 = vld [vmem:[%s18567_s16 + $0x8] sm:$0xff]  ;;  %v10459_v8 = vld [vmem:[%s18567_s16 + $0x120] sm:$0xff] }
 0x8cb   : > { %10597 = vmatpush.msrb.mxu3 %v10390_v0  ;;  %v10347_v0 = vadd.f32 %v10315_v36, %v10138_v47  ;;  %v10346_v4 = vadd.f32 %v10314_v43, %v10137_v35  ;;  %v10345_v1 = vadd.f32 %v10313_v30, %v10136_v24  ;;  %v10452_v27 = vld [vmem:[%s18567_s16 + $0xe8] sm:$0xff]  ;;  %v10454_v36 = vld [vmem:[%s18567_s16 + $0xf8] sm:$0xff] }
 0x8cc   : > { %v10375_v61 = vmax.f32 %v10343_v16, 0.0  ;;  %v10460_v30 = vld [vmem:[%s18567_s16 + $0x128] sm:$0xff]  ;;  %v10466_v16 = vld [vmem:[%s18567_s16 + $0x158] sm:$0xff] }
 0x8cd   : > { %10598 = vmatpush.msrb.mxu3 %v10389_v21  ;;  %v10379_v56 = vmax.f32 %v10347_v0, 0.0  ;;  %v10378_v60 = vmax.f32 %v10346_v4, 0.0  ;;  %v10344_v21 = vadd.f32 %v10312_v48, %v10135_v42  ;;  %v10377_v45 = vmax.f32 %v10345_v1, 0.0  ;;  %v10469_v4 = vld [vmem:[%s18567_s16 + $0x170] sm:$0xff]  ;;  %v10464_v1 = vld [vmem:[%s18567_s16 + $0x148] sm:$0xff] }
 0x8ce   : > { %10533 = vmatmul.f32.gmra.mxu2 %v10431_v62  ;;  %v10468_v62 = vld [vmem:[%s18567_s16 + $0x168] sm:$0xff] }
 0x8cf   : > { %10599 = vmatpush.msrb.mxu3 %v10388_v10  ;;  %v10376_v17 = vmax.f32 %v10344_v21, 0.0  ;;  %v10433_v10 = vld [vmem:[%s18567_s16 + $0x50] sm:$0xff] }
 0x8d1   : > { %10600 = vmatpush.msrb.mxu3 %v10387_v6  ;;  %v10439_v6 = vld [vmem:[%s18567_s16 + $0x80] sm:$0xff] }
 0x8d3   : > { %10601 = vmatpush.msrb.mxu3 %v10386_v15  ;;  %v10440_v15 = vld [vmem:[%s18567_s16 + $0x88] sm:$0xff] }
 0x8d5   : > { %10602 = vmatpush.msrb.mxu3 %v10385_v46  ;;  %v10446_v46 = vld [vmem:[%s18567_s16 + $0xb8] sm:$0xff] }
 0x8d6   : > { %10536 = vmatmul.f32.gmra.mxu2 %v10433_v10 }
 0x8d7   : > { %10603 = vmatpush.msrb.mxu3 %v10384_v11  ;;  %v10457_v11 = vld [vmem:[%s18567_s16 + $0x110] sm:$0xff] }
 0x8d9   : > { %10604 = vmatpush.msrb.mxu3 %v10383_v58  ;;  %v10461_v58 = vld [vmem:[%s18567_s16 + $0x130] sm:$0xff] }
 0x8db   : > { %10605 = vmatpush.msrb.mxu3 %v10382_v55  ;;  %v10458_v55 = vld [vmem:[%s18567_s16 + $0x118] sm:$0xff] }
 0x8dd   : > { %10606 = vmatpush.msrb.mxu3 %v10381_v53  ;;  %v10467_v53 = vld [vmem:[%s18567_s16 + $0x160] sm:$0xff] }
 0x8de   : > { %10539 = vmatmul.f32.gmra.mxu2 %v10435_v29 }
 0x8df   : > { %10607 = vmatpush.msrb.mxu3 %v10380_v41  ;;  %v10462_v41 = vld [vmem:[%s18567_s16 + $0x138] sm:$0xff] }
 0x8e1   : > { %10608 = vmatpush.msrb.mxu3 %v10379_v56 }
 0x8e3   : > { %10609 = vmatpush.msrb.mxu3 %v10378_v60 }
 0x8e5   : > { %10610 = vmatpush.msrb.mxu3 %v10377_v45 }
 0x8e6   : > { %10542 = vmatmul.f32.gmra.mxu2 %v10437_v2 }
 0x8e7   : > { %10611 = vmatpush.msrb.mxu3 %v10376_v17 }
 0x8e9   : > { %10612 = vmatpush.msrb.mxu3 %v10375_v61 }
 0x8ea   : > { %10613 = vmatmul.f32.vlgmr.msrb.gmra.mxu3 %v10424_v51 }
 0x8ee   : > { %10545 = vmatmul.f32.gmra.mxu2 %v10439_v6 }
 0x8f2   : > { %10616 = vmatmul.f32.gmra.mxu3 %v10426_v50 }
 0x8f6   : > { %10548 = vmatmul.f32.gmra.mxu2 %v10441_v59 }
 0x8fa   : > { %10619 = vmatmul.f32.gmra.mxu3 %v10428_v44  ;;  %v10470_v44 = vld [vmem:[%s18567_s16 + $0x178] sm:$0xff] }
 0x8fe   : > { %10551 = vmatmul.f32.gmra.mxu2 %v10443_v54 }
 0x902   : > { %10622 = vmatmul.f32.gmra.mxu3 %v10430_v18 }
 0x906   : > { %10554 = vmatmul.f32.gmra.mxu2 %v10445_v9 }
 0x90a   : > { %10625 = vmatmul.f32.gmra.mxu3 %v10432_v38  ;;  %v10472_v38 = vld [vmem:[%s18567_s16 + $0x188] sm:$0xf] }
 0x90e   : > { %10557 = vmatmul.f32.gmra.mxu2 %v10447_v14 }
 0x912   : > { %10628 = vmatmul.f32.gmra.mxu3 %v10434_v25 }
 0x916   : > { %10560 = vmatmul.f32.gmra.mxu2 %v10449_v49 }
 0x91a   : > { %10631 = vmatmul.f32.gmra.mxu3 %v10436_v13 }
 0x91e   : > { %10563 = vmatmul.f32.gmra.mxu2 %v10451_v23 }
 0x91f   : > { %v10522_v57 = vpop.f32.mrf.mxu2 }
 0x922   : > { %10634 = vmatmul.f32.gmra.mxu3 %v10438_v39 }
 0x926   : > { %10566 = vmatmul.f32.gmra.mxu2 %v10453_v7 }
 0x92a   : > { %10637 = vmatmul.f32.gmra.mxu3 %v10440_v15 }
 0x92e   : > { %10569 = vmatmul.f32.gmra.mxu2 %v10455_v3 }
 0x932   : > { %10640 = vmatmul.f32.gmra.mxu3 %v10442_v28 }
 0x936   : > { %10572 = vmatmul.f32.gmra.mxu2 %v10457_v11 }
 0x939   : > { %v10525_v19 = vpop.f32.mrf.mxu2 }
 0x93a   : > { %10643 = vmatmul.f32.gmra.mxu3 %v10444_v37 }
 0x93e   : > { %10575 = vmatmul.f32.gmra.mxu2 %v10459_v8 }
 0x941   : > { %v10528_v47 = vpop.f32.mrf.mxu2 }
 0x942   : > { %10646 = vmatmul.f32.gmra.mxu3 %v10446_v46 }
 0x946   : > { %10578 = vmatmul.f32.gmra.mxu2 %v10461_v58 }
 0x949   : > { %v10531_v52 = vpop.f32.mrf.mxu2 }
 0x94a   : > { %10649 = vmatmul.f32.gmra.mxu3 %v10448_v20 }
 0x94e   : > { %10581 = vmatmul.f32.gmra.mxu2 %v10463_v33 }
 0x951   : > { %v10534_v35 = vpop.f32.mrf.mxu2 }
 0x952   : > { %10652 = vmatmul.f32.gmra.mxu3 %v10450_v22 }
 0x956   : > { %10584 = vmatmul.f32.gmra.mxu2 %v10465_v63 }
 0x959   : > { %v10537_v26 = vpop.f32.mrf.mxu2 }
 0x95a   : > { %10655 = vmatmul.f32.gmra.mxu3 %v10452_v27 }
 0x95e   : > { %10587 = vmatmul.f32.gmra.mxu2 %v10467_v53 }
 0x961   : > { %v10540_v42 = vpop.f32.mrf.mxu2 }
 0x962   : > { %10658 = vmatmul.f32.gmra.mxu3 %v10454_v36 }
 0x966   : > { %10590 = vmatmul.f32.gmra.mxu2 %v10469_v4 }
 0x969   : > { %v10543_v12 = vpop.f32.mrf.mxu2 }
 0x96a   : > { %10661 = vmatmul.f32.gmra.mxu3 %v10456_v34 }
 0x96d   : > { %v10614_v40 = vpop.f32.mrf.mxu3 }
 0x96e   : > { %v10615_v43 = vadd.f32 %v10614_v40, %v10522_v57  ;;  %10593 = vmatmul.f32.gmra.mxu2 %v10471_v5 }
 0x970   : > { %10689 = vst [vmem:[%s18485_s22] sm:$0xff] %v10615_v43 }
 0x971   : > { %v10546_v21 = vpop.f32.mrf.mxu2 }
 0x972   : > { %10664 = vmatmul.f32.gmra.mxu3 %v10458_v55 }
 0x975   : > { %v10617_v31 = vpop.f32.mrf.mxu3 }
 0x976   : > { %v10618_v24 = vadd.f32 %v10617_v31, %v10525_v19 }
 0x978   : > { %10690 = vst [vmem:[%s18485_s22 + $0x8] sm:$0xff] %v10618_v24 }
 0x979   : > { %v10549_v61 = vpop.f32.mrf.mxu2 }
 0x97a   : > { %10667 = vmatmul.f32.gmra.mxu3 %v10460_v30 }
 0x97d   : > { %v10620_v0 = vpop.f32.mrf.mxu3 }
 0x97e   : > { %v10621_v48 = vadd.f32 %v10620_v0, %v10528_v47 }
 0x980   : > { %10691 = vst [vmem:[%s18485_s22 + $0x10] sm:$0xff] %v10621_v48 }
 0x981   : > { %v10552_v29 = vpop.f32.mrf.mxu2 }
 0x982   : > { %10670 = vmatmul.f32.gmra.mxu3 %v10462_v41 }
 0x985   : > { %v10623_v32 = vpop.f32.mrf.mxu3 }
 0x986   : > { %v10624_v56 = vadd.f32 %v10623_v32, %v10531_v52 }
 0x988   : > { %10692 = vst [vmem:[%s18485_s22 + $0x18] sm:$0xff] %v10624_v56 }
 0x989   : > { %v10555_v6 = vpop.f32.mrf.mxu2 }
 0x98a   : > { %10673 = vmatmul.f32.gmra.mxu3 %v10464_v1 }
 0x98d   : > { %v10626_v60 = vpop.f32.mrf.mxu3 }
 0x98e   : > { %v10627_v45 = vadd.f32 %v10626_v60, %v10534_v35 }
 0x990   : > { %10693 = vst [vmem:[%s18485_s22 + $0x20] sm:$0xff] %v10627_v45 }
 0x991   : > { %v10558_v13 = vpop.f32.mrf.mxu2 }
 0x992   : > { %10676 = vmatmul.f32.gmra.mxu3 %v10466_v16 }
 0x995   : > { %v10629_v17 = vpop.f32.mrf.mxu3 }
 0x996   : > { %v10630_v51 = vadd.f32 %v10629_v17, %v10537_v26 }
 0x998   : > { %10694 = vst [vmem:[%s18485_s22 + $0x28] sm:$0xff] %v10630_v51 }
 0x999   : > { %v10561_v15 = vpop.f32.mrf.mxu2 }
 0x99a   : > { %10679 = vmatmul.f32.gmra.mxu3 %v10468_v62 }
 0x99d   : > { %v10632_v50 = vpop.f32.mrf.mxu3 }
 0x99e   : > { %v10633_v10 = vadd.f32 %v10632_v50, %v10540_v42 }
 0x9a0   : > { %10695 = vst [vmem:[%s18485_s22 + $0x30] sm:$0xff] %v10633_v10 }
 0x9a1   : > { %v10564_v37 = vpop.f32.mrf.mxu2 }
 0x9a2   : > { %10682 = vmatmul.f32.gmra.mxu3 %v10470_v44 }
 0x9a5   : > { %v10635_v18 = vpop.f32.mrf.mxu3 }
 0x9a6   : > { %v10636_v2 = vadd.f32 %v10635_v18, %v10543_v12 }
 0x9a8   : > { %10696 = vst [vmem:[%s18485_s22 + $0x38] sm:$0xff] %v10636_v2 }
 0x9a9   : > { %v10567_v7 = vpop.f32.mrf.mxu2 }
 0x9aa   : > { %10685 = vmatmul.f32.gmra.mxu3 %v10472_v38 }
 0x9ad   : > { %v10638_v25 = vpop.f32.mrf.mxu3 }
 0x9ae   : > { %v10639_v59 = vadd.f32 %v10638_v25, %v10546_v21 }
 0x9b0   : > { %10697 = vst [vmem:[%s18485_s22 + $0x40] sm:$0xff] %v10639_v59 }
 0x9b1   : > { %v10570_v57 = vpop.f32.mrf.mxu2 }
 0x9b5   : > { %v10641_v54 = vpop.f32.mrf.mxu3 }
 0x9b6   : > { %v10642_v39 = vadd.f32 %v10641_v54, %v10549_v61 }
 0x9b8   : > { %10698 = vst [vmem:[%s18485_s22 + $0x48] sm:$0xff] %v10642_v39 }
 0x9b9   : > { %v10573_v27 = vpop.f32.mrf.mxu2 }
 0x9bd   : > { %v10644_v9 = vpop.f32.mrf.mxu3 }
 0x9be   : > { %v10645_v14 = vadd.f32 %v10644_v9, %v10552_v29 }
 0x9c0   : > { %10699 = vst [vmem:[%s18485_s22 + $0x50] sm:$0xff] %v10645_v14 }
 0x9c1   : > { %v10576_v58 = vpop.f32.mrf.mxu2 }
 0x9c5   : > { %v10647_v28 = vpop.f32.mrf.mxu3 }
 0x9c6   : > { %v10648_v49 = vadd.f32 %v10647_v28, %v10555_v6 }
 0x9c8   : > { %10700 = vst [vmem:[%s18485_s22 + $0x58] sm:$0xff] %v10648_v49 }
 0x9c9   : > { %v10579_v33 = vpop.f32.mrf.mxu2 }
 0x9cd   : > { %v10650_v23 = vpop.f32.mrf.mxu3 }
 0x9ce   : > { %v10651_v46 = vadd.f32 %v10650_v23, %v10558_v13 }
 0x9d0   : > { %10701 = vst [vmem:[%s18485_s22 + $0x60] sm:$0xff] %v10651_v46 }
 0x9d1   : > { %v10582_v43 = vpop.f32.mrf.mxu2 }
 0x9d5   : > { %v10653_v20 = vpop.f32.mrf.mxu3 }
 0x9d6   : > { %v10654_v3 = vadd.f32 %v10653_v20, %v10561_v15 }
 0x9d8   : > { %10702 = vst [vmem:[%s18485_s22 + $0x68] sm:$0xff] %v10654_v3 }
 0x9d9   : > { %v10585_v26 = vpop.f32.mrf.mxu2 }
 0x9dd   : > { %v10656_v22 = vpop.f32.mrf.mxu3 }
 0x9de   : > { %v10657_v11 = vadd.f32 %v10656_v22, %v10564_v37 }
 0x9e0   : > { %10703 = vst [vmem:[%s18485_s22 + $0x70] sm:$0xff] %v10657_v11 }
 0x9e1   : > { %v10588_v0 = vpop.f32.mrf.mxu2 }
 0x9e5   : > { %v10659_v19 = vpop.f32.mrf.mxu3 }
 0x9e6   : > { %v10660_v8 = vadd.f32 %v10659_v19, %v10567_v7 }
 0x9e8   : > { %10704 = vst [vmem:[%s18485_s22 + $0x78] sm:$0xff] %v10660_v8 }
 0x9e9   : > { %v10591_v41 = vpop.f32.mrf.mxu2 }
 0x9ed   : > { %v10662_v47 = vpop.f32.mrf.mxu3 }
 0x9ee   : > { %v10663_v36 = vadd.f32 %v10662_v47, %v10570_v57 }
 0x9f0   : > { %10705 = vst [vmem:[%s18485_s22 + $0x80] sm:$0xff] %v10663_v36 }
 0x9f1   : > { %v10594_v12 = vpop.f32.mrf.mxu2 }
 0x9f5   : > { %v10665_v52 = vpop.f32.mrf.mxu3 }
 0x9f6   : > { %v10666_v34 = vadd.f32 %v10665_v52, %v10573_v27 }
 0x9f8   : > { %10706 = vst [vmem:[%s18485_s22 + $0x88] sm:$0xff] %v10666_v34 }
 0x9fd   : > { %v10668_v40 = vpop.f32.mrf.mxu3 }
 0x9fe   : > { %v10669_v35 = vadd.f32 %v10668_v40, %v10576_v58 }
 0xa00   : > { %10707 = vst [vmem:[%s18485_s22 + $0x90] sm:$0xff] %v10669_v35 }
 0xa05   : > { %v10671_v55 = vpop.f32.mrf.mxu3 }
 0xa06   : > { %v10672_v63 = vadd.f32 %v10671_v55, %v10579_v33 }
 0xa08   : > { %10708 = vst [vmem:[%s18485_s22 + $0x98] sm:$0xff] %v10672_v63 }
 0xa0d   : > { %v10674_v31 = vpop.f32.mrf.mxu3 }
 0xa0e   : > { %v10675_v24 = vadd.f32 %v10674_v31, %v10582_v43 }
 0xa10   : > { %10709 = vst [vmem:[%s18485_s22 + $0xa0] sm:$0xff] %v10675_v24 }
 0xa15   : > { %v10677_v30 = vpop.f32.mrf.mxu3 }
 0xa16   : > { %v10678_v53 = vadd.f32 %v10677_v30, %v10585_v26 }
 0xa18   : > { %10710 = vst [vmem:[%s18485_s22 + $0xa8] sm:$0xff] %v10678_v53 }
 0xa1d   : > { %v10680_v42 = vpop.f32.mrf.mxu3 }
 0xa1e   : > { %v10681_v48 = vadd.f32 %v10680_v42, %v10588_v0 }
 0xa20   : > { %10711 = vst [vmem:[%s18485_s22 + $0xb0] sm:$0xff] %v10681_v48 }
 0xa25   : > { %v10683_v4 = vpop.f32.mrf.mxu3 }
 0xa26   : > { %v10684_v32 = vadd.f32 %v10683_v4, %v10591_v41 }
 0xa28   : > { %10712 = vst [vmem:[%s18485_s22 + $0xb8] sm:$0xff] %v10684_v32 }
 0xa2d   : > { %v10686_v56 = vpop.f32.mrf.mxu3 }
 0xa2e   : > { %v10687_v1 = vadd.f32 %v10686_v56, %v10594_v12 }
 0xa30   : > { %10713 = vst [vmem:[%s18485_s22 + $0xc0] sm:$0xf] %v10687_v1 }
 0xa31 PF: > { %s27_s24 = sadd.s32 1, %s12273_s24  }
 0xa32   : > { %p24_p4 = scmp.ge.s32.totalorder %s27_s24, 4  }
 0xa34   :  { %26 = sbr.rel (!%p24_p4) target bundleno = 3 (0x3), region = 118 }

</bundles_post_ra>
